<compile_context>
chip_gen: v7x
topology: tpu7x:2x2x1
jax: 0.10.0
libtpu: 0.0.40
codegen_flags: <defaults>
</compile_context>

<pallas_src>
import jax
import jax.numpy as jnp
from jax import lax
from jax.experimental import pallas as pl
from jax.experimental.pallas import tpu as pltpu


# ------------------------------ constants ---------------------------------- #

_H = 28                     # input spatial size (forced by the 7*7*64 fc1 input)
_H1 = 14                    # after pool1
_H2 = 7                     # after pool2
_C1 = 32
_C2 = 64
_HW1 = _H1 * _H1            # 196
_POOL_BLK = 200             # 196 rows used + 4 zero rows so block starts stay 8-aligned
_P1_ROWS = 4 * _POOL_BLK    # 800 conv1 im2col rows per image
_PAD = 16                   # zero margin (>= max |row shift| = 15) for conv2 im2col
_FEAT = _H2 * _H2 * _C2     # 3136


def _round_up(x, m):
    return (x + m - 1) // m * m


# --------------------------- Pallas kernel bodies --------------------------- #

def _feature_kernel(p1_ref, mask_ref, w1_ref, b1_ref, w2_ref, b2_ref, o_ref,
                    s2, s3):
    """Fused conv1+relu+pool1+conv2+relu+pool2+flatten for one image."""
    # conv1 as an MXU matmul over pre-built 3x3 patches; rows are grouped as
    # (pool-subposition p in 0..3, ho, wo), each group padded to 200 rows.
    a1 = jnp.dot(p1_ref[0], w1_ref[...], preferred_element_type=jnp.float32)
    a1 = jnp.maximum(a1 + b1_ref[...], 0.0)                           # (800, 32)

    # maxpool1: max over the four contiguous sub-position blocks -> rows (ho, wo).
    pooled1 = jnp.maximum(
        jnp.maximum(a1[0:_HW1, :], a1[_POOL_BLK:_POOL_BLK + _HW1, :]),
        jnp.maximum(a1[2 * _POOL_BLK:2 * _POOL_BLK + _HW1, :],
                    a1[3 * _POOL_BLK:3 * _POOL_BLK + _HW1, :]))       # (196, 32)

    # Stage pooled1 in a zero-margined scratch so every conv2 im2col tap is a
    # plain shifted contiguous row read (masked for the spatial border).
    s2[...] = jnp.zeros(s2.shape, s2.dtype)
    s2[_PAD:_PAD + _HW1, :] = pooled1

    mval = mask_ref[...]                                              # (196, 9)
    cols = []
    t = 0
    for ky in range(3):
        for kx in range(3):
            off = (ky - 1) * _H1 + (kx - 1)                           # in [-15, 15]
            shifted = s2[_PAD + off:_PAD + off + _HW1, :]             # (196, 32)
            cols.append(shifted * mval[:, t:t + 1])
            t += 1
    patches2 = jnp.concatenate(cols, axis=1)                          # (196, 288)

    a2 = jnp.dot(patches2, w2_ref[...], preferred_element_type=jnp.float32)
    a2 = jnp.maximum(a2 + b2_ref[...], 0.0)                           # (196, 64)

    # maxpool2: 4-tap max at full resolution via shifted reads from a padded
    # scratch; rows (2H, 2W) then hold the pooled value for output (H, W).
    s3[...] = jnp.zeros(s3.shape, s3.dtype)
    s3[0:_HW1, :] = a2
    m = jnp.maximum(
        jnp.maximum(s3[0:_HW1, :], s3[1:1 + _HW1, :]),
        jnp.maximum(s3[_H1:_H1 + _HW1, :], s3[_H1 + 1:_H1 + 1 + _HW1, :]))

    # flatten in (h, w, c) order (fc1 weight was permuted to match) -> (1, 3136).
    feats = []
    for hh in range(_H2):
        for ww in range(_H2):
            r = 2 * hh * _H1 + 2 * ww
            feats.append(m[r:r + 1, :])
    o_ref[0] = jnp.concatenate(feats, axis=1)                         # (1, 3136)


def _mlp_kernel(x_ref, w3_ref, b3_ref, w4_ref, b4_ref, o_ref):
    h = jnp.dot(x_ref[...], w3_ref[...], preferred_element_type=jnp.float32)
    h = h + b3_ref[...]
    # TODO(synk): nn.Dropout(p=0.5) is identity in eval mode; training-mode RNG dropout not implemented.
    o_ref[...] = jnp.dot(h, w4_ref[...], preferred_element_type=jnp.float32) + b4_ref[...]


# ------------------------------ host-side glue ------------------------------ #

def _build_conv1_patches(x2d):
    """(N,28,28) -> (N, 800, 9) im2col, rows grouped by 2x2-pool sub-position."""
    n = x2d.shape[0]
    xp = jnp.pad(x2d, ((0, 0), (1, 1), (1, 1)))                        # (N,30,30)
    taps = [xp[:, ky:ky + _H, kx:kx + _H] for ky in range(3) for kx in range(3)]
    pat = jnp.stack(taps, axis=-1)                                     # (N,28,28,9)
    pat = pat.reshape(n, _H1, 2, _H1, 2, 9).transpose(0, 2, 4, 1, 3, 5)
    pat = pat.reshape(n, 4, _HW1, 9)                                   # (N,4,196,9)
    pat = jnp.pad(pat, ((0, 0), (0, 0), (0, _POOL_BLK - _HW1), (0, 0)))
    return pat.reshape(n, _P1_ROWS, 9)                                 # (N,800,9)


def _conv2_valid_mask():
    """(196, 9) 0/1 mask: tap (ky,kx) valid at pooled position (ho, wo)."""
    r = jnp.arange(_HW1)
    ho = r // _H1
    wo = r % _H1
    cols = []
    for ky in range(3):
        for kx in range(3):
            ok = ((ho + ky - 1 >= 0) & (ho + ky - 1 < _H1) &
                  (wo + kx - 1 >= 0) & (wo + kx - 1 < _H1))
            cols.append(ok)
    return jnp.stack(cols, axis=1).astype(jnp.float32)


def extract_features(params, x_nchw):
    n = x_nchw.shape[0]
    x2d = x_nchw[:, 0, :, :]
    p1 = _build_conv1_patches(x2d)                                     # tiny, XLA
    mask = _conv2_valid_mask()                                         # constant

    cost = pl.CostEstimate(
        flops=int(n * (2 * _P1_ROWS * 9 * _C1 + 2 * _HW1 * 9 * _C1 * _C2)),
        transcendentals=0,
        bytes_accessed=int(n * (_P1_ROWS * 9 + _FEAT) * 4
                           + (9 * _C1 + 9 * _C1 * _C2 + _HW1 * 9 + _C1 + _C2) * 4),
    )
    feats = pl.pallas_call(
        _feature_kernel,
        out_shape=jax.ShapeDtypeStruct((n, 1, _FEAT), jnp.float32),
        grid=(n,),
        in_specs=[
            pl.BlockSpec((1, _P1_ROWS, 9), lambda i: (i, 0, 0)),   # per-image patches
            pl.BlockSpec((_HW1, 9), lambda i: (0, 0)),             # conv2 border mask
            pl.BlockSpec((9, _C1), lambda i: (0, 0)),              # conv1 weight
            pl.BlockSpec((1, _C1), lambda i: (0, 0)),              # conv1 bias
            pl.BlockSpec((9 * _C1, _C2), lambda i: (0, 0)),        # conv2 weight
            pl.BlockSpec((1, _C2), lambda i: (0, 0)),              # conv2 bias
        ],
        out_specs=pl.BlockSpec((1, 1, _FEAT), lambda i: (i, 0, 0)),
        scratch_shapes=[
            pltpu.VMEM((_PAD + _HW1 + _PAD, _C1), jnp.float32),    # padded pooled1
            pltpu.VMEM((_HW1 + 20, _C2), jnp.float32),             # padded conv2 out
        ],
        compiler_params=pltpu.CompilerParams(
            dimension_semantics=("parallel",),
            vmem_limit_bytes=32 * 1024 * 1024),
        cost_estimate=cost,
    )(p1, mask, params["w1"], params["b1"], params["w2"], params["b2"])
    return feats.reshape(n, _FEAT)


def mlp_head(params, feats):
    n = feats.shape[0]
    nc = params["w4"].shape[1]
    tm = 128 if n > 128 else _round_up(n, 8)
    npad = _round_up(n, tm)
    if npad != n:
        feats = jnp.pad(feats, ((0, npad - n), (0, 0)))

    cost = pl.CostEstimate(
        flops=int(2 * npad * (_FEAT * 512 + 512 * nc)),
        transcendentals=0,
        bytes_accessed=int((_FEAT * 512 + 512 * nc + 512 + nc) * 4
                           + npad * (_FEAT + nc) * 4),
    )
    out = pl.pallas_call(
        _mlp_kernel,
        out_shape=jax.ShapeDtypeStruct((npad, nc), jnp.float32),
        grid=(npad // tm,),
        in_specs=[
            pl.BlockSpec((tm, _FEAT), lambda i: (i, 0)),           # batch tile
            pl.BlockSpec((_FEAT, 512), lambda i: (0, 0)),          # fc1 weight (resident)
            pl.BlockSpec((1, 512), lambda i: (0, 0)),
            pl.BlockSpec((512, nc), lambda i: (0, 0)),             # fc2 weight (resident)
            pl.BlockSpec((1, nc), lambda i: (0, 0)),
        ],
        out_specs=pl.BlockSpec((tm, nc), lambda i: (i, 0)),
        compiler_params=pltpu.CompilerParams(
            dimension_semantics=("parallel",),
            vmem_limit_bytes=48 * 1024 * 1024),
        cost_estimate=cost,
    )(feats, params["w3"], params["b3"], params["w4"], params["b4"])
    return out[:n]


def simple_cnn_forward(params, x_nchw):
    feats = extract_features(params, x_nchw)
    return mlp_head(params, feats)


# --------------------------- parameters & reference ------------------------- #

def init_params(key, num_classes=10):
    """PyTorch-layout parameters (same layout/initialisation as nn.Module)."""
    ks = jax.random.split(key, 8)

    def u(k, shape, fan_in):
        bound = 1.0 / (fan_in ** 0.5)
        return jax.random.uniform(k, shape, jnp.float32, -bound, bound)

    return {
        "conv1_w": u(ks[0], (32, 1, 3, 3), 1 * 9),
        "conv1_b": u(ks[1], (32,), 1 * 9),
        "conv2_w": u(ks[2], (64, 32, 3, 3), 32 * 9),
        "conv2_b": u(ks[3], (64,), 32 * 9),
        "fc1_w": u(ks[4], (512, 7 * 7 * 64), 7 * 7 * 64),
        "fc1_b": u(ks[5], (512,), 7 * 7 * 64),
        "fc2_w": u(ks[6], (num_classes, 512), 512),
        "fc2_b": u(ks[7], (num_classes,), 512),
    }


def prepare_params(p):
    """One-time layout prep: im2col-ordered conv weights, pre-transposed fc weights,
    and the NCHW flatten permutation folded into fc1's input columns."""
    nc = p["fc2_w"].shape[0]
    return {
        "w1": jnp.transpose(p["conv1_w"], (2, 3, 1, 0)).reshape(9, _C1),
        "b1": p["conv1_b"].reshape(1, _C1),
        "w2": jnp.transpose(p["conv2_w"], (2, 3, 1, 0)).reshape(9 * _C1, _C2),
        "b2": p["conv2_b"].reshape(1, _C2),
        # fc1_w is (512, 3136) with columns in torch (c, h, w) order; kernel flattens
        # in (h, w, c) order, so permute the columns once here.
        "w3": jnp.transpose(p["fc1_w"].reshape(512, _C2, _H2, _H2),
                            (2, 3, 1, 0)).reshape(_FEAT, 512),
        "b3": p["fc1_b"].reshape(1, 512),
        "w4": p["fc2_w"].T,
        "b4": p["fc2_b"].reshape(1, nc),
    }


def reference_forward(params, x_nchw):
    """Pure-JAX (XLA) reference mirroring the PyTorch forward, for verification."""
    dn = ("NCHW", "OIHW", "NCHW")
    y = lax.conv_general_dilated(x_nchw, params["conv1_w"], (1, 1),
                                 ((1, 1), (1, 1)), dimension_numbers=dn)
    y = jnp.maximum(y + params["conv1_b"][None, :, None, None], 0.0)
    y = lax.reduce_window(y, -jnp.inf, lax.max, (1, 1, 2, 2), (1, 1, 2, 2), "VALID")
    y = lax.conv_general_dilated(y, params["conv2_w"], (1, 1),
                                 ((1, 1), (1, 1)), dimension_numbers=dn)
    y = jnp.maximum(y + params["conv2_b"][None, :, None, None], 0.0)
    y = lax.reduce_window(y, -jnp.inf, lax.max, (1, 1, 2, 2), (1, 1, 2, 2), "VALID")
    flat = y.reshape(y.shape[0], -1)
    h = flat @ params["fc1_w"].T + params["fc1_b"]
    return h @ params["fc2_w"].T + params["fc2_b"]


if __name__ == "__main__":
    key = jax.random.PRNGKey(0)
    pkey, xkey = jax.random.split(key)
    raw = init_params(pkey, num_classes=10)
    params = prepare_params(raw)          # one-time weight layout prep (not per-forward)
    # 28x28 single-channel input is forced by the fc layer (7*7*64); small batch.
    x = jax.random.normal(xkey, (2, 1, 28, 28), dtype=jnp.float32)

    fwd = jax.jit(simple_cnn_forward)
    out = jax.block_until_ready(fwd(params, x))
    assert out.shape == (2, 10), out.shape

    ref = reference_forward(raw, x)
    max_err = float(jnp.max(jnp.abs(out - ref)))
    assert max_err < 1e-2, f"mismatch vs XLA reference: {max_err}"

    print("KERNEL_OK")
</pallas_src>

<mosaic_0001>
module attributes {stable_mosaic.version = 11 : i64} {
  func.func @_feature_kernel(%arg0: i32, %arg1: memref<1x800x9xf32, #tpu.memory_space<vmem>>, %arg2: memref<196x9xf32, #tpu.memory_space<vmem>>, %arg3: memref<9x32xf32, #tpu.memory_space<vmem>>, %arg4: memref<1x32xf32, #tpu.memory_space<vmem>>, %arg5: memref<288x64xf32, #tpu.memory_space<vmem>>, %arg6: memref<1x64xf32, #tpu.memory_space<vmem>>, %arg7: memref<1x1x3136xf32, #tpu.memory_space<vmem>>, %arg8: memref<228x32xf32, #tpu.memory_space<vmem>>, %arg9: memref<216x64xf32, #tpu.memory_space<vmem>>) attributes {dimension_semantics = [#tpu.dimension_semantics<parallel>], iteration_bounds = array<i64: 2>, scalar_prefetch = 0 : i64, scratch_operands = 2 : i64, tpu.core_type = #tpu.core_type<tc>, window_params = [{transform_indices = @transform_0, window_bounds = array<i64: 1, 800, 9>}, {pipeline_mode = #tpu.pipeline_mode<synchronous>, transform_indices = @transform_1, window_bounds = array<i64: 196, 9>}, {pipeline_mode = #tpu.pipeline_mode<synchronous>, transform_indices = @transform_2, window_bounds = array<i64: 9, 32>}, {pipeline_mode = #tpu.pipeline_mode<synchronous>, transform_indices = @transform_3, window_bounds = array<i64: 1, 32>}, {pipeline_mode = #tpu.pipeline_mode<synchronous>, transform_indices = @transform_4, window_bounds = array<i64: 288, 64>}, {pipeline_mode = #tpu.pipeline_mode<synchronous>, transform_indices = @transform_5, window_bounds = array<i64: 1, 64>}, {transform_indices = @transform_6, window_bounds = array<i64: 1, 1, 3136>}]} {
    %c0 = arith.constant 0 : index
    %c0_0 = arith.constant 0 : index
    %c0_1 = arith.constant 0 : index
    %0 = vector.load %arg1[%c0, %c0_0, %c0_1] : memref<1x800x9xf32, #tpu.memory_space<vmem>>, vector<1x800x9xf32>
    %1 = vector.shape_cast %0 : vector<1x800x9xf32> to vector<800x9xf32>
    %c0_2 = arith.constant 0 : index
    %c0_3 = arith.constant 0 : index
    %2 = vector.load %arg3[%c0_2, %c0_3] : memref<9x32xf32, #tpu.memory_space<vmem>>, vector<9x32xf32>
    %cst = arith.constant dense<0.000000e+00> : vector<800x32xf32>
    %3 = tpu.matmul %1, %2, %cst {dimension_numbers = #tpu.dot_dimension_numbers<[1], [0], [0], [1], [0, 0, 1, 1], [], []>} : vector<800x9xf32>, vector<9x32xf32>, vector<800x32xf32> -> vector<800x32xf32>
    %c0_4 = arith.constant 0 : index
    %c0_5 = arith.constant 0 : index
    %4 = vector.load %arg4[%c0_4, %c0_5] : memref<1x32xf32, #tpu.memory_space<vmem>>, vector<1x32xf32>
    %5 = vector.broadcast %4 : vector<1x32xf32> to vector<800x32xf32>
    %6 = arith.addf %3, %5 : vector<800x32xf32>
    %cst_6 = arith.constant 0.000000e+00 : f32
    %7 = vector.broadcast %cst_6 : f32 to vector<800x32xf32>
    %8 = arith.maximumf %6, %7 : vector<800x32xf32>
    %9 = vector.extract_strided_slice %8 {offsets = [0, 0], sizes = [196, 32], strides = [1, 1]} : vector<800x32xf32> to vector<196x32xf32>
    %10 = vector.extract_strided_slice %8 {offsets = [200, 0], sizes = [196, 32], strides = [1, 1]} : vector<800x32xf32> to vector<196x32xf32>
    %11 = arith.maximumf %9, %10 : vector<196x32xf32>
    %12 = vector.extract_strided_slice %8 {offsets = [400, 0], sizes = [196, 32], strides = [1, 1]} : vector<800x32xf32> to vector<196x32xf32>
    %13 = vector.extract_strided_slice %8 {offsets = [600, 0], sizes = [196, 32], strides = [1, 1]} : vector<800x32xf32> to vector<196x32xf32>
    %14 = arith.maximumf %12, %13 : vector<196x32xf32>
    %15 = arith.maximumf %11, %14 : vector<196x32xf32>
    %cst_7 = arith.constant 0.000000e+00 : f32
    %16 = vector.broadcast %cst_7 : f32 to vector<228x32xf32>
    %c0_8 = arith.constant 0 : index
    %c0_9 = arith.constant 0 : index
    %17 = vector.load %arg8[%c0_8, %c0_9] : memref<228x32xf32, #tpu.memory_space<vmem>>, vector<228x32xf32>
    tpu.vector_store %arg8[%c0_8, %c0_9], %16 {strides = array<i32>} : memref<228x32xf32, #tpu.memory_space<vmem>>, vector<228x32xf32>,
    %c16 = arith.constant 16 : index
    %c0_10 = arith.constant 0 : index
    %18 = vector.load %arg8[%c16, %c0_10] : memref<228x32xf32, #tpu.memory_space<vmem>>, vector<196x32xf32>
    tpu.vector_store %arg8[%c16, %c0_10], %15 {strides = array<i32>} : memref<228x32xf32, #tpu.memory_space<vmem>>, vector<196x32xf32>,
    %c0_11 = arith.constant 0 : index
    %c0_12 = arith.constant 0 : index
    %19 = vector.load %arg2[%c0_11, %c0_12] : memref<196x9xf32, #tpu.memory_space<vmem>>, vector<196x9xf32>
    %c1 = arith.constant 1 : index
    %c0_13 = arith.constant 0 : index
    %20 = vector.load %arg8[%c1, %c0_13] : memref<228x32xf32, #tpu.memory_space<vmem>>, vector<196x32xf32>
    %21 = vector.extract_strided_slice %19 {offsets = [0, 0], sizes = [196, 1], strides = [1, 1]} : vector<196x9xf32> to vector<196x1xf32>
    %22 = vector.broadcast %21 : vector<196x1xf32> to vector<196x32xf32>
    %23 = arith.mulf %20, %22 : vector<196x32xf32>
    %c2 = arith.constant 2 : index
    %c0_14 = arith.constant 0 : index
    %24 = vector.load %arg8[%c2, %c0_14] : memref<228x32xf32, #tpu.memory_space<vmem>>, vector<196x32xf32>
    %25 = vector.extract_strided_slice %19 {offsets = [0, 1], sizes = [196, 1], strides = [1, 1]} : vector<196x9xf32> to vector<196x1xf32>
    %26 = vector.broadcast %25 : vector<196x1xf32> to vector<196x32xf32>
    %27 = arith.mulf %24, %26 : vector<196x32xf32>
    %c3 = arith.constant 3 : index
    %c0_15 = arith.constant 0 : index
    %28 = vector.load %arg8[%c3, %c0_15] : memref<228x32xf32, #tpu.memory_space<vmem>>, vector<196x32xf32>
    %29 = vector.extract_strided_slice %19 {offsets = [0, 2], sizes = [196, 1], strides = [1, 1]} : vector<196x9xf32> to vector<196x1xf32>
    %30 = vector.broadcast %29 : vector<196x1xf32> to vector<196x32xf32>
    %31 = arith.mulf %28, %30 : vector<196x32xf32>
    %c15 = arith.constant 15 : index
    %c0_16 = arith.constant 0 : index
    %32 = vector.load %arg8[%c15, %c0_16] : memref<228x32xf32, #tpu.memory_space<vmem>>, vector<196x32xf32>
    %33 = vector.extract_strided_slice %19 {offsets = [0, 3], sizes = [196, 1], strides = [1, 1]} : vector<196x9xf32> to vector<196x1xf32>
    %34 = vector.broadcast %33 : vector<196x1xf32> to vector<196x32xf32>
    %35 = arith.mulf %32, %34 : vector<196x32xf32>
    %c16_17 = arith.constant 16 : index
    %c0_18 = arith.constant 0 : index
    %36 = vector.load %arg8[%c16_17, %c0_18] : memref<228x32xf32, #tpu.memory_space<vmem>>, vector<196x32xf32>
    %37 = vector.extract_strided_slice %19 {offsets = [0, 4], sizes = [196, 1], strides = [1, 1]} : vector<196x9xf32> to vector<196x1xf32>
    %38 = vector.broadcast %37 : vector<196x1xf32> to vector<196x32xf32>
    %39 = arith.mulf %36, %38 : vector<196x32xf32>
    %c17 = arith.constant 17 : index
    %c0_19 = arith.constant 0 : index
    %40 = vector.load %arg8[%c17, %c0_19] : memref<228x32xf32, #tpu.memory_space<vmem>>, vector<196x32xf32>
    %41 = vector.extract_strided_slice %19 {offsets = [0, 5], sizes = [196, 1], strides = [1, 1]} : vector<196x9xf32> to vector<196x1xf32>
    %42 = vector.broadcast %41 : vector<196x1xf32> to vector<196x32xf32>
    %43 = arith.mulf %40, %42 : vector<196x32xf32>
    %c29 = arith.constant 29 : index
    %c0_20 = arith.constant 0 : index
    %44 = vector.load %arg8[%c29, %c0_20] : memref<228x32xf32, #tpu.memory_space<vmem>>, vector<196x32xf32>
    %45 = vector.extract_strided_slice %19 {offsets = [0, 6], sizes = [196, 1], strides = [1, 1]} : vector<196x9xf32> to vector<196x1xf32>
    %46 = vector.broadcast %45 : vector<196x1xf32> to vector<196x32xf32>
    %47 = arith.mulf %44, %46 : vector<196x32xf32>
    %c30 = arith.constant 30 : index
    %c0_21 = arith.constant 0 : index
    %48 = vector.load %arg8[%c30, %c0_21] : memref<228x32xf32, #tpu.memory_space<vmem>>, vector<196x32xf32>
    %49 = vector.extract_strided_slice %19 {offsets = [0, 7], sizes = [196, 1], strides = [1, 1]} : vector<196x9xf32> to vector<196x1xf32>
    %50 = vector.broadcast %49 : vector<196x1xf32> to vector<196x32xf32>
    %51 = arith.mulf %48, %50 : vector<196x32xf32>
    %c31 = arith.constant 31 : index
    %c0_22 = arith.constant 0 : index
    %52 = vector.load %arg8[%c31, %c0_22] : memref<228x32xf32, #tpu.memory_space<vmem>>, vector<196x32xf32>
    %53 = vector.extract_strided_slice %19 {offsets = [0, 8], sizes = [196, 1], strides = [1, 1]} : vector<196x9xf32> to vector<196x1xf32>
    %54 = vector.broadcast %53 : vector<196x1xf32> to vector<196x32xf32>
    %55 = arith.mulf %52, %54 : vector<196x32xf32>
    %56 = tpu.concatenate %23, %27, %31, %35, %39, %43, %47, %51, %55 in 1 : vector<196x32xf32>, vector<196x32xf32>, vector<196x32xf32>, vector<196x32xf32>, vector<196x32xf32>, vector<196x32xf32>, vector<196x32xf32>, vector<196x32xf32>, vector<196x32xf32> -> vector<196x288xf32>
    %c0_23 = arith.constant 0 : index
    %c0_24 = arith.constant 0 : index
    %57 = vector.load %arg5[%c0_23, %c0_24] : memref<288x64xf32, #tpu.memory_space<vmem>>, vector<288x64xf32>
    %cst_25 = arith.constant dense<0.000000e+00> : vector<196x64xf32>
    %58 = tpu.matmul %56, %57, %cst_25 {dimension_numbers = #tpu.dot_dimension_numbers<[1], [0], [0], [1], [0, 0, 1, 1], [], []>} : vector<196x288xf32>, vector<288x64xf32>, vector<196x64xf32> -> vector<196x64xf32>
    %c0_26 = arith.constant 0 : index
    %c0_27 = arith.constant 0 : index
    %59 = vector.load %arg6[%c0_26, %c0_27] : memref<1x64xf32, #tpu.memory_space<vmem>>, vector<1x64xf32>
    %60 = vector.broadcast %59 : vector<1x64xf32> to vector<196x64xf32>
    %61 = arith.addf %58, %60 : vector<196x64xf32>
    %cst_28 = arith.constant 0.000000e+00 : f32
    %62 = vector.broadcast %cst_28 : f32 to vector<196x64xf32>
    %63 = arith.maximumf %61, %62 : vector<196x64xf32>
    %cst_29 = arith.constant 0.000000e+00 : f32
    %64 = vector.broadcast %cst_29 : f32 to vector<216x64xf32>
    %c0_30 = arith.constant 0 : index
    %c0_31 = arith.constant 0 : index
    %65 = vector.load %arg9[%c0_30, %c0_31] : memref<216x64xf32, #tpu.memory_space<vmem>>, vector<216x64xf32>
    tpu.vector_store %arg9[%c0_30, %c0_31], %64 {strides = array<i32>} : memref<216x64xf32, #tpu.memory_space<vmem>>, vector<216x64xf32>,
    %c0_32 = arith.constant 0 : index
    %c0_33 = arith.constant 0 : index
    %66 = vector.load %arg9[%c0_32, %c0_33] : memref<216x64xf32, #tpu.memory_space<vmem>>, vector<196x64xf32>
    tpu.vector_store %arg9[%c0_32, %c0_33], %63 {strides = array<i32>} : memref<216x64xf32, #tpu.memory_space<vmem>>, vector<196x64xf32>,
    %c0_34 = arith.constant 0 : index
    %c0_35 = arith.constant 0 : index
    %67 = vector.load %arg9[%c0_34, %c0_35] : memref<216x64xf32, #tpu.memory_space<vmem>>, vector<196x64xf32>
    %c1_36 = arith.constant 1 : index
    %c0_37 = arith.constant 0 : index
    %68 = vector.load %arg9[%c1_36, %c0_37] : memref<216x64xf32, #tpu.memory_space<vmem>>, vector<196x64xf32>
    %69 = arith.maximumf %67, %68 : vector<196x64xf32>
    %c14 = arith.constant 14 : index
    %c0_38 = arith.constant 0 : index
    %70 = vector.load %arg9[%c14, %c0_38] : memref<216x64xf32, #tpu.memory_space<vmem>>, vector<196x64xf32>
    %c15_39 = arith.constant 15 : index
    %c0_40 = arith.constant 0 : index
    %71 = vector.load %arg9[%c15_39, %c0_40] : memref<216x64xf32, #tpu.memory_space<vmem>>, vector<196x64xf32>
    %72 = arith.maximumf %70, %71 : vector<196x64xf32>
    %73 = arith.maximumf %69, %72 : vector<196x64xf32>
    %74 = vector.extract_strided_slice %73 {offsets = [0, 0], sizes = [1, 64], strides = [1, 1]} : vector<196x64xf32> to vector<1x64xf32>
    %75 = vector.extract_strided_slice %73 {offsets = [2, 0], sizes = [1, 64], strides = [1, 1]} : vector<196x64xf32> to vector<1x64xf32>
    %76 = vector.extract_strided_slice %73 {offsets = [4, 0], sizes = [1, 64], strides = [1, 1]} : vector<196x64xf32> to vector<1x64xf32>
    %77 = vector.extract_strided_slice %73 {offsets = [6, 0], sizes = [1, 64], strides = [1, 1]} : vector<196x64xf32> to vector<1x64xf32>
    %78 = vector.extract_strided_slice %73 {offsets = [8, 0], sizes = [1, 64], strides = [1, 1]} : vector<196x64xf32> to vector<1x64xf32>
    %79 = vector.extract_strided_slice %73 {offsets = [10, 0], sizes = [1, 64], strides = [1, 1]} : vector<196x64xf32> to vector<1x64xf32>
    %80 = vector.extract_strided_slice %73 {offsets = [12, 0], sizes = [1, 64], strides = [1, 1]} : vector<196x64xf32> to vector<1x64xf32>
    %81 = vector.extract_strided_slice %73 {offsets = [28, 0], sizes = [1, 64], strides = [1, 1]} : vector<196x64xf32> to vector<1x64xf32>
    %82 = vector.extract_strided_slice %73 {offsets = [30, 0], sizes = [1, 64], strides = [1, 1]} : vector<196x64xf32> to vector<1x64xf32>
    %83 = vector.extract_strided_slice %73 {offsets = [32, 0], sizes = [1, 64], strides = [1, 1]} : vector<196x64xf32> to vector<1x64xf32>
    %84 = vector.extract_strided_slice %73 {offsets = [34, 0], sizes = [1, 64], strides = [1, 1]} : vector<196x64xf32> to vector<1x64xf32>
    %85 = vector.extract_strided_slice %73 {offsets = [36, 0], sizes = [1, 64], strides = [1, 1]} : vector<196x64xf32> to vector<1x64xf32>
    %86 = vector.extract_strided_slice %73 {offsets = [38, 0], sizes = [1, 64], strides = [1, 1]} : vector<196x64xf32> to vector<1x64xf32>
    %87 = vector.extract_strided_slice %73 {offsets = [40, 0], sizes = [1, 64], strides = [1, 1]} : vector<196x64xf32> to vector<1x64xf32>
    %88 = vector.extract_strided_slice %73 {offsets = [56, 0], sizes = [1, 64], strides = [1, 1]} : vector<196x64xf32> to vector<1x64xf32>
    %89 = vector.extract_strided_slice %73 {offsets = [58, 0], sizes = [1, 64], strides = [1, 1]} : vector<196x64xf32> to vector<1x64xf32>
    %90 = vector.extract_strided_slice %73 {offsets = [60, 0], sizes = [1, 64], strides = [1, 1]} : vector<196x64xf32> to vector<1x64xf32>
    %91 = vector.extract_strided_slice %73 {offsets = [62, 0], sizes = [1, 64], strides = [1, 1]} : vector<196x64xf32> to vector<1x64xf32>
    %92 = vector.extract_strided_slice %73 {offsets = [64, 0], sizes = [1, 64], strides = [1, 1]} : vector<196x64xf32> to vector<1x64xf32>
    %93 = vector.extract_strided_slice %73 {offsets = [66, 0], sizes = [1, 64], strides = [1, 1]} : vector<196x64xf32> to vector<1x64xf32>
    %94 = vector.extract_strided_slice %73 {offsets = [68, 0], sizes = [1, 64], strides = [1, 1]} : vector<196x64xf32> to vector<1x64xf32>
    %95 = vector.extract_strided_slice %73 {offsets = [84, 0], sizes = [1, 64], strides = [1, 1]} : vector<196x64xf32> to vector<1x64xf32>
    %96 = vector.extract_strided_slice %73 {offsets = [86, 0], sizes = [1, 64], strides = [1, 1]} : vector<196x64xf32> to vector<1x64xf32>
    %97 = vector.extract_strided_slice %73 {offsets = [88, 0], sizes = [1, 64], strides = [1, 1]} : vector<196x64xf32> to vector<1x64xf32>
    %98 = vector.extract_strided_slice %73 {offsets = [90, 0], sizes = [1, 64], strides = [1, 1]} : vector<196x64xf32> to vector<1x64xf32>
    %99 = vector.extract_strided_slice %73 {offsets = [92, 0], sizes = [1, 64], strides = [1, 1]} : vector<196x64xf32> to vector<1x64xf32>
    %100 = vector.extract_strided_slice %73 {offsets = [94, 0], sizes = [1, 64], strides = [1, 1]} : vector<196x64xf32> to vector<1x64xf32>
    %101 = vector.extract_strided_slice %73 {offsets = [96, 0], sizes = [1, 64], strides = [1, 1]} : vector<196x64xf32> to vector<1x64xf32>
    %102 = vector.extract_strided_slice %73 {offsets = [112, 0], sizes = [1, 64], strides = [1, 1]} : vector<196x64xf32> to vector<1x64xf32>
    %103 = vector.extract_strided_slice %73 {offsets = [114, 0], sizes = [1, 64], strides = [1, 1]} : vector<196x64xf32> to vector<1x64xf32>
    %104 = vector.extract_strided_slice %73 {offsets = [116, 0], sizes = [1, 64], strides = [1, 1]} : vector<196x64xf32> to vector<1x64xf32>
    %105 = vector.extract_strided_slice %73 {offsets = [118, 0], sizes = [1, 64], strides = [1, 1]} : vector<196x64xf32> to vector<1x64xf32>
    %106 = vector.extract_strided_slice %73 {offsets = [120, 0], sizes = [1, 64], strides = [1, 1]} : vector<196x64xf32> to vector<1x64xf32>
    %107 = vector.extract_strided_slice %73 {offsets = [122, 0], sizes = [1, 64], strides = [1, 1]} : vector<196x64xf32> to vector<1x64xf32>
    %108 = vector.extract_strided_slice %73 {offsets = [124, 0], sizes = [1, 64], strides = [1, 1]} : vector<196x64xf32> to vector<1x64xf32>
    %109 = vector.extract_strided_slice %73 {offsets = [140, 0], sizes = [1, 64], strides = [1, 1]} : vector<196x64xf32> to vector<1x64xf32>
    %110 = vector.extract_strided_slice %73 {offsets = [142, 0], sizes = [1, 64], strides = [1, 1]} : vector<196x64xf32> to vector<1x64xf32>
    %111 = vector.extract_strided_slice %73 {offsets = [144, 0], sizes = [1, 64], strides = [1, 1]} : vector<196x64xf32> to vector<1x64xf32>
    %112 = vector.extract_strided_slice %73 {offsets = [146, 0], sizes = [1, 64], strides = [1, 1]} : vector<196x64xf32> to vector<1x64xf32>
    %113 = vector.extract_strided_slice %73 {offsets = [148, 0], sizes = [1, 64], strides = [1, 1]} : vector<196x64xf32> to vector<1x64xf32>
    %114 = vector.extract_strided_slice %73 {offsets = [150, 0], sizes = [1, 64], strides = [1, 1]} : vector<196x64xf32> to vector<1x64xf32>
    %115 = vector.extract_strided_slice %73 {offsets = [152, 0], sizes = [1, 64], strides = [1, 1]} : vector<196x64xf32> to vector<1x64xf32>
    %116 = vector.extract_strided_slice %73 {offsets = [168, 0], sizes = [1, 64], strides = [1, 1]} : vector<196x64xf32> to vector<1x64xf32>
    %117 = vector.extract_strided_slice %73 {offsets = [170, 0], sizes = [1, 64], strides = [1, 1]} : vector<196x64xf32> to vector<1x64xf32>
    %118 = vector.extract_strided_slice %73 {offsets = [172, 0], sizes = [1, 64], strides = [1, 1]} : vector<196x64xf32> to vector<1x64xf32>
    %119 = vector.extract_strided_slice %73 {offsets = [174, 0], sizes = [1, 64], strides = [1, 1]} : vector<196x64xf32> to vector<1x64xf32>
    %120 = vector.extract_strided_slice %73 {offsets = [176, 0], sizes = [1, 64], strides = [1, 1]} : vector<196x64xf32> to vector<1x64xf32>
    %121 = vector.extract_strided_slice %73 {offsets = [178, 0], sizes = [1, 64], strides = [1, 1]} : vector<196x64xf32> to vector<1x64xf32>
    %122 = vector.extract_strided_slice %73 {offsets = [180, 0], sizes = [1, 64], strides = [1, 1]} : vector<196x64xf32> to vector<1x64xf32>
    %123 = tpu.concatenate %74, %75, %76, %77, %78, %79, %80, %81, %82, %83, %84, %85, %86, %87, %88, %89 in 1 : vector<1x64xf32>, vector<1x64xf32>, vector<1x64xf32>, vector<1x64xf32>, vector<1x64xf32>, vector<1x64xf32>, vector<1x64xf32>, vector<1x64xf32>, vector<1x64xf32>, vector<1x64xf32>, vector<1x64xf32>, vector<1x64xf32>, vector<1x64xf32>, vector<1x64xf32>, vector<1x64xf32>, vector<1x64xf32> -> vector<1x1024xf32>
    %124 = tpu.concatenate %90, %91, %92, %93, %94, %95, %96, %97, %98, %99, %100, %101, %102, %103, %104, %105 in 1 : vector<1x64xf32>, vector<1x64xf32>, vector<1x64xf32>, vector<1x64xf32>, vector<1x64xf32>, vector<1x64xf32>, vector<1x64xf32>, vector<1x64xf32>, vector<1x64xf32>, vector<1x64xf32>, vector<1x64xf32>, vector<1x64xf32>, vector<1x64xf32>, vector<1x64xf32>, vector<1x64xf32>, vector<1x64xf32> -> vector<1x1024xf32>
    %125 = tpu.concatenate %106, %107, %108, %109, %110, %111, %112, %113, %114, %115, %116, %117, %118, %119, %120, %121 in 1 : vector<1x64xf32>, vector<1x64xf32>, vector<1x64xf32>, vector<1x64xf32>, vector<1x64xf32>, vector<1x64xf32>, vector<1x64xf32>, vector<1x64xf32>, vector<1x64xf32>, vector<1x64xf32>, vector<1x64xf32>, vector<1x64xf32>, vector<1x64xf32>, vector<1x64xf32>, vector<1x64xf32>, vector<1x64xf32> -> vector<1x1024xf32>
    %126 = tpu.concatenate %123, %124, %125, %122 in 1 : vector<1x1024xf32>, vector<1x1024xf32>, vector<1x1024xf32>, vector<1x64xf32> -> vector<1x3136xf32>
    %c0_41 = arith.constant 0 : index
    %c0_42 = arith.constant 0 : index
    %c0_43 = arith.constant 0 : index
    %127 = vector.load %arg7[%c0_41, %c0_42, %c0_43] : memref<1x1x3136xf32, #tpu.memory_space<vmem>>, vector<1x1x3136xf32>
    %128 = vector.shape_cast %127 : vector<1x1x3136xf32> to vector<1x3136xf32>
    %129 = vector.shape_cast %126 : vector<1x3136xf32> to vector<1x1x3136xf32>
    tpu.vector_store %arg7[%c0_41, %c0_42, %c0_43], %129 {strides = array<i32>} : memref<1x1x3136xf32, #tpu.memory_space<vmem>>, vector<1x1x3136xf32>,
    return
  }
  func.func @transform_0(%arg0: i32) -> (i32, i32, i32) {
    %c0_i32 = arith.constant 0 : i32
    %c0_i32_0 = arith.constant 0 : i32
    %c0_i32_1 = arith.constant 0 : i32
    return %arg0, %c0_i32, %c0_i32_0 : i32, i32, i32
  }
  func.func @transform_1(%arg0: i32) -> (i32, i32) {
    %c0_i32 = arith.constant 0 : i32
    %c0_i32_0 = arith.constant 0 : i32
    %c0_i32_1 = arith.constant 0 : i32
    return %c0_i32, %c0_i32_0 : i32, i32
  }
  func.func @transform_2(%arg0: i32) -> (i32, i32) {
    %c0_i32 = arith.constant 0 : i32
    %c0_i32_0 = arith.constant 0 : i32
    %c0_i32_1 = arith.constant 0 : i32
    return %c0_i32, %c0_i32_0 : i32, i32
  }
  func.func @transform_3(%arg0: i32) -> (i32, i32) {
    %c0_i32 = arith.constant 0 : i32
    %c0_i32_0 = arith.constant 0 : i32
    %c0_i32_1 = arith.constant 0 : i32
    return %c0_i32, %c0_i32_0 : i32, i32
  }
  func.func @transform_4(%arg0: i32) -> (i32, i32) {
    %c0_i32 = arith.constant 0 : i32
    %c0_i32_0 = arith.constant 0 : i32
    %c0_i32_1 = arith.constant 0 : i32
    return %c0_i32, %c0_i32_0 : i32, i32
  }
  func.func @transform_5(%arg0: i32) -> (i32, i32) {
    %c0_i32 = arith.constant 0 : i32
    %c0_i32_0 = arith.constant 0 : i32
    %c0_i32_1 = arith.constant 0 : i32
    return %c0_i32, %c0_i32_0 : i32, i32
  }
  func.func @transform_6(%arg0: i32) -> (i32, i32, i32) {
    %c0_i32 = arith.constant 0 : i32
    %c0_i32_0 = arith.constant 0 : i32
    %c0_i32_1 = arith.constant 0 : i32
    return %arg0, %c0_i32, %c0_i32_0 : i32, i32, i32
  }
}

module attributes {stable_mosaic.version = 11 : i64} {
  func.func @_mlp_kernel(%arg0: i32, %arg1: memref<8x3136xf32, #tpu.memory_space<vmem>>, %arg2: memref<3136x512xf32, #tpu.memory_space<vmem>>, %arg3: memref<1x512xf32, #tpu.memory_space<vmem>>, %arg4: memref<512x10xf32, #tpu.memory_space<vmem>>, %arg5: memref<1x10xf32, #tpu.memory_space<vmem>>, %arg6: memref<8x10xf32, #tpu.memory_space<vmem>>) attributes {dimension_semantics = [#tpu.dimension_semantics<parallel>], iteration_bounds = array<i64: 1>, scalar_prefetch = 0 : i64, scratch_operands = 0 : i64, tpu.core_type = #tpu.core_type<tc>, window_params = [{transform_indices = @transform_0, window_bounds = array<i64: 8, 3136>}, {pipeline_mode = #tpu.pipeline_mode<synchronous>, transform_indices = @transform_1, window_bounds = array<i64: 3136, 512>}, {pipeline_mode = #tpu.pipeline_mode<synchronous>, transform_indices = @transform_2, window_bounds = array<i64: 1, 512>}, {pipeline_mode = #tpu.pipeline_mode<synchronous>, transform_indices = @transform_3, window_bounds = array<i64: 512, 10>}, {pipeline_mode = #tpu.pipeline_mode<synchronous>, transform_indices = @transform_4, window_bounds = array<i64: 1, 10>}, {transform_indices = @transform_5, window_bounds = array<i64: 8, 10>}]} {
    %c0 = arith.constant 0 : index
    %c0_0 = arith.constant 0 : index
    %0 = vector.load %arg1[%c0, %c0_0] : memref<8x3136xf32, #tpu.memory_space<vmem>>, vector<8x3136xf32>
    %c0_1 = arith.constant 0 : index
    %c0_2 = arith.constant 0 : index
    %1 = vector.load %arg2[%c0_1, %c0_2] : memref<3136x512xf32, #tpu.memory_space<vmem>>, vector<3136x512xf32>
    %cst = arith.constant dense<0.000000e+00> : vector<8x512xf32>
    %2 = tpu.matmul %0, %1, %cst {dimension_numbers = #tpu.dot_dimension_numbers<[1], [0], [0], [1], [0, 0, 1, 1], [], []>} : vector<8x3136xf32>, vector<3136x512xf32>, vector<8x512xf32> -> vector<8x512xf32>
    %c0_3 = arith.constant 0 : index
    %c0_4 = arith.constant 0 : index
    %3 = vector.load %arg3[%c0_3, %c0_4] : memref<1x512xf32, #tpu.memory_space<vmem>>, vector<1x512xf32>
    %4 = vector.broadcast %3 : vector<1x512xf32> to vector<8x512xf32>
    %5 = arith.addf %2, %4 : vector<8x512xf32>
    %c0_5 = arith.constant 0 : index
    %c0_6 = arith.constant 0 : index
    %6 = vector.load %arg4[%c0_5, %c0_6] : memref<512x10xf32, #tpu.memory_space<vmem>>, vector<512x10xf32>
    %cst_7 = arith.constant dense<0.000000e+00> : vector<8x10xf32>
    %7 = tpu.matmul %5, %6, %cst_7 {dimension_numbers = #tpu.dot_dimension_numbers<[1], [0], [0], [1], [0, 0, 1, 1], [], []>} : vector<8x512xf32>, vector<512x10xf32>, vector<8x10xf32> -> vector<8x10xf32>
    %c0_8 = arith.constant 0 : index
    %c0_9 = arith.constant 0 : index
    %8 = vector.load %arg5[%c0_8, %c0_9] : memref<1x10xf32, #tpu.memory_space<vmem>>, vector<1x10xf32>
    %9 = vector.broadcast %8 : vector<1x10xf32> to vector<8x10xf32>
    %10 = arith.addf %7, %9 : vector<8x10xf32>
    %c0_10 = arith.constant 0 : index
    %c0_11 = arith.constant 0 : index
    %11 = vector.load %arg6[%c0_10, %c0_11] : memref<8x10xf32, #tpu.memory_space<vmem>>, vector<8x10xf32>
    tpu.vector_store %arg6[%c0_10, %c0_11], %10 {strides = array<i32>} : memref<8x10xf32, #tpu.memory_space<vmem>>, vector<8x10xf32>,
    return
  }
  func.func @transform_0(%arg0: i32) -> (i32, i32) {
    %c0_i32 = arith.constant 0 : i32
    %c0_i32_0 = arith.constant 0 : i32
    return %arg0, %c0_i32 : i32, i32
  }
  func.func @transform_1(%arg0: i32) -> (i32, i32) {
    %c0_i32 = arith.constant 0 : i32
    %c0_i32_0 = arith.constant 0 : i32
    %c0_i32_1 = arith.constant 0 : i32
    return %c0_i32, %c0_i32_0 : i32, i32
  }
  func.func @transform_2(%arg0: i32) -> (i32, i32) {
    %c0_i32 = arith.constant 0 : i32
    %c0_i32_0 = arith.constant 0 : i32
    %c0_i32_1 = arith.constant 0 : i32
    return %c0_i32, %c0_i32_0 : i32, i32
  }
  func.func @transform_3(%arg0: i32) -> (i32, i32) {
    %c0_i32 = arith.constant 0 : i32
    %c0_i32_0 = arith.constant 0 : i32
    %c0_i32_1 = arith.constant 0 : i32
    return %c0_i32, %c0_i32_0 : i32, i32
  }
  func.func @transform_4(%arg0: i32) -> (i32, i32) {
    %c0_i32 = arith.constant 0 : i32
    %c0_i32_0 = arith.constant 0 : i32
    %c0_i32_1 = arith.constant 0 : i32
    return %c0_i32, %c0_i32_0 : i32, i32
  }
  func.func @transform_5(%arg0: i32) -> (i32, i32) {
    %c0_i32 = arith.constant 0 : i32
    %c0_i32_0 = arith.constant 0 : i32
    return %arg0, %c0_i32 : i32, i32
  }
}

</mosaic_0001>

<bundles_post_ra>
// kernel: simple_cnn_forward.2
= control target key start
LH: loop header
LB: loop body
LE: loop exit
PB: predicated region body
PF: predicated region fallthrough
CT: control target
= control target key end

     0   :  { %s5926_s21 = smov 0   ;;  %s8373_s0 = inlined_call_operand.vmem [shape: f32[2,800,9], index: 0, kind: input, shape index: {}]   ;;  %s8374_s1 = inlined_call_operand.vmem [shape: f32[196,9], index: 1, kind: input, shape index: {}]   ;;  %s8375_s2 = inlined_call_operand.vmem [shape: f32[9,32], index: 2, kind: input, shape index: {}]   ;;  %s8376_s3 = inlined_call_operand.vmem [shape: f32[1,32], index: 3, kind: input, shape index: {}]   ;;  %s8377_s4 = inlined_call_operand.vmem [shape: f32[288,64], index: 4, kind: input, shape index: {}]   ;;  %s8378_s5 = inlined_call_operand.vmem [shape: f32[1,64], index: 5, kind: input, shape index: {}]   ;;  %s8379_s6 = inlined_call_operand.vmem [shape: f32[2,1,3136], index: 6, kind: output, shape index: {}]  }
   0x1 LB: > { %s4721_s22 = sadd.s32 4294967295, %s5872_s21   ;;  %p4725_p0 = scmp.ge.s32.totalorder %s5872_s21, 1  ;;  %s5872_s21 = sphi %s5926_s21, %s16_s21  }
   0x2   : > { %p212_p1 = scmp.lt.s32.totalorder %s5872_s21, 3 }
   0x4   : > { %p213_p2 = pnand %p4725_p0, %p212_p1 }
   0x6   : > { %216 = sbr.rel (%p213_p2) target bundleno = 1310 (0x51e), region = 44 }
   0xd   : > { %v5937_v0 = vld [vmem:[%s8374_s1 + $0x10] sm:$0xff]  ;;  %v5942_v1 = vld [vmem:[%s8374_s1] sm:$0xff]  ;;  %vm660_vm0 = vcmask 1040384   ;;  %v5874_v3 = vmov 0   ;;  %v351_v4 = vld [vmem:[%s8375_s2 + $0x8] sm:$0x1] }
   0xe   : > { %v350_v2 = vld [vmem:[%s8375_s2] sm:$0xff]  ;;  %5413 = vset.pattern.permute.xlu1 %v5874_v3  ;;  %5412 = vset.pattern.permute.xlu0 %v5874_v3  ;;  %vm5875_vm1 = vmmov 1   ;;  %p241_p3 = scmp.lt.s32.totalorder %s4721_s22, 1  ;;  %vm1404_vm3 = vcmask 261120   ;;  %v5959_v7 = vld [vmem:[%s8374_s1 + $0x18] sm:$0xff]  ;;  %v5964_v8 = vld [vmem:[%s8374_s1 + $0x8] sm:$0xff] }
   0xf   : > { %vm5950_vm2 = vmpackc.low %vm660_vm0, %vm5875_vm1  ;;  %1522 = vperm.xlu1 %5413, %v5937_v0   ;;  %1512 = vperm.xlu0 %5412, %v5942_v1   ;;  %v5225_v6 = vpack.c.bf16 %v351_v4, %v350_v2  ;;  %v8380_v9 = vmov 0.0   ;;  %vm359_vm4 = vcmask 72704   ;;  %v6039_v10 = vld [vmem:[%s8374_s1 + $0x28] sm:$0xff]  ;;  %v6044_v11 = vld [vmem:[%s8374_s1 + $0x20] sm:$0xff]  ;;  %v5877_v54 = vmov 1   ;;  %s5884_s24 = smov 32  }
  0x10   : > { %s8673_s22 = smov (!%p241_p3, %s4721_s22), 1  ;;  %1405 = vst.msk [vmem:[#allocation2] sm:$0xff] %vm1404_vm3, %v8380_v9  ;;  %1406 = vst.msk [vmem:[#allocation2 + $0x8] sm:$0xff] %vm1404_vm3, %v8380_v9  ;;  %v6058_v16 = vld [vmem:[%s8374_s1 + $0x38] sm:$0xff]  ;;  %v6063_v17 = vld [vmem:[%s8374_s1 + $0x30] sm:$0xff]  ;;  %vm1433_vm5 = vcmask 257024  }
  0x11   : > { %1407 = vst.msk [vmem:[#allocation2 + $0x10] sm:$0xff] %vm1404_vm3, %v8380_v9  ;;  %1408 = vst.msk [vmem:[#allocation2 + $0x18] sm:$0xff] %vm1404_vm3, %v8380_v9  ;;  %5227 = vmatprep.subr.msk.bf16.mxu0 %vm5950_vm2, %v5225_v6  ;;  %s5385_s11 = smul.u32 800, %s8673_s22  ;;  %v6074_v20 = vld [vmem:[%s8374_s1 + $0x48] sm:$0xff]  ;;  %v6079_v21 = vld [vmem:[%s8374_s1 + $0x40] sm:$0xff]  ;;  %s5885_s7 = smov 96  }
  0x12   : > { %1409 = vst.msk [vmem:[#allocation2 + $0x20] sm:$0xff] %vm1404_vm3, %v8380_v9  ;;  %1410 = vst.msk [vmem:[#allocation2 + $0x28] sm:$0xff] %vm1404_vm3, %v8380_v9  ;;  %5230 = vmatpush3.bf16.msk.msra.mxu0 %vm5950_vm2, %v5225_v6  ;;  %v6090_v24 = vld [vmem:[%s8374_s1 + $0x58] sm:$0xff]  ;;  %v6095_v25 = vld [vmem:[%s8374_s1 + $0x50] sm:$0xff]  ;;  %s5888_s20 = smov 64   ;;  %vm3485_vm6 = vcmask 523264  }
  0x13   : > { %1411 = vst.msk [vmem:[#allocation2 + $0x30] sm:$0xff] %vm1404_vm3, %v8380_v9  ;;  %1412 = vst.msk [vmem:[#allocation2 + $0x38] sm:$0xff] %vm1404_vm3, %v8380_v9  ;;  %1527 = vperm.xlu1 %5413, %v5959_v7   ;;  %1517 = vperm.xlu0 %5412, %v5964_v8   ;;  %s6034_s14 = scalar_lea.vmem %s8373_s0, %s5385_s11  ;;  %v6106_v28 = vld [vmem:[%s8374_s1 + $0x68] sm:$0xff]  ;;  %v6111_v29 = vld [vmem:[%s8374_s1 + $0x60] sm:$0xff]  ;;  %vm3511_vm7 = vcmask 785408   ;;  %vm5889_vm8 = vmmov 0  }
  0x14   : > { %1413 = vst.msk [vmem:[#allocation2 + $0x40] sm:$0xff] %vm1404_vm3, %v8380_v9  ;;  %1414 = vst.msk [vmem:[#allocation2 + $0x48] sm:$0xff] %vm1404_vm3, %v8380_v9  ;;  %v250_v12 = vld [vmem:[%s6034_s14] sm:$0xff]  ;;  %v251_v13 = vld [vmem:[%s6034_s14 + $0x8] sm:$0xff]  ;;  %vm4186_vm9 = vcmask 519168   ;;  %s5386_s11 = smul.u32 25, %s8673_s22 }
  0x15   : > { %1415 = vst.msk [vmem:[#allocation2 + $0x50] sm:$0xff] %vm1404_vm3, %v8380_v9  ;;  %1416 = vst.msk [vmem:[#allocation2 + $0x58] sm:$0xff] %vm1404_vm3, %v8380_v9  ;;  %v252_v14 = vld [vmem:[%s6034_s14 + $0x10] sm:$0xff]  ;;  %4992 = vmatprep.mubr.msk.f32.mxu0 %vm359_vm4, %v250_v12  ;;  %v253_v15 = vld [vmem:[%s6034_s14 + $0x18] sm:$0xff] }
  0x16   : > { %1417 = vst.msk [vmem:[#allocation2 + $0x60] sm:$0xff] %vm1404_vm3, %v8380_v9  ;;  %1418 = vst.msk [vmem:[#allocation2 + $0x68] sm:$0xff] %vm1404_vm3, %v8380_v9  ;;  %4993 = vmatmul.mubr.msk.f32.vlgmr.msra.gmra.mrb[0].mxu0 %vm359_vm4, %v251_v13  ;;  %v254_v18 = vld [vmem:[%s6034_s14 + $0x20] sm:$0xff]  ;;  %v255_v19 = vld [vmem:[%s6034_s14 + $0x28] sm:$0xff] }
  0x17   : > { %1419 = vst.msk [vmem:[#allocation2 + $0x70] sm:$0xff] %vm1404_vm3, %v8380_v9  ;;  %1420 = vst.msk [vmem:[#allocation2 + $0x78] sm:$0xff] %vm1404_vm3, %v8380_v9  ;;  %1537 = vperm.xlu1 %5413, %v6039_v10   ;;  %1532 = vperm.xlu0 %5412, %v6044_v11   ;;  %v256_v22 = vld [vmem:[%s6034_s14 + $0x30] sm:$0xff]  ;;  %v257_v23 = vld [vmem:[%s6034_s14 + $0x38] sm:$0xff] }
  0x18   : > { %1421 = vst.msk [vmem:[#allocation2 + $0x80] sm:$0xff] %vm1404_vm3, %v8380_v9  ;;  %1422 = vst.msk [vmem:[#allocation2 + $0x88] sm:$0xff] %vm1404_vm3, %v8380_v9  ;;  %4995 = vmatprep.mubr.msk.f32.mxu0 %vm359_vm4, %v252_v14  ;;  %v258_v26 = vld [vmem:[%s6034_s14 + $0x40] sm:$0xff]  ;;  %v259_v27 = vld [vmem:[%s6034_s14 + $0x48] sm:$0xff] }
  0x19   : > { %1423 = vst.msk [vmem:[#allocation2 + $0x90] sm:$0xff] %vm1404_vm3, %v8380_v9  ;;  %1424 = vst.msk [vmem:[#allocation2 + $0x98] sm:$0xff] %vm1404_vm3, %v8380_v9  ;;  %v260_v30 = vld [vmem:[%s6034_s14 + $0x50] sm:$0xff]  ;;  %v261_v31 = vld [vmem:[%s6034_s14 + $0x58] sm:$0xff] }
  0x1a   : > { %1425 = vst.msk [vmem:[#allocation2 + $0xa0] sm:$0xff] %vm1404_vm3, %v8380_v9  ;;  %1426 = vst.msk [vmem:[#allocation2 + $0xa8] sm:$0xff] %vm1404_vm3, %v8380_v9  ;;  %4996 = vmatmul.mubr.msk.f32.gmra.mrb[2].mxu0 %vm359_vm4, %v253_v15  ;;  %v6122_v32 = vld [vmem:[%s8374_s1 + $0x78] sm:$0xff]  ;;  %v6127_v33 = vld [vmem:[%s8374_s1 + $0x70] sm:$0xff] }
  0x1b   : > { %1427 = vst.msk [vmem:[#allocation2 + $0xb0] sm:$0xff] %vm1404_vm3, %v8380_v9  ;;  %1428 = vst.msk [vmem:[#allocation2 + $0xb8] sm:$0xff] %vm1404_vm3, %v8380_v9  ;;  %1547 = vperm.xlu1 %5413, %v6058_v16   ;;  %1542 = vperm.xlu0 %5412, %v6063_v17   ;;  %v262_v34 = vld [vmem:[%s6034_s14 + $0x60] sm:$0xff]  ;;  %v263_v35 = vld [vmem:[%s6034_s14 + $0x68] sm:$0xff] }
  0x1c   : > { %1429 = vst.msk [vmem:[#allocation2 + $0xc0] sm:$0xff] %vm1404_vm3, %v8380_v9  ;;  %1430 = vst.msk [vmem:[#allocation2 + $0xc8] sm:$0xff] %vm1404_vm3, %v8380_v9  ;;  %4998 = vmatprep.mubr.msk.f32.mxu0 %vm359_vm4, %v254_v18  ;;  %v6138_v36 = vld [vmem:[%s8374_s1 + $0x88] sm:$0xff]  ;;  %v6143_v37 = vld [vmem:[%s8374_s1 + $0x80] sm:$0xff] }
  0x1d   : > { %1431 = vst.msk [vmem:[#allocation2 + $0xd0] sm:$0xff] %vm1404_vm3, %v8380_v9  ;;  %1432 = vst.msk [vmem:[#allocation2 + $0xd8] sm:$0xff] %vm1404_vm3, %v8380_v9  ;;  %v264_v38 = vld [vmem:[%s6034_s14 + $0x70] sm:$0xff]  ;;  %v265_v39 = vld [vmem:[%s6034_s14 + $0x78] sm:$0xff] }
  0x1e   : > { %4999 = vmatmul.mubr.msk.f32.gmra.mrb[4].mxu0 %vm359_vm4, %v255_v19  ;;  %v6154_v40 = vld [vmem:[%s8374_s1 + $0x98] sm:$0xff]  ;;  %v6159_v41 = vld [vmem:[%s8374_s1 + $0x90] sm:$0xff]  ;;  %v266_v42 = vld [vmem:[%s6034_s14 + $0x80] sm:$0xff] }
  0x1f   : > { %1557 = vperm.xlu1 %5413, %v6074_v20   ;;  %1552 = vperm.xlu0 %5412, %v6079_v21   ;;  %v267_v43 = vld [vmem:[%s6034_s14 + $0x88] sm:$0xff]  ;;  %v6175_v45 = vld [vmem:[%s8374_s1 + $0xa0] sm:$0xff]  ;;  %v268_v46 = vld [vmem:[%s6034_s14 + $0x90] sm:$0xff] }
  0x20   : > { %5001 = vmatprep.mubr.msk.f32.mxu0 %vm359_vm4, %v256_v22  ;;  %v6170_v44 = vld [vmem:[%s8374_s1 + $0xa8] sm:$0xff]  ;;  %v269_v47 = vld [vmem:[%s6034_s14 + $0x98] sm:$0xff]  ;;  %v6191_v49 = vld [vmem:[%s8374_s1 + $0xb0] sm:$0xff] }
  0x21   : > { %v6186_v48 = vld [vmem:[%s8374_s1 + $0xb8] sm:$0xff]  ;;  %v270_v50 = vld [vmem:[%s6034_s14 + $0xa0] sm:$0xff]  ;;  %v271_v51 = vld [vmem:[%s6034_s14 + $0xa8] sm:$0xff] }
  0x22   : > { %5002 = vmatmul.mubr.msk.f32.gmra.mrb[6].mxu0 %vm359_vm4, %v257_v23  ;;  %v6202_v52 = vld [vmem:[%s8374_s1 + $0xc0] sm:$0xf]  ;;  %v272_v53 = vld [vmem:[%s6034_s14 + $0xb0] sm:$0xff]  ;;  %v273_v55 = vld [vmem:[%s6034_s14 + $0xb8] sm:$0xff] }
  0x23   : > { %1567 = vperm.xlu1 %5413, %v6090_v24   ;;  %1562 = vperm.xlu0 %5412, %v6095_v25   ;;  %v274_v56 = vld [vmem:[%s6034_s14 + $0xc0] sm:$0xff]  ;;  %v275_v57 = vld [vmem:[%s6034_s14 + $0xc8] sm:$0xff]  ;;  %v276_v58 = vld [vmem:[%s6034_s14 + $0xd0] sm:$0xff] }
  0x24   : > { %5004 = vmatprep.mubr.msk.f32.mxu0 %vm359_vm4, %v258_v26  ;;  %v277_v59 = vld [vmem:[%s6034_s14 + $0xd8] sm:$0xff]  ;;  %v278_v60 = vld [vmem:[%s6034_s14 + $0xe0] sm:$0xff]  ;;  %v279_v61 = vld [vmem:[%s6034_s14 + $0xe8] sm:$0xff] }
  0x25   : > { %v280_v62 = vld [vmem:[%s6034_s14 + $0xf0] sm:$0xff]  ;;  %v281_v63 = vld [vmem:[%s6034_s14 + $0xf8] sm:$0xff]  ;;  %v282_v2 = vld [vmem:[%s6034_s14 + $0x100] sm:$0xff] }
  0x26   : > { %5005 = vmatmul.mubr.msk.f32.gmra.mrb[8].mxu0 %vm359_vm4, %v259_v27  ;;  %v283_v3 = vld [vmem:[%s6034_s14 + $0x108] sm:$0xff]  ;;  %v284_v4 = vld [vmem:[%s6034_s14 + $0x110] sm:$0xff]  ;;  %v285_v5 = vld [vmem:[%s6034_s14 + $0x118] sm:$0xff] }
  0x27   : > { %1577 = vperm.xlu1 %5413, %v6106_v28   ;;  %1572 = vperm.xlu0 %5412, %v6111_v29   ;;  %v286_v6 = vld [vmem:[%s6034_s14 + $0x120] sm:$0xff]  ;;  %v287_v12 = vld [vmem:[%s6034_s14 + $0x128] sm:$0xff]  ;;  %v288_v13 = vld [vmem:[%s6034_s14 + $0x130] sm:$0xff] }
  0x28   : > { %5007 = vmatprep.mubr.msk.f32.mxu0 %vm359_vm4, %v260_v30  ;;  %v289_v14 = vld [vmem:[%s6034_s14 + $0x138] sm:$0xff]  ;;  %v290_v15 = vld [vmem:[%s6034_s14 + $0x140] sm:$0xff]  ;;  %v291_v18 = vld [vmem:[%s6034_s14 + $0x148] sm:$0xff] }
  0x29   : > { %v292_v19 = vld [vmem:[%s6034_s14 + $0x150] sm:$0xff]  ;;  %v293_v22 = vld [vmem:[%s6034_s14 + $0x158] sm:$0xff]  ;;  %v294_v23 = vld [vmem:[%s6034_s14 + $0x160] sm:$0xff] }
  0x2a   : > { %5008 = vmatmul.mubr.msk.f32.gmra.mrb[10].mxu0 %vm359_vm4, %v261_v31  ;;  %v295_v26 = vld [vmem:[%s6034_s14 + $0x168] sm:$0xff]  ;;  %v296_v27 = vld [vmem:[%s6034_s14 + $0x170] sm:$0xff]  ;;  %v297_v30 = vld [vmem:[%s6034_s14 + $0x178] sm:$0xff] }
  0x2b   : > { %1587 = vperm.xlu1 %5413, %v6122_v32   ;;  %1582 = vperm.xlu0 %5412, %v6127_v33   ;;  %v298_v31 = vld [vmem:[%s6034_s14 + $0x180] sm:$0xff] }
  0x2c   : > { %5010 = vmatprep.mubr.msk.f32.mxu0 %vm359_vm4, %v262_v34  ;;  %v5878_v34 = vmov 2   ;;  %v346_v9 = vld [vmem:[%s6034_s14 + $0x300] sm:$0xff] }
  0x2e   : > { %5011 = vmatmul.mubr.msk.f32.gmra.mrb[12].mxu0 %vm359_vm4, %v263_v35  ;;  %v299_v35 = vld [vmem:[%s6034_s14 + $0x188] sm:$0xff] }
  0x2f   : > { %1597 = vperm.xlu1 %5413, %v6138_v36   ;;  %1592 = vperm.xlu0 %5412, %v6143_v37  }
  0x30   : > { %5013 = vmatprep.mubr.msk.f32.mxu0 %vm359_vm4, %v264_v38  ;;  %v300_v38 = vld [vmem:[%s6034_s14 + $0x190] sm:$0xff] }
  0x32   : > { %5014 = vmatmul.mubr.msk.f32.gmra.mrb[14].mxu0 %vm359_vm4, %v265_v39  ;;  %v301_v39 = vld [vmem:[%s6034_s14 + $0x198] sm:$0xff] }
  0x33   : > { %1607 = vperm.xlu1 %5413, %v6154_v40   ;;  %1602 = vperm.xlu0 %5412, %v6159_v41  }
  0x34   : > { %5016 = vmatprep.mubr.msk.f32.mxu0 %vm359_vm4, %v266_v42  ;;  %v302_v42 = vld [vmem:[%s6034_s14 + $0x1a0] sm:$0xff] }
  0x36   : > { %5017 = vmatmul.mubr.msk.f32.gmra.mrb[16].mxu0 %vm359_vm4, %v267_v43  ;;  %v303_v43 = vld [vmem:[%s6034_s14 + $0x1a8] sm:$0xff] }
  0x37   : > { %1617 = vperm.xlu1 %5413, %v6170_v44   ;;  %1612 = vperm.xlu0 %5412, %v6175_v45  }
  0x38   : > { %5019 = vmatprep.mubr.msk.f32.mxu0 %vm359_vm4, %v268_v46  ;;  %v304_v46 = vld [vmem:[%s6034_s14 + $0x1b0] sm:$0xff] }
  0x3a   : > { %5020 = vmatmul.mubr.msk.f32.gmra.mrb[18].mxu0 %vm359_vm4, %v269_v47  ;;  %v305_v47 = vld [vmem:[%s6034_s14 + $0x1b8] sm:$0xff] }
  0x3b   : > { %1627 = vperm.xlu1 %5413, %v6186_v48   ;;  %1622 = vperm.xlu0 %5412, %v6191_v49  }
  0x3c   : > { %5022 = vmatprep.mubr.msk.f32.mxu0 %vm359_vm4, %v270_v50  ;;  %v306_v50 = vld [vmem:[%s6034_s14 + $0x1c0] sm:$0xff] }
  0x3e   : > { %5023 = vmatmul.mubr.msk.f32.gmra.mrb[20].mxu0 %vm359_vm4, %v271_v51  ;;  %v307_v51 = vld [vmem:[%s6034_s14 + $0x1c8] sm:$0xff] }
  0x3f   : > { %5414 = vset.pattern.permute.xlu1 %v5877_v54  ;;  %1632 = vperm.xlu0 %5412, %v6202_v52  }
  0x40   : > { %1686 = vperm.xlu1 %5414, %v5942_v1   ;;  %5025 = vmatprep.mubr.msk.f32.mxu0 %vm359_vm4, %v272_v53  ;;  %v308_v53 = vld [vmem:[%s6034_s14 + $0x1d0] sm:$0xff] }
  0x42   : > { %5026 = vmatmul.mubr.msk.f32.gmra.mrb[22].mxu0 %vm359_vm4, %v273_v55  ;;  %v310_v55 = vld [vmem:[%s6034_s14 + $0x1e0] sm:$0xff] }
  0x43   : > { %5415 = vset.pattern.permute.xlu0 %v5877_v54  ;;  %5028 = vmatprep.mubr.msk.f32.mxu0 %vm359_vm4, %v274_v56  ;;  %v309_v54 = vld [vmem:[%s6034_s14 + $0x1d8] sm:$0xff]  ;;  %v311_v56 = vld [vmem:[%s6034_s14 + $0x1e8] sm:$0xff] }
  0x44   : > { %1694 = vperm.xlu1 %5414, %v5937_v0   ;;  %1690 = vperm.xlu0 %5415, %v5964_v8  }
  0x46   : > { %5029 = vmatmul.mubr.msk.f32.gmra.mrb[24].mxu0 %vm359_vm4, %v275_v57  ;;  %v312_v57 = vld [vmem:[%s6034_s14 + $0x1f0] sm:$0xff] }
  0x47   : > { %5031 = vmatprep.mubr.msk.f32.mxu0 %vm359_vm4, %v276_v58 }
  0x48   : > { %1698 = vperm.xlu1 %5414, %v5959_v7   ;;  %1702 = vperm.xlu0 %5415, %v6044_v11  }
  0x4a   : > { %5032 = vmatmul.mubr.msk.f32.gmra.mrb[26].mxu0 %vm359_vm4, %v277_v59 }
  0x4b   : > { %5034 = vmatprep.mubr.msk.f32.mxu0 %vm359_vm4, %v278_v60  ;;  %v313_v60 = vld [vmem:[%s6034_s14 + $0x1f8] sm:$0xff] }
  0x4c   : > { %1706 = vperm.xlu1 %5414, %v6039_v10   ;;  %1710 = vperm.xlu0 %5415, %v6063_v17  }
  0x4e   : > { %5035 = vmatmul.mubr.msk.f32.gmra.mrb[28].mxu0 %vm359_vm4, %v279_v61  ;;  %v314_v61 = vld [vmem:[%s6034_s14 + $0x200] sm:$0xff] }
  0x4f   : > { %5037 = vmatprep.mubr.msk.f32.mxu0 %vm359_vm4, %v280_v62 }
  0x50   : > { %1714 = vperm.xlu1 %5414, %v6058_v16   ;;  %1718 = vperm.xlu0 %5415, %v6079_v21  }
  0x52   : > { %5038 = vmatmul.mubr.msk.f32.gmra.mrb[30].mxu0 %vm359_vm4, %v281_v63 }
  0x53   : > { %5040 = vmatprep.mubr.msk.f32.mxu0 %vm359_vm4, %v282_v2  ;;  %v315_v2 = vld [vmem:[%s6034_s14 + $0x208] sm:$0xff] }
  0x54   : > { %1722 = vperm.xlu1 %5414, %v6074_v20   ;;  %1726 = vperm.xlu0 %5415, %v6095_v25  }
  0x56   : > { %5041 = vmatmul.mubr.msk.f32.gmra.mrb[32].mxu0 %vm359_vm4, %v283_v3  ;;  %v316_v3 = vld [vmem:[%s6034_s14 + $0x210] sm:$0xff] }
  0x57   : > { %5043 = vmatprep.mubr.msk.f32.mxu0 %vm359_vm4, %v284_v4 }
  0x58   : > { %1730 = vperm.xlu1 %5414, %v6090_v24   ;;  %1734 = vperm.xlu0 %5415, %v6111_v29  }
  0x5a   : > { %5044 = vmatmul.mubr.msk.f32.gmra.mrb[34].mxu0 %vm359_vm4, %v285_v5 }
  0x5b   : > { %5046 = vmatprep.mubr.msk.f32.mxu0 %vm359_vm4, %v286_v6  ;;  %v317_v6 = vld [vmem:[%s6034_s14 + $0x218] sm:$0xff] }
  0x5c   : > { %1738 = vperm.xlu1 %5414, %v6106_v28   ;;  %1742 = vperm.xlu0 %5415, %v6127_v33  }
  0x5e   : > { %5047 = vmatmul.mubr.msk.f32.gmra.mrb[36].mxu0 %vm359_vm4, %v287_v12  ;;  %v318_v12 = vld [vmem:[%s6034_s14 + $0x220] sm:$0xff] }
  0x5f   : > { %5049 = vmatprep.mubr.msk.f32.mxu0 %vm359_vm4, %v288_v13 }
  0x60   : > { %1746 = vperm.xlu1 %5414, %v6122_v32   ;;  %1750 = vperm.xlu0 %5415, %v6143_v37  }
  0x62   : > { %5050 = vmatmul.mubr.msk.f32.gmra.mrb[38].mxu0 %vm359_vm4, %v289_v14 }
  0x63   : > { %5052 = vmatprep.mubr.msk.f32.mxu0 %vm359_vm4, %v290_v15  ;;  %v319_v15 = vld [vmem:[%s6034_s14 + $0x228] sm:$0xff] }
  0x64   : > { %1754 = vperm.xlu1 %5414, %v6138_v36   ;;  %1758 = vperm.xlu0 %5415, %v6159_v41  }
  0x66   : > { %5053 = vmatmul.mubr.msk.f32.gmra.mrb[40].mxu0 %vm359_vm4, %v291_v18  ;;  %v320_v18 = vld [vmem:[%s6034_s14 + $0x230] sm:$0xff] }
  0x67   : > { %5055 = vmatprep.mubr.msk.f32.mxu0 %vm359_vm4, %v292_v19 }
  0x68   : > { %1762 = vperm.xlu1 %5414, %v6154_v40   ;;  %1766 = vperm.xlu0 %5415, %v6175_v45  }
  0x6a   : > { %5056 = vmatmul.mubr.msk.f32.gmra.mrb[42].mxu0 %vm359_vm4, %v293_v22 }
  0x6b   : > { %5058 = vmatprep.mubr.msk.f32.mxu0 %vm359_vm4, %v294_v23  ;;  %v321_v23 = vld [vmem:[%s6034_s14 + $0x238] sm:$0xff] }
  0x6c   : > { %1770 = vperm.xlu1 %5414, %v6170_v44   ;;  %1774 = vperm.xlu0 %5415, %v6191_v49  }
  0x6e   : > { %5059 = vmatmul.mubr.msk.f32.gmra.mrb[44].mxu0 %vm359_vm4, %v295_v26  ;;  %v322_v26 = vld [vmem:[%s6034_s14 + $0x240] sm:$0xff] }
  0x6f   : > { %5061 = vmatprep.mubr.msk.f32.mxu0 %vm359_vm4, %v296_v27 }
  0x70   : > { %1778 = vperm.xlu1 %5414, %v6186_v48   ;;  %1782 = vperm.xlu0 %5415, %v6202_v52  }
  0x72   : > { %5062 = vmatmul.mubr.msk.f32.gmra.mrb[46].mxu0 %vm359_vm4, %v297_v30 }
  0x73   : > { %5064 = vmatprep.mubr.msk.f32.mxu0 %vm359_vm4, %v298_v31  ;;  %v323_v31 = vld [vmem:[%s6034_s14 + $0x248] sm:$0xff] }
  0x74   : > { %5416 = vset.pattern.permute.xlu1 %v5878_v34  ;;  %5417 = vset.pattern.permute.xlu0 %v5878_v34  ;;  %v324_v34 = vld [vmem:[%s6034_s14 + $0x250] sm:$0xff] }
  0x75   : > { %1836 = vperm.xlu1 %5416, %v5942_v1   ;;  %1840 = vperm.xlu0 %5417, %v5964_v8  }
  0x76   : > { %5065 = vmatmul.mubr.msk.f32.gmra.mrb[48].mxu0 %vm359_vm4, %v299_v35  ;;  %v5879_v35 = vmov 3  }
  0x77   : > { %5067 = vmatprep.mubr.msk.f32.mxu0 %vm359_vm4, %v300_v38 }
  0x79   : > { %1844 = vperm.xlu1 %5416, %v5937_v0   ;;  %1852 = vperm.xlu0 %5417, %v6044_v11  }
  0x7a   : > { %5068 = vmatmul.mubr.msk.f32.gmra.mrb[50].mxu0 %vm359_vm4, %v301_v39 }
  0x7b   : > { %5070 = vmatprep.mubr.msk.f32.mxu0 %vm359_vm4, %v302_v42  ;;  %v325_v42 = vld [vmem:[%s6034_s14 + $0x258] sm:$0xff] }
  0x7d   : > { %1848 = vperm.xlu1 %5416, %v5959_v7   ;;  %1860 = vperm.xlu0 %5417, %v6063_v17  }
  0x7e   : > { %5071 = vmatmul.mubr.msk.f32.gmra.mrb[52].mxu0 %vm359_vm4, %v303_v43  ;;  %v326_v43 = vld [vmem:[%s6034_s14 + $0x260] sm:$0xff] }
  0x7f   : > { %5073 = vmatprep.mubr.msk.f32.mxu0 %vm359_vm4, %v304_v46 }
  0x81   : > { %1856 = vperm.xlu1 %5416, %v6039_v10   ;;  %1868 = vperm.xlu0 %5417, %v6079_v21  }
  0x82   : > { %5074 = vmatmul.mubr.msk.f32.gmra.mrb[54].mxu0 %vm359_vm4, %v305_v47 }
  0x83   : > { %5076 = vmatprep.mubr.msk.f32.mxu0 %vm359_vm4, %v306_v50  ;;  %v327_v50 = vld [vmem:[%s6034_s14 + $0x268] sm:$0xff] }
  0x85   : > { %1864 = vperm.xlu1 %5416, %v6058_v16   ;;  %1876 = vperm.xlu0 %5417, %v6095_v25  }
  0x86   : > { %5077 = vmatmul.mubr.msk.f32.gmra.mrb[56].mxu0 %vm359_vm4, %v307_v51  ;;  %v328_v51 = vld [vmem:[%s6034_s14 + $0x270] sm:$0xff] }
  0x87   : > { %5079 = vmatprep.mubr.msk.f32.mxu0 %vm359_vm4, %v308_v53 }
  0x89   : > { %1872 = vperm.xlu1 %5416, %v6074_v20   ;;  %1884 = vperm.xlu0 %5417, %v6111_v29  }
  0x8a   : > { %5080 = vmatmul.mubr.msk.f32.gmra.mrb[58].mxu0 %vm359_vm4, %v309_v54 }
  0x8b   : > { %5082 = vmatprep.mubr.msk.f32.mxu0 %vm359_vm4, %v310_v55  ;;  %v329_v55 = vld [vmem:[%s6034_s14 + $0x278] sm:$0xff] }
  0x8d   : > { %1880 = vperm.xlu1 %5416, %v6090_v24   ;;  %1892 = vperm.xlu0 %5417, %v6127_v33  }
  0x8e   : > { %v6325_v58 = vpop.permute.xlu1 %1522  ;;  %v6327_v59 = vpop.permute.xlu0 %1512  ;;  %5083 = vmatmul.mubr.msk.f32.gmra.mrb[60].mxu0 %vm359_vm4, %v311_v56  ;;  %v330_v56 = vld [vmem:[%s6034_s14 + $0x280] sm:$0xff] }
  0x8f   : > { %8394 = vst [vmem:[#allocation4_spill] sm:$0xff] %v6325_v58  ;;  %8395 = vst [vmem:[#allocation5_spill] sm:$0xff] %v6327_v59  ;;  %5085 = vmatprep.mubr.msk.f32.mxu0 %vm359_vm4, %v312_v57 }
  0x91   : > { %1888 = vperm.xlu1 %5416, %v6106_v28   ;;  %1900 = vperm.xlu0 %5417, %v6143_v37  }
  0x92   : > { %v6335_v62 = vpop.permute.xlu1 %1527  ;;  %v6337_v63 = vpop.permute.xlu0 %1517  ;;  %5086 = vmatmul.mubr.msk.f32.gmra.mrb[62].mxu0 %vm359_vm4, %v313_v60 }
  0x93   : > { %8396 = vst [vmem:[#allocation6_spill] sm:$0xff] %v6335_v62  ;;  %8397 = vst [vmem:[#allocation7_spill] sm:$0xff] %v6337_v63  ;;  %5088 = vmatprep.mubr.msk.f32.mxu0 %vm359_vm4, %v314_v61  ;;  %v331_v61 = vld [vmem:[%s6034_s14 + $0x288] sm:$0xff] }
  0x95   : > { %1896 = vperm.xlu1 %5416, %v6122_v32   ;;  %1908 = vperm.xlu0 %5417, %v6159_v41  }
  0x96   : > { %v6345_v4 = vpop.permute.xlu1 %1537  ;;  %v6347_v5 = vpop.permute.xlu0 %1532  ;;  %5089 = vmatmul.mubr.msk.f32.gmra.mrb[64].mxu0 %vm359_vm4, %v315_v2  ;;  %v332_v2 = vld [vmem:[%s6034_s14 + $0x290] sm:$0xff] }
  0x97   : > { %8398 = vst [vmem:[#allocation8_spill] sm:$0xff] %v6345_v4  ;;  %8399 = vst [vmem:[#allocation9_spill] sm:$0xff] %v6347_v5  ;;  %5091 = vmatprep.mubr.msk.f32.mxu0 %vm359_vm4, %v316_v3  ;;  %v348_v4 = vld [vmem:[%s6034_s14 + $0x310] sm:$0xff] }
  0x99   : > { %1904 = vperm.xlu1 %5416, %v6138_v36   ;;  %1916 = vperm.xlu0 %5417, %v6175_v45  }
  0x9a   : > { %v6355_v13 = vpop.permute.xlu1 %1547  ;;  %v6357_v14 = vpop.permute.xlu0 %1542  ;;  %5092 = vmatmul.mubr.msk.f32.gmra.mrb[66].mxu0 %vm359_vm4, %v317_v6 }
  0x9b   : > { %8400 = vst [vmem:[#allocation10_spill] sm:$0xff] %v6355_v13  ;;  %8401 = vst [vmem:[#allocation11_spill] sm:$0xff] %v6357_v14  ;;  %5094 = vmatprep.mubr.msk.f32.mxu0 %vm359_vm4, %v318_v12  ;;  %v333_v12 = vld [vmem:[%s6034_s14 + $0x298] sm:$0xff] }
  0x9d   : > { %1912 = vperm.xlu1 %5416, %v6154_v40   ;;  %1924 = vperm.xlu0 %5417, %v6191_v49  }
  0x9e   : > { %v6365_v19 = vpop.permute.xlu1 %1557  ;;  %v6367_v22 = vpop.permute.xlu0 %1552  ;;  %5095 = vmatmul.mubr.msk.f32.gmra.mrb[68].mxu0 %vm359_vm4, %v319_v15  ;;  %v334_v15 = vld [vmem:[%s6034_s14 + $0x2a0] sm:$0xff] }
  0x9f   : > { %8402 = vst [vmem:[#allocation12_spill] sm:$0xff] %v6365_v19  ;;  %8403 = vst [vmem:[#allocation13_spill] sm:$0xff] %v6367_v22  ;;  %5097 = vmatprep.mubr.msk.f32.mxu0 %vm359_vm4, %v320_v18 }
  0xa1   : > { %1920 = vperm.xlu1 %5416, %v6170_v44   ;;  %1932 = vperm.xlu0 %5417, %v6202_v52  }
  0xa2   : > { %v6375_v27 = vpop.permute.xlu1 %1567  ;;  %v6377_v30 = vpop.permute.xlu0 %1562  ;;  %5098 = vmatmul.mubr.msk.f32.gmra.mrb[70].mxu0 %vm359_vm4, %v321_v23 }
  0xa3   : > { %8404 = vst [vmem:[#allocation14_spill] sm:$0xff] %v6375_v27  ;;  %8405 = vst [vmem:[#allocation15_spill] sm:$0xff] %v6377_v30  ;;  %5100 = vmatprep.mubr.msk.f32.mxu0 %vm359_vm4, %v322_v26  ;;  %v335_v26 = vld [vmem:[%s6034_s14 + $0x2a8] sm:$0xff] }
  0xa5   : > { %1928 = vperm.xlu1 %5416, %v6186_v48   ;;  %5419 = vset.pattern.permute.xlu0 %v5879_v35 }
  0xa6   : > { %v6384_v38 = vpop.permute.xlu1 %1577  ;;  %1990 = vperm.xlu0 %5419, %v5964_v8   ;;  %v6387_v39 = vpop.permute.xlu0 %1572  ;;  %5101 = vmatmul.mubr.msk.f32.gmra.mrb[72].mxu0 %vm359_vm4, %v323_v31  ;;  %v336_v31 = vld [vmem:[%s6034_s14 + $0x2b0] sm:$0xff] }
  0xa7   : > { %8406 = vst [vmem:[#allocation16_spill] sm:$0xff] %v6384_v38  ;;  %8407 = vst [vmem:[#allocation17_spill] sm:$0xff] %v6387_v39  ;;  %5103 = vmatprep.mubr.msk.f32.mxu0 %vm359_vm4, %v324_v34 }
  0xa9   : > { %5418 = vset.pattern.permute.xlu1 %v5879_v35 }
  0xaa   : > { %v6393_v46 = vpop.permute.xlu1 %1587  ;;  %1986 = vperm.xlu1 %5418, %v5942_v1   ;;  %2002 = vperm.xlu0 %5419, %v6044_v11   ;;  %v6397_v47 = vpop.permute.xlu0 %1582 }
  0xab   : > { %8408 = vst [vmem:[#allocation18_spill] sm:$0xff] %v6393_v46  ;;  %8409 = vst [vmem:[#allocation19_spill] sm:$0xff] %v6397_v47  ;;  %5104 = vmatmul.mubr.msk.f32.gmra.mrb[74].mxu0 %vm359_vm4, %v325_v42  ;;  %v337_v42 = vld [vmem:[%s6034_s14 + $0x2b8] sm:$0xff] }
  0xac   : > { %5106 = vmatprep.mubr.msk.f32.mxu0 %vm359_vm4, %v326_v43  ;;  %v338_v43 = vld [vmem:[%s6034_s14 + $0x2c0] sm:$0xff] }
  0xae   : > { %v6403_v53 = vpop.permute.xlu1 %1597  ;;  %1994 = vperm.xlu1 %5418, %v5937_v0   ;;  %2010 = vperm.xlu0 %5419, %v6063_v17   ;;  %v6407_v54 = vpop.permute.xlu0 %1592 }
  0xaf   : > { %8410 = vst [vmem:[#allocation20_spill] sm:$0xff] %v6403_v53  ;;  %8411 = vst [vmem:[#allocation21_spill] sm:$0xff] %v6407_v54  ;;  %5107 = vmatmul.mubr.msk.f32.gmra.mrb[76].mxu0 %vm359_vm4, %v327_v50 }
  0xb0   : > { %5109 = vmatprep.mubr.msk.f32.mxu0 %vm359_vm4, %v328_v51 }
  0xb2   : > { %v6413_v57 = vpop.permute.xlu1 %1607  ;;  %1998 = vperm.xlu1 %5418, %v5959_v7   ;;  %2018 = vperm.xlu0 %5419, %v6079_v21   ;;  %v6417_v60 = vpop.permute.xlu0 %1602 }
  0xb3   : > { %8412 = vst [vmem:[#allocation22_spill] sm:$0xff] %v6413_v57  ;;  %8413 = vst [vmem:[#allocation23_spill] sm:$0xff] %v6417_v60  ;;  %5110 = vmatmul.mubr.msk.f32.gmra.mrb[78].mxu0 %vm359_vm4, %v329_v55  ;;  %v339_v55 = vld [vmem:[%s6034_s14 + $0x2c8] sm:$0xff] }
  0xb4   : > { %5112 = vmatprep.mubr.msk.f32.mxu0 %vm359_vm4, %v330_v56  ;;  %v340_v56 = vld [vmem:[%s6034_s14 + $0x2d0] sm:$0xff] }
  0xb6   : > { %v6423_v3 = vpop.permute.xlu1 %1617  ;;  %2006 = vperm.xlu1 %5418, %v6039_v10   ;;  %2026 = vperm.xlu0 %5419, %v6095_v25   ;;  %v6427_v6 = vpop.permute.xlu0 %1612 }
  0xb7   : > { %8414 = vst [vmem:[#allocation24_spill] sm:$0xff] %v6423_v3  ;;  %8415 = vst [vmem:[#allocation25_spill] sm:$0xff] %v6427_v6  ;;  %5113 = vmatmul.mubr.msk.f32.gmra.mrb[80].mxu0 %vm359_vm4, %v331_v61 }
  0xb8   : > { %5115 = vmatprep.mubr.msk.f32.mxu0 %vm359_vm4, %v332_v2 }
  0xba   : > { %v6433_v18 = vpop.permute.xlu1 %1627  ;;  %2014 = vperm.xlu1 %5418, %v6058_v16   ;;  %2034 = vperm.xlu0 %5419, %v6111_v29   ;;  %v6437_v23 = vpop.permute.xlu0 %1622 }
  0xbb   : > { %8416 = vst [vmem:[#allocation26_spill] sm:$0xff] %v6433_v18  ;;  %8417 = vst [vmem:[#allocation27_spill] sm:$0xff] %v6437_v23  ;;  %5116 = vmatmul.mubr.msk.f32.gmra.mrb[82].mxu0 %vm359_vm4, %v333_v12  ;;  %v341_v12 = vld [vmem:[%s6034_s14 + $0x2d8] sm:$0xff] }
  0xbc   : > { %5118 = vmatprep.mubr.msk.f32.mxu0 %vm359_vm4, %v334_v15  ;;  %v342_v15 = vld [vmem:[%s6034_s14 + $0x2e0] sm:$0xff] }
  0xbe   : > { %2022 = vperm.xlu1 %5418, %v6074_v20   ;;  %2042 = vperm.xlu0 %5419, %v6127_v33   ;;  %v6445_v34 = vpop.permute.xlu0 %1632 }
  0xbf   : > { %8418 = vst [vmem:[#allocation28_spill] sm:$0xff] %v6445_v34  ;;  %5119 = vmatmul.mubr.msk.f32.gmra.mrb[84].mxu0 %vm359_vm4, %v335_v26  ;;  %v6448_v35 = vpop.permute.xlu1 %1686 }
  0xc0   : > { %8419 = vst [vmem:[#allocation29_spill] sm:$0xff] %v6448_v35  ;;  %5121 = vmatprep.mubr.msk.f32.mxu0 %vm359_vm4, %v336_v31 }
  0xc2   : > { %2030 = vperm.xlu1 %5418, %v6090_v24   ;;  %2050 = vperm.xlu0 %5419, %v6143_v37  }
  0xc3   : > { %5122 = vmatmul.mubr.msk.f32.gmra.mrb[86].mxu0 %vm359_vm4, %v337_v42  ;;  %v6456_v50 = vpop.permute.xlu1 %1694  ;;  %v6458_v51 = vpop.permute.xlu0 %1690  ;;  %v343_v42 = vld [vmem:[%s6034_s14 + $0x2e8] sm:$0xff] }
  0xc4   : > { %8420 = vst [vmem:[#allocation30_spill] sm:$0xff] %v6456_v50  ;;  %8421 = vst [vmem:[#allocation31_spill] sm:$0xff] %v6458_v51  ;;  %5124 = vmatprep.mubr.msk.f32.mxu0 %vm359_vm4, %v338_v43  ;;  %v344_v43 = vld [vmem:[%s6034_s14 + $0x2f0] sm:$0xff] }
  0xc6   : > { %2038 = vperm.xlu1 %5418, %v6106_v28   ;;  %2058 = vperm.xlu0 %5419, %v6159_v41  }
  0xc7   : > { %5125 = vmatmul.mubr.msk.f32.gmra.mrb[88].mxu0 %vm359_vm4, %v339_v55  ;;  %v6466_v61 = vpop.permute.xlu1 %1698  ;;  %v6468_v2 = vpop.permute.xlu0 %1702 }
  0xc8   : > { %8422 = vst [vmem:[#allocation32_spill] sm:$0xff] %v6466_v61  ;;  %8423 = vst [vmem:[#allocation33_spill] sm:$0xff] %v6468_v2  ;;  %5127 = vmatprep.mubr.msk.f32.mxu0 %vm359_vm4, %v340_v56 }
  0xca   : > { %2046 = vperm.xlu1 %5418, %v6122_v32   ;;  %2066 = vperm.xlu0 %5419, %v6175_v45  }
  0xcb   : > { %5128 = vmatmul.mubr.msk.f32.gmra.mrb[90].mxu0 %vm359_vm4, %v341_v12  ;;  %v6476_v26 = vpop.permute.xlu1 %1706  ;;  %v6478_v31 = vpop.permute.xlu0 %1710  ;;  %v345_v12 = vld [vmem:[%s6034_s14 + $0x2f8] sm:$0xff] }
  0xcc   : > { %8424 = vst [vmem:[#allocation34_spill] sm:$0xff] %v6476_v26  ;;  %8425 = vst [vmem:[#allocation35_spill] sm:$0xff] %v6478_v31  ;;  %5130 = vmatprep.mubr.msk.f32.mxu0 %vm359_vm4, %v342_v15 }
  0xce   : > { %2054 = vperm.xlu1 %5418, %v6138_v36   ;;  %2074 = vperm.xlu0 %5419, %v6191_v49  }
  0xcf   : > { %5131 = vmatmul.mubr.msk.f32.gmra.mrb[92].mxu0 %vm359_vm4, %v343_v42  ;;  %v6486_v55 = vpop.permute.xlu1 %1714  ;;  %v6488_v56 = vpop.permute.xlu0 %1718  ;;  %v347_v42 = vld [vmem:[%s6034_s14 + $0x308] sm:$0xff] }
  0xd0   : > { %8426 = vst [vmem:[#allocation36_spill] sm:$0xff] %v6486_v55  ;;  %5133 = vmatprep.mubr.msk.f32.mxu0 %vm359_vm4, %v344_v43  ;;  %v5880_v43 = vmov 4  }
  0xd2   : > { %2062 = vperm.xlu1 %5418, %v6154_v40   ;;  %2082 = vperm.xlu0 %5419, %v6202_v52  }
  0xd3   : > { %5134 = vmatmul.mubr.msk.f32.gmra.mrb[94].mxu0 %vm359_vm4, %v345_v12  ;;  %v6496_v15 = vpop.permute.xlu1 %1722  ;;  %v6498_v14 = vpop.permute.xlu0 %1726  ;;  %v349_v12 = vld [vmem:[%s6034_s14 + $0x318] sm:$0xff]  ;;  %s8240_s14 = scalar_lea.vmem %s8379_s6, %s5386_s11 }
  0xd4   : > { %8427 = vst [vmem:[#allocation37_spill] sm:$0xff] %v6496_v15  ;;  %8428 = vst [vmem:[#allocation38_spill] sm:$0xff] %v6498_v14  ;;  %5136 = vmatprep.mubr.msk.f32.mxu0 %vm359_vm4, %v346_v9 }
  0xd6   : > { %2070 = vperm.xlu1 %5418, %v6170_v44   ;;  %5421 = vset.pattern.permute.xlu0 %v5880_v43 }
  0xd7   : > { %5137 = vmatmul.mubr.msk.f32.gmra.mrb[96].mxu0 %vm359_vm4, %v347_v42  ;;  %v6505_v5 = vpop.permute.xlu1 %1730  ;;  %2140 = vperm.xlu0 %5421, %v5964_v8   ;;  %v6508_v62 = vpop.permute.xlu0 %1734 }
  0xd8   : > { %8429 = vst [vmem:[#allocation39_spill] sm:$0xff] %v6505_v5  ;;  %8430 = vst [vmem:[#allocation40_spill] sm:$0xff] %v6508_v62  ;;  %5139 = vmatprep.mubr.msk.f32.mxu0 %vm359_vm4, %v348_v4 }
  0xda   : > { %2078 = vperm.xlu1 %5418, %v6186_v48  }
  0xdb   : > { %5140 = vmatmul.mubr.msk.f32.gmra.mrb[98].mxu0 %vm359_vm4, %v349_v12  ;;  %v6514_v9 = vpop.permute.xlu1 %1738  ;;  %2152 = vperm.xlu0 %5421, %v6044_v11   ;;  %v6517_v58 = vpop.permute.xlu0 %1742 }
  0xdc   : > { %8431 = vst [vmem:[#allocation41_spill] sm:$0xff] %v6514_v9  ;;  %8432 = vst [vmem:[#allocation42_spill] sm:$0xff] %v6517_v58  ;;  %v6867_v58 = vld [vmem:[%s8374_s1 + $0xb8] sm:$0xff] }
  0xdd   : > { %8484 = vst [vmem:[#allocation93_spill] sm:$0xff] %v6867_v58 }
  0xde   : > { %5420 = vset.pattern.permute.xlu1 %v5880_v43 }
  0xdf   : > { %2136 = vperm.xlu1 %5420, %v5942_v1   ;;  %v6520_v42 = vpop.permute.xlu1 %1746  ;;  %2160 = vperm.xlu0 %5421, %v6063_v17   ;;  %v6523_v63 = vpop.permute.xlu0 %1750 }
  0xe0   : > { %8433 = vst [vmem:[#allocation43_spill] sm:$0xff] %v6520_v42  ;;  %8434 = vst [vmem:[#allocation44_spill] sm:$0xff] %v6523_v63 }
  0xe3   : > { %2144 = vperm.xlu1 %5420, %v5937_v0   ;;  %v6526_v4 = vpop.permute.xlu1 %1754  ;;  %2168 = vperm.xlu0 %5421, %v6079_v21   ;;  %v6529_v12 = vpop.permute.xlu0 %1758 }
  0xe4   : > { %8435 = vst [vmem:[#allocation45_spill] sm:$0xff] %v6526_v4  ;;  %8436 = vst [vmem:[#allocation46_spill] sm:$0xff] %v6529_v12 }
  0xe7   : > { %2148 = vperm.xlu1 %5420, %v5959_v7   ;;  %v6532_v59 = vpop.permute.xlu1 %1762  ;;  %2176 = vperm.xlu0 %5421, %v6095_v25   ;;  %v6535_v43 = vpop.permute.xlu0 %1766 }
  0xe8   : > { %8437 = vst [vmem:[#allocation47_spill] sm:$0xff] %v6532_v59  ;;  %8438 = vst [vmem:[#allocation48_spill] sm:$0xff] %v6535_v43 }
  0xe9   : > { %v6537_v34 = vpop.f32.mrb[0].mxu0 }
  0xea   : > { %v6542_v18 = vpop.f32.mrb[1].mxu0 }
  0xeb   : > { %2156 = vperm.xlu1 %5420, %v6039_v10   ;;  %v6540_v31 = vpop.permute.xlu1 %1770  ;;  %2184 = vperm.xlu0 %5421, %v6111_v29   ;;  %v6545_v26 = vpop.permute.xlu0 %1774 }
  0xec   : > { %8439 = vst [vmem:[#allocation49_spill] sm:$0xff] %v6540_v31  ;;  %8440 = vst [vmem:[#allocation50_spill] sm:$0xff] %v6545_v26 }
  0xed   : > { %v6547_v23 = vpop.f32.mrb[2].mxu0 }
  0xee   : > { %v6552_v3 = vpop.f32.mrb[3].mxu0 }
  0xef   : > { %2164 = vperm.xlu1 %5420, %v6058_v16   ;;  %v6550_v2 = vpop.permute.xlu1 %1778  ;;  %2192 = vperm.xlu0 %5421, %v6127_v33   ;;  %v6555_v61 = vpop.permute.xlu0 %1782 }
  0xf0   : > { %8441 = vst [vmem:[#allocation51_spill] sm:$0xff] %v6550_v2  ;;  %8442 = vst [vmem:[#allocation52_spill] sm:$0xff] %v6555_v61 }
  0xf1   : > { %v6557_v6 = vpop.f32.mrb[4].mxu0 }
  0xf2   : > { %v6560_v57 = vpop.f32.mrb[5].mxu0 }
  0xf3   : > { %2172 = vperm.xlu1 %5420, %v6074_v20   ;;  %2200 = vperm.xlu0 %5421, %v6143_v37  }
  0xf4   : > { %v6563_v50 = vpop.permute.xlu1 %1836  ;;  %v6565_v60 = vpop.permute.xlu0 %1840 }
  0xf5   : > { %8443 = vst [vmem:[#allocation53_spill] sm:$0xff] %v6563_v50  ;;  %8444 = vst [vmem:[#allocation54_spill] sm:$0xff] %v6565_v60  ;;  %v6567_v51 = vpop.f32.mrb[6].mxu0 }
  0xf6   : > { %v6570_v53 = vpop.f32.mrb[7].mxu0 }
  0xf7   : > { %2180 = vperm.xlu1 %5420, %v6090_v24   ;;  %2208 = vperm.xlu0 %5421, %v6159_v41  }
  0xf8   : > { %v6573_v35 = vpop.permute.xlu1 %1844  ;;  %v6575_v54 = vpop.permute.xlu0 %1852 }
  0xf9   : > { %8445 = vst [vmem:[#allocation55_spill] sm:$0xff] %v6573_v35  ;;  %8446 = vst [vmem:[#allocation56_spill] sm:$0xff] %v6575_v54  ;;  %v6577_v46 = vpop.f32.mrb[8].mxu0 }
  0xfa   : > { %v6580_v47 = vpop.f32.mrb[9].mxu0 }
  0xfb   : > { %2188 = vperm.xlu1 %5420, %v6106_v28   ;;  %2216 = vperm.xlu0 %5421, %v6175_v45  }
  0xfc   : > { %v6583_v60 = vpop.permute.xlu1 %1848  ;;  %v6585_v50 = vpop.permute.xlu0 %1860 }
  0xfd   : > { %8447 = vst [vmem:[#allocation57_spill] sm:$0xff] %v6583_v60  ;;  %8448 = vst [vmem:[#allocation58_spill] sm:$0xff] %v6585_v50  ;;  %v6587_v38 = vpop.f32.mrb[10].mxu0 }
  0xfe   : > { %v6590_v39 = vpop.f32.mrb[11].mxu0 }
  0xff   : > { %2196 = vperm.xlu1 %5420, %v6122_v32   ;;  %2224 = vperm.xlu0 %5421, %v6191_v49  }
 0x100   : > { %v6593_v54 = vpop.permute.xlu1 %1856  ;;  %v6595_v35 = vpop.permute.xlu0 %1868 }
 0x101   : > { %8449 = vst [vmem:[#allocation59_spill] sm:$0xff] %v6593_v54  ;;  %8450 = vst [vmem:[#allocation60_spill] sm:$0xff] %v6595_v35  ;;  %v6597_v27 = vpop.f32.mrb[12].mxu0  ;;  %v5881_v54 = vmov 5  }
 0x102   : > { %v6600_v30 = vpop.f32.mrb[13].mxu0 }
 0x103   : > { %2204 = vperm.xlu1 %5420, %v6138_v36   ;;  %2232 = vperm.xlu0 %5421, %v6202_v52  }
 0x104   : > { %v6603_v50 = vpop.permute.xlu1 %1864  ;;  %v6605_v60 = vpop.permute.xlu0 %1876 }
 0x105   : > { %8451 = vst [vmem:[#allocation61_spill] sm:$0xff] %v6603_v50  ;;  %8452 = vst [vmem:[#allocation62_spill] sm:$0xff] %v6605_v60  ;;  %v6607_v32 = vpop.f32.mrb[14].mxu0 }
 0x106   : > { %v6610_v19 = vpop.f32.mrb[15].mxu0 }
 0x107   : > { %2212 = vperm.xlu1 %5420, %v6154_v40   ;;  %5423 = vset.pattern.permute.xlu0 %v5881_v54 }
 0x108   : > { %v6612_v22 = vpop.permute.xlu1 %1872  ;;  %2290 = vperm.xlu0 %5423, %v5964_v8   ;;  %v6615_v36 = vpop.permute.xlu0 %1884 }
 0x109   : > { %8453 = vst [vmem:[#allocation63_spill] sm:$0xff] %v6612_v22  ;;  %8454 = vst [vmem:[#allocation64_spill] sm:$0xff] %v6615_v36  ;;  %v6617_v13 = vpop.f32.mrb[16].mxu0 }
 0x10a   : > { %v6620_v61 = vpop.f32.mrb[17].mxu0 }
 0x10b   : > { %2220 = vperm.xlu1 %5420, %v6170_v44  }
 0x10c   : > { %v6622_v2 = vpop.permute.xlu1 %1880  ;;  %2302 = vperm.xlu0 %5423, %v6044_v11   ;;  %v6625_v40 = vpop.permute.xlu0 %1892  ;;  %v6644_v11 = vld [vmem:[%s8376_s3] ss:$0 sm:$0xff] }
 0x10d   : > { %8455 = vst [vmem:[#allocation65_spill] sm:$0xff] %v6622_v2  ;;  %8456 = vst [vmem:[#allocation66_spill] sm:$0xff] %v6625_v40  ;;  %v6627_v31 = vpop.f32.mrb[18].mxu0  ;;  %v5833_v2 = vld [vmem:[%s8374_s1 + $0x50] sm:$0xff] }
 0x10e   : > { %v6630_v26 = vpop.f32.mrb[19].mxu0 }
 0x10f   : > { %2228 = vperm.xlu1 %5420, %v6186_v48  }
 0x110   : > { %v6632_v8 = vpop.permute.xlu1 %1888  ;;  %2310 = vperm.xlu0 %5423, %v6063_v17   ;;  %v6635_v59 = vpop.permute.xlu0 %1900 }
 0x111   : > { %8457 = vst [vmem:[#allocation67_spill] sm:$0xff] %v6632_v8  ;;  %8458 = vst [vmem:[#allocation68_spill] sm:$0xff] %v6635_v59  ;;  %v6637_v44 = vpop.f32.mrb[20].mxu0 }
 0x112   : > { %v6639_v43 = vpop.f32.mrb[21].mxu0 }
 0x113   : > { %5422 = vset.pattern.permute.xlu1 %v5881_v54  ;;  %v731_v54 = vadd.f32 %v6644_v11, %v6542_v18  ;;  %v736_v18 = vadd.f32 %v6537_v34, %v6644_v11 }
 0x114   : > { %2286 = vperm.xlu1 %5422, %v5942_v1   ;;  %v6647_v48 = vpop.permute.xlu1 %1896  ;;  %2318 = vperm.xlu0 %5423, %v6079_v21   ;;  %v6650_v4 = vpop.permute.xlu0 %1908  ;;  %v741_v21 = vadd.f32 %v6644_v11, %v6552_v3  ;;  %v751_v3 = vadd.f32 %v6644_v11, %v6560_v57 }
 0x115   : > { %8459 = vst [vmem:[#allocation69_spill] sm:$0xff] %v6647_v48  ;;  %8460 = vst [vmem:[#allocation70_spill] sm:$0xff] %v6650_v4  ;;  %v6652_v17 = vpop.f32.mrb[22].mxu0  ;;  %v1229_v40 = vmax.f32 %v731_v54, 0.0  ;;  %v1230_v34 = vmax.f32 %v736_v18, 0.0  ;;  %v761_v18 = vadd.f32 %v6644_v11, %v6570_v53 }
 0x116   : > { %v6656_v59 = vpop.f32.mrb[23].mxu0 }
 0x118   : > { %2294 = vperm.xlu1 %5422, %v5937_v0   ;;  %v6659_v12 = vpop.permute.xlu1 %1904  ;;  %2326 = vperm.xlu0 %5423, %v6095_v25   ;;  %v6662_v1 = vpop.permute.xlu0 %1916 }
 0x119   : > { %8461 = vst [vmem:[#allocation71_spill] sm:$0xff] %v6659_v12  ;;  %8462 = vst [vmem:[#allocation72_spill] sm:$0xff] %v6662_v1  ;;  %v5030_v42 = vpop.f32.mrb[24].mxu0  ;;  %v1231_v12 = vmax.f32 %v741_v21, 0.0 }
 0x11a   : > { %v856_v4 = vadd.f32 %v5030_v42, %v6644_v11  ;;  %v6667_v63 = vpop.f32.mrb[25].mxu0 }
 0x11c   : > { %2298 = vperm.xlu1 %5422, %v5959_v7   ;;  %v6672_v0 = vpop.permute.xlu1 %1912  ;;  %2334 = vperm.xlu0 %5423, %v6111_v29   ;;  %v6675_v25 = vpop.permute.xlu0 %1924  ;;  %v1254_v1 = vmax.f32 %v856_v4, 0.0  ;;  %v746_v7 = vadd.f32 %v6547_v23, %v6644_v11 }
 0x11d   : > { %8463 = vst [vmem:[#allocation73_spill] sm:$0xff] %v6672_v0  ;;  %8464 = vst [vmem:[#allocation74_spill] sm:$0xff] %v6675_v25  ;;  %v5033_v54 = vpop.f32.mrb[26].mxu0  ;;  %v1233_v25 = vmax.f32 %v751_v3, 0.0 }
 0x11e   : > { %v6679_v42 = vmax.f32 %v1229_v40, %v1254_v1  ;;  %v866_v48 = vadd.f32 %v5033_v54, %v6644_v11  ;;  %v860_v9 = vpop.f32.mrb[27].mxu0  ;;  %v1232_v0 = vmax.f32 %v746_v7, 0.0  ;;  %v771_v7 = vadd.f32 %v6644_v11, %v6580_v47 }
 0x11f   : > { %v861_v4 = vadd.f32 %v6644_v11, %v860_v9  ;;  %v756_v9 = vadd.f32 %v6557_v6, %v6644_v11 }
 0x120   : > { %2306 = vperm.xlu1 %5422, %v6039_v10   ;;  %v6685_v29 = vpop.permute.xlu1 %1920  ;;  %2342 = vperm.xlu0 %5423, %v6127_v33   ;;  %v6689_v21 = vpop.permute.xlu0 %1932  ;;  %v1256_v57 = vmax.f32 %v866_v48, 0.0 }
 0x121   : > { %8465 = vst [vmem:[#allocation75_spill] sm:$0xff] %v6685_v29  ;;  %8466 = vst [vmem:[#allocation76_spill] sm:$0xff] %v6689_v21  ;;  %v1255_v40 = vmax.f32 %v861_v4, 0.0  ;;  %v5036_v1 = vpop.f32.mrb[28].mxu0  ;;  %v6841_v29 = vld [vmem:[%s8374_s1 + $0xa8] sm:$0xff] }
 0x122   : > { %v6693_v54 = vmax.f32 %v1231_v12, %v1256_v57  ;;  %v876_v23 = vadd.f32 %v5036_v1, %v6644_v11  ;;  %v870_v10 = vpop.f32.mrb[29].mxu0  ;;  %v1235_v1 = vmax.f32 %v761_v18, 0.0 }
 0x123   : > { %v6701_v48 = vmax.f32 %v1230_v34, %v1255_v40  ;;  %v871_v3 = vadd.f32 %v6644_v11, %v870_v10  ;;  %v1234_v34 = vmax.f32 %v756_v9, 0.0  ;;  %v766_v40 = vadd.f32 %v6567_v51, %v6644_v11 }
 0x124   : > { %2314 = vperm.xlu1 %5422, %v6058_v16   ;;  %v6699_v33 = vpop.permute.xlu1 %1928  ;;  %2350 = vperm.xlu0 %5423, %v6143_v37   ;;  %v1258_v53 = vmax.f32 %v876_v23, 0.0  ;;  %v781_v9 = vadd.f32 %v6644_v11, %v6590_v39 }
 0x125   : > { %8467 = vst [vmem:[#allocation77_spill] sm:$0xff] %v6699_v33  ;;  %v6705_v12 = vpop.permute.xlu0 %1990  ;;  %v1257_v4 = vmax.f32 %v871_v3, 0.0  ;;  %v5039_v57 = vpop.f32.mrb[30].mxu0  ;;  %v826_v33 = vadd.f32 %v6627_v31, %v6644_v11 }
 0x126   : > { %8468 = vst [vmem:[#allocation78_spill] sm:$0xff] %v6705_v12  ;;  %v6709_v6 = vmax.f32 %v1233_v25, %v1258_v53  ;;  %v886_v16 = vadd.f32 %v5039_v57, %v6644_v11  ;;  %v880_v21 = vpop.f32.mrb[31].mxu0  ;;  %v1237_v53 = vmax.f32 %v771_v7, 0.0 }
 0x127   : > { %v6715_v37 = vmax.f32 %v1232_v0, %v1257_v4  ;;  %v881_v23 = vadd.f32 %v6644_v11, %v880_v21  ;;  %v1236_v4 = vmax.f32 %v766_v40, 0.0  ;;  %v791_v40 = vadd.f32 %v6644_v11, %v6600_v30 }
 0x128   : > { %2322 = vperm.xlu1 %5422, %v6074_v20   ;;  %2358 = vperm.xlu0 %5423, %v6159_v41   ;;  %v1260_v47 = vmax.f32 %v886_v16, 0.0  ;;  %v776_v41 = vadd.f32 %v6577_v46, %v6644_v11 }
 0x129   : > { %v6719_v18 = vpop.permute.xlu1 %1986  ;;  %v6721_v25 = vpop.permute.xlu0 %2002  ;;  %v1259_v10 = vmax.f32 %v881_v23, 0.0 }
 0x12a   : > { %8469 = vst [vmem:[#allocation79_spill] sm:$0xff] %v6719_v18  ;;  %8470 = vst [vmem:[#allocation80_spill] sm:$0xff] %v6721_v25  ;;  %v5042_v3 = vpop.f32.mrb[32].mxu0  ;;  %v6725_v51 = vmax.f32 %v1235_v1, %v1260_v47  ;;  %v1239_v47 = vmax.f32 %v781_v9, 0.0 }
 0x12b   : > { %v896_v20 = vadd.f32 %v5042_v3, %v6644_v11  ;;  %v890_v0 = vpop.f32.mrb[33].mxu0  ;;  %v6731_v21 = vmax.f32 %v1234_v34, %v1259_v10  ;;  %v1238_v10 = vmax.f32 %v776_v41, 0.0 }
 0x12c   : > { %2330 = vperm.xlu1 %5422, %v6090_v24   ;;  %v891_v57 = vadd.f32 %v6644_v11, %v890_v0  ;;  %2366 = vperm.xlu0 %5423, %v6175_v45   ;;  %v786_v45 = vadd.f32 %v6587_v38, %v6644_v11 }
 0x12d   : > { %v6735_v7 = vpop.permute.xlu1 %1994  ;;  %v1262_v39 = vmax.f32 %v896_v20, 0.0  ;;  %v6737_v1 = vpop.permute.xlu0 %2010 }
 0x12e   : > { %8471 = vst [vmem:[#allocation81_spill] sm:$0xff] %v6735_v7  ;;  %8472 = vst [vmem:[#allocation82_spill] sm:$0xff] %v6737_v1  ;;  %v1261_v16 = vmax.f32 %v891_v57, 0.0  ;;  %v5045_v23 = vpop.f32.mrb[34].mxu0  ;;  %v6815_v7 = vld [vmem:[%s8374_s1 + $0x98] sm:$0xff] }
 0x12f   : > { %v6741_v46 = vmax.f32 %v1237_v53, %v1262_v39  ;;  %v906_v24 = vadd.f32 %v5045_v23, %v6644_v11  ;;  %v900_v34 = vpop.f32.mrb[35].mxu0  ;;  %v801_v53 = vadd.f32 %v6644_v11, %v6610_v19  ;;  %v1241_v39 = vmax.f32 %v791_v40, 0.0  ;;  %v6765_v23 = vld [vmem:[%s8374_s1 + $0x78] sm:$0xff] }
 0x130   : > { %2338 = vperm.xlu1 %5422, %v6106_v28   ;;  %v6747_v3 = vmax.f32 %v1236_v4, %v1261_v16  ;;  %v901_v20 = vadd.f32 %v6644_v11, %v900_v34  ;;  %2374 = vperm.xlu0 %5423, %v6191_v49   ;;  %v1240_v16 = vmax.f32 %v786_v45, 0.0  ;;  %v796_v49 = vadd.f32 %v6597_v27, %v6644_v11 }
 0x131   : > { %v6751_v9 = vpop.permute.xlu1 %1998  ;;  %v1264_v30 = vmax.f32 %v906_v24, 0.0  ;;  %v6755_v0 = vpop.permute.xlu0 %2018  ;;  %v1243_v34 = vmax.f32 %v801_v53, 0.0  ;;  %v6786_v53 = vld [vmem:[%s8374_s1 + $0x88] sm:$0xff] }
 0x132   : > { %8473 = vst [vmem:[#allocation83_spill] sm:$0xff] %v6751_v9  ;;  %8474 = vst [vmem:[#allocation84_spill] sm:$0xff] %v6755_v0  ;;  %v1263_v41 = vmax.f32 %v901_v20, 0.0  ;;  %v5048_v57 = vpop.f32.mrb[36].mxu0  ;;  %v816_v9 = vadd.f32 %v6617_v13, %v6644_v11 }
 0x133   : > { %v6757_v38 = vmax.f32 %v1239_v47, %v1264_v30  ;;  %v916_v28 = vadd.f32 %v5048_v57, %v6644_v11  ;;  %v910_v4 = vpop.f32.mrb[37].mxu0  ;;  %v811_v30 = vadd.f32 %v6644_v11, %v6620_v61 }
 0x134   : > { %2346 = vperm.xlu1 %5422, %v6765_v23   ;;  %v6768_v19 = vmax.f32 %v1238_v10, %v1263_v41  ;;  %v911_v40 = vadd.f32 %v6644_v11, %v910_v4  ;;  %2382 = vperm.xlu0 %5423, %v6202_v52   ;;  %v1242_v4 = vmax.f32 %v796_v49, 0.0  ;;  %v806_v52 = vadd.f32 %v6607_v32, %v6644_v11 }
 0x135   : > { %v6772_v47 = vpop.permute.xlu1 %2006  ;;  %v1266_v24 = vmax.f32 %v916_v28, 0.0  ;;  %v6774_v45 = vpop.permute.xlu0 %2026  ;;  %v1246_v18 = vmax.f32 %v816_v9, 0.0  ;;  %v6852_v9 = vld [vmem:[%s8374_s1 + $0x70] sm:$0xff] }
 0x136   : > { %8475 = vst [vmem:[#allocation85_spill] sm:$0xff] %v6772_v47  ;;  %8476 = vst [vmem:[#allocation86_spill] sm:$0xff] %v6774_v45  ;;  %v1265_v27 = vmax.f32 %v911_v40, 0.0  ;;  %v5051_v20 = vpop.f32.mrb[38].mxu0  ;;  %v8382_v40 = vmov 7   ;;  %v821_v47 = vadd.f32 %v6644_v11, %v6630_v26  ;;  %v1244_v1 = vmax.f32 %v806_v52, 0.0 }
 0x137   : > { %v6778_v57 = vmax.f32 %v1241_v39, %v1266_v24  ;;  %v926_v10 = vadd.f32 %v5051_v20, %v6644_v11  ;;  %v920_v41 = vpop.f32.mrb[39].mxu0  ;;  %v8477_v39 = vmov 0.0   ;;  %v6800_v24 = vld [vmem:[%s8374_s1 + $0x40] sm:$0xff]  ;;  %v6826_v52 = vld [vmem:[%s8374_s1 + $0x58] sm:$0xff] }
 0x138   : > { %2354 = vperm.xlu1 %5422, %v6786_v53   ;;  %v6789_v28 = vmax.f32 %v1240_v16, %v1265_v27  ;;  %v921_v61 = vadd.f32 %v6644_v11, %v920_v41  ;;  %1434 = vst.msk [vmem:[#allocation2 + $0xe0] sm:$0xf] %vm1433_vm5, %v8477_v39  ;;  %5426 = vset.pattern.permute.xlu0 %v8382_v40  ;;  %v1245_v41 = vmax.f32 %v811_v30, 0.0  ;;  %v1247_v12 = vmax.f32 %v821_v47, 0.0 }
 0x139   : > { %v6795_v49 = vpop.permute.xlu1 %2014  ;;  %v1268_v32 = vmax.f32 %v926_v10, 0.0  ;;  %2618 = vperm.xlu0 %5426, %v6800_v24   ;;  %v6803_v16 = vpop.permute.xlu0 %2034 }
 0x13a   : > { %8478 = vst [vmem:[#allocation87_spill] sm:$0xff] %v6795_v49  ;;  %8479 = vst [vmem:[#allocation88_spill] sm:$0xff] %v6803_v16  ;;  %v1267_v27 = vmax.f32 %v921_v61, 0.0  ;;  %v5054_v20 = vpop.f32.mrb[40].mxu0 }
 0x13b   : > { %v6807_v25 = vmax.f32 %v1243_v34, %v1268_v32  ;;  %v936_v40 = vadd.f32 %v5054_v20, %v6644_v11  ;;  %v930_v10 = vpop.f32.mrb[41].mxu0 }
 0x13c   : > { %2362 = vperm.xlu1 %5422, %v6815_v7   ;;  %v6818_v30 = vmax.f32 %v1242_v4, %v1267_v27  ;;  %v931_v26 = vadd.f32 %v6644_v11, %v930_v10  ;;  %v831_v4 = vadd.f32 %v6644_v11, %v6639_v43 }
 0x13d   : > { %v6821_v34 = vpop.permute.xlu1 %2022  ;;  %v1270_v61 = vmax.f32 %v936_v40, 0.0  ;;  %2630 = vperm.xlu0 %5426, %v6826_v52   ;;  %v6829_v13 = vpop.permute.xlu0 %2042 }
 0x13e   : > { %8480 = vst [vmem:[#allocation89_spill] sm:$0xff] %v6821_v34  ;;  %8481 = vst [vmem:[#allocation90_spill] sm:$0xff] %v6829_v13  ;;  %v1269_v32 = vmax.f32 %v931_v26, 0.0  ;;  %v5057_v20 = vpop.f32.mrb[42].mxu0  ;;  %v1249_v36 = vmax.f32 %v831_v4, 0.0  ;;  %v1248_v13 = vmax.f32 %v826_v33, 0.0 }
 0x13f   : > { %v6833_v27 = vmax.f32 %v1245_v41, %v1270_v61  ;;  %v946_v10 = vadd.f32 %v5057_v20, %v6644_v11  ;;  %v940_v40 = vpop.f32.mrb[43].mxu0 }
 0x140   : > { %2370 = vperm.xlu1 %5422, %v6841_v29   ;;  %v6844_v47 = vmax.f32 %v1244_v1, %v1269_v32  ;;  %v941_v43 = vadd.f32 %v6644_v11, %v940_v40  ;;  %v841_v1 = vadd.f32 %v6644_v11, %v6656_v59 }
 0x141   : > { %v6847_v41 = vpop.permute.xlu1 %2030  ;;  %v1272_v26 = vmax.f32 %v946_v10, 0.0  ;;  %2642 = vperm.xlu0 %5426, %v6852_v9   ;;  %v6855_v31 = vpop.permute.xlu0 %2050 }
 0x142   : > { %8482 = vst [vmem:[#allocation91_spill] sm:$0xff] %v6847_v41  ;;  %8483 = vst [vmem:[#allocation92_spill] sm:$0xff] %v6855_v31  ;;  %v1271_v61 = vmax.f32 %v941_v43, 0.0  ;;  %v5060_v20 = vpop.f32.mrb[44].mxu0  ;;  %v836_v41 = vadd.f32 %v6637_v44, %v6644_v11  ;;  %v851_v31 = vadd.f32 %v6644_v11, %v6667_v63  ;;  %v5823_v63 = vld [vmem:[%s8374_s1] sm:$0xff] }
 0x143   : > { %v6859_v32 = vmax.f32 %v1247_v12, %v1272_v26  ;;  %v956_v40 = vadd.f32 %v5060_v20, %v6644_v11  ;;  %v950_v10 = vpop.f32.mrb[45].mxu0  ;;  %v1251_v20 = vmax.f32 %v841_v1, 0.0 }
 0x144   : > { %2378 = vperm.xlu1 %5422, %v6867_v58   ;;  %v6870_v4 = vmax.f32 %v1246_v18, %v1271_v61  ;;  %v951_v59 = vadd.f32 %v6644_v11, %v950_v10  ;;  %v1250_v5 = vmax.f32 %v836_v41, 0.0  ;;  %v846_v10 = vadd.f32 %v6652_v17, %v6644_v11  ;;  %v6897_v41 = vld [vmem:[%s8374_s1 + $0xa0] sm:$0xff] }
 0x145   : > { %v6873_v12 = vpop.permute.xlu1 %2038  ;;  %v1274_v43 = vmax.f32 %v956_v40, 0.0  ;;  %2654 = vperm.xlu0 %5426, %v6786_v53   ;;  %v6876_v33 = vpop.permute.xlu0 %2058  ;;  %v8384_v40 = vmov 6  }
 0x146   : > { %8485 = vst [vmem:[#allocation94_spill] sm:$0xff] %v6870_v4  ;;  %8486 = vst [vmem:[#allocation95_spill] sm:$0xff] %v6873_v12  ;;  %v1273_v26 = vmax.f32 %v951_v59, 0.0  ;;  %v5063_v44 = vpop.f32.mrb[46].mxu0 }
 0x147   : > { %8487 = vst [vmem:[#allocation96_spill] sm:$0xff] %v6876_v33  ;;  %v6880_v8 = vmax.f32 %v1249_v36, %v1274_v43  ;;  %v966_v18 = vadd.f32 %v5063_v44, %v6644_v11  ;;  %v960_v61 = vpop.f32.mrb[47].mxu0 }
 0x148   : > { %5424 = vset.pattern.permute.xlu1 %v8384_v40  ;;  %v6886_v12 = vmax.f32 %v1248_v13, %v1273_v26  ;;  %v961_v59 = vadd.f32 %v6644_v11, %v960_v61  ;;  %v1253_v26 = vmax.f32 %v851_v31, 0.0  ;;  %v1252_v40 = vmax.f32 %v846_v10, 0.0 }
 0x149   : > { %8488 = vst [vmem:[#allocation97_spill] sm:$0xff] %v6880_v8  ;;  %2436 = vperm.xlu1 %5424, %v5823_v63   ;;  %v6892_v36 = vpop.permute.xlu1 %2046  ;;  %v1276_v1 = vmax.f32 %v966_v18, 0.0  ;;  %2666 = vperm.xlu0 %5426, %v6897_v41   ;;  %v6900_v17 = vpop.permute.xlu0 %2066 }
 0x14a   : > { %8489 = vst [vmem:[#allocation98_spill] sm:$0xff] %v6886_v12  ;;  %8490 = vst [vmem:[#allocation99_spill] sm:$0xff] %v6892_v36  ;;  %v1275_v13 = vmax.f32 %v961_v59, 0.0  ;;  %v5066_v43 = vpop.f32.mrb[48].mxu0  ;;  %v5825_v36 = vld [vmem:[%s8374_s1 + $0x10] sm:$0xff] }
 0x14b   : > { %8491 = vst [vmem:[#allocation100_spill] sm:$0xff] %v6900_v17  ;;  %v6902_v44 = vmax.f32 %v1251_v20, %v1276_v1  ;;  %v976_v61 = vadd.f32 %v5066_v43, %v6644_v11  ;;  %v970_v63 = vpop.f32.mrb[49].mxu0 }
 0x14c   : > { %v6905_v33 = vmax.f32 %v1250_v5, %v1275_v13  ;;  %v971_v18 = vadd.f32 %v6644_v11, %v970_v63 }
 0x14d   : > { %8492 = vst [vmem:[#allocation101_spill] sm:$0xff] %v6902_v44  ;;  %2444 = vperm.xlu1 %5424, %v5825_v36   ;;  %v6911_v16 = vpop.permute.xlu1 %2054  ;;  %v1278_v59 = vmax.f32 %v976_v61, 0.0  ;;  %2678 = vperm.xlu0 %5426, %v6867_v58   ;;  %v6914_v31 = vpop.permute.xlu0 %2074  ;;  %v5826_v36 = vld [vmem:[%s8374_s1 + $0x18] sm:$0xff]  ;;  %v8499_v61 = vmov 6  }
 0x14e   : > { %8493 = vst [vmem:[#allocation102_spill] sm:$0xff] %v6905_v33  ;;  %8494 = vst [vmem:[#allocation103_spill] sm:$0xff] %v6911_v16  ;;  %v1277_v20 = vmax.f32 %v971_v18, 0.0  ;;  %v6916_v1 = vpop.f32.mrb[50].mxu0 }
 0x14f   : > { %8495 = vst [vmem:[#allocation104_spill] sm:$0xff] %v6914_v31  ;;  %v6918_v10 = vmax.f32 %v1253_v26, %v1278_v59  ;;  %v6920_v5 = vpop.f32.mrb[51].mxu0  ;;  %v5827_v26 = vld [vmem:[%s8374_s1 + $0x8] sm:$0xff] }
 0x150   : > { %v6922_v13 = vmax.f32 %v1252_v40, %v1277_v20  ;;  %v5828_v59 = vld [vmem:[%s8374_s1 + $0x28] sm:$0xff] }
 0x151   : > { %8496 = vst [vmem:[#allocation105_spill] sm:$0xff] %v6918_v10  ;;  %2448 = vperm.xlu1 %5424, %v5826_v36   ;;  %v6927_v43 = vpop.permute.xlu1 %2062  ;;  %5434 = vset.pattern.permute.xlu0 %v8499_v61  ;;  %v6930_v63 = vpop.permute.xlu0 %2082  ;;  %v7061_v10 = vld [vmem:[%s8374_s1 + $0xc0] sm:$0xf] }
 0x152   : > { %8497 = vst [vmem:[#allocation106_spill] sm:$0xff] %v6922_v13  ;;  %8498 = vst [vmem:[#allocation107_spill] sm:$0xff] %v6927_v43  ;;  %v6932_v18 = vpop.f32.mrb[52].mxu0  ;;  %2440 = vperm.xlu0 %5434, %v5827_v26   ;;  %v5830_v26 = vld [vmem:[%s8374_s1 + $0x38] sm:$0xff] }
 0x153   : > { %8500 = vst [vmem:[#allocation108_spill] sm:$0xff] %v6930_v63  ;;  %v6937_v40 = vpop.f32.mrb[53].mxu0  ;;  %v5829_v63 = vld [vmem:[%s8374_s1 + $0x20] sm:$0xff]  ;;  %8523 = vst [vmem:[#allocation130_spill] sm:$0xff] %v7061_v10 }
 0x155   : > { %2456 = vperm.xlu1 %5424, %v5828_v59   ;;  %v6942_v20 = vpop.permute.xlu1 %2070  ;;  %v6944_v36 = vpop.f32.mrb[54].mxu0 }
 0x156   : > { %8501 = vst [vmem:[#allocation109_spill] sm:$0xff] %v6942_v20  ;;  %2452 = vperm.xlu0 %5434, %v5829_v63   ;;  %v6949_v31 = vpop.permute.xlu0 %2140  ;;  %v6951_v43 = vpop.f32.mrb[55].mxu0  ;;  %v5831_v20 = vld [vmem:[%s8374_s1 + $0x30] sm:$0xff] }
 0x157   : > { %8502 = vst [vmem:[#allocation110_spill] sm:$0xff] %v6949_v31  ;;  %v5832_v31 = vld [vmem:[%s8374_s1 + $0x48] sm:$0xff] }
 0x159   : > { %2464 = vperm.xlu1 %5424, %v5830_v26   ;;  %v6956_v17 = vpop.permute.xlu1 %2078  ;;  %v6958_v59 = vpop.f32.mrb[56].mxu0 }
 0x15a   : > { %8503 = vst [vmem:[#allocation111_spill] sm:$0xff] %v6956_v17  ;;  %2460 = vperm.xlu0 %5434, %v5831_v20   ;;  %v6963_v16 = vpop.permute.xlu0 %2152  ;;  %v6965_v63 = vpop.f32.mrb[57].mxu0 }
 0x15b   : > { %8504 = vst [vmem:[#allocation112_spill] sm:$0xff] %v6963_v16 }
 0x15d   : > { %2472 = vperm.xlu1 %5424, %v5832_v31   ;;  %v6972_v34 = vpop.f32.mrb[58].mxu0 }
 0x15e   : > { %v6970_v60 = vpop.permute.xlu1 %2136  ;;  %2468 = vperm.xlu0 %5434, %v6800_v24   ;;  %v6975_v17 = vpop.permute.xlu0 %2160  ;;  %v8509_v24 = vmov 7  }
 0x15f   : > { %8505 = vst [vmem:[#allocation113_spill] sm:$0xff] %v6970_v60  ;;  %8506 = vst [vmem:[#allocation114_spill] sm:$0xff] %v6975_v17  ;;  %v6977_v62 = vpop.f32.mrb[59].mxu0 }
 0x161   : > { %2480 = vperm.xlu1 %5424, %v6826_v52   ;;  %v6982_v16 = vpop.f32.mrb[60].mxu0  ;;  %v5834_v52 = vld [vmem:[%s8374_s1 + $0x60] sm:$0xff] }
 0x162   : > { %v6980_v20 = vpop.permute.xlu1 %2144  ;;  %2476 = vperm.xlu0 %5434, %v5833_v2   ;;  %v6987_v60 = vpop.permute.xlu0 %2168 }
 0x163   : > { %8507 = vst [vmem:[#allocation115_spill] sm:$0xff] %v6980_v20  ;;  %8508 = vst [vmem:[#allocation116_spill] sm:$0xff] %v6987_v60  ;;  %v6989_v15 = vpop.f32.mrb[61].mxu0 }
 0x165   : > { %5425 = vset.pattern.permute.xlu1 %v8509_v24  ;;  %v6994_v45 = vpop.f32.mrb[62].mxu0 }
 0x166   : > { %2614 = vperm.xlu1 %5425, %v5830_v26   ;;  %v6992_v17 = vpop.permute.xlu1 %2148  ;;  %2484 = vperm.xlu0 %5434, %v5834_v52   ;;  %v6999_v20 = vpop.permute.xlu0 %2176  ;;  %v5835_v26 = vld [vmem:[%s8374_s1 + $0x68] sm:$0xff] }
 0x167   : > { %8510 = vst [vmem:[#allocation117_spill] sm:$0xff] %v6992_v17  ;;  %8511 = vst [vmem:[#allocation118_spill] sm:$0xff] %v6999_v20  ;;  %v7001_v35 = vpop.f32.mrb[63].mxu0 }
 0x169   : > { %v7005_v49 = vpop.f32.mrb[64].mxu0 }
 0x16a   : > { %2622 = vperm.xlu1 %5425, %v5832_v31   ;;  %v7003_v60 = vpop.permute.xlu1 %2156  ;;  %2488 = vperm.xlu0 %5434, %v5835_v26   ;;  %v7010_v17 = vpop.permute.xlu0 %2184  ;;  %v7021_v31 = vld [vmem:[%s8374_s1 + $0x80] sm:$0xff] }
 0x16b   : > { %8512 = vst [vmem:[#allocation119_spill] sm:$0xff] %v7003_v60  ;;  %8513 = vst [vmem:[#allocation120_spill] sm:$0xff] %v7010_v17  ;;  %v7012_v14 = vpop.f32.mrb[65].mxu0 }
 0x16d   : > { %v7016_v20 = vpop.f32.mrb[66].mxu0 }
 0x16e   : > { %2626 = vperm.xlu1 %5425, %v5833_v2   ;;  %v7014_v39 = vpop.permute.xlu1 %2164  ;;  %2500 = vperm.xlu0 %5434, %v7021_v31   ;;  %v7024_v60 = vpop.permute.xlu0 %2192 }
 0x16f   : > { %8514 = vst [vmem:[#allocation121_spill] sm:$0xff] %v7014_v39  ;;  %8515 = vst [vmem:[#allocation122_spill] sm:$0xff] %v7024_v60  ;;  %v7026_v22 = vpop.f32.mrb[67].mxu0  ;;  %v7044_v60 = vld [vmem:[%s8374_s1 + $0xb0] sm:$0xff] }
 0x170   : > { %8519 = vst [vmem:[#allocation126_spill] sm:$0xff] %v7044_v60 }
 0x171   : > { %v7030_v50 = vpop.f32.mrb[68].mxu0 }
 0x172   : > { %2634 = vperm.xlu1 %5425, %v5834_v52   ;;  %v7028_v17 = vpop.permute.xlu1 %2172  ;;  %2512 = vperm.xlu0 %5434, %v6815_v7   ;;  %v7033_v2 = vpop.permute.xlu0 %2200 }
 0x173   : > { %8516 = vst [vmem:[#allocation123_spill] sm:$0xff] %v7028_v17  ;;  %8517 = vst [vmem:[#allocation124_spill] sm:$0xff] %v7033_v2  ;;  %v7035_v39 = vpop.f32.mrb[69].mxu0 }
 0x175   : > { %v7039_v13 = vpop.f32.mrb[70].mxu0 }
 0x176   : > { %2638 = vperm.xlu1 %5425, %v5835_v26   ;;  %v7037_v0 = vpop.permute.xlu1 %2180  ;;  %2524 = vperm.xlu0 %5434, %v7044_v60   ;;  %v7047_v52 = vpop.permute.xlu0 %2208 }
 0x177   : > { %8518 = vst [vmem:[#allocation125_spill] sm:$0xff] %v7037_v0  ;;  %8520 = vst [vmem:[#allocation127_spill] sm:$0xff] %v7047_v52  ;;  %v7049_v17 = vpop.f32.mrb[71].mxu0  ;;  %v981_v0 = vadd.f32 %v6644_v11, %v6920_v5  ;;  %v991_v5 = vadd.f32 %v6644_v11, %v6937_v40 }
 0x179   : > { %v7054_v26 = vpop.f32.mrb[72].mxu0  ;;  %v1279_v55 = vmax.f32 %v981_v0, 0.0  ;;  %v1001_v0 = vadd.f32 %v6644_v11, %v6951_v43 }
 0x17a   : > { %5427 = vset.pattern.permute.xlu1 %v8499_v61  ;;  %v7052_v2 = vpop.permute.xlu1 %2188  ;;  %8522 = vst [vmem:[#allocation129_spill] sm:$0xff] %v7054_v26  ;;  %2532 = vperm.xlu0 %5434, %v7061_v10   ;;  %v7064_v58 = vpop.permute.xlu0 %2216 }
 0x17b   : > { %8521 = vst [vmem:[#allocation128_spill] sm:$0xff] %v7052_v2  ;;  %8524 = vst [vmem:[#allocation131_spill] sm:$0xff] %v7064_v58  ;;  %2492 = vperm.xlu1 %5427, %v6852_v9   ;;  %v7067_v52 = vpop.f32.mrb[73].mxu0  ;;  %v986_v9 = vadd.f32 %v6916_v1, %v6644_v11  ;;  %v996_v1 = vadd.f32 %v6932_v18, %v6644_v11 }
 0x17e   : > { %v5105_v33 = vpop.f32.mrb[74].mxu0  ;;  %v7069_v2 = vpop.permute.xlu1 %2196 }
 0x17f   : > { %8525 = vst [vmem:[#allocation132_spill] sm:$0xff] %v7069_v2  ;;  %v1106_v44 = vadd.f32 %v5105_v33, %v6644_v11  ;;  %v7074_v12 = vpop.permute.xlu0 %2224  ;;  %2496 = vperm.xlu1 %5427, %v6765_v23   ;;  %v7077_v10 = vpop.f32.mrb[75].mxu0  ;;  %v1281_v2 = vmax.f32 %v991_v5, 0.0 }
 0x180   : > { %8526 = vst [vmem:[#allocation133_spill] sm:$0xff] %v7074_v12  ;;  %8527 = vst [vmem:[#allocation134_spill] sm:$0xff] %v7077_v10  ;;  %v1280_v10 = vmax.f32 %v986_v9, 0.0 }
 0x181   : > { %v1304_v58 = vmax.f32 %v1106_v44, 0.0 }
 0x182   : > { %v5108_v60 = vpop.f32.mrb[76].mxu0  ;;  %v7081_v8 = vpop.permute.xlu1 %2204 }
 0x183   : > { %8528 = vst [vmem:[#allocation135_spill] sm:$0xff] %v7081_v8  ;;  %v1354_v40 = vmax.f32 %v1279_v55, %v1304_v58  ;;  %v1116_v33 = vadd.f32 %v5108_v60, %v6644_v11  ;;  %v7086_v26 = vpop.permute.xlu0 %2232  ;;  %v1110_v12 = vpop.f32.mrb[77].mxu0  ;;  %5428 = vset.pattern.permute.xlu1 %v8509_v24  ;;  %v1283_v60 = vmax.f32 %v1001_v0, 0.0 }
 0x184   : > { %8529 = vst [vmem:[#allocation136_spill] sm:$0xff] %v7086_v26  ;;  %v1111_v44 = vadd.f32 %v6644_v11, %v1110_v12  ;;  %2646 = vperm.xlu1 %5428, %v6765_v23   ;;  %v1011_v26 = vadd.f32 %v6644_v11, %v6965_v63  ;;  %v1282_v12 = vmax.f32 %v996_v1, 0.0  ;;  %v1006_v23 = vadd.f32 %v6944_v36, %v6644_v11 }
 0x185   : > { %v1379_v5 = vmax.f32 %v6679_v42, %v1354_v40  ;;  %v1306_v8 = vmax.f32 %v1116_v33, 0.0  ;;  %v1021_v36 = vadd.f32 %v6644_v11, %v6977_v62 }
 0x186   : > { %v1305_v43 = vmax.f32 %v1111_v44, 0.0  ;;  %v5111_v58 = vpop.f32.mrb[78].mxu0  ;;  %v7094_v55 = vpop.permute.xlu1 %2212  ;;  %v1285_v1 = vmax.f32 %v1011_v26, 0.0 }
 0x187   : > { %1435 = vst.msk [vmem:[#allocation2 + $0x10] sm:$0xff] %vm1404_vm3, %v1379_v5  ;;  %v1356_v9 = vmax.f32 %v1281_v2, %v1306_v8  ;;  %v1126_v18 = vadd.f32 %v5111_v58, %v6644_v11  ;;  %v1120_v4 = vpop.f32.mrb[79].mxu0  ;;  %v7103_v33 = vpop.permute.xlu0 %2290 }
 0x188   : > { %v1355_v42 = vmax.f32 %v1280_v10, %v1305_v43  ;;  %v1121_v40 = vadd.f32 %v6644_v11, %v1120_v4  ;;  %2650 = vperm.xlu1 %5428, %v7021_v31   ;;  %v1284_v31 = vmax.f32 %v1006_v23, 0.0 }
 0x189   : > { %v1381_v0 = vmax.f32 %v6693_v54, %v1356_v9  ;;  %v1308_v63 = vmax.f32 %v1126_v18, 0.0  ;;  %v1016_v54 = vadd.f32 %v6958_v59, %v6644_v11  ;;  %v1287_v59 = vmax.f32 %v1021_v36, 0.0 }
 0x18a   : > { %v1380_v44 = vmax.f32 %v6701_v48, %v1355_v42  ;;  %v1307_v8 = vmax.f32 %v1121_v40, 0.0  ;;  %v5114_v2 = vpop.f32.mrb[80].mxu0  ;;  %v7108_v5 = vpop.permute.xlu1 %2220 }
 0x18b   : > { %1437 = vst.msk [vmem:[#allocation2 + $0x20] sm:$0xff] %vm1404_vm3, %v1381_v0  ;;  %v1358_v4 = vmax.f32 %v1283_v60, %v1308_v63  ;;  %v1136_v10 = vadd.f32 %v5114_v2, %v6644_v11  ;;  %v1130_v43 = vpop.f32.mrb[81].mxu0  ;;  %v7118_v9 = vpop.permute.xlu0 %2302 }
 0x18c   : > { %1436 = vst.msk [vmem:[#allocation2 + $0x18] sm:$0xff] %vm1404_vm3, %v1380_v44  ;;  %v1357_v48 = vmax.f32 %v1282_v12, %v1307_v8  ;;  %v1131_v58 = vadd.f32 %v6644_v11, %v1130_v43  ;;  %5429 = vset.pattern.permute.xlu1 %v8499_v61  ;;  %v1031_v12 = vadd.f32 %v6644_v11, %v6989_v15 }
 0x18d   : > { %v1383_v62 = vmax.f32 %v6709_v6, %v1358_v4  ;;  %v1310_v26 = vmax.f32 %v1136_v10, 0.0  ;;  %2504 = vperm.xlu1 %5429, %v6786_v53   ;;  %v1286_v6 = vmax.f32 %v1016_v54, 0.0  ;;  %v1026_v53 = vadd.f32 %v6972_v34, %v6644_v11 }
 0x18e   : > { %v1382_v60 = vmax.f32 %v6715_v37, %v1357_v48  ;;  %v1309_v18 = vmax.f32 %v1131_v58, 0.0  ;;  %v5117_v23 = vpop.f32.mrb[82].mxu0  ;;  %v7124_v42 = vpop.permute.xlu1 %2228  ;;  %v1289_v34 = vmax.f32 %v1031_v12, 0.0  ;;  %v1041_v43 = vadd.f32 %v6644_v11, %v7001_v35 }
 0x18f   : > { %1439 = vst.msk [vmem:[#allocation2 + $0x30] sm:$0xff] %vm1404_vm3, %v1383_v62  ;;  %v1360_v40 = vmax.f32 %v1285_v1, %v1310_v26  ;;  %v1146_v0 = vadd.f32 %v5117_v23, %v6644_v11  ;;  %v1140_v63 = vpop.f32.mrb[83].mxu0  ;;  %v7134_v8 = vpop.permute.xlu0 %2310  ;;  %v5839_v1 = vld [vmem:[%s8374_s1 + $0x90] sm:$0xff]  ;;  %v1288_v58 = vmax.f32 %v1026_v53, 0.0  ;;  %v1036_v62 = vadd.f32 %v6982_v16, %v6644_v11 }
 0x190   : > { %1438 = vst.msk [vmem:[#allocation2 + $0x28] sm:$0xff] %vm1404_vm3, %v1382_v60  ;;  %v1359_v37 = vmax.f32 %v1284_v31, %v1309_v18  ;;  %v1141_v44 = vadd.f32 %v6644_v11, %v1140_v63  ;;  %8530 = vst [vmem:[#allocation137_spill] sm:$0xff] %v7134_v8  ;;  %v1051_v16 = vadd.f32 %v6644_v11, %v7012_v14 }
 0x191   : > { %v1385_v2 = vmax.f32 %v6725_v51, %v1360_v40  ;;  %v1312_v15 = vmax.f32 %v1146_v0, 0.0  ;;  %2508 = vperm.xlu1 %5429, %v5839_v1   ;;  %v1291_v40 = vmax.f32 %v1041_v43, 0.0 }
 0x192   : > { %v1384_v36 = vmax.f32 %v6731_v21, %v1359_v37  ;;  %v1311_v4 = vmax.f32 %v1141_v44, 0.0  ;;  %v5120_v10 = vpop.f32.mrb[84].mxu0  ;;  %v1046_v37 = vadd.f32 %v6994_v45, %v6644_v11  ;;  %v1061_v45 = vadd.f32 %v6644_v11, %v7026_v22 }
 0x193   : > { %1441 = vst.msk [vmem:[#allocation2 + $0x40] sm:$0xff] %vm1404_vm3, %v1385_v2  ;;  %v1362_v31 = vmax.f32 %v1287_v59, %v1312_v15  ;;  %v1156_v54 = vadd.f32 %v5120_v10, %v6644_v11  ;;  %v1150_v51 = vpop.f32.mrb[85].mxu0  ;;  %v7145_v48 = vpop.permute.xlu1 %2286  ;;  %v1293_v10 = vmax.f32 %v1051_v16, 0.0 }
 0x194   : > { %1440 = vst.msk [vmem:[#allocation2 + $0x38] sm:$0xff] %vm1404_vm3, %v1384_v36  ;;  %v1361_v21 = vmax.f32 %v1286_v6, %v1311_v4  ;;  %v1151_v26 = vadd.f32 %v6644_v11, %v1150_v51  ;;  %v7151_v60 = vpop.permute.xlu0 %2318 }
 0x195   : > { %v1387_v35 = vmax.f32 %v6741_v46, %v1362_v31  ;;  %v1314_v18 = vmax.f32 %v1156_v54, 0.0  ;;  %5430 = vset.pattern.permute.xlu1 %v8509_v24  ;;  %v1290_v46 = vmax.f32 %v1036_v62, 0.0 }
 0x196   : > { %v1386_v23 = vmax.f32 %v6747_v3, %v1361_v21  ;;  %v1313_v59 = vmax.f32 %v1151_v26, 0.0  ;;  %v5123_v12 = vpop.f32.mrb[86].mxu0  ;;  %2658 = vperm.xlu1 %5430, %v5839_v1   ;;  %v1066_v21 = vadd.f32 %v7016_v20, %v6644_v11 }
 0x197   : > { %1443 = vst.msk [vmem:[#allocation2 + $0x50] sm:$0xff] %vm1404_vm3, %v1387_v35  ;;  %v1364_v0 = vmax.f32 %v1289_v34, %v1314_v18  ;;  %v1166_v63 = vadd.f32 %v5123_v12, %v6644_v11  ;;  %v1160_v6 = vpop.f32.mrb[87].mxu0  ;;  %v7160_v53 = vpop.permute.xlu1 %2294 }
 0x198   : > { %1442 = vst.msk [vmem:[#allocation2 + $0x48] sm:$0xff] %vm1404_vm3, %v1386_v23  ;;  %v1363_v3 = vmax.f32 %v1288_v58, %v1313_v59  ;;  %v1161_v44 = vadd.f32 %v6644_v11, %v1160_v6  ;;  %v7166_v2 = vpop.permute.xlu0 %2326  ;;  %v1071_v23 = vadd.f32 %v6644_v11, %v7035_v39 }
 0x199   : > { %v1389_v14 = vmax.f32 %v6757_v38, %v1364_v0  ;;  %v1316_v15 = vmax.f32 %v1166_v63, 0.0  ;;  %v1292_v38 = vmax.f32 %v1046_v37, 0.0  ;;  %v1076_v37 = vadd.f32 %v7030_v50, %v6644_v11 }
 0x19a   : > { %v1388_v1 = vmax.f32 %v6768_v19, %v1363_v3  ;;  %v1315_v36 = vmax.f32 %v1161_v44, 0.0  ;;  %v5126_v4 = vpop.f32.mrb[88].mxu0  ;;  %2662 = vperm.xlu1 %5430, %v6815_v7   ;;  %v1056_v19 = vadd.f32 %v7005_v49, %v6644_v11  ;;  %v1295_v49 = vmax.f32 %v1061_v45, 0.0 }
 0x19b   : > { %1445 = vst.msk [vmem:[#allocation2 + $0x60] sm:$0xff] %vm1404_vm3, %v1389_v14  ;;  %v1366_v34 = vmax.f32 %v1291_v40, %v1316_v15  ;;  %v1176_v43 = vadd.f32 %v5126_v4, %v6644_v11  ;;  %v1170_v31 = vpop.f32.mrb[89].mxu0  ;;  %v7175_v54 = vpop.permute.xlu1 %2298  ;;  %v1297_v14 = vmax.f32 %v1071_v23, 0.0  ;;  %v1081_v15 = vadd.f32 %v6644_v11, %v7049_v17 }
 0x19c   : > { %1444 = vst.msk [vmem:[#allocation2 + $0x58] sm:$0xff] %vm1404_vm3, %v1388_v1  ;;  %v1365_v51 = vmax.f32 %v1290_v46, %v1315_v36  ;;  %v1171_v7 = vadd.f32 %v6644_v11, %v1170_v31  ;;  %v7181_v58 = vpop.permute.xlu0 %2334  ;;  %v1294_v20 = vmax.f32 %v1056_v19, 0.0  ;;  %v1296_v46 = vmax.f32 %v1066_v21, 0.0 }
 0x19d   : > { %v1391_v22 = vmax.f32 %v6778_v57, %v1366_v34  ;;  %v1318_v62 = vmax.f32 %v1176_v43, 0.0 }
 0x19e   : > { %v1390_v26 = vmax.f32 %v6789_v28, %v1365_v51  ;;  %v1317_v35 = vmax.f32 %v1171_v7, 0.0  ;;  %v5129_v18 = vpop.f32.mrb[90].mxu0  ;;  %5431 = vset.pattern.permute.xlu1 %v8499_v61 }
 0x19f   : > { %1447 = vst.msk [vmem:[#allocation2 + $0x70] sm:$0xff] %vm1404_vm3, %v1391_v22  ;;  %v1368_v59 = vmax.f32 %v1293_v10, %v1318_v62  ;;  %v1186_v12 = vadd.f32 %v5129_v18, %v6644_v11  ;;  %v1180_v57 = vpop.f32.mrb[91].mxu0  ;;  %2516 = vperm.xlu1 %5431, %v6897_v41   ;;  %v7193_v40 = vpop.permute.xlu1 %2306  ;;  %v1668_v63 = vld [vmem:[#allocation2 + $0x42] sm:$0xff]  ;;  %v1299_v22 = vmax.f32 %v1081_v15, 0.0 }
 0x1a0   : > { %1446 = vst.msk [vmem:[#allocation2 + $0x68] sm:$0xff] %vm1404_vm3, %v1390_v26  ;;  %v1367_v28 = vmax.f32 %v1292_v38, %v1317_v35  ;;  %v1181_v16 = vadd.f32 %v6644_v11, %v1180_v57  ;;  %v7197_v0 = vpop.permute.xlu0 %2342  ;;  %v1793_v50 = vmul.f32 %v6488_v56, %v1668_v63  ;;  %v1091_v56 = vadd.f32 %v6644_v11, %v7067_v52 }
 0x1a1   : > { %v1393_v39 = vmax.f32 %v6807_v25, %v1368_v59  ;;  %v1320_v6 = vmax.f32 %v1186_v12, 0.0  ;;  %v8531_v59 = vld [vmem:[#allocation94_spill] sm:$0xff] }
 0x1a2   : > { %v1392_v41 = vmax.f32 %v6818_v30, %v1367_v28  ;;  %v1319_v3 = vmax.f32 %v1181_v16, 0.0  ;;  %v5132_v44 = vpop.f32.mrb[92].mxu0  ;;  %v8532_v28 = vld [vmem:[#allocation134_spill] sm:$0xff] }
 0x1a3   : > { %v2268_v1 = vld [vmem:[#allocation2 + $0x51] sm:$0xff]  ;;  %1449 = vst.msk [vmem:[#allocation2 + $0x80] sm:$0xff] %vm1404_vm3, %v1393_v39  ;;  %v1370_v36 = vmax.f32 %v1295_v49, %v1320_v6  ;;  %v1196_v4 = vadd.f32 %v5132_v44, %v6644_v11  ;;  %v1190_v25 = vpop.f32.mrb[93].mxu0  ;;  %2520 = vperm.xlu1 %5431, %v6841_v29   ;;  %v7208_v10 = vpop.permute.xlu1 %2314  ;;  %v1101_v16 = vadd.f32 %v6644_v11, %v8532_v28 }
 0x1a4   : > { %v2393_v30 = vmul.f32 %v7151_v60, %v2268_v1  ;;  %1448 = vst.msk [vmem:[#allocation2 + $0x78] sm:$0xff] %vm1404_vm3, %v1392_v41  ;;  %v1369_v45 = vmax.f32 %v1294_v20, %v1319_v3  ;;  %v1191_v17 = vadd.f32 %v6644_v11, %v1190_v25  ;;  %v7214_v34 = vpop.permute.xlu0 %2350 }
 0x1a5   : > { %v1395_v43 = vmax.f32 %v6833_v27, %v1370_v36  ;;  %v1322_v31 = vmax.f32 %v1196_v4, 0.0  ;;  %v1298_v27 = vmax.f32 %v1076_v37, 0.0  ;;  %v8533_v37 = vld [vmem:[#allocation129_spill] sm:$0xff]  ;;  %v8535_v36 = vld [vmem:[#allocation126_spill] sm:$0xff] }
 0x1a6   : > { %v5451_v38 = vpack.i.bf16 %v1793_v50, %v2393_v30  ;;  %v1394_v19 = vmax.f32 %v6844_v47, %v1369_v45  ;;  %v1321_v51 = vmax.f32 %v1191_v17, 0.0  ;;  %v5135_v7 = vpop.f32.mrb[94].mxu0  ;;  %v1086_v47 = vadd.f32 %v7039_v13, %v6644_v11  ;;  %v8536_v4 = vld [vmem:[#allocation98_spill] sm:$0xff]  ;;  %v1667_v17 = vld [vmem:[#allocation2 + $0x3a] sm:$0xff] }
 0x1a7   : > { %1451 = vst.msk [vmem:[#allocation2 + $0x90] sm:$0xff] %vm1404_vm3, %v1395_v43  ;;  %v1372_v60 = vmax.f32 %v1297_v14, %v1322_v31  ;;  %v1206_v62 = vadd.f32 %v5135_v7, %v6644_v11  ;;  %v1200_v21 = vpop.f32.mrb[95].mxu0  ;;  %5432 = vset.pattern.permute.xlu1 %v8509_v24  ;;  %v7223_v26 = vpop.permute.xlu1 %2322  ;;  %v1301_v13 = vmax.f32 %v1091_v56, 0.0  ;;  %v8534_v14 = vld [vmem:[#allocation97_spill] sm:$0xff]  ;;  %v1303_v45 = vmax.f32 %v1101_v16, 0.0 }
 0x1a8   : > { %1450 = vst.msk [vmem:[#allocation2 + $0x88] sm:$0xff] %vm1404_vm3, %v1394_v19  ;;  %v1371_v35 = vmax.f32 %v1296_v46, %v1321_v51  ;;  %v1201_v18 = vadd.f32 %v6644_v11, %v1200_v21  ;;  %v7229_v52 = vpop.permute.xlu0 %2358  ;;  %5452 = vrot.lane.b32.xlu0 %v5451_v38, %s5884_s24  ;;  %2670 = vperm.xlu1 %5432, %v6841_v29   ;;  %v2267_v43 = vld [vmem:[#allocation2 + $0x49] sm:$0xff] }
 0x1a9   : > { %v1397_v49 = vmax.f32 %v6859_v32, %v1372_v60  ;;  %v1324_v23 = vmax.f32 %v1206_v62, 0.0  ;;  %v1300_v32 = vmax.f32 %v1086_v47, 0.0  ;;  %v1096_v29 = vadd.f32 %v8533_v37, %v6644_v11  ;;  %v8537_v21 = vld [vmem:[#allocation101_spill] sm:$0xff] }
 0x1aa   : > { %v1396_v12 = vmax.f32 %v8531_v59, %v1371_v35  ;;  %v1323_v57 = vmax.f32 %v1201_v18, 0.0  ;;  %v5138_v20 = vpop.f32.mrb[96].mxu0  ;;  %v8538_v35 = vld [vmem:[#allocation36_spill] sm:$0xff]  ;;  %v8541_v16 = vld [vmem:[#allocation105_spill] sm:$0xff] }
 0x1ab   : > { %1453 = vst.msk [vmem:[#allocation2 + $0xa0] sm:$0xff] %vm1404_vm3, %v1397_v49  ;;  %v1374_v63 = vmax.f32 %v1299_v22, %v1324_v23  ;;  %v1216_v39 = vadd.f32 %v5138_v20, %v6644_v11  ;;  %v1210_v6 = vpop.f32.mrb[97].mxu0  ;;  %v7239_v46 = vpop.permute.xlu1 %2330  ;;  %v1302_v7 = vmax.f32 %v1096_v29, 0.0  ;;  %v2392_v22 = vmul.f32 %v7208_v10, %v2267_v43  ;;  %v8539_v49 = vld [vmem:[#allocation102_spill] sm:$0xff]  ;;  %v2568_v29 = vld [vmem:[#allocation2 + $0x5e] sm:$0xff] }
 0x1ac   : > { %1452 = vst.msk [vmem:[#allocation2 + $0x98] sm:$0xff] %vm1404_vm3, %v1396_v12  ;;  %v1373_v41 = vmax.f32 %v1298_v27, %v1323_v57  ;;  %v1211_v3 = vadd.f32 %v6644_v11, %v1210_v6  ;;  %v7245_v44 = vpop.permute.xlu0 %2366  ;;  %2674 = vperm.xlu1 %5432, %v8535_v36   ;;  %v5840_v11 = vld [vmem:[%s8376_s3] ss:$0 sm:$0xff]  ;;  %v1792_v18 = vmul.f32 %v8538_v35, %v1667_v17  ;;  %v8540_v12 = vld [vmem:[#allocation93_spill] sm:$0xff]  ;;  %v3614_v17 = vld [vmem:[%s8377_s4 + $0x10] sm:$0xff] }
 0x1ad   : > { %v1399_v15 = vmax.f32 %v8534_v14, %v1374_v63  ;;  %v1326_v1 = vmax.f32 %v1216_v39, 0.0  ;;  %v8542_v63 = vld [vmem:[#allocation106_spill] sm:$0xff] }
 0x1ae   : > { %v1398_v25 = vmax.f32 %v8536_v4, %v1373_v41  ;;  %v1325_v50 = vmax.f32 %v1211_v3, 0.0  ;;  %v5141_v30 = vpop.f32.mrb[98].mxu0  ;;  %v5435_v20 = vpack.i.bf16 %v1792_v18, %v2392_v22  ;;  %v8543_v41 = vld [vmem:[#allocation84_spill] sm:$0xff] }
 0x1af   : > { %1455 = vst.msk [vmem:[#allocation2 + $0xb0] sm:$0xff] %vm1404_vm3, %v1399_v15  ;;  %v1376_v31 = vmax.f32 %v1301_v13, %v1326_v1  ;;  %v1226_v38 = vadd.f32 %v5840_v11, %v5141_v30  ;;  %v1220_v19 = vpop.f32.mrb[99].mxu0  ;;  %v7254_v51 = vpop.permute.xlu1 %2338  ;;  %v3612_v15 = vld [vmem:[%s8377_s4] sm:$0xff]  ;;  %v3613_v1 = vld [vmem:[%s8377_s4 + $0x8] sm:$0xff] }
 0x1b0   : > { %1454 = vst.msk [vmem:[#allocation2 + $0xa8] sm:$0xff] %vm1404_vm3, %v1398_v25  ;;  %v1375_v56 = vmax.f32 %v1300_v32, %v1325_v50  ;;  %v1221_v60 = vadd.f32 %v5840_v11, %v1220_v19  ;;  %v7258_v62 = vpop.permute.xlu0 %2374  ;;  %5433 = vset.pattern.permute.xlu1 %v8499_v61  ;;  %v1968_v32 = vld [vmem:[#allocation2 + $0x4f] sm:$0xff]  ;;  %v5232_v50 = vpack.c.bf16 %v3613_v1, %v3612_v15  ;;  %v8389_v11 = vmov 8   ;;  %v3616_v19 = vld [vmem:[%s8377_s4 + $0x20] sm:$0xff] }
 0x1b1   : > { %v1401_v27 = vmax.f32 %v8537_v21, %v1376_v31  ;;  %v1328_v47 = vmax.f32 %v1226_v38, 0.0  ;;  %2528 = vperm.xlu1 %5433, %v8540_v12   ;;  %v2093_v3 = vmul.f32 %v8543_v41, %v1968_v32  ;;  %v3615_v31 = vld [vmem:[%s8377_s4 + $0x18] sm:$0xff]  ;;  %5691 = vset.pattern.permute.xlu0 %v8389_v11  ;;  %v3618_v21 = vld [vmem:[%s8377_s4 + $0x30] sm:$0xff] }
 0x1b2   : > { %v1400_v23 = vmax.f32 %v8539_v49, %v1375_v56  ;;  %v1327_v59 = vmax.f32 %v1221_v60, 0.0  ;;  %v5235_v38 = vpack.c.bf16 %v3615_v31, %v3614_v17  ;;  %v3620_v49 = vld [vmem:[%s8377_s4 + $0x40] sm:$0xff]  ;;  %v3626_v41 = vld [vmem:[%s8377_s4 + $0x70] sm:$0xff] }
 0x1b3   : > { %1457 = vst.msk [vmem:[#allocation2 + $0xc0] sm:$0xff] %vm1404_vm3, %v1401_v27  ;;  %v1378_v10 = vmax.f32 %v1303_v45, %v1328_v47  ;;  %v7266_v57 = vpop.permute.xlu1 %2346  ;;  %v5886_v45 = vmov 0.0|0.0   ;;  %v3619_v27 = vld [vmem:[%s8377_s4 + $0x38] sm:$0xff] }
 0x1b4   : > { %1456 = vst.msk [vmem:[#allocation2 + $0xb8] sm:$0xff] %vm1404_vm3, %v1400_v23  ;;  %v1377_v13 = vmax.f32 %v1302_v7, %v1327_v59  ;;  %v7269_v28 = vpop.permute.xlu0 %2382  ;;  %5285 = vmatprep.subr.bf16.mxu1 %v5886_v45  ;;  %5231 = vmatprep.subr.bf16.mxu0 %v5886_v45  ;;  %v3617_v7 = vld [vmem:[%s8377_s4 + $0x28] sm:$0xff]  ;;  %v5241_v35 = vpack.c.bf16 %v3619_v27, %v3618_v21  ;;  %v2417_v1 = vld [vmem:[#allocation2 + $0x55] sm:$0xff] }
 0x1b5   : > { %v1403_v61 = vmax.f32 %v8541_v16, %v1378_v10  ;;  %5436 = vrot.lane.b32.xlu1 %v5435_v20, %s5884_s24  ;;  %5301 = vmatpush1.bf16.msra.mxu1 %v5232_v50  ;;  %v5238_v56 = vpack.c.bf16 %v3617_v7, %v3616_v19  ;;  %v3621_v23 = vld [vmem:[%s8377_s4 + $0x48] sm:$0xff]  ;;  %v3622_v10 = vld [vmem:[%s8377_s4 + $0x50] sm:$0xff]  ;;  %v3623_v20 = vld [vmem:[%s8377_s4 + $0x58] sm:$0xff] }
 0x1b6   : > { %v1402_v39 = vmax.f32 %v8542_v63, %v1377_v13  ;;  %5450 = vset.pattern.permute.xlu1 %v8509_v24  ;;  %5286 = vmatprep.subr.bf16.mxu1 %v5886_v45  ;;  %v5244_v12 = vpack.c.bf16 %v3621_v23, %v3620_v49  ;;  %v3624_v63 = vld [vmem:[%s8377_s4 + $0x60] sm:$0xff]  ;;  %v3629_v19 = vld [vmem:[%s8377_s4 + $0x88] sm:$0xff]  ;;  %v2272_v11 = vld [vmem:[#allocation2 + $0x71] sm:$0xff] }
 0x1b7   : > { %1459 = vst.msk [vmem:[#allocation2 + $0xd0] sm:$0xf] %vm1433_vm5, %v1403_v61  ;;  %v7275_v6 = vpop.permute.xlu1 %2354  ;;  %5233 = vmatpush1.bf16.msra.mxu0 %v5232_v50  ;;  %v5247_v61 = vpack.c.bf16 %v3623_v20, %v3622_v10  ;;  %v8545_v50 = vld [vmem:[#allocation61_spill] sm:$0xff] }
 0x1b8   : > { %1458 = vst.msk [vmem:[#allocation2 + $0xc8] sm:$0xff] %vm1404_vm3, %v1402_v39  ;;  %v2619_v37 = vpop.permute.xlu0 %2618  ;;  %5234 = vmatprep.subr.bf16.mxu0 %v5886_v45  ;;  %v3625_v39 = vld [vmem:[%s8377_s4 + $0x68] sm:$0xff] }
 0x1b9   : > { %v2693_v14 = vmul.f32 %v2619_v37, %v2568_v29  ;;  %5302 = vmatpush1.bf16.msra.mxu1 %v5235_v38  ;;  %v5250_v37 = vpack.c.bf16 %v3625_v39, %v3624_v63  ;;  %v1819_v7 = vld [vmem:[#allocation2 + $0x4b] sm:$0xff]  ;;  %v2270_v27 = vld [vmem:[#allocation2 + $0x61] sm:$0xff]  ;;  %v3631_v63 = vld [vmem:[%s8377_s4 + $0x98] sm:$0xff] }
 0x1ba   : > { %5287 = vmatprep.subr.bf16.mxu1 %v5886_v45  ;;  %v2419_v49 = vld [vmem:[#allocation2 + $0x65] sm:$0xff]  ;;  %v1670_v39 = vld [vmem:[#allocation2 + $0x52] sm:$0xff] }
 0x1bb   : > { %v7286_v36 = vpop.permute.xlu1 %2362  ;;  %v5461_v4 = vpack.i.bf16 %v2093_v3, %v2693_v14  ;;  %5236 = vmatpush1.bf16.msra.mxu0 %v5235_v38  ;;  %v3627_v3 = vld [vmem:[%s8377_s4 + $0x78] sm:$0xff]  ;;  %v3628_v38 = vld [vmem:[%s8377_s4 + $0x80] sm:$0xff] }
 0x1bc   : > { %v7288_v25 = vpop.permute.xlu0 %2630  ;;  %5237 = vmatprep.subr.bf16.mxu0 %v5886_v45  ;;  %v1817_v14 = vld [vmem:[#allocation2 + $0x3b] sm:$0xff]  ;;  %v5256_v23 = vpack.c.bf16 %v3629_v19, %v3628_v38  ;;  %v1967_v38 = vld [vmem:[#allocation2 + $0x47] sm:$0xff] }
 0x1bd   : > { %5462 = vrot.lane.b32.xlu0 %v5461_v4, %s5885_s7  ;;  %5303 = vmatpush1.bf16.msra.mxu1 %v5238_v56  ;;  %v5253_v4 = vpack.c.bf16 %v3627_v3, %v3626_v41  ;;  %v1942_v17 = vmul.f32 %v8545_v50, %v1817_v14  ;;  %v3632_v50 = vld [vmem:[%s8377_s4 + $0xa0] sm:$0xff] }
 0x1be   : > { %5288 = vmatprep.subr.bf16.mxu1 %v5886_v45 }
 0x1bf   : > { %v7291_v30 = vpop.permute.xlu1 %2370  ;;  %5239 = vmatpush1.bf16.msra.mxu0 %v5238_v56 }
 0x1c0   : > { %v7298_v43 = vpop.permute.xlu0 %2642  ;;  %5240 = vmatprep.subr.bf16.mxu0 %v5886_v45 }
 0x1c1   : > { %5304 = vmatpush1.bf16.msra.mxu1 %v5241_v35 }
 0x1c2   : > { %5289 = vmatprep.subr.bf16.mxu1 %v5886_v45 }
 0x1c3   : > { %v7311_v22 = vpop.permute.xlu1 %2378  ;;  %5242 = vmatpush1.bf16.msra.mxu0 %v5241_v35 }
 0x1c4   : > { %v7314_v60 = vpop.permute.xlu0 %2654  ;;  %5243 = vmatprep.subr.bf16.mxu0 %v5886_v45 }
 0x1c5   : > { %5305 = vmatpush1.bf16.msra.mxu1 %v5244_v12 }
 0x1c6   : > { %5290 = vmatprep.subr.bf16.mxu1 %v5886_v45 }
 0x1c7   : > { %5245 = vmatpush1.bf16.msra.mxu0 %v5244_v12  ;;  %v8546_v12 = vld [vmem:[#allocation63_spill] sm:$0xff] }
 0x1c8   : > { %v7324_v47 = vpop.permute.xlu1 %2436  ;;  %v7326_v18 = vpop.permute.xlu0 %2666  ;;  %5246 = vmatprep.subr.bf16.mxu0 %v5886_v45  ;;  %v1944_v10 = vmul.f32 %v8546_v12, %v1819_v7 }
 0x1c9   : > { %5306 = vmatpush1.bf16.msra.mxu1 %v5247_v61 }
 0x1ca   : > { %5291 = vmatprep.subr.bf16.mxu1 %v5886_v45 }
 0x1cb   : > { %5248 = vmatpush1.bf16.msra.mxu0 %v5247_v61  ;;  %v3630_v61 = vld [vmem:[%s8377_s4 + $0x90] sm:$0xff] }
 0x1cc   : > { %v7336_v59 = vpop.permute.xlu1 %2444  ;;  %v7345_v13 = vpop.permute.xlu0 %2678  ;;  %5249 = vmatprep.subr.bf16.mxu0 %v5886_v45  ;;  %v5259_v14 = vpack.c.bf16 %v3631_v63, %v3630_v61 }
 0x1cd   : > { %5307 = vmatpush1.bf16.msra.mxu1 %v5250_v37 }
 0x1ce   : > { %5292 = vmatprep.subr.bf16.mxu1 %v5886_v45 }
 0x1cf   : > { %5251 = vmatpush1.bf16.msra.mxu0 %v5250_v37  ;;  %v2395_v37 = vmul.f32 %v7166_v2, %v2270_v27  ;;  %v8548_v2 = vld [vmem:[#allocation38_spill] sm:$0xff] }
 0x1d0   : > { %v7348_v16 = vpop.permute.xlu1 %2448  ;;  %5252 = vmatprep.subr.bf16.mxu0 %v5886_v45  ;;  %v3634_v27 = vld [vmem:[%s8377_s4 + $0xb0] sm:$0xff] }
 0x1d1   : > { %v7360_v29 = vpop.permute.xlu0 %2440  ;;  %5308 = vmatpush1.bf16.msra.mxu1 %v5253_v4 }
 0x1d2   : > { %5293 = vmatprep.subr.bf16.mxu1 %v5886_v45 }
 0x1d3   : > { %5254 = vmatpush1.bf16.msra.mxu0 %v5253_v4 }
 0x1d4   : > { %v7358_v32 = vpop.permute.xlu1 %2456  ;;  %5255 = vmatprep.subr.bf16.mxu0 %v5886_v45 }
 0x1d5   : > { %8544 = vst [vmem:[#allocation94_spill] sm:$0xff] %v7358_v32  ;;  %v7378_v56 = vpop.permute.xlu0 %2452  ;;  %5309 = vmatpush1.bf16.msra.mxu1 %v5256_v23 }
 0x1d6   : > { %5294 = vmatprep.subr.bf16.mxu1 %v5886_v45 }
 0x1d7   : > { %5257 = vmatpush1.bf16.msra.mxu0 %v5256_v23 }
 0x1d8   : > { %v2465_v15 = vpop.permute.xlu1 %2464  ;;  %5258 = vmatprep.subr.bf16.mxu0 %v5886_v45 }
 0x1d9   : > { %v2542_v31 = vmul.f32 %v2465_v15, %v2417_v1  ;;  %v8547_v15 = vmov 0.0   ;;  %v1795_v1 = vmul.f32 %v8548_v2, %v1670_v39  ;;  %v7445_v4 = vpop.permute.xlu0 %2460  ;;  %5310 = vmatpush1.bf16.msra.mxu1 %v5259_v14  ;;  %v3636_v39 = vld [vmem:[%s8377_s4 + $0xc0] sm:$0xff] }
 0x1da   : > { %4135 = vst.msk [vmem:[#allocation3] sm:$0xff] %vm3485_vm6, %v8547_v15  ;;  %4136 = vst.msk [vmem:[#allocation3 + $0x8] sm:$0xff] %vm3485_vm6, %v8547_v15  ;;  %5295 = vmatprep.subr.bf16.mxu1 %v5886_v45  ;;  %v1970_v2 = vld [vmem:[#allocation2 + $0x5f] sm:$0xff] }
 0x1db   : > { %v5440_v21 = vpack.i.bf16 %v1942_v17, %v2542_v31  ;;  %4137 = vst.msk [vmem:[#allocation3 + $0x10] sm:$0xff] %vm3485_vm6, %v8547_v15  ;;  %4138 = vst.msk [vmem:[#allocation3 + $0x18] sm:$0xff] %vm3485_vm6, %v8547_v15  ;;  %v3633_v17 = vld [vmem:[%s8377_s4 + $0xa8] sm:$0xff]  ;;  %v5481_v31 = vpack.i.bf16 %v1795_v1, %v2395_v37  ;;  %5260 = vmatpush1.bf16.msra.mxu0 %v5259_v14  ;;  %v2418_v14 = vld [vmem:[#allocation2 + $0x5d] sm:$0xff] }
 0x1dc   : > { %v2473_v35 = vpop.permute.xlu1 %2472  ;;  %4139 = vst.msk [vmem:[#allocation3 + $0x20] sm:$0xff] %vm3485_vm6, %v8547_v15  ;;  %4140 = vst.msk [vmem:[#allocation3 + $0x28] sm:$0xff] %vm3485_vm6, %v8547_v15  ;;  %v5262_v19 = vpack.c.bf16 %v3633_v17, %v3632_v50  ;;  %5261 = vmatprep.subr.bf16.mxu0 %v5886_v45  ;;  %v3637_v37 = vld [vmem:[%s8377_s4 + $0xc8] sm:$0xff] }
 0x1dd   : > { %v2544_v20 = vmul.f32 %v2473_v35, %v2419_v49  ;;  %5441 = vrot.lane.b32.xlu1 %v5440_v21, %s5888_s20  ;;  %4141 = vst.msk [vmem:[#allocation3 + $0x30] sm:$0xff] %vm3485_vm6, %v8547_v15  ;;  %4142 = vst.msk [vmem:[#allocation3 + $0x38] sm:$0xff] %vm3485_vm6, %v8547_v15  ;;  %v2567_v21 = vld [vmem:[#allocation2 + $0x56] sm:$0xff]  ;;  %v5268_v50 = vpack.c.bf16 %v3637_v37, %v3636_v39 }
 0x1de   : > { %4143 = vst.msk [vmem:[#allocation3 + $0x40] sm:$0xff] %vm3485_vm6, %v8547_v15  ;;  %4144 = vst.msk [vmem:[#allocation3 + $0x48] sm:$0xff] %vm3485_vm6, %v8547_v15  ;;  %v3635_v35 = vld [vmem:[%s8377_s4 + $0xb8] sm:$0xff]  ;;  %5311 = vmatpush1.bf16.msra.mxu1 %v5262_v19 }
 0x1df   : > { %v5471_v41 = vpack.i.bf16 %v1944_v10, %v2544_v20  ;;  %4145 = vst.msk [vmem:[#allocation3 + $0x50] sm:$0xff] %vm3485_vm6, %v8547_v15  ;;  %4146 = vst.msk [vmem:[#allocation3 + $0x58] sm:$0xff] %vm3485_vm6, %v8547_v15  ;;  %v8550_v49 = vld [vmem:[#allocation87_spill] sm:$0xff]  ;;  %v2469_v10 = vpop.permute.xlu0 %2468  ;;  %v5265_v61 = vpack.c.bf16 %v3635_v35, %v3634_v27  ;;  %5296 = vmatprep.subr.bf16.mxu1 %v5886_v45  ;;  %5263 = vmatpush1.bf16.msra.mxu0 %v5262_v19  ;;  %v8551_v35 = vld [vmem:[#allocation60_spill] sm:$0xff] }
 0x1e0   : > { %v7392_v3 = vpop.permute.xlu1 %2480  ;;  %4147 = vst.msk [vmem:[#allocation3 + $0x60] sm:$0xff] %vm3485_vm6, %v8547_v15  ;;  %4148 = vst.msk [vmem:[#allocation3 + $0x68] sm:$0xff] %vm3485_vm6, %v8547_v15  ;;  %v2092_v23 = vmul.f32 %v8550_v49, %v1967_v38  ;;  %5264 = vmatprep.subr.bf16.mxu0 %v5886_v45  ;;  %v2543_v1 = vmul.f32 %v2469_v10, %v2418_v14  ;;  %v2570_v38 = vld [vmem:[#allocation2 + $0x6e] sm:$0xff]  ;;  %v3639_v19 = vld [vmem:[%s8377_s4 + $0xd8] sm:$0xff] }
 0x1e1   : > { %4149 = vst.msk [vmem:[#allocation3 + $0x70] sm:$0xff] %vm3485_vm6, %v8547_v15  ;;  %4150 = vst.msk [vmem:[#allocation3 + $0x78] sm:$0xff] %vm3485_vm6, %v8547_v15  ;;  %5472 = vrot.lane.b32.xlu0 %v5471_v41, %s5888_s20  ;;  %v1818_v41 = vld [vmem:[#allocation2 + $0x43] sm:$0xff]  ;;  %v2269_v27 = vld [vmem:[#allocation2 + $0x59] sm:$0xff] }
 0x1e2   : > { %4151 = vst.msk [vmem:[#allocation3 + $0x80] sm:$0xff] %vm3485_vm6, %v8547_v15  ;;  %4152 = vst.msk [vmem:[#allocation3 + $0x88] sm:$0xff] %vm3485_vm6, %v8547_v15  ;;  %5312 = vmatpush1.bf16.msra.mxu1 %v5265_v61  ;;  %v1943_v49 = vmul.f32 %v8551_v35, %v1818_v41  ;;  %v2394_v39 = vmul.f32 %v7223_v26, %v2269_v27  ;;  %v1821_v37 = vld [vmem:[#allocation2 + $0x5b] sm:$0xff]  ;;  %v8554_v41 = vld [vmem:[#allocation37_spill] sm:$0xff] }
 0x1e3   : > { %4153 = vst.msk [vmem:[#allocation3 + $0x90] sm:$0xff] %vm3485_vm6, %v8547_v15  ;;  %4154 = vst.msk [vmem:[#allocation3 + $0x98] sm:$0xff] %vm3485_vm6, %v8547_v15  ;;  %v2477_v17 = vpop.permute.xlu0 %2476  ;;  %5297 = vmatprep.subr.bf16.mxu1 %v5886_v45  ;;  %5266 = vmatpush1.bf16.msra.mxu0 %v5265_v61  ;;  %v2421_v14 = vld [vmem:[#allocation2 + $0x75] sm:$0xff]  ;;  %v3640_v26 = vld [vmem:[%s8377_s4 + $0xe0] sm:$0xff] }
 0x1e4   : > { %4155 = vst.msk [vmem:[#allocation3 + $0xa0] sm:$0xff] %vm3485_vm6, %v8547_v15  ;;  %4156 = vst.msk [vmem:[#allocation3 + $0xa8] sm:$0xff] %vm3485_vm6, %v8547_v15  ;;  %5267 = vmatprep.subr.bf16.mxu0 %v5886_v45  ;;  %v3641_v61 = vld [vmem:[%s8377_s4 + $0xe8] sm:$0xff] }
 0x1e5   : > { %4157 = vst.msk [vmem:[#allocation3 + $0xb0] sm:$0xff] %vm3485_vm6, %v8547_v15  ;;  %4158 = vst.msk [vmem:[#allocation3 + $0xb8] sm:$0xff] %vm3485_vm6, %v8547_v15  ;;  %v2615_v7 = vpop.permute.xlu1 %2614  ;;  %5482 = vrot.lane.b32.xlu0 %v5481_v31, %s5884_s24  ;;  %v2569_v27 = vld [vmem:[#allocation2 + $0x66] sm:$0xff] }
 0x1e6   : > { %4159 = vst.msk [vmem:[#allocation3 + $0xc0] sm:$0xff] %vm3485_vm6, %v8547_v15  ;;  %8549 = vst [vmem:[#allocation134_spill] sm:$0xff] %v7445_v4  ;;  %v2692_v12 = vmul.f32 %v2615_v7, %v2567_v21  ;;  %v3638_v7 = vld [vmem:[%s8377_s4 + $0xd0] sm:$0xff]  ;;  %v5456_v4 = vpack.i.bf16 %v1943_v49, %v2543_v1  ;;  %v2546_v15 = vmul.f32 %v7392_v3, %v2421_v14  ;;  %5313 = vmatpush1.bf16.msra.mxu1 %v5268_v50  ;;  %v8555_v1 = vld [vmem:[#allocation65_spill] sm:$0xff]  ;;  %v8556_v49 = vmov 8  }
 0x1e7   : > { %v1669_v21 = vld [vmem:[#allocation2 + $0x4a] sm:$0xff]  ;;  %v5271_v32 = vpack.c.bf16 %v3639_v19, %v3638_v7  ;;  %5298 = vmatprep.subr.bf16.mxu1 %v5886_v45  ;;  %v2397_v3 = vmul.f32 %v7181_v58, %v2272_v11  ;;  %v7500_v19 = vpop.permute.xlu0 %2484  ;;  %5269 = vmatpush1.bf16.msra.mxu0 %v5268_v50  ;;  %v3643_v58 = vld [vmem:[%s8377_s4 + $0xf8] sm:$0xff]  ;;  %v8557_v11 = vld [vmem:[#allocation40_spill] sm:$0xff] }
 0x1e8   : > { %v5445_v20 = vpack.i.bf16 %v2092_v23, %v2692_v12  ;;  %v8552_v23 = vld [vmem:[#allocation86_spill] sm:$0xff]  ;;  %v1794_v35 = vmul.f32 %v8554_v41, %v1669_v21  ;;  %5270 = vmatprep.subr.bf16.mxu0 %v5886_v45  ;;  %v2572_v41 = vld [vmem:[#allocation2 + $0x7e] sm:$0xff] }
 0x1e9   : > { %v2623_v63 = vpop.permute.xlu1 %2622  ;;  %v2095_v12 = vmul.f32 %v8552_v23, %v1970_v2  ;;  %v1969_v21 = vld [vmem:[#allocation2 + $0x57] sm:$0xff]  ;;  %v1972_v14 = vld [vmem:[#allocation2 + $0x6f] sm:$0xff] }
 0x1ea   : > { %5446 = vrot.lane.b32.xlu1 %v5445_v20, %s5885_s7  ;;  %v8553_v20 = vld [vmem:[#allocation130_spill] sm:$0xff]  ;;  %v5466_v7 = vpack.i.bf16 %v1794_v35, %v2394_v39  ;;  %5314 = vmatpush1.bf16.msra.mxu1 %v5271_v32 }
 0x1eb   : > { %5299 = vmatprep.subr.bf16.mxu1 %v5886_v45  ;;  %5272 = vmatpush1.bf16.msra.mxu0 %v5271_v32  ;;  %v1671_v32 = vld [vmem:[#allocation2 + $0x5a] sm:$0xff] }
 0x1ec   : > { %5273 = vmatprep.subr.bf16.mxu0 %v5886_v45 }
 0x1ed   : > { %v2627_v31 = vpop.permute.xlu1 %2626 }
 0x1ee   : > { %v2695_v10 = vmul.f32 %v2627_v31, %v2570_v38  ;;  %2682 = vperm.xlu1 %5450, %v8553_v20   ;;  %v1672_v31 = vld [vmem:[#allocation2 + $0x62] sm:$0xff]  ;;  %v1946_v38 = vmul.f32 %v8555_v1, %v1821_v37  ;;  %v2420_v37 = vld [vmem:[#allocation2 + $0x6d] sm:$0xff]  ;;  %v2489_v1 = vpop.permute.xlu0 %2488 }
 0x1f0   : > { %v5491_v8 = vpack.i.bf16 %v2095_v12, %v2695_v10  ;;  %v5501_v23 = vpack.i.bf16 %v1946_v38, %v2546_v15  ;;  %v2694_v12 = vmul.f32 %v2623_v63, %v2569_v27  ;;  %v5274_v10 = vpack.c.bf16 %v3641_v61, %v3640_v26  ;;  %v1820_v15 = vld [vmem:[#allocation2 + $0x53] sm:$0xff]  ;;  %v8558_v63 = vld [vmem:[#allocation89_spill] sm:$0xff] }
 0x1f1   : > { %v2635_v2 = vpop.permute.xlu1 %2634  ;;  %v2094_v50 = vmul.f32 %v8558_v63, %v1969_v21  ;;  %v2545_v26 = vmul.f32 %v2477_v17, %v2420_v37  ;;  %v2271_v38 = vld [vmem:[#allocation2 + $0x69] sm:$0xff] }
 0x1f2   : > { %5492 = vrot.lane.b32.xlu0 %v5491_v8, %s5885_s7  ;;  %5457 = vrot.lane.b32.xlu1 %v5456_v4, %s5888_s20  ;;  %v3642_v8 = vld [vmem:[%s8377_s4 + $0xf0] sm:$0xff]  ;;  %v1797_v4 = vmul.f32 %v8557_v11, %v1672_v31  ;;  %v2697_v31 = vmul.f32 %v2635_v2, %v2572_v41  ;;  %v2396_v17 = vmul.f32 %v7239_v46, %v2271_v38 }
 0x1f3   : > { %5707 = vset.pattern.permute.xlu1 %v8556_v49  ;;  %v5277_v35 = vpack.c.bf16 %v3643_v58, %v3642_v8  ;;  %v5476_v61 = vpack.i.bf16 %v2094_v50, %v2694_v12  ;;  %5315 = vmatpush1.bf16.msra.mxu1 %v5274_v10  ;;  %v8559_v21 = vld [vmem:[#allocation62_spill] sm:$0xff]  ;;  %v2423_v12 = vld [vmem:[#allocation2 + $0x85] sm:$0xff]  ;;  %v8562_v50 = vld [vmem:[#allocation67_spill] sm:$0xff] }
 0x1f4   : > { %v5511_v39 = vpack.i.bf16 %v1797_v4, %v2397_v3  ;;  %5300 = vmatprep.subr.bf16.mxu1 %v5886_v45  ;;  %v1945_v27 = vmul.f32 %v8559_v21, %v1820_v15  ;;  %v1823_v2 = vld [vmem:[#allocation2 + $0x6b] sm:$0xff]  ;;  %5275 = vmatpush1.bf16.msra.mxu0 %v5274_v10  ;;  %v2548_v58 = vmul.f32 %v2489_v1, %v2423_v12  ;;  %v2274_v4 = vld [vmem:[#allocation2 + $0x81] sm:$0xff]  ;;  %v8561_v15 = vld [vmem:[#allocation39_spill] sm:$0xff] }
 0x1f5   : > { %v7511_v20 = vpop.permute.xlu1 %2638  ;;  %5276 = vmatprep.subr.bf16.mxu0 %v5886_v45  ;;  %v1796_v63 = vmul.f32 %v8561_v15, %v1671_v32  ;;  %v1674_v46 = vld [vmem:[#allocation2 + $0x72] sm:$0xff]  ;;  %v1971_v10 = vld [vmem:[#allocation2 + $0x67] sm:$0xff]  ;;  %v2399_v41 = vmul.f32 %v7197_v0, %v2274_v4 }
 0x1f6   : > { %5502 = vrot.lane.b32.xlu0 %v5501_v23, %s5888_s20  ;;  %5467 = vrot.lane.b32.xlu1 %v5466_v7, %s5884_s24  ;;  %v8560_v23 = vld [vmem:[#allocation88_spill] sm:$0xff]  ;;  %v5486_v8 = vpack.i.bf16 %v1945_v27, %v2545_v26  ;;  %v8563_v1 = vld [vmem:[#allocation42_spill] sm:$0xff]  ;;  %v8564_v21 = vld [vmem:[#allocation91_spill] sm:$0xff] }
 0x1f7   : > { %v2097_v7 = vmul.f32 %v8560_v23, %v1972_v14  ;;  %5316 = vmatpush1.bf16.msra.mxu1 %v5277_v35  ;;  %v2571_v14 = vld [vmem:[#allocation2 + $0x76] sm:$0xff]  ;;  %v5496_v26 = vpack.i.bf16 %v1796_v63, %v2396_v17  ;;  %v1799_v38 = vmul.f32 %v8563_v1, %v1674_v46  ;;  %v2096_v27 = vmul.f32 %v8564_v21, %v1971_v10  ;;  %v1822_v23 = vld [vmem:[#allocation2 + $0x63] sm:$0xff]  ;;  %v2574_v32 = vld [vmem:[#allocation2 + $0x8e] sm:$0xff] }
 0x1f8   : > { %5279 = vmatprep.subr.bf16.mxu1 %v5886_v45  ;;  %5278 = vmatpush1.bf16.msra.mxu0 %v5277_v35  ;;  %v2699_v17 = vmul.f32 %v7298_v43, %v2574_v32  ;;  %v8566_v4 = vld [vmem:[#allocation64_spill] sm:$0xff]  ;;  %v1973_v21 = vld [vmem:[#allocation2 + $0x77] sm:$0xff] }
 0x1f9   : > { %v5521_v11 = vpack.i.bf16 %v2097_v7, %v2697_v31  ;;  %v1974_v7 = vld [vmem:[#allocation2 + $0x7f] sm:$0xff]  ;;  %v5541_v35 = vpack.i.bf16 %v1799_v38, %v2399_v41  ;;  %v1947_v15 = vmul.f32 %v8566_v4, %v1822_v23 }
 0x1fa   : > { %v7521_v3 = vpop.permute.xlu1 %2492  ;;  %5512 = vrot.lane.b32.xlu0 %v5511_v39, %s5884_s24  ;;  %5477 = vrot.lane.b32.xlu1 %v5476_v61, %s5885_s7  ;;  %v1948_v39 = vmul.f32 %v8562_v50, %v1823_v2  ;;  %v2696_v61 = vmul.f32 %v7288_v25, %v2571_v14  ;;  %v2422_v2 = vld [vmem:[#allocation2 + $0x7d] sm:$0xff] }
 0x1fb   : > { %v2547_v25 = vmul.f32 %v7500_v19, %v2422_v2  ;;  %v2273_v63 = vld [vmem:[#allocation2 + $0x79] sm:$0xff]  ;;  %v8567_v19 = vld [vmem:[#allocation41_spill] sm:$0xff] }
 0x1fc   : > { %v5531_v31 = vpack.i.bf16 %v1948_v39, %v2548_v58  ;;  %v5506_v0 = vpack.i.bf16 %v2096_v27, %v2696_v61  ;;  %v8565_v58 = vld [vmem:[#allocation90_spill] sm:$0xff]  ;;  %v1825_v50 = vld [vmem:[#allocation2 + $0x7b] sm:$0xff]  ;;  %v2398_v10 = vmul.f32 %v7254_v51, %v2273_v63  ;;  %v2573_v27 = vld [vmem:[#allocation2 + $0x86] sm:$0xff] }
 0x1fd   : > { %v2425_v39 = vld [vmem:[#allocation2 + $0x95] sm:$0xff]  ;;  %v5516_v41 = vpack.i.bf16 %v1947_v15, %v2547_v25  ;;  %v1676_v38 = vld [vmem:[#allocation2 + $0x82] sm:$0xff]  ;;  %v2698_v51 = vmul.f32 %v7511_v20, %v2573_v27 }
 0x1fe   : > { %v2497_v37 = vpop.permute.xlu1 %2496  ;;  %5522 = vrot.lane.b32.xlu0 %v5521_v11, %s5885_s7  ;;  %5487 = vrot.lane.b32.xlu1 %v5486_v8, %s5888_s20  ;;  %v1673_v8 = vld [vmem:[#allocation2 + $0x6a] sm:$0xff]  ;;  %v2099_v11 = vmul.f32 %v8565_v58, %v1974_v7  ;;  %v1824_v25 = vld [vmem:[#allocation2 + $0x73] sm:$0xff] }
 0x1ff   : > { %v2550_v43 = vmul.f32 %v2497_v37, %v2425_v39  ;;  %v1798_v61 = vmul.f32 %v8567_v19, %v1673_v8  ;;  %v8569_v37 = vld [vmem:[#allocation44_spill] sm:$0xff]  ;;  %v2424_v8 = vld [vmem:[#allocation2 + $0x8d] sm:$0xff] }
 0x200   : > { %v5551_v14 = vpack.i.bf16 %v2099_v11, %v2699_v17  ;;  %v1976_v58 = vld [vmem:[#allocation2 + $0x8f] sm:$0xff]  ;;  %v2576_v11 = vld [vmem:[#allocation2 + $0x9e] sm:$0xff] }
 0x201   : > { %v5526_v7 = vpack.i.bf16 %v1798_v61, %v2398_v10  ;;  %v8571_v39 = vld [vmem:[#allocation66_spill] sm:$0xff]  ;;  %v2427_v19 = vld [vmem:[#allocation2 + $0xa5] sm:$0xff] }
 0x202   : > { %5532 = vrot.lane.b32.xlu0 %v5531_v31, %s5888_s20  ;;  %5497 = vrot.lane.b32.xlu1 %v5496_v26, %s5884_s24  ;;  %v2276_v26 = vld [vmem:[#allocation2 + $0x91] sm:$0xff]  ;;  %v8568_v31 = vld [vmem:[#allocation69_spill] sm:$0xff]  ;;  %v1949_v10 = vmul.f32 %v8571_v39, %v1824_v25 }
 0x203   : > { %v7538_v12 = vpop.permute.xlu1 %2646  ;;  %v1950_v1 = vmul.f32 %v8568_v31, %v1825_v50  ;;  %v2401_v23 = vmul.f32 %v7214_v34, %v2276_v26  ;;  %v2549_v34 = vmul.f32 %v7521_v3, %v2424_v8  ;;  %v1675_v50 = vld [vmem:[#allocation2 + $0x7a] sm:$0xff]  ;;  %v1827_v26 = vld [vmem:[#allocation2 + $0x8b] sm:$0xff] }
 0x204   : > { %v8575_v8 = vld [vmem:[#allocation46_spill] sm:$0xff] }
 0x205   : > { %v5561_v32 = vpack.i.bf16 %v1950_v1, %v2550_v43  ;;  %v2275_v43 = vld [vmem:[#allocation2 + $0x89] sm:$0xff]  ;;  %v5546_v31 = vpack.i.bf16 %v1949_v10, %v2549_v34  ;;  %v2426_v34 = vld [vmem:[#allocation2 + $0x9d] sm:$0xff] }
 0x206   : > { %5542 = vrot.lane.b32.xlu0 %v5541_v35, %s5884_s24  ;;  %5507 = vrot.lane.b32.xlu1 %v5506_v0, %s5885_s7  ;;  %v1801_v35 = vmul.f32 %v8569_v37, %v1676_v38  ;;  %v8570_v0 = vld [vmem:[#allocation95_spill] sm:$0xff]  ;;  %v2400_v61 = vmul.f32 %v7266_v57, %v2275_v43  ;;  %v1975_v37 = vld [vmem:[#allocation2 + $0x87] sm:$0xff] }
 0x207   : > { %v2651_v46 = vpop.permute.xlu1 %2650  ;;  %v2098_v17 = vmul.f32 %v8570_v0, %v1973_v21  ;;  %v8573_v21 = vld [vmem:[#allocation43_spill] sm:$0xff]  ;;  %v8577_v43 = vld [vmem:[#allocation68_spill] sm:$0xff] }
 0x208   : > { %v5571_v4 = vpack.i.bf16 %v1801_v35, %v2401_v23  ;;  %v2701_v63 = vmul.f32 %v2651_v46, %v2576_v11  ;;  %v2278_v46 = vld [vmem:[#allocation2 + $0xa1] sm:$0xff]  ;;  %v1800_v27 = vmul.f32 %v8573_v21, %v1675_v50  ;;  %v8574_v23 = vld [vmem:[#allocation71_spill] sm:$0xff]  ;;  %v2578_v50 = vld [vmem:[#allocation2 + $0xae] sm:$0xff] }
 0x209   : > { %v5536_v15 = vpack.i.bf16 %v2098_v17, %v2698_v51  ;;  %v1678_v51 = vld [vmem:[#allocation2 + $0x92] sm:$0xff]  ;;  %v2403_v0 = vmul.f32 %v7229_v52, %v2278_v46  ;;  %v1826_v11 = vld [vmem:[#allocation2 + $0x83] sm:$0xff] }
 0x20a   : > { %5552 = vrot.lane.b32.xlu0 %v5551_v14, %s5885_s7  ;;  %5517 = vrot.lane.b32.xlu1 %v5516_v41, %s5888_s20  ;;  %v8572_v14 = vld [vmem:[#allocation92_spill] sm:$0xff]  ;;  %v2575_v35 = vld [vmem:[#allocation2 + $0x96] sm:$0xff]  ;;  %v5556_v57 = vpack.i.bf16 %v1800_v27, %v2400_v61 }
 0x20b   : > { %v2101_v41 = vmul.f32 %v8572_v14, %v1976_v58  ;;  %v2700_v17 = vmul.f32 %v7538_v12, %v2575_v35  ;;  %v1803_v58 = vmul.f32 %v8575_v8, %v1678_v51  ;;  %v2429_v46 = vld [vmem:[#allocation2 + $0xb5] sm:$0xff]  ;;  %v8579_v51 = vld [vmem:[#allocation45_spill] sm:$0xff] }
 0x20c   : > { %v2505_v2 = vpop.permute.xlu1 %2504 }
 0x20d   : > { %v5581_v1 = vpack.i.bf16 %v2101_v41, %v2701_v63  ;;  %v2552_v3 = vmul.f32 %v2505_v2, %v2427_v19  ;;  %v1978_v63 = vld [vmem:[#allocation2 + $0x9f] sm:$0xff]  ;;  %v5601_v39 = vpack.i.bf16 %v1803_v58, %v2403_v0  ;;  %v1677_v41 = vld [vmem:[#allocation2 + $0x8a] sm:$0xff] }
 0x20e   : > { %5562 = vrot.lane.b32.xlu0 %v5561_v32, %s5888_s20  ;;  %5527 = vrot.lane.b32.xlu1 %v5526_v7, %s5884_s24  ;;  %v1952_v7 = vmul.f32 %v8574_v23, %v1827_v26  ;;  %v2501_v32 = vpop.permute.xlu0 %2500  ;;  %v1951_v26 = vmul.f32 %v8577_v43, %v1826_v11  ;;  %v8578_v19 = vld [vmem:[#allocation96_spill] sm:$0xff] }
 0x20f   : > { %v2551_v52 = vmul.f32 %v2501_v32, %v2426_v34  ;;  %v2103_v61 = vmul.f32 %v8578_v19, %v1978_v63  ;;  %v1802_v32 = vmul.f32 %v8579_v51, %v1677_v41  ;;  %v1680_v0 = vld [vmem:[#allocation2 + $0xa2] sm:$0xff]  ;;  %v8582_v34 = vld [vmem:[#allocation103_spill] sm:$0xff] }
 0x210   : > { %v7558_v20 = vpop.permute.xlu1 %2508  ;;  %v5591_v2 = vpack.i.bf16 %v1952_v7, %v2552_v3  ;;  %v1829_v3 = vld [vmem:[#allocation2 + $0x9b] sm:$0xff]  ;;  %v2280_v7 = vld [vmem:[#allocation2 + $0xb1] sm:$0xff] }
 0x211   : > { %v5576_v27 = vpack.i.bf16 %v1951_v26, %v2551_v52  ;;  %v2405_v8 = vmul.f32 %v7245_v44, %v2280_v7  ;;  %v2580_v52 = vld [vmem:[#allocation2 + $0xbe] sm:$0xff] }
 0x212   : > { %5572 = vrot.lane.b32.xlu0 %v5571_v4, %s5884_s24  ;;  %5537 = vrot.lane.b32.xlu1 %v5536_v15, %s5885_s7  ;;  %v8576_v4 = vld [vmem:[#allocation99_spill] sm:$0xff]  ;;  %v2513_v12 = vpop.permute.xlu0 %2512  ;;  %v2705_v44 = vmul.f32 %v7326_v18, %v2580_v52  ;;  %v8583_v26 = vld [vmem:[#allocation100_spill] sm:$0xff] }
 0x213   : > { %v2100_v15 = vmul.f32 %v8576_v4, %v1975_v37  ;;  %v2554_v23 = vmul.f32 %v2513_v12, %v2429_v46  ;;  %v8580_v37 = vld [vmem:[#allocation73_spill] sm:$0xff]  ;;  %v8581_v4 = vld [vmem:[#allocation48_spill] sm:$0xff] }
 0x214   : > { %v1954_v35 = vmul.f32 %v8580_v37, %v1829_v3  ;;  %v1679_v43 = vld [vmem:[#allocation2 + $0x9a] sm:$0xff]  ;;  %v2279_v3 = vld [vmem:[#allocation2 + $0xa9] sm:$0xff] }
 0x215   : > { %v2659_v38 = vpop.permute.xlu1 %2658  ;;  %v5566_v10 = vpack.i.bf16 %v2100_v15, %v2700_v17  ;;  %v2577_v17 = vld [vmem:[#allocation2 + $0xa6] sm:$0xff]  ;;  %v1805_v15 = vmul.f32 %v8581_v4, %v1680_v0  ;;  %v8588_v4 = vld [vmem:[#allocation107_spill] sm:$0xff] }
 0x216   : > { %5582 = vrot.lane.b32.xlu0 %v5581_v1, %s5885_s7  ;;  %5547 = vrot.lane.b32.xlu1 %v5546_v31, %s5888_s20  ;;  %v2703_v14 = vmul.f32 %v2659_v38, %v2578_v50  ;;  %v2277_v1 = vld [vmem:[#allocation2 + $0x99] sm:$0xff]  ;;  %v5621_v11 = vpack.i.bf16 %v1954_v35, %v2554_v23  ;;  %v1831_v46 = vld [vmem:[#allocation2 + $0xab] sm:$0xff]  ;;  %v2282_v7 = vld [vmem:[#allocation2 + $0xc1] sm:$0xff] }
 0x217   : > { %v2402_v21 = vmul.f32 %v7275_v6, %v2277_v1  ;;  %v2702_v6 = vmul.f32 %v7314_v60, %v2577_v17  ;;  %v1828_v50 = vld [vmem:[#allocation2 + $0x93] sm:$0xff]  ;;  %v1979_v0 = vld [vmem:[#allocation2 + $0xa7] sm:$0xff] }
 0x218   : > { %v5611_v38 = vpack.i.bf16 %v2103_v61, %v2703_v14  ;;  %v5631_v14 = vpack.i.bf16 %v1805_v15, %v2405_v8  ;;  %v8584_v61 = vld [vmem:[#allocation70_spill] sm:$0xff]  ;;  %v2407_v8 = vmul.f32 %v7258_v62, %v2282_v7  ;;  %v2104_v15 = vmul.f32 %v8588_v4, %v1979_v0  ;;  %v8593_v0 = vld [vmem:[#allocation109_spill] sm:$0xff] }
 0x219   : > { %v7571_v25 = vpop.permute.xlu1 %2662  ;;  %v5586_v58 = vpack.i.bf16 %v1802_v32, %v2402_v21  ;;  %v1953_v1 = vmul.f32 %v8584_v61, %v1828_v50  ;;  %v2431_v21 = vld [vmem:[#allocation2 + $0xc5] sm:$0xff]  ;;  %v8586_v32 = vld [vmem:[#allocation75_spill] sm:$0xff] }
 0x21a   : > { %5592 = vrot.lane.b32.xlu0 %v5591_v2, %s5888_s20  ;;  %5557 = vrot.lane.b32.xlu1 %v5556_v57, %s5884_s24  ;;  %v1977_v57 = vld [vmem:[#allocation2 + $0x97] sm:$0xff]  ;;  %v1956_v37 = vmul.f32 %v8586_v32, %v1831_v46  ;;  %v1982_v50 = vld [vmem:[#allocation2 + $0xbf] sm:$0xff] }
 0x21b   : > { %v2102_v63 = vmul.f32 %v8582_v34, %v1977_v57  ;;  %v1682_v35 = vld [vmem:[#allocation2 + $0xb2] sm:$0xff]  ;;  %v1830_v34 = vld [vmem:[#allocation2 + $0xa3] sm:$0xff] }
 0x21c   : > { %v2579_v57 = vld [vmem:[#allocation2 + $0xb6] sm:$0xff] }
 0x21d   : > { %v5596_v12 = vpack.i.bf16 %v2102_v63, %v2702_v6  ;;  %v2430_v63 = vld [vmem:[#allocation2 + $0xbd] sm:$0xff] }
 0x21e   : > { %v7579_v31 = vpop.permute.xlu1 %2516  ;;  %5602 = vrot.lane.b32.xlu0 %v5601_v39, %s5884_s24  ;;  %5567 = vrot.lane.b32.xlu1 %v5566_v10, %s5885_s7  ;;  %v1980_v39 = vld [vmem:[#allocation2 + $0xaf] sm:$0xff]  ;;  %v2281_v61 = vld [vmem:[#allocation2 + $0xb9] sm:$0xff] }
 0x21f   : > { %v2428_v10 = vld [vmem:[#allocation2 + $0xad] sm:$0xff]  ;;  %v2105_v19 = vmul.f32 %v8583_v26, %v1980_v39  ;;  %v2555_v62 = vmul.f32 %v7579_v31, %v2430_v63  ;;  %v1981_v7 = vld [vmem:[#allocation2 + $0xb7] sm:$0xff] }
 0x220   : > { %v2553_v41 = vmul.f32 %v7558_v20, %v2428_v10  ;;  %v8585_v20 = vld [vmem:[#allocation47_spill] sm:$0xff]  ;;  %v2582_v39 = vld [vmem:[#allocation2 + $0xce] sm:$0xff] }
 0x221   : > { %v5641_v23 = vpack.i.bf16 %v2105_v19, %v2705_v44  ;;  %v1804_v51 = vmul.f32 %v8585_v20, %v1679_v43  ;;  %v8589_v44 = vld [vmem:[#allocation72_spill] sm:$0xff]  ;;  %v1681_v19 = vld [vmem:[#allocation2 + $0xaa] sm:$0xff]  ;;  %v8595_v63 = vld [vmem:[#allocation51_spill] sm:$0xff] }
 0x222   : > { %5612 = vrot.lane.b32.xlu0 %v5611_v38, %s5885_s7  ;;  %5577 = vrot.lane.b32.xlu1 %v5576_v27, %s5888_s20  ;;  %v2521_v2 = vpop.permute.xlu1 %2520  ;;  %v2404_v27 = vmul.f32 %v7286_v36, %v2279_v3  ;;  %v5606_v38 = vpack.i.bf16 %v1953_v1, %v2553_v41  ;;  %v2704_v36 = vmul.f32 %v7571_v25, %v2579_v57  ;;  %v2433_v25 = vld [vmem:[#allocation2 + $0xd5] sm:$0xff]  ;;  %v8590_v43 = vld [vmem:[#allocation104_spill] sm:$0xff]  ;;  %v8591_v31 = vld [vmem:[#allocation49_spill] sm:$0xff] }
 0x223   : > { %v2556_v18 = vmul.f32 %v2521_v2, %v2431_v21  ;;  %v8587_v2 = vld [vmem:[#allocation50_spill] sm:$0xff]  ;;  %v1955_v41 = vmul.f32 %v8589_v44, %v1830_v34  ;;  %v2107_v26 = vmul.f32 %v8590_v43, %v1982_v50  ;;  %v1833_v1 = vld [vmem:[#allocation2 + $0xbb] sm:$0xff]  ;;  %v2406_v3 = vmul.f32 %v7291_v30, %v2281_v61  ;;  %v2581_v20 = vld [vmem:[#allocation2 + $0xc6] sm:$0xff] }
 0x224   : > { %v5626_v10 = vpack.i.bf16 %v2104_v15, %v2704_v36  ;;  %v2106_v57 = vmul.f32 %v8593_v0, %v1981_v7  ;;  %v1832_v30 = vld [vmem:[#allocation2 + $0xb3] sm:$0xff]  ;;  %v2434_v43 = vld [vmem:[#allocation2 + $0xdd] sm:$0xf]  ;;  %v1834_v61 = vld [vmem:[#allocation2 + $0xc3] sm:$0xf] }
 0x225   : > { %v5651_v6 = vpack.i.bf16 %v1956_v37, %v2556_v18  ;;  %v5636_v46 = vpack.i.bf16 %v1955_v41, %v2555_v62  ;;  %v8594_v36 = vld [vmem:[#allocation74_spill] sm:$0xff]  ;;  %v8599_v0 = vld [vmem:[#allocation121_spill] sm:$0xff] }
 0x226   : > { %5622 = vrot.lane.b32.xlu0 %v5621_v11, %s5888_s20  ;;  %5587 = vrot.lane.b32.xlu1 %v5586_v58, %s5884_s24  ;;  %v5616_v58 = vpack.i.bf16 %v1804_v51, %v2404_v27  ;;  %v1807_v11 = vmul.f32 %v8587_v2, %v1682_v35  ;;  %v2525_v35 = vpop.permute.xlu0 %2524  ;;  %v5841_v2 = vld [vmem:[%s8374_s1] sm:$0xff]  ;;  %v2583_v34 = vld [vmem:[#allocation2 + $0xd6] sm:$0xff]  ;;  %v2284_v62 = vld [vmem:[#allocation2 + $0xd1] sm:$0xf] }
 0x227   : > { %v2671_v60 = vpop.permute.xlu1 %2670  ;;  %v2409_v44 = vmul.f32 %v7269_v28, %v2284_v62  ;;  %v5844_v62 = vld [vmem:[%s8374_s1 + $0x18] sm:$0xff] }
 0x228   : > { %v5661_v52 = vpack.i.bf16 %v1807_v11, %v2407_v8  ;;  %v2706_v32 = vmul.f32 %v2671_v60, %v2581_v20  ;;  %v1683_v60 = vld [vmem:[#allocation2 + $0xba] sm:$0xff]  ;;  %v2283_v11 = vld [vmem:[#allocation2 + $0xc9] sm:$0xff] }
 0x229   : > { %v2408_v4 = vmul.f32 %v7311_v22, %v2283_v11  ;;  %v1808_v50 = vmul.f32 %v8595_v63, %v1683_v60 }
 0x22a   : > { %5632 = vrot.lane.b32.xlu0 %v5631_v14, %s5884_s24  ;;  %5597 = vrot.lane.b32.xlu1 %v5596_v12, %s5885_s7  ;;  %v2533_v22 = vpop.permute.xlu0 %2532 }
 0x22b   : > { %v2675_v17 = vpop.permute.xlu1 %2674 }
 0x22c   : > { %v2707_v14 = vmul.f32 %v2675_v17, %v2582_v39  ;;  %v2432_v17 = vld [vmem:[#allocation2 + $0xcd] sm:$0xff] }
 0x22d   : > { %v2557_v8 = vmul.f32 %v2525_v35, %v2432_v17  ;;  %v1983_v39 = vld [vmem:[#allocation2 + $0xc7] sm:$0xff] }
 0x22e   : > { %5642 = vrot.lane.b32.xlu0 %v5641_v23, %s5885_s7  ;;  %5607 = vrot.lane.b32.xlu1 %v5606_v38, %s5888_s20  ;;  %v5671_v21 = vpack.i.bf16 %v2107_v26, %v2707_v14  ;;  %v1806_v23 = vmul.f32 %v8591_v31, %v1681_v19  ;;  %v8592_v38 = vld [vmem:[#allocation77_spill] sm:$0xff]  ;;  %v8596_v14 = vld [vmem:[#allocation111_spill] sm:$0xff]  ;;  %v8597_v26 = vld [vmem:[#allocation52_spill] sm:$0xff] }
 0x22f   : > { %v1958_v18 = vmul.f32 %v8592_v38, %v1833_v1  ;;  %v2117_v38 = vld [vmem:[#allocation2 + $0x48] sm:$0xff] }
 0x230   : > { %v2529_v12 = vpop.permute.xlu1 %2528  ;;  %v5646_v51 = vpack.i.bf16 %v1806_v23, %v2406_v3  ;;  %v2559_v3 = vmul.f32 %v2533_v22, %v2434_v43  ;;  %v5842_v35 = vld [vmem:[%s8374_s1 + $0x8] sm:$0xff]  ;;  %v3647_v22 = vld [vmem:[%s8377_s4 + $0x118] sm:$0xff]  ;;  %v8601_v43 = vld [vmem:[#allocation108_spill] sm:$0xff] }
 0x231   : > { %v2558_v27 = vmul.f32 %v2529_v12, %v2433_v25  ;;  %v2108_v12 = vmul.f32 %v8596_v14, %v1983_v39  ;;  %v1684_v25 = vld [vmem:[#allocation2 + $0xc2] sm:$0xf]  ;;  %v1984_v14 = vld [vmem:[#allocation2 + $0xcf] sm:$0xf] }
 0x232   : > { %5652 = vrot.lane.b32.xlu0 %v5651_v6, %s5888_s20  ;;  %5617 = vrot.lane.b32.xlu1 %v5616_v58, %s5884_s24  ;;  %v5656_v58 = vpack.i.bf16 %v2106_v57, %v2706_v32  ;;  %v1957_v6 = vmul.f32 %v8594_v36, %v1832_v30  ;;  %v1809_v19 = vmul.f32 %v8597_v26, %v1684_v25  ;;  %v8600_v30 = vld [vmem:[#allocation10_spill] sm:$0xff] }
 0x233   : > { %v5681_v37 = vpack.i.bf16 %v1958_v18, %v2558_v27  ;;  %v1492_v18 = vld [vmem:[#allocation2 + $0x39] sm:$0xff]  ;;  %v2242_v57 = vmul.f32 %v8599_v0, %v2117_v38  ;;  %v2109_v26 = vmul.f32 %v8601_v43, %v1984_v14  ;;  %v7702_v0 = vld [vmem:[%s8374_s1 + $0x28] sm:$0xff]  ;;  %v5847_v14 = vld [vmem:[%s8374_s1 + $0x30] sm:$0xff] }
 0x234   : > { %v5666_v15 = vpack.i.bf16 %v1957_v6, %v2557_v8  ;;  %v5692_v1 = vpack.i.bf16 %v1809_v19, %v2409_v44  ;;  %v5437_v27 = vpop.permute.xlu1 %5436  ;;  %v1642_v17 = vmul.f32 %v8600_v30, %v1492_v18  ;;  %v8602_v38 = vld [vmem:[#allocation116_spill] sm:$0xff] }
 0x235   : > { %v5439_v7 = vunpack.i.h.bf16 %v5437_v27  ;;  %v5438_v20 = vunpack.i.l.bf16 %v5437_v27 }
 0x236   : > { %5662 = vrot.lane.b32.xlu0 %v5661_v52, %s5884_s24  ;;  %5627 = vrot.lane.b32.xlu1 %v5626_v10, %s5885_s7  ;;  %v5676_v52 = vpack.i.bf16 %v1808_v50, %v2408_v4  ;;  %v2708_v10 = vmul.f32 %v7345_v13, %v2583_v34 }
 0x237   : > { %v3544_v6 = vsel %vm1404_vm3, %v2242_v57, %v5438_v20  ;;  %v3467_v60 = vsel %vm1404_vm3, %v1642_v17, %v5439_v7  ;;  %v8603_v7 = vld [vmem:[#allocation13_spill] sm:$0xff]  ;;  %v2119_v17 = vld [vmem:[#allocation2 + $0x58] sm:$0xff] }
 0x238   : > { %v5686_v41 = vpack.i.bf16 %v2108_v12, %v2708_v10  ;;  %v2584_v12 = vld [vmem:[#allocation2 + $0xde] sm:$0xf] }
 0x23a   : > { %5672 = vrot.lane.b32.xlu0 %v5671_v21, %s5885_s7  ;;  %5637 = vrot.lane.b32.xlu1 %v5636_v46, %s5888_s20  ;;  %v8598_v46 = vld [vmem:[#allocation76_spill] sm:$0xff]  ;;  %v7639_v21 = vpop.permute.xlu0 %5452 }
 0x23b   : > { %v1959_v13 = vmul.f32 %v8598_v46, %v1834_v61  ;;  %v2118_v61 = vld [vmem:[#allocation2 + $0x50] sm:$0xff]  ;;  %v5455_v46 = vunpack.i.h.bf16 %v7639_v21 }
 0x23c   : > { %v2243_v18 = vmul.f32 %v8602_v38, %v2118_v61  ;;  %v2120_v61 = vld [vmem:[#allocation2 + $0x60] sm:$0xff] }
 0x23d   : > { %v5697_v31 = vpack.i.bf16 %v1959_v13, %v2559_v3  ;;  %v5454_v13 = vunpack.i.l.bf16 %v7639_v21 }
 0x23e   : > { %5682 = vrot.lane.b32.xlu0 %v5681_v37, %s5888_s20  ;;  %5647 = vrot.lane.b32.xlu1 %v5646_v51, %s5884_s24  ;;  %v7642_v23 = vpop.permute.xlu0 %5462 }
 0x23f   : > { %v5465_v21 = vunpack.i.h.bf16 %v7642_v23  ;;  %v3545_v57 = vsel %vm1404_vm3, %v2243_v18, %v5454_v13 }
 0x242   : > { %2736 = vperm.xlu0 %5691, %v5841_v2   ;;  %5657 = vrot.lane.b32.xlu1 %v5656_v58, %s5885_s7 }
 0x246   : > { %5667 = vrot.lane.b32.xlu1 %v5666_v15, %s5888_s20 }
 0x24a   : > { %5677 = vrot.lane.b32.xlu1 %v5676_v52, %s5884_s24  ;;  %v3645_v52 = vld [vmem:[%s8377_s4 + $0x108] sm:$0xff] }
 0x24e   : > { %5687 = vrot.lane.b32.xlu1 %v5686_v41, %s5885_s7  ;;  %v3646_v41 = vld [vmem:[%s8377_s4 + $0x110] sm:$0xff] }
 0x24f   : > { %v5442_v28 = vpop.permute.xlu1 %5441  ;;  %v5283_v3 = vpack.c.bf16 %v3647_v22, %v3646_v41 }
 0x250   : > { %v5444_v51 = vunpack.i.h.bf16 %v5442_v28  ;;  %v5443_v32 = vunpack.i.l.bf16 %v5442_v28 }
 0x252   : > { %5693 = vrot.lane.b32.xlu1 %v5692_v1, %s5884_s24  ;;  %v3569_v11 = vsel %vm3485_vm6, %v3544_v6, %v5443_v32  ;;  %v3493_v4 = vsel %vm3485_vm6, %v3467_v60, %v5444_v51  ;;  %v1493_v1 = vld [vmem:[#allocation2 + $0x41] sm:$0xff] }
 0x253   : > { %v7645_v37 = vpop.permute.xlu0 %5472  ;;  %v1643_v20 = vmul.f32 %v8603_v7, %v1493_v1  ;;  %v1495_v1 = vld [vmem:[#allocation2 + $0x51] sm:$0xff] }
 0x254   : > { %v5475_v22 = vunpack.i.h.bf16 %v7645_v37 }
 0x255   : > { %v3468_v30 = vsel %vm1404_vm3, %v1643_v20, %v5455_v46 }
 0x256   : > { %5698 = vrot.lane.b32.xlu1 %v5697_v31, %s5888_s20 }
 0x257   : > { %v7659_v63 = vpop.permute.xlu0 %5482 }
 0x258   : > { %v5484_v46 = vunpack.i.l.bf16 %v7659_v63 }
 0x25a   : > { %2740 = vperm.xlu1 %5707, %v5842_v35  }
 0x25c   : > { %v5447_v8 = vpop.permute.xlu1 %5446 }
 0x25d   : > { %v5449_v58 = vunpack.i.h.bf16 %v5447_v8  ;;  %v5448_v36 = vunpack.i.l.bf16 %v5447_v8  ;;  %v1494_v8 = vld [vmem:[#allocation2 + $0x49] sm:$0xff] }
 0x25e   : > { %5708 = vset.pattern.permute.xlu1 %v8509_v24  ;;  %v5843_v24 = vld [vmem:[%s8374_s1 + $0x10] sm:$0xff] }
 0x25f   : > { %2586 = vperm.xlu1 %5708, %v5841_v2   ;;  %v3594_v15 = vsel %vm3511_vm7, %v3569_v11, %v5448_v36  ;;  %v3519_v34 = vsel %vm3511_vm7, %v3493_v4, %v5449_v58  ;;  %v3644_v2 = vld [vmem:[%s8377_s4 + $0x100] sm:$0xff] }
 0x260   : > { %3829 = vmatprep.mubr.f32.mxu1 %v3594_v15  ;;  %v5280_v10 = vpack.c.bf16 %v3645_v52, %v3644_v2  ;;  %v8605_v52 = vld [vmem:[#allocation12_spill] sm:$0xff] }
 0x261   : > { %3830 = vmatmul.mubr.f32.vlgmr.msra.gmra.mrb[0].mxu1 %v3519_v34  ;;  %v8604_v34 = vld [vmem:[#allocation123_spill] sm:$0xff] }
 0x262   : > { %5281 = vmatpush3.bf16.msra.mxu1 %v5280_v10  ;;  %v2244_v2 = vmul.f32 %v8604_v34, %v2119_v17  ;;  %v1644_v10 = vmul.f32 %v8605_v52, %v1494_v8  ;;  %v2121_v17 = vld [vmem:[#allocation2 + $0x68] sm:$0xff]  ;;  %v1496_v8 = vld [vmem:[#allocation2 + $0x59] sm:$0xff]  ;;  %v8609_v52 = vld [vmem:[#allocation14_spill] sm:$0xff] }
 0x263   : > { %2590 = vperm.xlu1 %5708, %v5842_v35   ;;  %5282 = vmatprep.subr.bf16.mxu1 %v5886_v45  ;;  %v5845_v45 = vld [vmem:[%s8374_s1 + $0x20] sm:$0xff]  ;;  %v5464_v35 = vunpack.i.l.bf16 %v7642_v23  ;;  %v8608_v34 = vld [vmem:[#allocation125_spill] sm:$0xff] }
 0x264   : > { %v7661_v50 = vpop.permute.xlu0 %5492 }
 0x266   : > { %5284 = vmatpush3.bf16.msra.mxu1 %v5283_v3  ;;  %v5485_v3 = vunpack.i.h.bf16 %v7659_v63  ;;  %v8606_v63 = vld [vmem:[#allocation118_spill] sm:$0xff] }
 0x267   : > { %2594 = vperm.xlu1 %5708, %v5843_v24   ;;  %v2245_v7 = vmul.f32 %v8606_v63, %v2120_v61  ;;  %v2122_v61 = vld [vmem:[#allocation2 + $0x70] sm:$0xff] }
 0x268   : > { %v7666_v39 = vpop.permute.xlu0 %5502 }
 0x26b   : > { %2598 = vperm.xlu1 %5708, %v5844_v62  }
 0x26c   : > { %v7677_v25 = vpop.permute.xlu0 %5512 }
 0x26d   : > { %v2683_v44 = vpop.permute.xlu1 %2682 }
 0x26e   : > { %v2709_v19 = vmul.f32 %v2683_v44, %v2584_v12 }
 0x26f   : > { %2602 = vperm.xlu1 %5708, %v5845_v45  }
 0x270   : > { %v5702_v27 = vpack.i.bf16 %v2109_v26, %v2709_v19  ;;  %v7692_v31 = vpop.permute.xlu0 %5522 }
 0x271   : > { %v5458_v28 = vpop.permute.xlu1 %5457 }
 0x272   : > { %v5460_v51 = vunpack.i.h.bf16 %v5458_v28  ;;  %v5459_v32 = vunpack.i.l.bf16 %v5458_v28  ;;  %5703 = vrot.lane.b32.xlu0 %v5702_v27, %s5885_s7 }
 0x273   : > { %2606 = vperm.xlu1 %5708, %v7702_v0  }
 0x274   : > { %v7707_v58 = vpop.permute.xlu0 %5532  ;;  %v3570_v36 = vsel %vm3485_vm6, %v3545_v57, %v5459_v32  ;;  %v3494_v6 = vsel %vm3485_vm6, %v3468_v30, %v5460_v51  ;;  %v3547_v57 = vsel %vm1404_vm3, %v2245_v7, %v5484_v46  ;;  %v5514_v46 = vunpack.i.l.bf16 %v7677_v25 }
 0x275   : > { %v5468_v23 = vpop.permute.xlu1 %5467  ;;  %v3595_v60 = vsel %vm3511_vm7, %v3570_v36, %v5464_v35  ;;  %v3520_v11 = vsel %vm3511_vm7, %v3494_v6, %v5465_v21  ;;  %v5495_v21 = vunpack.i.h.bf16 %v7661_v50  ;;  %v5494_v35 = vunpack.i.l.bf16 %v7661_v50  ;;  %v5849_v36 = vld [vmem:[%s8374_s1 + $0x60] sm:$0xff] }
 0x276   : > { %v5470_v4 = vunpack.i.h.bf16 %v5468_v23  ;;  %v5469_v15 = vunpack.i.l.bf16 %v5468_v23  ;;  %2744 = vperm.xlu0 %5691, %v5843_v24   ;;  %3834 = vmatprep.mubr.f32.mxu1 %v3595_v60  ;;  %v5474_v24 = vunpack.i.l.bf16 %v7645_v37  ;;  %v5848_v37 = vld [vmem:[%s8374_s1 + $0x50] sm:$0xff] }
 0x277   : > { %2610 = vperm.xlu1 %5708, %v5847_v14   ;;  %3835 = vmatmul.mubr.f32.gmra.mrb[2].mxu1 %v3520_v11 }
 0x278   : > { %v7718_v12 = vpop.permute.xlu0 %5542  ;;  %v3546_v44 = vsel %vm1404_vm3, %v2244_v2, %v5469_v15  ;;  %v3469_v41 = vsel %vm1404_vm3, %v1644_v10, %v5470_v4  ;;  %v2246_v2 = vmul.f32 %v8608_v34, %v2121_v17  ;;  %v1646_v10 = vmul.f32 %v8609_v52, %v1496_v8  ;;  %v1498_v17 = vld [vmem:[#allocation2 + $0x69] sm:$0xff]  ;;  %v8612_v34 = vld [vmem:[#allocation128_spill] sm:$0xff] }
 0x279   : > { %v5478_v43 = vpop.permute.xlu1 %5477  ;;  %v3571_v13 = vsel %vm3485_vm6, %v3546_v44, %v5474_v24  ;;  %v3495_v27 = vsel %vm3485_vm6, %v3469_v41, %v5475_v22  ;;  %v5850_v44 = vld [vmem:[%s8374_s1 + $0x70] sm:$0xff]  ;;  %v5505_v24 = vunpack.i.h.bf16 %v7666_v39  ;;  %v8613_v52 = vld [vmem:[#allocation16_spill] sm:$0xff] }
 0x27a   : > { %v5480_v26 = vunpack.i.h.bf16 %v5478_v43  ;;  %v5479_v19 = vunpack.i.l.bf16 %v5478_v43  ;;  %2748 = vperm.xlu0 %5691, %v5844_v62   ;;  %v5504_v43 = vunpack.i.l.bf16 %v7666_v39  ;;  %v5851_v39 = vld [vmem:[%s8374_s1 + $0x80] sm:$0xff]  ;;  %v5853_v8 = vld [vmem:[%s8374_s1 + $0x90] sm:$0xff] }
 0x27b   : > { %5709 = vset.pattern.permute.xlu1 %v8556_v49  ;;  %v8607_v49 = vld [vmem:[#allocation15_spill] sm:$0xff] }
 0x27c   : > { %v7729_v28 = vpop.permute.xlu0 %5552  ;;  %2776 = vperm.xlu1 %5709, %v5848_v37   ;;  %v3596_v62 = vsel %vm3511_vm7, %v3571_v13, %v5479_v19  ;;  %v3521_v38 = vsel %vm3511_vm7, %v3495_v27, %v5480_v26  ;;  %v1645_v20 = vmul.f32 %v8607_v49, %v1495_v1  ;;  %v1497_v1 = vld [vmem:[#allocation2 + $0x61] sm:$0xff] }
 0x27d   : > { %v5488_v18 = vpop.permute.xlu1 %5487  ;;  %3839 = vmatprep.mubr.f32.mxu1 %v3596_v62 }
 0x27e   : > { %v5490_v51 = vunpack.i.h.bf16 %v5488_v18  ;;  %v5489_v32 = vunpack.i.l.bf16 %v5488_v18  ;;  %2752 = vperm.xlu0 %5691, %v5845_v45   ;;  %3840 = vmatmul.mubr.f32.gmra.mrb[4].mxu1 %v3521_v38  ;;  %v3470_v30 = vsel %vm1404_vm3, %v1645_v20, %v5485_v3  ;;  %v5515_v3 = vunpack.i.h.bf16 %v7677_v25  ;;  %v8610_v18 = vld [vmem:[#allocation120_spill] sm:$0xff]  ;;  %v8611_v25 = vld [vmem:[#allocation17_spill] sm:$0xff] }
 0x27f   : > { %v2247_v63 = vmul.f32 %v8610_v18, %v2122_v61  ;;  %v1647_v7 = vmul.f32 %v8611_v25, %v1497_v1  ;;  %v5856_v61 = vld [vmem:[%s8374_s1 + $0x48] sm:$0xff]  ;;  %v2124_v1 = vld [vmem:[#allocation2 + $0x80] sm:$0xff]  ;;  %v8614_v18 = vld [vmem:[#allocation122_spill] sm:$0xff] }
 0x280   : > { %2784 = vperm.xlu1 %5709, %v5849_v36   ;;  %v3572_v6 = vsel %vm3485_vm6, %v3547_v57, %v5489_v32  ;;  %v3496_v45 = vsel %vm3485_vm6, %v3470_v30, %v5490_v51  ;;  %v7749_v11 = vpop.permute.xlu0 %5562  ;;  %v5852_v51 = vld [vmem:[%s8374_s1 + $0x38] sm:$0xff]  ;;  %v5525_v32 = vunpack.i.h.bf16 %v7692_v31 }
 0x281   : > { %v5498_v23 = vpop.permute.xlu1 %5497  ;;  %v3597_v60 = vsel %vm3511_vm7, %v3572_v6, %v5494_v35  ;;  %v3522_v50 = vsel %vm3511_vm7, %v3496_v45, %v5495_v21  ;;  %v5524_v21 = vunpack.i.l.bf16 %v7692_v31  ;;  %v3549_v35 = vsel %vm1404_vm3, %v2247_v63, %v5514_v46  ;;  %v2123_v30 = vld [vmem:[#allocation2 + $0x78] sm:$0xff] }
 0x282   : > { %v5500_v4 = vunpack.i.h.bf16 %v5498_v23  ;;  %v5499_v15 = vunpack.i.l.bf16 %v5498_v23  ;;  %2756 = vperm.xlu0 %5691, %v7702_v0   ;;  %3844 = vmatprep.mubr.f32.mxu1 %v3597_v60  ;;  %v3472_v57 = vsel %vm1404_vm3, %v1647_v7, %v5515_v3  ;;  %v1499_v3 = vld [vmem:[#allocation2 + $0x71] sm:$0xff]  ;;  %v5545_v46 = vunpack.i.h.bf16 %v7718_v12 }
 0x283   : > { %3845 = vmatmul.mubr.f32.gmra.mrb[6].mxu1 %v3522_v50  ;;  %v2249_v63 = vmul.f32 %v8614_v18, %v2124_v1  ;;  %v8615_v25 = vld [vmem:[#allocation19_spill] sm:$0xff]  ;;  %v1660_v1 = vld [vmem:[#allocation2 + $0x2] sm:$0xff] }
 0x284   : > { %2792 = vperm.xlu1 %5709, %v5850_v44   ;;  %v3548_v41 = vsel %vm1404_vm3, %v2246_v2, %v5499_v15  ;;  %v3471_v22 = vsel %vm1404_vm3, %v1646_v10, %v5500_v4  ;;  %v7765_v37 = vpop.permute.xlu0 %5572  ;;  %v5854_v15 = vld [vmem:[%s8374_s1 + $0x40] sm:$0xff]  ;;  %v2248_v2 = vmul.f32 %v8612_v34, %v2123_v30  ;;  %v1648_v10 = vmul.f32 %v8613_v52, %v1498_v17  ;;  %v5855_v44 = vld [vmem:[%s8374_s1 + $0x98] sm:$0xff]  ;;  %v8617_v34 = vld [vmem:[#allocation18_spill] sm:$0xff] }
 0x285   : > { %v5508_v0 = vpop.permute.xlu1 %5507  ;;  %v3573_v13 = vsel %vm3485_vm6, %v3548_v41, %v5504_v43  ;;  %v3497_v27 = vsel %vm3485_vm6, %v3471_v22, %v5505_v24  ;;  %v5535_v24 = vunpack.i.h.bf16 %v7707_v58  ;;  %v5534_v43 = vunpack.i.l.bf16 %v7707_v58  ;;  %v1500_v30 = vld [vmem:[#allocation2 + $0x79] sm:$0xff] }
 0x286   : > { %v5510_v26 = vunpack.i.h.bf16 %v5508_v0  ;;  %v5509_v19 = vunpack.i.l.bf16 %v5508_v0  ;;  %2760 = vperm.xlu0 %5691, %v5847_v14   ;;  %v1649_v7 = vmul.f32 %v8615_v25, %v1499_v3  ;;  %v5575_v3 = vunpack.i.h.bf16 %v7765_v37  ;;  %v8618_v18 = vld [vmem:[#allocation124_spill] sm:$0xff]  ;;  %v8619_v25 = vld [vmem:[#allocation21_spill] sm:$0xff] }
 0x288   : > { %2800 = vperm.xlu1 %5709, %v5851_v39   ;;  %v3598_v62 = vsel %vm3511_vm7, %v3573_v13, %v5509_v19  ;;  %v3523_v14 = vsel %vm3511_vm7, %v3497_v27, %v5510_v26  ;;  %v7788_v60 = vpop.permute.xlu0 %5582  ;;  %v5544_v13 = vunpack.i.l.bf16 %v7718_v12  ;;  %v5857_v12 = vld [vmem:[%s8374_s1 + $0x58] sm:$0xff] }
 0x289   : > { %v5518_v38 = vpop.permute.xlu1 %5517  ;;  %3849 = vmatprep.mubr.f32.mxu1 %v3598_v62 }
 0x28a   : > { %v5520_v49 = vunpack.i.h.bf16 %v5518_v38  ;;  %v5519_v20 = vunpack.i.l.bf16 %v5518_v38  ;;  %2764 = vperm.xlu0 %5691, %v5852_v51   ;;  %3850 = vmatmul.mubr.f32.gmra.mrb[8].mxu1 %v3523_v14  ;;  %v5555_v51 = vunpack.i.h.bf16 %v7729_v28 }
 0x28c   : > { %2808 = vperm.xlu1 %5709, %v5853_v8   ;;  %v3574_v36 = vsel %vm3485_vm6, %v3549_v35, %v5519_v20  ;;  %v3498_v6 = vsel %vm3485_vm6, %v3472_v57, %v5520_v49  ;;  %v7809_v62 = vpop.permute.xlu0 %5592  ;;  %v3474_v35 = vsel %vm1404_vm3, %v1649_v7, %v5545_v46  ;;  %v2125_v57 = vld [vmem:[#allocation2 + $0x88] sm:$0xff]  ;;  %v5574_v46 = vunpack.i.l.bf16 %v7765_v37 }
 0x28d   : > { %v5528_v45 = vpop.permute.xlu1 %5527  ;;  %v3599_v23 = vsel %vm3511_vm7, %v3574_v36, %v5524_v21  ;;  %v3524_v31 = vsel %vm3511_vm7, %v3498_v6, %v5525_v32  ;;  %v5554_v32 = vunpack.i.l.bf16 %v7729_v28  ;;  %v3551_v21 = vsel %vm1404_vm3, %v2249_v63, %v5544_v13  ;;  %v5858_v28 = vld [vmem:[%s8374_s1 + $0x68] sm:$0xff] }
 0x28e   : > { %v5530_v50 = vunpack.i.h.bf16 %v5528_v45  ;;  %v5529_v4 = vunpack.i.l.bf16 %v5528_v45  ;;  %2768 = vperm.xlu0 %5691, %v5854_v15   ;;  %3854 = vmatprep.mubr.f32.mxu1 %v3599_v23 }
 0x28f   : > { %3855 = vmatmul.mubr.f32.gmra.mrb[10].mxu1 %v3524_v31 }
 0x290   : > { %2812 = vperm.xlu1 %5709, %v5855_v44   ;;  %v3550_v41 = vsel %vm1404_vm3, %v2248_v2, %v5529_v4  ;;  %v3473_v22 = vsel %vm1404_vm3, %v1648_v10, %v5530_v50  ;;  %v7826_v23 = vpop.permute.xlu0 %5602  ;;  %v8616_v4 = vld [vmem:[#allocation132_spill] sm:$0xff]  ;;  %v1650_v2 = vmul.f32 %v8617_v34, %v1500_v30  ;;  %v2260_v44 = vld [vmem:[#allocation2 + $0x11] sm:$0xff] }
 0x291   : > { %v5538_v0 = vpop.permute.xlu1 %5537  ;;  %v3575_v27 = vsel %vm3485_vm6, %v3550_v41, %v5534_v43  ;;  %v3499_v39 = vsel %vm3485_vm6, %v3473_v22, %v5535_v24  ;;  %v2250_v15 = vmul.f32 %v8616_v4, %v2125_v57  ;;  %v5565_v41 = vunpack.i.h.bf16 %v7749_v11  ;;  %v2261_v4 = vld [vmem:[#allocation2 + $0x19] sm:$0xff] }
 0x292   : > { %v5540_v26 = vunpack.i.h.bf16 %v5538_v0  ;;  %v5539_v19 = vunpack.i.l.bf16 %v5538_v0  ;;  %2772 = vperm.xlu0 %5691, %v5856_v61   ;;  %v5564_v22 = vunpack.i.l.bf16 %v7749_v11  ;;  %v1501_v61 = vld [vmem:[#allocation2 + $0x81] sm:$0xff]  ;;  %v2385_v11 = vmul.f32 %v7145_v48, %v2260_v44 }
 0x293   : > { %v1651_v7 = vmul.f32 %v8619_v25, %v1501_v61  ;;  %v5860_v48 = vld [vmem:[%s8374_s1 + $0x88] sm:$0xff]  ;;  %v5595_v61 = vunpack.i.h.bf16 %v7809_v62 }
 0x294   : > { %v3600_v58 = vsel %vm3511_vm7, %v3575_v27, %v5539_v19  ;;  %v3525_v14 = vsel %vm3511_vm7, %v3499_v39, %v5540_v26  ;;  %v5859_v26 = vld [vmem:[%s8374_s1 + $0x78] sm:$0xff]  ;;  %v2126_v19 = vld [vmem:[#allocation2 + $0x90] sm:$0xff]  ;;  %v7845_v39 = vpop.permute.xlu0 %5612 }
 0x295   : > { %v5548_v38 = vpop.permute.xlu1 %5547  ;;  %3859 = vmatprep.mubr.f32.mxu1 %v3600_v58  ;;  %v2251_v63 = vmul.f32 %v8618_v18, %v2126_v19  ;;  %v3476_v30 = vsel %vm1404_vm3, %v1651_v7, %v5575_v3  ;;  %v5605_v18 = vunpack.i.h.bf16 %v7826_v23 }
 0x296   : > { %v5550_v49 = vunpack.i.h.bf16 %v5548_v38  ;;  %v5549_v20 = vunpack.i.l.bf16 %v5548_v38  ;;  %2780 = vperm.xlu0 %5691, %v5857_v12   ;;  %3860 = vmatmul.mubr.f32.gmra.mrb[12].mxu1 %v3525_v14 }
 0x297   : > { %v3553_v57 = vsel %vm1404_vm3, %v2251_v63, %v5574_v46  ;;  %v8624_v46 = vld [vmem:[#allocation31_spill] sm:$0xff]  ;;  %v5604_v63 = vunpack.i.l.bf16 %v7826_v23 }
 0x298   : > { %v3576_v17 = vsel %vm3485_vm6, %v3551_v21, %v5549_v20  ;;  %v3500_v8 = vsel %vm3485_vm6, %v3474_v35, %v5550_v49  ;;  %v8620_v49 = vld [vmem:[#allocation29_spill] sm:$0xff]  ;;  %v5585_v21 = vunpack.i.h.bf16 %v7788_v60  ;;  %v5584_v35 = vunpack.i.l.bf16 %v7788_v60 }
 0x299   : > { %v5558_v36 = vpop.permute.xlu1 %5557  ;;  %v3601_v6 = vsel %vm3511_vm7, %v3576_v17, %v5554_v32  ;;  %v3526_v45 = vsel %vm3511_vm7, %v3500_v8, %v5555_v51  ;;  %v1785_v37 = vmul.f32 %v8620_v49, %v1660_v1  ;;  %v1810_v20 = vld [vmem:[#allocation2 + $0x3] sm:$0xff]  ;;  %v2127_v17 = vld [vmem:[#allocation2 + $0x98] sm:$0xff]  ;;  %v5594_v1 = vunpack.i.l.bf16 %v7809_v62 }
 0x29a   : > { %v5560_v31 = vunpack.i.h.bf16 %v5558_v36  ;;  %v5559_v50 = vunpack.i.l.bf16 %v5558_v36  ;;  %2788 = vperm.xlu0 %5691, %v5858_v28   ;;  %3864 = vmatprep.mubr.f32.mxu1 %v3601_v6  ;;  %v2410_v32 = vld [vmem:[#allocation2 + $0x1d] sm:$0xff]  ;;  %v1502_v8 = vld [vmem:[#allocation2 + $0x89] sm:$0xff] }
 0x29b   : > { %3865 = vmatmul.mubr.f32.gmra.mrb[14].mxu1 %v3526_v45  ;;  %v5710_v36 = vpack.i.bf16 %v1785_v37, %v2385_v11  ;;  %v2535_v6 = vmul.f32 %v7324_v47, %v2410_v32  ;;  %v8622_v47 = vld [vmem:[#allocation135_spill] sm:$0xff] }
 0x29c   : > { %v3552_v52 = vsel %vm1404_vm3, %v2250_v15, %v5559_v50  ;;  %v3475_v10 = vsel %vm1404_vm3, %v1650_v2, %v5560_v31  ;;  %v8621_v50 = vld [vmem:[#allocation53_spill] sm:$0xff]  ;;  %v7865_v2 = vpop.permute.xlu0 %5622  ;;  %v2252_v44 = vmul.f32 %v8622_v47, %v2127_v17  ;;  %v8625_v32 = vld [vmem:[#allocation127_spill] sm:$0xff] }
 0x29d   : > { %v5568_v24 = vpop.permute.xlu1 %5567  ;;  %v3577_v13 = vsel %vm3485_vm6, %v3552_v52, %v5564_v22  ;;  %v3501_v27 = vsel %vm3485_vm6, %v3475_v10, %v5565_v41  ;;  %v1935_v28 = vmul.f32 %v8621_v50, %v1810_v20  ;;  %v8623_v41 = vld [vmem:[#allocation20_spill] sm:$0xff]  ;;  %v2129_v50 = vld [vmem:[#allocation2 + $0xa8] sm:$0xff] }
 0x29e   : > { %v5570_v43 = vunpack.i.h.bf16 %v5568_v24  ;;  %v5569_v0 = vunpack.i.l.bf16 %v5568_v24  ;;  %2796 = vperm.xlu0 %5691, %v5859_v26   ;;  %v1652_v22 = vmul.f32 %v8623_v41, %v1502_v8  ;;  %v1661_v24 = vld [vmem:[#allocation2 + $0xa] sm:$0xff] }
 0x2a0   : > { %v3602_v58 = vsel %vm3511_vm7, %v3577_v13, %v5569_v0  ;;  %v3527_v14 = vsel %vm3511_vm7, %v3501_v27, %v5570_v43  ;;  %v2386_v43 = vmul.f32 %v7103_v33, %v2261_v4  ;;  %v5715_v0 = vpack.i.bf16 %v1935_v28, %v2535_v6  ;;  %v2411_v33 = vld [vmem:[#allocation2 + $0x25] sm:$0xff]  ;;  %v7882_v37 = vpop.permute.xlu0 %5632  ;;  %v1504_v28 = vld [vmem:[#allocation2 + $0x99] sm:$0xff] }
 0x2a1   : > { %v5578_v38 = vpop.permute.xlu1 %5577  ;;  %3869 = vmatprep.mubr.f32.mxu1 %v3602_v58  ;;  %v1786_v13 = vmul.f32 %v8624_v46, %v1661_v24  ;;  %v2128_v58 = vld [vmem:[#allocation2 + $0xa0] sm:$0xff]  ;;  %v2536_v49 = vmul.f32 %v7360_v29, %v2411_v33  ;;  %v5615_v29 = vunpack.i.h.bf16 %v7845_v39  ;;  %v5614_v6 = vunpack.i.l.bf16 %v7845_v39  ;;  %v2130_v33 = vld [vmem:[#allocation2 + $0xb0] sm:$0xff] }
 0x2a2   : > { %v5580_v12 = vunpack.i.h.bf16 %v5578_v38  ;;  %v5579_v51 = vunpack.i.l.bf16 %v5578_v38  ;;  %2804 = vperm.xlu0 %5691, %v5860_v48   ;;  %3870 = vmatmul.mubr.f32.gmra.mrb[16].mxu1 %v3527_v14  ;;  %v1503_v14 = vld [vmem:[#allocation2 + $0x91] sm:$0xff] }
 0x2a3   : > { %v1811_v38 = vld [vmem:[#allocation2 + $0xb] sm:$0xff]  ;;  %v5725_v62 = vpack.i.bf16 %v1786_v13, %v2386_v43  ;;  %v5625_v13 = vunpack.i.h.bf16 %v7865_v2 }
 0x2a4   : > { %v3578_v45 = vsel %vm3485_vm6, %v3553_v57, %v5579_v51  ;;  %v3502_v31 = vsel %vm3485_vm6, %v3476_v30, %v5580_v12  ;;  %v2262_v51 = vld [vmem:[#allocation2 + $0x21] sm:$0xff]  ;;  %v1662_v57 = vld [vmem:[#allocation2 + $0x12] sm:$0xff]  ;;  %v5643_v41 = vpop.permute.xlu0 %5642 }
 0x2a5   : > { %v5588_v15 = vpop.permute.xlu1 %5587  ;;  %v3603_v34 = vsel %vm3511_vm7, %v3578_v45, %v5584_v35  ;;  %v3528_v60 = vsel %vm3511_vm7, %v3502_v31, %v5585_v21  ;;  %v2253_v21 = vmul.f32 %v8625_v32, %v2128_v58  ;;  %v8626_v35 = vld [vmem:[#allocation23_spill] sm:$0xff]  ;;  %v8627_v30 = vld [vmem:[#allocation54_spill] sm:$0xff]  ;;  %v2387_v4 = vmul.f32 %v7160_v53, %v2262_v51 }
 0x2a6   : > { %v5590_v52 = vunpack.i.h.bf16 %v5588_v15  ;;  %v5589_v10 = vunpack.i.l.bf16 %v5588_v15  ;;  %3874 = vmatprep.mubr.f32.mxu1 %v3603_v34  ;;  %5711 = vrot.lane.b32.xlu0 %v5710_v36, %s5884_s24  ;;  %v1653_v23 = vmul.f32 %v8626_v35, %v1503_v14  ;;  %v1936_v17 = vmul.f32 %v8627_v30, %v1811_v38  ;;  %v8629_v43 = vld [vmem:[#allocation22_spill] sm:$0xff]  ;;  %v8630_v58 = vld [vmem:[#allocation55_spill] sm:$0xff]  ;;  %v8633_v30 = vld [vmem:[#allocation32_spill] sm:$0xff] }
 0x2a7   : > { %3875 = vmatmul.mubr.f32.gmra.mrb[18].mxu1 %v3528_v60  ;;  %v3555_v45 = vsel %vm1404_vm3, %v2253_v21, %v5604_v63  ;;  %v2254_v53 = vmul.f32 %v7094_v55, %v2129_v50  ;;  %v1663_v63 = vld [vmem:[#allocation2 + $0x1a] sm:$0xff] }
 0x2a8   : > { %v3554_v26 = vsel %vm1404_vm3, %v2252_v44, %v5589_v10  ;;  %v3477_v19 = vsel %vm1404_vm3, %v1652_v22, %v5590_v52  ;;  %v3478_v31 = vsel %vm1404_vm3, %v1653_v23, %v5605_v18  ;;  %v5730_v15 = vpack.i.bf16 %v1936_v17, %v2536_v49  ;;  %v8628_v52 = vld [vmem:[#allocation30_spill] sm:$0xff]  ;;  %v1505_v18 = vld [vmem:[#allocation2 + $0xa1] sm:$0xff]  ;;  %v8631_v21 = vld [vmem:[#allocation131_spill] sm:$0xff] }
 0x2a9   : > { %v5598_v3 = vpop.permute.xlu1 %5597  ;;  %v3579_v25 = vsel %vm3485_vm6, %v3554_v26, %v5594_v1  ;;  %v3503_v7 = vsel %vm3485_vm6, %v3477_v19, %v5595_v61  ;;  %v1787_v10 = vmul.f32 %v8628_v52, %v1662_v57  ;;  %v1812_v26 = vld [vmem:[#allocation2 + $0x13] sm:$0xff]  ;;  %v2255_v35 = vmul.f32 %v8631_v21, %v2130_v33  ;;  %v8632_v23 = vld [vmem:[#allocation25_spill] sm:$0xff]  ;;  %v1813_v17 = vld [vmem:[#allocation2 + $0x1b] sm:$0xff] }
 0x2aa   : > { %v5600_v27 = vunpack.i.h.bf16 %v5598_v3  ;;  %v5599_v11 = vunpack.i.l.bf16 %v5598_v3  ;;  %5716 = vrot.lane.b32.xlu0 %v5715_v0, %s5888_s20  ;;  %v1654_v0 = vmul.f32 %v8629_v43, %v1504_v28  ;;  %v2412_v19 = vld [vmem:[#allocation2 + $0x2d] sm:$0xff]  ;;  %v1937_v14 = vmul.f32 %v8630_v58, %v1812_v26  ;;  %v2131_v50 = vld [vmem:[#allocation2 + $0xb8] sm:$0xff]  ;;  %v8635_v43 = vld [vmem:[#allocation24_spill] sm:$0xff] }
 0x2ab   : > { %v5740_v61 = vpack.i.bf16 %v1787_v10, %v2387_v4  ;;  %v2537_v1 = vmul.f32 %v7336_v59, %v2412_v19  ;;  %v5635_v59 = vunpack.i.h.bf16 %v7882_v37  ;;  %v1655_v57 = vmul.f32 %v8632_v23, %v1505_v18  ;;  %v1506_v28 = vld [vmem:[#allocation2 + $0xa9] sm:$0xff]  ;;  %v2264_v52 = vld [vmem:[#allocation2 + $0x31] sm:$0xff]  ;;  %v2414_v18 = vld [vmem:[#allocation2 + $0x3d] sm:$0xff] }
 0x2ac   : > { %v3604_v20 = vsel %vm3511_vm7, %v3579_v25, %v5599_v11  ;;  %v3529_v12 = vsel %vm3511_vm7, %v3503_v7, %v5600_v27  ;;  %v5624_v27 = vunpack.i.l.bf16 %v7865_v2  ;;  %v2263_v25 = vld [vmem:[#allocation2 + $0x29] sm:$0xff]  ;;  %v5634_v7 = vunpack.i.l.bf16 %v7882_v37  ;;  %v8639_v23 = vld [vmem:[#allocation56_spill] sm:$0xff] }
 0x2ad   : > { %v5608_v48 = vpop.permute.xlu1 %5607  ;;  %3879 = vmatprep.mubr.f32.mxu1 %v3604_v20  ;;  %v2388_v2 = vmul.f32 %v7175_v54, %v2263_v25  ;;  %v5745_v20 = vpack.i.bf16 %v1937_v14, %v2537_v1  ;;  %v1788_v37 = vmul.f32 %v8633_v30, %v1663_v63  ;;  %v2413_v54 = vld [vmem:[#allocation2 + $0x35] sm:$0xff]  ;;  %v8634_v10 = vld [vmem:[#allocation57_spill] sm:$0xff]  ;;  %v2389_v19 = vmul.f32 %v7118_v9, %v2264_v52 }
 0x2ae   : > { %v5610_v8 = vunpack.i.h.bf16 %v5608_v48  ;;  %v5609_v36 = vunpack.i.l.bf16 %v5608_v48  ;;  %3880 = vmatmul.mubr.f32.gmra.mrb[20].mxu1 %v3529_v12  ;;  %5726 = vrot.lane.b32.xlu0 %v5725_v62, %s5884_s24  ;;  %v5653_v12 = vpop.permute.xlu0 %5652  ;;  %v1664_v26 = vld [vmem:[#allocation2 + $0x22] sm:$0xff] }
 0x2af   : > { %v5755_v4 = vpack.i.bf16 %v1788_v37, %v2388_v2  ;;  %v1814_v33 = vld [vmem:[#allocation2 + $0x23] sm:$0xff] }
 0x2b0   : > { %v3580_v34 = vsel %vm3485_vm6, %v3555_v45, %v5609_v36  ;;  %v3504_v60 = vsel %vm3485_vm6, %v3478_v31, %v5610_v8  ;;  %v3557_v45 = vsel %vm1404_vm3, %v2255_v35, %v5634_v7  ;;  %v3480_v31 = vsel %vm1404_vm3, %v1655_v57, %v5635_v59  ;;  %v1665_v35 = vld [vmem:[#allocation2 + $0x2a] sm:$0xff] }
 0x2b1   : > { %v5618_v47 = vpop.permute.xlu1 %5617  ;;  %v3605_v44 = vsel %vm3511_vm7, %v3580_v34, %v5614_v6  ;;  %v3530_v39 = vsel %vm3511_vm7, %v3504_v60, %v5615_v29  ;;  %v5645_v29 = vunpack.i.h.bf16 %v5643_v41  ;;  %v5644_v6 = vunpack.i.l.bf16 %v5643_v41 }
 0x2b2   : > { %v5620_v22 = vunpack.i.h.bf16 %v5618_v47  ;;  %v5619_v24 = vunpack.i.l.bf16 %v5618_v47  ;;  %3884 = vmatprep.mubr.f32.mxu1 %v3605_v44  ;;  %5731 = vrot.lane.b32.xlu0 %v5730_v15, %s5888_s20  ;;  %v2538_v15 = vmul.f32 %v7348_v16, %v2413_v54  ;;  %v1938_v47 = vmul.f32 %v8634_v10, %v1813_v17 }
 0x2b3   : > { %3885 = vmatmul.mubr.f32.gmra.mrb[22].mxu1 %v3530_v39  ;;  %v2256_v16 = vmul.f32 %v7108_v5, %v2131_v50  ;;  %v2132_v5 = vld [vmem:[#allocation2 + $0xc0] sm:$0xff]  ;;  %v1939_v57 = vmul.f32 %v8639_v23, %v1814_v33 }
 0x2b4   : > { %v3556_v3 = vsel %vm1404_vm3, %v2254_v53, %v5619_v24  ;;  %v3479_v46 = vsel %vm1404_vm3, %v1654_v0, %v5620_v22  ;;  %v5663_v22 = vpop.permute.xlu0 %5662  ;;  %v1656_v0 = vmul.f32 %v8635_v43, %v1506_v28  ;;  %v1509_v23 = vld [vmem:[#allocation2 + $0xc1] sm:$0xf] }
 0x2b5   : > { %v5628_v11 = vpop.permute.xlu1 %5627  ;;  %v3581_v62 = vsel %vm3485_vm6, %v3556_v3, %v5624_v27  ;;  %v3505_v49 = vsel %vm3485_vm6, %v3479_v46, %v5625_v13  ;;  %v5655_v46 = vunpack.i.h.bf16 %v5653_v12  ;;  %v5654_v13 = vunpack.i.l.bf16 %v5653_v12 }
 0x2b6   : > { %v5630_v55 = vunpack.i.h.bf16 %v5628_v11  ;;  %v5629_v38 = vunpack.i.l.bf16 %v5628_v11  ;;  %5741 = vrot.lane.b32.xlu0 %v5740_v61, %s5884_s24  ;;  %v5760_v61 = vpack.i.bf16 %v1938_v47, %v2538_v15  ;;  %v8636_v11 = vld [vmem:[#allocation33_spill] sm:$0xff]  ;;  %v5665_v63 = vunpack.i.h.bf16 %v5663_v22 }
 0x2b7   : > { %v1789_v58 = vmul.f32 %v8636_v11, %v1664_v26  ;;  %v5664_v9 = vunpack.i.l.bf16 %v5663_v22  ;;  %v1815_v22 = vld [vmem:[#allocation2 + $0x2b] sm:$0xff] }
 0x2b8   : > { %v3606_v51 = vsel %vm3511_vm7, %v3581_v62, %v5629_v38  ;;  %v3531_v48 = vsel %vm3511_vm7, %v3505_v49, %v5630_v55  ;;  %v1507_v38 = vld [vmem:[#allocation2 + $0xb1] sm:$0xff]  ;;  %v2539_v62 = vmul.f32 %v7378_v56, %v2414_v18  ;;  %v5673_v49 = vpop.permute.xlu0 %5672  ;;  %v2265_v56 = vld [vmem:[#allocation2 + $0x39] sm:$0xff] }
 0x2b9   : > { %v5638_v32 = vpop.permute.xlu1 %5637  ;;  %3889 = vmatprep.mubr.f32.mxu1 %v3606_v51  ;;  %v5770_v7 = vpack.i.bf16 %v1789_v58, %v2389_v19  ;;  %v8637_v51 = vld [vmem:[#allocation133_spill] sm:$0xff]  ;;  %v5675_v17 = vunpack.i.h.bf16 %v5673_v49  ;;  %v1666_v11 = vld [vmem:[#allocation2 + $0x32] sm:$0xff] }
 0x2ba   : > { %v5640_v8 = vunpack.i.h.bf16 %v5638_v32  ;;  %v5639_v36 = vunpack.i.l.bf16 %v5638_v32  ;;  %3890 = vmatmul.mubr.f32.gmra.mrb[24].mxu1 %v3531_v48  ;;  %5746 = vrot.lane.b32.xlu0 %v5745_v20, %s5888_s20  ;;  %v2257_v48 = vmul.f32 %v8637_v51, %v2132_v5  ;;  %v8638_v32 = vld [vmem:[#allocation27_spill] sm:$0xff]  ;;  %v2266_v19 = vld [vmem:[#allocation2 + $0x41] sm:$0xff] }
 0x2bb   : > { %v1657_v21 = vmul.f32 %v8638_v32, %v1507_v38  ;;  %v2134_v32 = vld [vmem:[#allocation2 + $0xd0] sm:$0xf] }
 0x2bc   : > { %v3582_v34 = vsel %vm3485_vm6, %v3557_v45, %v5639_v36  ;;  %v3506_v60 = vsel %vm3485_vm6, %v3480_v31, %v5640_v8  ;;  %v5674_v8 = vunpack.i.l.bf16 %v5673_v49  ;;  %v3559_v36 = vsel %vm1404_vm3, %v2257_v48, %v5664_v9  ;;  %v5683_v10 = vpop.permute.xlu0 %5682  ;;  %v8645_v9 = vld [vmem:[#allocation35_spill] sm:$0xff]  ;;  %v1960_v49 = vld [vmem:[#allocation2 + $0xf] sm:$0xff] }
 0x2bd   : > { %v5648_v44 = vpop.permute.xlu1 %5647  ;;  %v3607_v39 = vsel %vm3511_vm7, %v3582_v34, %v5644_v6  ;;  %v3532_v41 = vsel %vm3511_vm7, %v3506_v60, %v5645_v29  ;;  %v3482_v54 = vsel %vm1404_vm3, %v1657_v21, %v5665_v63  ;;  %v2133_v29 = vld [vmem:[#allocation2 + $0xc8] sm:$0xff]  ;;  %v1508_v6 = vld [vmem:[#allocation2 + $0xb9] sm:$0xff]  ;;  %v2390_v45 = vmul.f32 %v7193_v40, %v2265_v56 }
 0x2be   : > { %v5650_v24 = vunpack.i.h.bf16 %v5648_v44  ;;  %v5649_v53 = vunpack.i.l.bf16 %v5648_v44  ;;  %3894 = vmatprep.mubr.f32.mxu1 %v3607_v39  ;;  %5756 = vrot.lane.b32.xlu0 %v5755_v4, %s5884_s24  ;;  %v5775_v31 = vpack.i.bf16 %v1939_v57, %v2539_v62  ;;  %v8640_v4 = vld [vmem:[#allocation34_spill] sm:$0xff]  ;;  %v2258_v40 = vmul.f32 %v7124_v42, %v2133_v29 }
 0x2bf   : > { %3895 = vmatmul.mubr.f32.gmra.mrb[26].mxu1 %v3532_v41  ;;  %v1790_v15 = vmul.f32 %v8640_v4, %v1665_v35  ;;  %v8641_v39 = vld [vmem:[#allocation26_spill] sm:$0xff] }
 0x2c0   : > { %v3558_v1 = vsel %vm1404_vm3, %v2256_v16, %v5649_v53  ;;  %v3481_v3 = vsel %vm1404_vm3, %v1656_v0, %v5650_v24  ;;  %v1658_v41 = vmul.f32 %v8641_v39, %v1508_v6  ;;  %v2415_v24 = vld [vmem:[#allocation2 + $0x45] sm:$0xff]  ;;  %v8642_v16 = vld [vmem:[#allocation94_spill] sm:$0xff] }
 0x2c1   : > { %v5658_v27 = vpop.permute.xlu1 %5657  ;;  %v3583_v25 = vsel %vm3485_vm6, %v3558_v1, %v5654_v13  ;;  %v3507_v59 = vsel %vm3485_vm6, %v3481_v3, %v5655_v46  ;;  %v5785_v53 = vpack.i.bf16 %v1790_v15, %v2390_v45  ;;  %v2540_v43 = vmul.f32 %v8642_v16, %v2415_v24  ;;  %v8643_v46 = vld [vmem:[#allocation59_spill] sm:$0xff]  ;;  %v2737_v21 = vpop.permute.xlu0 %2736  ;;  %v2561_v45 = vld [vmem:[#allocation2 + $0x26] sm:$0xff] }
 0x2c2   : > { %v5660_v14 = vunpack.i.h.bf16 %v5658_v27  ;;  %v5659_v55 = vunpack.i.l.bf16 %v5658_v27  ;;  %5761 = vrot.lane.b32.xlu0 %v5760_v61, %s5888_s20  ;;  %v5685_v61 = vunpack.i.h.bf16 %v5683_v10  ;;  %v5684_v1 = vunpack.i.l.bf16 %v5683_v10  ;;  %v1961_v6 = vld [vmem:[#allocation2 + $0x17] sm:$0xff]  ;;  %v2710_v24 = vld [vmem:[#allocation2 + $0x1f] sm:$0xff] }
 0x2c3   : > { %v1940_v13 = vmul.f32 %v8643_v46, %v1815_v22  ;;  %v8650_v16 = vmov 0.0  }
 0x2c4   : > { %v3608_v2 = vsel %vm3511_vm7, %v3583_v25, %v5659_v55  ;;  %v3533_v20 = vsel %vm3511_vm7, %v3507_v59, %v5660_v14  ;;  %v8644_v55 = vld [vmem:[#allocation137_spill] sm:$0xff]  ;;  %v1791_v25 = vmul.f32 %v8645_v9, %v1666_v11  ;;  %v2563_v11 = vld [vmem:[#allocation2 + $0x36] sm:$0xff] }
 0x2c5   : > { %v5668_v12 = vpop.permute.xlu1 %5667  ;;  %3899 = vmatprep.mubr.f32.mxu1 %v3608_v2  ;;  %v2391_v5 = vmul.f32 %v8644_v55, %v2266_v19  ;;  %v5790_v38 = vpack.i.bf16 %v1940_v13, %v2540_v43  ;;  %v2835_v43 = vmul.f32 %v2737_v21, %v2710_v24  ;;  %v2711_v19 = vld [vmem:[#allocation2 + $0x27] sm:$0xff]  ;;  %v1964_v55 = vld [vmem:[#allocation2 + $0x2f] sm:$0xff] }
 0x2c6   : > { %v5670_v30 = vunpack.i.h.bf16 %v5668_v12  ;;  %v5669_v37 = vunpack.i.l.bf16 %v5668_v12  ;;  %3900 = vmatmul.mubr.f32.gmra.mrb[28].mxu1 %v3533_v20  ;;  %5771 = vrot.lane.b32.xlu0 %v5770_v7, %s5884_s24  ;;  %v2560_v20 = vld [vmem:[#allocation2 + $0x1e] sm:$0xff]  ;;  %v5862_v13 = vld [vmem:[%s8374_s1 + $0xa8] sm:$0xff] }
 0x2c7   : > { %v5800_v59 = vpack.i.bf16 %v1791_v25, %v2391_v5  ;;  %v8646_v12 = vld [vmem:[#allocation79_spill] sm:$0xff]  ;;  %v8653_v25 = vld [vmem:[#allocation82_spill] sm:$0xff] }
 0x2c8   : > { %v3584_v50 = vsel %vm3485_vm6, %v3559_v36, %v5669_v37  ;;  %v3508_v28 = vsel %vm3485_vm6, %v3482_v54, %v5670_v30  ;;  %v2085_v51 = vmul.f32 %v8646_v12, %v1960_v49  ;;  %v8648_v54 = vld [vmem:[#allocation28_spill] sm:$0xff] }
 0x2c9   : > { %v5678_v34 = vpop.permute.xlu1 %5677  ;;  %v3609_v60 = vsel %vm3511_vm7, %v3584_v50, %v5674_v8  ;;  %v3534_v52 = vsel %vm3511_vm7, %v3508_v28, %v5675_v17  ;;  %v8647_v8 = vld [vmem:[#allocation136_spill] sm:$0xff]  ;;  %v1659_v29 = vmul.f32 %v8648_v54, %v1509_v23 }
 0x2ca   : > { %v5680_v47 = vunpack.i.h.bf16 %v5678_v34  ;;  %v5679_v44 = vunpack.i.l.bf16 %v5678_v34  ;;  %3904 = vmatprep.mubr.f32.mxu1 %v3609_v60  ;;  %5776 = vrot.lane.b32.xlu0 %v5775_v31, %s5888_s20  ;;  %v2259_v36 = vmul.f32 %v8647_v8, %v2134_v32  ;;  %v8654_v23 = vld [vmem:[#allocation80_spill] sm:$0xff] }
 0x2cb   : > { %3905 = vmatmul.mubr.f32.gmra.mrb[30].mxu1 %v3534_v52 }
 0x2cc   : > { %v3560_v0 = vsel %vm1404_vm3, %v2258_v40, %v5679_v44  ;;  %v3483_v26 = vsel %vm1404_vm3, %v1658_v41, %v5680_v47  ;;  %v8649_v47 = vld [vmem:[#allocation78_spill] sm:$0xff]  ;;  %v5861_v40 = vld [vmem:[%s8374_s1 + $0xa0] sm:$0xff] }
 0x2cd   : > { %v5688_v3 = vpop.permute.xlu1 %5687  ;;  %v3585_v58 = vsel %vm3485_vm6, %v3560_v0, %v5684_v1  ;;  %v3509_v14 = vsel %vm3485_vm6, %v3483_v26, %v5685_v61  ;;  %v2086_v44 = vmul.f32 %v8649_v47, %v1961_v6  ;;  %v2562_v0 = vld [vmem:[#allocation2 + $0x2e] sm:$0xff] }
 0x2ce   : > { %v5690_v27 = vunpack.i.h.bf16 %v5688_v3  ;;  %v5689_v42 = vunpack.i.l.bf16 %v5688_v3  ;;  %5786 = vrot.lane.b32.xlu0 %v5785_v53, %s5884_s24  ;;  %v8651_v3 = vld [vmem:[#allocation81_spill] sm:$0xff] }
 0x2cf   : > { %v2087_v46 = vmul.f32 %v2710_v24, %v8651_v3 }
 0x2d0   : > { %v3610_v33 = vsel %vm3511_vm7, %v3585_v58, %v5689_v42  ;;  %v3535_v18 = vsel %vm3511_vm7, %v3509_v14, %v5690_v27  ;;  %v1966_v58 = vld [vmem:[#allocation2 + $0x3f] sm:$0xff] }
 0x2d1   : > { %v5694_v63 = vpop.permute.xlu1 %5693  ;;  %3909 = vmatprep.mubr.f32.mxu1 %v3610_v33  ;;  %v2566_v33 = vld [vmem:[#allocation2 + $0x4e] sm:$0xff] }
 0x2d2   : > { %3910 = vmatmul.mubr.f32.gmra.mrb[32].mxu1 %v3535_v18  ;;  %5791 = vrot.lane.b32.xlu0 %v5790_v38, %s5888_s20  ;;  %v5695_v35 = vunpack.i.l.bf16 %v5694_v63  ;;  %v5696_v57 = vunpack.i.h.bf16 %v5694_v63  ;;  %v8652_v63 = vld [vmem:[#allocation83_spill] sm:$0xff] }
 0x2d3   : > { %v2088_v9 = vmul.f32 %v2711_v19, %v8652_v63  ;;  %v2725_v63 = vld [vmem:[#allocation2 + $0x97] sm:$0xff] }
 0x2d4   : > { %v3561_v50 = vsel %vm1404_vm3, %v2259_v36, %v5695_v35  ;;  %v3484_v34 = vsel %vm1404_vm3, %v1659_v29, %v5696_v57  ;;  %v2089_v57 = vmul.f32 %v8654_v23, %v1964_v55  ;;  %v2565_v36 = vld [vmem:[#allocation2 + $0x46] sm:$0xff]  ;;  %v2716_v29 = vld [vmem:[#allocation2 + $0x4f] sm:$0xff] }
 0x2d5   : > { %v5699_v7 = vpop.permute.xlu1 %5698 }
 0x2d6   : > { %5801 = vrot.lane.b32.xlu0 %v5800_v59, %s5884_s24  ;;  %v5701_v37 = vunpack.i.h.bf16 %v5699_v7  ;;  %v5700_v56 = vunpack.i.l.bf16 %v5699_v7  ;;  %v2091_v59 = vmul.f32 %v8653_v25, %v1966_v58 }
 0x2d8   : > { %v3586_v52 = vsel %vm3485_vm6, %v3561_v50, %v5700_v56  ;;  %v3510_v10 = vsel %vm3485_vm6, %v3484_v34, %v5701_v37  ;;  %v2715_v56 = vld [vmem:[#allocation2 + $0x47] sm:$0xff]  ;;  %v8656_v34 = vld [vmem:[#allocation134_spill] sm:$0xff] }
 0x2d9   : > { %v2741_v62 = vpop.permute.xlu1 %2740 }
 0x2da   : > { %v2836_v1 = vmul.f32 %v2741_v62, %v2711_v19  ;;  %v5863_v62 = vld [vmem:[%s8374_s1 + $0xb0] sm:$0xff] }
 0x2de   : > { %v2587_v2 = vpop.permute.xlu1 %2586 }
 0x2df   : > { %v2685_v48 = vmul.f32 %v2587_v2, %v2560_v20  ;;  %v1965_v2 = vld [vmem:[#allocation2 + $0x37] sm:$0xff] }
 0x2e1   : > { %v5720_v30 = vpack.i.bf16 %v2085_v51, %v2685_v48  ;;  %v2564_v48 = vld [vmem:[#allocation2 + $0x3e] sm:$0xff] }
 0x2e2   : > { %v2591_v17 = vpop.permute.xlu1 %2590 }
 0x2e3   : > { %5721 = vrot.lane.b32.xlu1 %v5720_v30, %s5885_s7  ;;  %v2686_v28 = vmul.f32 %v2591_v17, %v2561_v45  ;;  %v5864_v30 = vld [vmem:[%s8374_s1 + $0xb8] sm:$0xff] }
 0x2e4   : > { %v5704_v31 = vpop.permute.xlu0 %5703 }
 0x2e5   : > { %v5706_v4 = vunpack.i.h.bf16 %v5704_v31  ;;  %v5705_v15 = vunpack.i.l.bf16 %v5704_v31  ;;  %v5735_v22 = vpack.i.bf16 %v2086_v44, %v2686_v28  ;;  %v8655_v31 = vld [vmem:[#allocation85_spill] sm:$0xff]  ;;  %v5865_v28 = vld [vmem:[%s8374_s1 + $0xc0] sm:$0xf] }
 0x2e6   : > { %v2595_v60 = vpop.permute.xlu1 %2594  ;;  %v2090_v50 = vmul.f32 %v8655_v31, %v1965_v2 }
 0x2e7   : > { %2816 = vperm.xlu1 %5709, %v5861_v40   ;;  %v3611_v39 = vsel %vm3511_vm7, %v3586_v52, %v5705_v15  ;;  %v3536_v41 = vsel %vm3511_vm7, %v3510_v10, %v5706_v4  ;;  %v2687_v26 = vmul.f32 %v2595_v60, %v2562_v0  ;;  %v1816_v4 = vld [vmem:[#allocation2 + $0x33] sm:$0xff] }
 0x2e8   : > { %3914 = vmatprep.mubr.f32.mxu1 %v3611_v39  ;;  %v2416_v15 = vld [vmem:[#allocation2 + $0x4d] sm:$0xff]  ;;  %v2717_v10 = vld [vmem:[#allocation2 + $0x57] sm:$0xff] }
 0x2e9   : > { %3915 = vmatmul.mubr.f32.gmra.mrb[34].mxu1 %v3536_v41  ;;  %v5750_v27 = vpack.i.bf16 %v2087_v46, %v2687_v26  ;;  %v2541_v60 = vmul.f32 %v8656_v34, %v2416_v15  ;;  %v8657_v40 = vld [vmem:[#allocation58_spill] sm:$0xff] }
 0x2ea   : > { %v2599_v53 = vpop.permute.xlu1 %2598  ;;  %5150 = vmatprep.mubr.msk.f32.mxu1 %vm5889_vm8, %v8650_v16  ;;  %v1941_v39 = vmul.f32 %v8657_v40, %v1816_v4  ;;  %v2721_v46 = vld [vmem:[#allocation2 + $0x77] sm:$0xff] }
 0x2eb   : > { %5736 = vrot.lane.b32.xlu1 %v5735_v22, %s5885_s7  ;;  %v2688_v14 = vmul.f32 %v2599_v53, %v2563_v11  ;;  %v2718_v22 = vld [vmem:[#allocation2 + $0x5f] sm:$0xff] }
 0x2ec   : > { %v5805_v41 = vpack.i.bf16 %v1941_v39, %v2541_v60 }
 0x2ed   : > { %5151 = vmatmul.mubr.msk.f32.vlgmr.msra.gmra.mrb[36].mxu1 %vm1404_vm3, %v2835_v43  ;;  %v5765_v49 = vpack.i.bf16 %v2088_v9, %v2688_v14  ;;  %v2719_v43 = vld [vmem:[#allocation2 + $0x67] sm:$0xff] }
 0x2ee   : > { %v2603_v61 = vpop.permute.xlu1 %2602  ;;  %5153 = vmatprep.mubr.msk.f32.mxu1 %vm5889_vm8, %v8650_v16  ;;  %v2723_v14 = vld [vmem:[#allocation2 + $0x87] sm:$0xff] }
 0x2ef   : > { %2820 = vperm.xlu1 %5709, %v5862_v13   ;;  %v2689_v32 = vmul.f32 %v2603_v61, %v2564_v48  ;;  %v2720_v61 = vld [vmem:[#allocation2 + $0x6f] sm:$0xff] }
 0x2f1   : > { %5154 = vmatmul.mubr.msk.f32.gmra.mrb[38].mxu1 %vm1404_vm3, %v2836_v1  ;;  %v5780_v37 = vpack.i.bf16 %v2089_v57, %v2689_v32  ;;  %v2729_v32 = vld [vmem:[#allocation2 + $0xb7] sm:$0xff] }
 0x2f2   : > { %v2607_v42 = vpop.permute.xlu1 %2606  ;;  %5156 = vmatprep.mubr.msk.f32.mxu1 %vm5889_vm8, %v8650_v16 }
 0x2f3   : > { %5751 = vrot.lane.b32.xlu1 %v5750_v27, %s5885_s7  ;;  %v2690_v54 = vmul.f32 %v2607_v42, %v2565_v36  ;;  %v2722_v42 = vld [vmem:[#allocation2 + $0x7f] sm:$0xff] }
 0x2f5   : > { %v2745_v5 = vpop.permute.xlu0 %2744  ;;  %v5795_v52 = vpack.i.bf16 %v2090_v50, %v2690_v54 }
 0x2f6   : > { %v2837_v38 = vmul.f32 %v2745_v5, %v1964_v55  ;;  %v2611_v18 = vpop.permute.xlu1 %2610 }
 0x2f7   : > { %v2691_v7 = vmul.f32 %v2611_v18, %v2566_v33  ;;  %2824 = vperm.xlu1 %5709, %v5863_v62  }
 0x2f8   : > { %5157 = vmatmul.mubr.msk.f32.gmra.mrb[40].mxu1 %vm1404_vm3, %v2837_v38  ;;  %v2724_v38 = vld [vmem:[#allocation2 + $0x8f] sm:$0xff] }
 0x2f9   : > { %v5810_v20 = vpack.i.bf16 %v2091_v59, %v2691_v7  ;;  %v2749_v12 = vpop.permute.xlu0 %2748  ;;  %5159 = vmatprep.mubr.msk.f32.mxu1 %vm5889_vm8, %v8650_v16  ;;  %v2726_v59 = vld [vmem:[#allocation2 + $0x9f] sm:$0xff] }
 0x2fa   : > { %v2838_v51 = vmul.f32 %v2749_v12, %v1965_v2  ;;  %v2727_v2 = vld [vmem:[#allocation2 + $0xa7] sm:$0xff]  ;;  %v2728_v12 = vld [vmem:[#allocation2 + $0xaf] sm:$0xff] }
 0x2fb   : > { %5766 = vrot.lane.b32.xlu1 %v5765_v49, %s5885_s7  ;;  %5811 = vrot.lane.b32.xlu0 %v5810_v20, %s5885_s7  ;;  %v2777_v19 = vpop.permute.xlu1 %2776 }
 0x2fc   : > { %5160 = vmatmul.mubr.msk.f32.gmra.mrb[42].mxu1 %vm1404_vm3, %v2838_v51  ;;  %v2845_v1 = vmul.f32 %v2777_v19, %v2720_v61 }
 0x2fd   : > { %v2753_v21 = vpop.permute.xlu0 %2752  ;;  %5162 = vmatprep.mubr.msk.f32.mxu1 %vm5889_vm8, %v8650_v16 }
 0x2fe   : > { %v2839_v35 = vmul.f32 %v2753_v21, %v1966_v58 }
 0x2ff   : > { %2828 = vperm.xlu1 %5709, %v5864_v30   ;;  %v2785_v27 = vpop.permute.xlu1 %2784  ;;  %v1485_v30 = vld [vmem:[#allocation2 + $0x1] sm:$0xff] }
 0x300   : > { %5163 = vmatmul.mubr.msk.f32.gmra.mrb[44].mxu1 %vm1404_vm3, %v2839_v35  ;;  %v2847_v11 = vmul.f32 %v2785_v27, %v2722_v42 }
 0x301   : > { %v2757_v17 = vpop.permute.xlu0 %2756  ;;  %5165 = vmatprep.mubr.msk.f32.mxu1 %vm5889_vm8, %v8650_v16 }
 0x302   : > { %v2840_v8 = vmul.f32 %v2757_v17, %v2715_v56 }
 0x303   : > { %5781 = vrot.lane.b32.xlu1 %v5780_v37, %s5885_s7  ;;  %v2793_v5 = vpop.permute.xlu1 %2792  ;;  %v2110_v37 = vld [vmem:[#allocation2 + $0x10] sm:$0xff] }
 0x304   : > { %5166 = vmatmul.mubr.msk.f32.gmra.mrb[46].mxu1 %vm1404_vm3, %v2840_v8  ;;  %v2849_v33 = vmul.f32 %v2793_v5, %v2724_v38 }
 0x305   : > { %v2761_v6 = vpop.permute.xlu0 %2760  ;;  %5168 = vmatprep.mubr.msk.f32.mxu1 %vm5889_vm8, %v8650_v16 }
 0x306   : > { %v2841_v45 = vmul.f32 %v2761_v6, %v2716_v29  ;;  %v8658_v29 = vld [vmem:[#allocation5_spill] sm:$0xff] }
 0x307   : > { %2832 = vperm.xlu1 %5709, %v5865_v28   ;;  %v2801_v25 = vpop.permute.xlu1 %2800  ;;  %v1635_v6 = vmul.f32 %v8658_v29, %v1485_v30 }
 0x308   : > { %5169 = vmatmul.mubr.msk.f32.gmra.mrb[48].mxu1 %vm1404_vm3, %v2841_v45  ;;  %v2851_v7 = vmul.f32 %v2801_v25, %v2726_v59  ;;  %v8659_v45 = vld [vmem:[#allocation113_spill] sm:$0xff]  ;;  %v2112_v25 = vld [vmem:[#allocation2 + $0x20] sm:$0xff]  ;;  %v1487_v59 = vld [vmem:[#allocation2 + $0x11] sm:$0xff] }
 0x309   : > { %v2765_v47 = vpop.permute.xlu0 %2764  ;;  %5171 = vmatprep.mubr.msk.f32.mxu1 %vm5889_vm8, %v8650_v16  ;;  %v2235_v31 = vmul.f32 %v8659_v45, %v2110_v37  ;;  %v1488_v45 = vld [vmem:[#allocation2 + $0x19] sm:$0xff] }
 0x30a   : > { %v2842_v44 = vmul.f32 %v2765_v47, %v2717_v10 }
 0x30b   : > { %5796 = vrot.lane.b32.xlu1 %v5795_v52, %s5885_s7  ;;  %v2809_v49 = vpop.permute.xlu1 %2808 }
 0x30c   : > { %5172 = vmatmul.mubr.msk.f32.gmra.mrb[0].mxu1 %vm1404_vm3, %v2842_v44  ;;  %v2853_v51 = vmul.f32 %v2809_v49, %v2728_v12 }
 0x30d   : > { %v2769_v24 = vpop.permute.xlu0 %2768  ;;  %5174 = vmatprep.mubr.msk.f32.mxu1 %vm5889_vm8, %v8650_v16 }
 0x30e   : > { %v2843_v53 = vmul.f32 %v2769_v24, %v2718_v22  ;;  %v2111_v24 = vld [vmem:[#allocation2 + $0x18] sm:$0xff] }
 0x30f   : > { %5806 = vrot.lane.b32.xlu1 %v5805_v41, %s5888_s20  ;;  %v2813_v48 = vpop.permute.xlu1 %2812  ;;  %v2730_v41 = vld [vmem:[#allocation2 + $0xbf] sm:$0xff] }
 0x310   : > { %5175 = vmatmul.mubr.msk.f32.gmra.mrb[2].mxu1 %vm1404_vm3, %v2843_v53  ;;  %v2854_v21 = vmul.f32 %v2813_v48, %v2729_v32  ;;  %v1486_v53 = vld [vmem:[#allocation2 + $0x9] sm:$0xff]  ;;  %v8663_v32 = vld [vmem:[#allocation4_spill] sm:$0xff] }
 0x311   : > { %v2773_v0 = vpop.permute.xlu0 %2772  ;;  %5177 = vmatprep.mubr.msk.f32.mxu1 %vm5889_vm8, %v8650_v16 }
 0x312   : > { %v2844_v26 = vmul.f32 %v2773_v0, %v2719_v43 }
 0x314   : > { %5178 = vmatmul.mubr.msk.f32.gmra.mrb[4].mxu1 %vm1404_vm3, %v2844_v26 }
 0x315   : > { %5180 = vmatprep.mubr.msk.f32.mxu1 %vm5889_vm8, %v8650_v16  ;;  %v2781_v3 = vpop.permute.xlu0 %2780 }
 0x316   : > { %v2846_v13 = vmul.f32 %v2781_v3, %v2721_v46  ;;  %v8661_v46 = vld [vmem:[#allocation7_spill] sm:$0xff] }
 0x318   : > { %5181 = vmatmul.mubr.msk.f32.gmra.mrb[6].mxu1 %vm1404_vm3, %v2845_v1  ;;  %v8660_v1 = vld [vmem:[#allocation110_spill] sm:$0xff] }
 0x319   : > { %5183 = vmatprep.mubr.msk.f32.mxu1 %vm5889_vm8, %v8650_v16  ;;  %v2789_v58 = vpop.permute.xlu0 %2788  ;;  %v2236_v3 = vmul.f32 %v8660_v1, %v2111_v24  ;;  %v2733_v24 = vld [vmem:[#allocation2 + $0xd7] sm:$0xff] }
 0x31a   : > { %v2848_v55 = vmul.f32 %v2789_v58, %v2723_v14  ;;  %v2114_v1 = vld [vmem:[#allocation2 + $0x30] sm:$0xff] }
 0x31c   : > { %5184 = vmatmul.mubr.msk.f32.gmra.mrb[8].mxu1 %vm1404_vm3, %v2846_v13  ;;  %v1636_v13 = vmul.f32 %v8661_v46, %v1486_v53 }
 0x31d   : > { %5186 = vmatprep.mubr.msk.f32.mxu1 %vm5889_vm8, %v8650_v16  ;;  %v2797_v18 = vpop.permute.xlu0 %2796 }
 0x31e   : > { %v2850_v9 = vmul.f32 %v2797_v18, %v2725_v63  ;;  %v2731_v63 = vld [vmem:[#allocation2 + $0xc7] sm:$0xff] }
 0x320   : > { %5187 = vmatmul.mubr.msk.f32.gmra.mrb[10].mxu1 %vm1404_vm3, %v2847_v11 }
 0x321   : > { %5189 = vmatprep.mubr.msk.f32.mxu1 %vm5889_vm8, %v8650_v16  ;;  %v2805_v62 = vpop.permute.xlu0 %2804 }
 0x322   : > { %v2852_v20 = vmul.f32 %v2805_v62, %v2727_v2 }
 0x324   : > { %5190 = vmatmul.mubr.msk.f32.gmra.mrb[12].mxu1 %vm1404_vm3, %v2848_v55 }
 0x325   : > { %5192 = vmatprep.mubr.msk.f32.mxu1 %vm5889_vm8, %v8650_v16  ;;  %v5712_v35 = vpop.permute.xlu0 %5711 }
 0x326   : > { %v5714_v56 = vunpack.i.h.bf16 %v5712_v35  ;;  %v5713_v17 = vunpack.i.l.bf16 %v5712_v35 }
 0x328   : > { %5193 = vmatmul.mubr.msk.f32.gmra.mrb[14].mxu1 %vm1404_vm3, %v2849_v33  ;;  %v3460_v28 = vsel %vm1404_vm3, %v1635_v6, %v5714_v56  ;;  %v3537_v34 = vsel %vm1404_vm3, %v2235_v31, %v5713_v17  ;;  %v2113_v6 = vld [vmem:[#allocation2 + $0x28] sm:$0xff] }
 0x329   : > { %5195 = vmatprep.mubr.msk.f32.mxu1 %vm5889_vm8, %v8650_v16  ;;  %v5717_v23 = vpop.permute.xlu0 %5716 }
 0x32a   : > { %v5719_v8 = vunpack.i.h.bf16 %v5717_v23  ;;  %v5718_v36 = vunpack.i.l.bf16 %v5717_v23 }
 0x32c   : > { %5196 = vmatmul.mubr.msk.f32.gmra.mrb[16].mxu1 %vm1404_vm3, %v2850_v9  ;;  %v3486_v60 = vsel %vm3485_vm6, %v3460_v28, %v5719_v8  ;;  %v3562_v52 = vsel %vm3485_vm6, %v3537_v34, %v5718_v36 }
 0x32d   : > { %5198 = vmatprep.mubr.msk.f32.mxu1 %vm5889_vm8, %v8650_v16  ;;  %v5727_v57 = vpop.permute.xlu0 %5726 }
 0x32e   : > { %v5729_v43 = vunpack.i.h.bf16 %v5727_v57  ;;  %v5728_v0 = vunpack.i.l.bf16 %v5727_v57 }
 0x330   : > { %5199 = vmatmul.mubr.msk.f32.gmra.mrb[18].mxu1 %vm1404_vm3, %v2851_v7  ;;  %v3538_v14 = vsel %vm1404_vm3, %v2236_v3, %v5728_v0  ;;  %v3461_v55 = vsel %vm1404_vm3, %v1636_v13, %v5729_v43  ;;  %v1489_v3 = vld [vmem:[#allocation2 + $0x21] sm:$0xff] }
 0x331   : > { %5201 = vmatprep.mubr.msk.f32.mxu1 %vm5889_vm8, %v8650_v16  ;;  %v5732_v54 = vpop.permute.xlu0 %5731 }
 0x332   : > { %v5734_v19 = vunpack.i.h.bf16 %v5732_v54  ;;  %v5733_v61 = vunpack.i.l.bf16 %v5732_v54  ;;  %v2732_v54 = vld [vmem:[#allocation2 + $0xcf] sm:$0xff] }
 0x334   : > { %5202 = vmatmul.mubr.msk.f32.gmra.mrb[20].mxu1 %vm1404_vm3, %v2852_v20  ;;  %v3563_v5 = vsel %vm3485_vm6, %v3538_v14, %v5733_v61  ;;  %v3487_v38 = vsel %vm3485_vm6, %v3461_v55, %v5734_v19  ;;  %v8667_v55 = vld [vmem:[#allocation9_spill] sm:$0xff] }
 0x335   : > { %5204 = vmatprep.mubr.msk.f32.mxu1 %vm5889_vm8, %v8650_v16  ;;  %v5742_v44 = vpop.permute.xlu0 %5741 }
 0x336   : > { %v5744_v7 = vunpack.i.h.bf16 %v5742_v44  ;;  %v5743_v62 = vunpack.i.l.bf16 %v5742_v44 }
 0x338   : > { %5205 = vmatmul.mubr.msk.f32.gmra.mrb[22].mxu1 %vm1404_vm3, %v2853_v51  ;;  %v8662_v51 = vld [vmem:[#allocation115_spill] sm:$0xff] }
 0x339   : > { %5207 = vmatprep.mubr.msk.f32.mxu1 %vm5889_vm8, %v8650_v16  ;;  %v5747_v40 = vpop.permute.xlu0 %5746  ;;  %v2237_v48 = vmul.f32 %v8662_v51, %v2112_v25 }
 0x33a   : > { %v5749_v2 = vunpack.i.h.bf16 %v5747_v40  ;;  %v5748_v20 = vunpack.i.l.bf16 %v5747_v40 }
 0x33b   : > { %v3539_v30 = vsel %vm1404_vm3, %v2237_v48, %v5743_v62 }
 0x33c   : > { %5208 = vmatmul.mubr.msk.f32.gmra.mrb[24].mxu1 %vm1404_vm3, %v2854_v21  ;;  %v1637_v21 = vmul.f32 %v8663_v32, %v1487_v59  ;;  %v3564_v56 = vsel %vm3485_vm6, %v3539_v30, %v5748_v20  ;;  %v2734_v59 = vld [vmem:[#allocation2 + $0xdf] sm:$0xf] }
 0x33d   : > { %5210 = vmatprep.mubr.msk.f32.mxu1 %vm5889_vm8, %v8650_v16  ;;  %v8080_v39 = vpop.permute.xlu0 %5756 }
 0x33e   : > { %v3462_v37 = vsel %vm1404_vm3, %v1637_v21, %v5744_v7  ;;  %v5759_v31 = vunpack.i.h.bf16 %v8080_v39 }
 0x33f   : > { %v3488_v17 = vsel %vm3485_vm6, %v3462_v37, %v5749_v2  ;;  %v8669_v37 = vld [vmem:[#allocation8_spill] sm:$0xff] }
 0x341   : > { %v5762_v42 = vpop.permute.xlu0 %5761 }
 0x342   : > { %v5763_v34 = vunpack.i.l.bf16 %v5762_v42 }
 0x345   : > { %v5772_v12 = vpop.permute.xlu0 %5771 }
 0x346   : > { %v5774_v46 = vunpack.i.h.bf16 %v5772_v12  ;;  %v5773_v13 = vunpack.i.l.bf16 %v5772_v12  ;;  %v2115_v12 = vld [vmem:[#allocation2 + $0x38] sm:$0xff] }
 0x349   : > { %v5777_v28 = vpop.permute.xlu0 %5776 }
 0x34d   : > { %v5787_v0 = vpop.permute.xlu0 %5786 }
 0x34e   : > { %v5789_v51 = vunpack.i.h.bf16 %v5787_v0  ;;  %v5788_v48 = vunpack.i.l.bf16 %v5787_v0 }
 0x355   : > { %v5722_v50 = vpop.permute.xlu1 %5721 }
 0x356   : > { %v5724_v4 = vunpack.i.h.bf16 %v5722_v50  ;;  %v5723_v15 = vunpack.i.l.bf16 %v5722_v50  ;;  %v5758_v50 = vunpack.i.l.bf16 %v8080_v39 }
 0x358   : > { %v3587_v10 = vsel %vm3511_vm7, %v3562_v52, %v5723_v15  ;;  %v3512_v47 = vsel %vm3511_vm7, %v3486_v60, %v5724_v4  ;;  %v5764_v15 = vunpack.i.h.bf16 %v5762_v42  ;;  %v8664_v60 = vld [vmem:[#allocation117_spill] sm:$0xff]  ;;  %v5779_v42 = vunpack.i.h.bf16 %v5777_v28 }
 0x359   : > { %3794 = vmatprep.mubr.f32.mxu0 %v3587_v10  ;;  %v2238_v52 = vmul.f32 %v8664_v60, %v2113_v6  ;;  %v8665_v10 = vld [vmem:[#allocation6_spill] sm:$0xff]  ;;  %v2116_v6 = vld [vmem:[#allocation2 + $0x40] sm:$0xff] }
 0x35a   : > { %3795 = vmatmul.mubr.f32.vlgmr.msra.gmra.mrb[100].mxu0 %v3512_v47  ;;  %v1638_v47 = vmul.f32 %v8665_v10, %v1488_v45  ;;  %v1491_v45 = vld [vmem:[#allocation2 + $0x31] sm:$0xff] }
 0x35b   : > { %v8670_v10 = vld [vmem:[#allocation114_spill] sm:$0xff] }
 0x35c   : > { %v3463_v39 = vsel %vm1404_vm3, %v1638_v47, %v5759_v31  ;;  %v2241_v47 = vmul.f32 %v8670_v10, %v2116_v6 }
 0x35d   : > { %v3489_v43 = vsel %vm3485_vm6, %v3463_v39, %v5764_v15 }
 0x366   : > { %v2817_v22 = vpop.permute.xlu1 %2816 }
 0x367   : > { %v2855_v26 = vmul.f32 %v2817_v22, %v2730_v41  ;;  %v3540_v22 = vsel %vm1404_vm3, %v2238_v52, %v5758_v50 }
 0x368   : > { %v3565_v53 = vsel %vm3485_vm6, %v3540_v22, %v5763_v34 }
 0x369   : > { %5211 = vmatmul.mubr.msk.f32.gmra.mrb[26].mxu1 %vm1404_vm3, %v2855_v26 }
 0x36a   : > { %v5737_v27 = vpop.permute.xlu1 %5736  ;;  %5213 = vmatprep.mubr.msk.f32.mxu1 %vm5889_vm8, %v8650_v16 }
 0x36b   : > { %v5739_v11 = vunpack.i.h.bf16 %v5737_v27  ;;  %v5738_v58 = vunpack.i.l.bf16 %v5737_v27 }
 0x36d   : > { %v3588_v33 = vsel %vm3511_vm7, %v3563_v5, %v5738_v58  ;;  %v3513_v18 = vsel %vm3511_vm7, %v3487_v38, %v5739_v11  ;;  %v5778_v11 = vunpack.i.l.bf16 %v5777_v28  ;;  %v8666_v58 = vld [vmem:[#allocation112_spill] sm:$0xff]  ;;  %v1639_v5 = vmul.f32 %v8667_v55, %v1489_v3 }
 0x36e   : > { %v2821_v9 = vpop.permute.xlu1 %2820  ;;  %3799 = vmatprep.mubr.f32.mxu0 %v3588_v33  ;;  %v2239_v14 = vmul.f32 %v8666_v58, %v2114_v1  ;;  %v5792_v33 = vpop.permute.xlu0 %5791 }
 0x36f   : > { %v2856_v49 = vmul.f32 %v2821_v9, %v2731_v63  ;;  %3800 = vmatmul.mubr.f32.gmra.mrb[102].mxu0 %v3513_v18  ;;  %v3464_v25 = vsel %vm1404_vm3, %v1639_v5, %v5774_v46  ;;  %v5794_v21 = vunpack.i.h.bf16 %v5792_v33 }
 0x370   : > { %v3541_v9 = vsel %vm1404_vm3, %v2239_v14, %v5773_v13  ;;  %v3490_v62 = vsel %vm3485_vm6, %v3464_v25, %v5779_v42 }
 0x371   : > { %5214 = vmatmul.mubr.msk.f32.gmra.mrb[28].mxu1 %vm1404_vm3, %v2856_v49  ;;  %v3566_v7 = vsel %vm3485_vm6, %v3541_v9, %v5778_v11 }
 0x372   : > { %v5752_v35 = vpop.permute.xlu1 %5751  ;;  %5216 = vmatprep.mubr.msk.f32.mxu1 %vm5889_vm8, %v8650_v16 }
 0x373   : > { %v5754_v23 = vunpack.i.h.bf16 %v5752_v35  ;;  %v5753_v57 = vunpack.i.l.bf16 %v5752_v35  ;;  %v5793_v35 = vunpack.i.l.bf16 %v5792_v33 }
 0x375   : > { %v3589_v8 = vsel %vm3511_vm7, %v3564_v56, %v5753_v57  ;;  %v3514_v36 = vsel %vm3511_vm7, %v3488_v17, %v5754_v23  ;;  %v5802_v23 = vpop.permute.xlu0 %5801  ;;  %v8668_v57 = vld [vmem:[#allocation119_spill] sm:$0xff] }
 0x376   : > { %v2825_v29 = vpop.permute.xlu1 %2824  ;;  %3804 = vmatprep.mubr.f32.mxu0 %v3589_v8  ;;  %v2240_v30 = vmul.f32 %v8668_v57, %v2115_v12  ;;  %v5804_v31 = vunpack.i.h.bf16 %v5802_v23  ;;  %v5803_v50 = vunpack.i.l.bf16 %v5802_v23 }
 0x377   : > { %v2857_v4 = vmul.f32 %v2825_v29, %v2732_v54  ;;  %3805 = vmatmul.mubr.f32.gmra.mrb[104].mxu0 %v3514_v36 }
 0x378   : > { %v3542_v54 = vsel %vm1404_vm3, %v2240_v30, %v5788_v48 }
 0x379   : > { %5217 = vmatmul.mubr.msk.f32.gmra.mrb[30].mxu1 %vm1404_vm3, %v2857_v4  ;;  %v3567_v28 = vsel %vm3485_vm6, %v3542_v54, %v5793_v35  ;;  %v5812_v15 = vpop.permute.xlu0 %5811 }
 0x37a   : > { %v5767_v44 = vpop.permute.xlu1 %5766  ;;  %5219 = vmatprep.mubr.msk.f32.mxu1 %vm5889_vm8, %v8650_v16  ;;  %v5814_v39 = vunpack.i.h.bf16 %v5812_v15 }
 0x37b   : > { %v5769_v40 = vunpack.i.h.bf16 %v5767_v44  ;;  %v5768_v41 = vunpack.i.l.bf16 %v5767_v44  ;;  %v8671_v44 = vld [vmem:[#allocation11_spill] sm:$0xff] }
 0x37d   : > { %v3590_v26 = vsel %vm3511_vm7, %v3565_v53, %v5768_v41  ;;  %v3515_v19 = vsel %vm3511_vm7, %v3489_v43, %v5769_v40  ;;  %v1641_v40 = vmul.f32 %v8671_v44, %v1491_v45  ;;  %v3543_v53 = vsel %vm1404_vm3, %v2241_v47, %v5803_v50 }
 0x37e   : > { %v2829_v61 = vpop.permute.xlu1 %2828  ;;  %3809 = vmatprep.mubr.f32.mxu0 %v3590_v26 }
 0x37f   : > { %v2858_v27 = vmul.f32 %v2829_v61, %v2733_v24  ;;  %3810 = vmatmul.mubr.f32.gmra.mrb[106].mxu0 %v3515_v19  ;;  %v5813_v24 = vunpack.i.l.bf16 %v5812_v15  ;;  %v3466_v43 = vsel %vm1404_vm3, %v1641_v40, %v5804_v31 }
 0x381   : > { %5220 = vmatmul.mubr.msk.f32.gmra.mrb[32].mxu1 %vm1404_vm3, %v2858_v27 }
 0x382   : > { %v5782_v38 = vpop.permute.xlu1 %5781  ;;  %5222 = vmatprep.mubr.msk.f32.mxu1 %vm5889_vm8, %v8650_v16  ;;  %v1490_v16 = vld [vmem:[#allocation2 + $0x29] sm:$0xff] }
 0x383   : > { %v5784_v18 = vunpack.i.h.bf16 %v5782_v38  ;;  %v5783_v63 = vunpack.i.l.bf16 %v5782_v38  ;;  %v1640_v56 = vmul.f32 %v8669_v37, %v1490_v16 }
 0x385   : > { %v3591_v49 = vsel %vm3511_vm7, %v3566_v7, %v5783_v63  ;;  %v3516_v2 = vsel %vm3511_vm7, %v3490_v62, %v5784_v18  ;;  %v3465_v29 = vsel %vm1404_vm3, %v1640_v56, %v5789_v51  ;;  %v8162_v63 = vld [vmem:[%s8378_s5] ss:$0 sm:$0xff] }
 0x386   : > { %v2833_v20 = vpop.permute.xlu1 %2832  ;;  %3814 = vmatprep.mubr.f32.mxu0 %v3591_v49  ;;  %v3491_v4 = vsel %vm3485_vm6, %v3465_v29, %v5794_v21 }
 0x387   : > { %v2859_v32 = vmul.f32 %v2833_v20, %v2734_v59  ;;  %3815 = vmatmul.mubr.f32.gmra.mrb[108].mxu0 %v3516_v2 }
 0x389   : > { %5223 = vmatmul.mubr.msk.f32.gmra.mrb[34].mxu1 %vm1404_vm3, %v2859_v32 }
 0x38a   : > { %v5797_v17 = vpop.permute.xlu1 %5796 }
 0x38b   : > { %v5799_v8 = vunpack.i.h.bf16 %v5797_v17  ;;  %v5798_v36 = vunpack.i.l.bf16 %v5797_v17 }
 0x38d   : > { %v3592_v34 = vsel %vm3511_vm7, %v3567_v28, %v5798_v36  ;;  %v3517_v60 = vsel %vm3511_vm7, %v3491_v4, %v5799_v8 }
 0x38e   : > { %v5807_v52 = vpop.permute.xlu1 %5806  ;;  %3819 = vmatprep.mubr.f32.mxu0 %v3592_v34 }
 0x38f   : > { %v5809_v41 = vunpack.i.h.bf16 %v5807_v52  ;;  %v5808_v22 = vunpack.i.l.bf16 %v5807_v52  ;;  %3820 = vmatmul.mubr.f32.gmra.mrb[110].mxu0 %v3517_v60 }
 0x391   : > { %v3568_v0 = vsel %vm3485_vm6, %v3543_v53, %v5808_v22  ;;  %v3492_v26 = vsel %vm3485_vm6, %v3466_v43, %v5809_v41 }
 0x392   : > { %v3593_v19 = vsel %vm3511_vm7, %v3568_v0, %v5813_v24  ;;  %v3518_v61 = vsel %vm3511_vm7, %v3492_v26, %v5814_v39 }
 0x393   : > { %3824 = vmatprep.mubr.f32.mxu0 %v3593_v19 }
 0x394   : > { %3825 = vmatmul.mubr.f32.gmra.mrb[112].mxu0 %v3518_v61 }
 0x3c0   : > { %v8145_v1 = vpop.f32.mrb[36].mxu1 }
 0x3c1   : > { %v5152_v3 = vpop.f32.mrb[37].mxu1 }
 0x3c4   : > { %v8147_v46 = vpop.f32.mrb[38].mxu1 }
 0x3c5   : > { %v5155_v13 = vpop.f32.mrb[39].mxu1 }
 0x3cb   : > { %v8149_v27 = vpop.f32.mrb[40].mxu1 }
 0x3cc   : > { %v5158_v42 = vpop.f32.mrb[41].mxu1 }
 0x3cf   : > { %v8151_v11 = vpop.f32.mrb[42].mxu1 }
 0x3d0   : > { %v5161_v58 = vpop.f32.mrb[43].mxu1 }
 0x3d3   : > { %v8153_v14 = vpop.f32.mrb[44].mxu1 }
 0x3d4   : > { %v5164_v55 = vpop.f32.mrb[45].mxu1 }
 0x3d7   : > { %v8155_v5 = vpop.f32.mrb[46].mxu1 }
 0x3d8   : > { %v5167_v38 = vpop.f32.mrb[47].mxu1 }
 0x3db   : > { %v8157_v33 = vpop.f32.mrb[48].mxu1 }
 0x3dc   : > { %v5170_v18 = vpop.f32.mrb[49].mxu1 }
 0x3df   : > { %v4021_v9 = vpop.f32.mrb[0].mxu1 }
 0x3e0   : > { %v5331_v25 = vadd.f32 %v8162_v63, %v4021_v9  ;;  %v5173_v59 = vpop.f32.mrb[1].mxu1 }
 0x3e2   : > { %v4117_v7 = vmax.f32 %v5331_v25, 0.0 }
 0x3e3   : > { %v4026_v62 = vpop.f32.mrb[2].mxu1 }
 0x3e4   : > { %4169 = vst.msk [vmem:[#allocation3 + $0x38] sm:$0xff] %vm3485_vm6, %v4117_v7  ;;  %v5332_v49 = vadd.f32 %v8162_v63, %v4026_v62  ;;  %v5176_v2 = vpop.f32.mrb[3].mxu1 }
 0x3e6   : > { %v4118_v20 = vmax.f32 %v5332_v49, 0.0 }
 0x3e7   : > { %v4031_v12 = vpop.f32.mrb[4].mxu1 }
 0x3e8   : > { %4170 = vst.msk [vmem:[#allocation3 + $0x40] sm:$0xff] %vm3485_vm6, %v4118_v20  ;;  %v5333_v16 = vadd.f32 %v8162_v63, %v4031_v12  ;;  %v5179_v51 = vpop.f32.mrb[5].mxu1 }
 0x3ea   : > { %v4119_v48 = vmax.f32 %v5333_v16, 0.0 }
 0x3eb   : > { %v4036_v32 = vpop.f32.mrb[6].mxu1 }
 0x3ec   : > { %4171 = vst.msk [vmem:[#allocation3 + $0x48] sm:$0xff] %vm3485_vm6, %v4119_v48  ;;  %v5334_v21 = vadd.f32 %v8162_v63, %v4036_v32  ;;  %v5182_v35 = vpop.f32.mrb[7].mxu1 }
 0x3ee   : > { %v4120_v23 = vmax.f32 %v5334_v21, 0.0 }
 0x3ef   : > { %v4041_v57 = vpop.f32.mrb[8].mxu1 }
 0x3f0   : > { %4172 = vst.msk [vmem:[#allocation3 + $0x50] sm:$0xff] %vm3485_vm6, %v4120_v23  ;;  %v5335_v30 = vadd.f32 %v8162_v63, %v4041_v57  ;;  %v5185_v37 = vpop.f32.mrb[9].mxu1 }
 0x3f2   : > { %v4121_v56 = vmax.f32 %v5335_v30, 0.0 }
 0x3f3   : > { %v4046_v17 = vpop.f32.mrb[10].mxu1 }
 0x3f4   : > { %4173 = vst.msk [vmem:[#allocation3 + $0x58] sm:$0xff] %vm3485_vm6, %v4121_v56  ;;  %v5336_v8 = vadd.f32 %v8162_v63, %v4046_v17  ;;  %v5188_v36 = vpop.f32.mrb[11].mxu1 }
 0x3f6   : > { %v4122_v54 = vmax.f32 %v5336_v8, 0.0 }
 0x3f7   : > { %v4051_v29 = vpop.f32.mrb[12].mxu1 }
 0x3f8   : > { %4174 = vst.msk [vmem:[#allocation3 + $0x60] sm:$0xff] %vm3485_vm6, %v4122_v54  ;;  %v5337_v6 = vadd.f32 %v8162_v63, %v4051_v29  ;;  %v5191_v45 = vpop.f32.mrb[13].mxu1 }
 0x3fa   : > { %v4123_v31 = vmax.f32 %v5337_v6, 0.0 }
 0x3fb   : > { %v4056_v50 = vpop.f32.mrb[14].mxu1 }
 0x3fc   : > { %4175 = vst.msk [vmem:[#allocation3 + $0x68] sm:$0xff] %vm3485_vm6, %v4123_v31  ;;  %v5338_v28 = vadd.f32 %v8162_v63, %v4056_v50  ;;  %v5194_v4 = vpop.f32.mrb[15].mxu1 }
 0x3fe   : > { %v4124_v15 = vmax.f32 %v5338_v28, 0.0 }
 0x3ff   : > { %v4061_v34 = vpop.f32.mrb[16].mxu1 }
 0x400   : > { %4176 = vst.msk [vmem:[#allocation3 + $0x70] sm:$0xff] %vm3485_vm6, %v4124_v15  ;;  %v5339_v60 = vadd.f32 %v8162_v63, %v4061_v34  ;;  %v5197_v52 = vpop.f32.mrb[17].mxu1 }
 0x402   : > { %v4125_v10 = vmax.f32 %v5339_v60, 0.0 }
 0x403   : > { %v4066_v47 = vpop.f32.mrb[18].mxu1 }
 0x404   : > { %4177 = vst.msk [vmem:[#allocation3 + $0x78] sm:$0xff] %vm3485_vm6, %v4125_v10  ;;  %v5340_v44 = vadd.f32 %v8162_v63, %v4066_v47  ;;  %v5200_v40 = vpop.f32.mrb[19].mxu1 }
 0x406   : > { %v4126_v41 = vmax.f32 %v5340_v44, 0.0 }
 0x407   : > { %v4071_v22 = vpop.f32.mrb[20].mxu1 }
 0x408   : > { %4178 = vst.msk [vmem:[#allocation3 + $0x80] sm:$0xff] %vm3485_vm6, %v4126_v41  ;;  %v5341_v39 = vadd.f32 %v8162_v63, %v4071_v22  ;;  %v5203_v24 = vpop.f32.mrb[21].mxu1 }
 0x40a   : > { %v4127_v53 = vmax.f32 %v5341_v39, 0.0 }
 0x40b   : > { %v4076_v43 = vpop.f32.mrb[22].mxu1 }
 0x40c   : > { %4179 = vst.msk [vmem:[#allocation3 + $0x88] sm:$0xff] %vm3485_vm6, %v4127_v53  ;;  %v5342_v0 = vadd.f32 %v8162_v63, %v4076_v43  ;;  %v5206_v26 = vpop.f32.mrb[23].mxu1 }
 0x40e   : > { %v4128_v19 = vmax.f32 %v5342_v0, 0.0 }
 0x40f   : > { %v4081_v61 = vpop.f32.mrb[24].mxu1 }
 0x410   : > { %4180 = vst.msk [vmem:[#allocation3 + $0x90] sm:$0xff] %vm3485_vm6, %v4128_v19  ;;  %v5343_v3 = vadd.f32 %v8162_v63, %v4081_v61  ;;  %v5209_v13 = vpop.f32.mrb[25].mxu1 }
 0x412   : > { %v4129_v42 = vmax.f32 %v5343_v3, 0.0 }
 0x414   : > { %4181 = vst.msk [vmem:[#allocation3 + $0x98] sm:$0xff] %vm3485_vm6, %v4129_v42 }
 0x42d   : > { %v3796_v58 = vpop.f32.mrb[100].mxu0 }
 0x42e   : > { %v3797_v55 = vadd.f32 %v8162_v63, %v3796_v58  ;;  %v3798_v38 = vpop.f32.mrb[101].mxu0 }
 0x430   : > { %v3987_v18 = vadd.f32 %v8145_v1, %v3797_v55 }
 0x432   : > { %v4110_v9 = vmax.f32 %v3987_v18, 0.0  ;;  %v5890_v18 = vmov 1966171168  }
 0x434   : > { %4162 = vst.msk [vmem:[#allocation3] sm:$0xff] %vm3485_vm6, %v4110_v9  ;;  %v4500_v9 = vunpack.c.l.s4 %v5890_v18 }
 0x43b   : > { %v4188_v4 = vld [vmem:[#allocation3] sm:$0xff] }
 0x43c   : > { %v4086_v25 = vpop.f32.mrb[26].mxu1 }
 0x43d   : > { %v5344_v59 = vadd.f32 %v8162_v63, %v4086_v25  ;;  %v5212_v7 = vpop.f32.mrb[27].mxu1  ;;  %v4502_v25 = vlaneseq }
 0x43f   : > { %v4130_v62 = vmax.f32 %v5344_v59, 0.0  ;;  %vm4665_vm10 = vcmp.lt.s32.totalorder %v4502_v25, 64 }
 0x441   : > { %4182 = vst.msk [vmem:[#allocation3 + $0xa0] sm:$0xff] %vm3485_vm6, %v4130_v62 }
 0x442   : > { %v3801_v49 = vpop.f32.mrb[102].mxu0 }
 0x443   : > { %v3802_v2 = vadd.f32 %v8162_v63, %v3801_v49  ;;  %v3803_v20 = vpop.f32.mrb[103].mxu0 }
 0x444   : > { %v4091_v12 = vpop.f32.mrb[28].mxu1 }
 0x445   : > { %v3992_v16 = vadd.f32 %v8147_v46, %v3802_v2  ;;  %v5345_v51 = vadd.f32 %v8162_v63, %v4091_v12  ;;  %v5215_v1 = vpop.f32.mrb[29].mxu1 }
 0x446   : > { %v4503_v1 = vshrl.u32 %v4502_v25, 7  ;;  %v4248_v25 = vld [vmem:[#allocation3 + $0x6e] sm:$0xff] }
 0x447   : > { %v4111_v48 = vmax.f32 %v3992_v16, 0.0  ;;  %v4131_v32 = vmax.f32 %v5345_v51, 0.0  ;;  %v4501_v51 = vunpack.c.0.s8 %v4500_v9  ;;  %v4196_v9 = vld [vmem:[#allocation3 + $0x58] sm:$0xff] }
 0x449   : > { %4163 = vst.msk [vmem:[#allocation3 + $0x8] sm:$0xff] %vm3485_vm6, %v4111_v48  ;;  %4183 = vst.msk [vmem:[#allocation3 + $0xa8] sm:$0xff] %vm3485_vm6, %v4131_v32 }
 0x44a   : > { %v3806_v21 = vpop.f32.mrb[104].mxu0 }
 0x44b   : > { %v3807_v35 = vadd.f32 %v8162_v63, %v3806_v21  ;;  %v3808_v23 = vpop.f32.mrb[105].mxu0 }
 0x44c   : > { %v4096_v57 = vpop.f32.mrb[30].mxu1 }
 0x44d   : > { %v3997_v30 = vadd.f32 %v8149_v27, %v3807_v35  ;;  %v5346_v37 = vadd.f32 %v8162_v63, %v4096_v57  ;;  %v5218_v56 = vpop.f32.mrb[31].mxu1 }
 0x44f   : > { %v4112_v46 = vmax.f32 %v3997_v30, 0.0  ;;  %v4132_v17 = vmax.f32 %v5346_v37, 0.0  ;;  %v8231_v30 = vsub.s32 %v4501_v51, %v4503_v1  ;;  %v4212_v1 = vld [vmem:[#allocation3 + $0x51] sm:$0xff] }
 0x450   : > { %v4205_v27 = vld [vmem:[#allocation3 + $0x1] sm:$0xff] }
 0x451   : > { %4164 = vst.msk [vmem:[#allocation3 + $0x10] sm:$0xff] %vm3485_vm6, %v4112_v46  ;;  %4184 = vst.msk [vmem:[#allocation3 + $0xb0] sm:$0xff] %vm3485_vm6, %v4132_v17  ;;  %v4222_v60 = vmax.f32 %v4188_v4, %v4205_v27  ;;  %v4189_v19 = vld [vmem:[#allocation3 + $0x8] sm:$0xff] }
 0x452   : > { %v3811_v8 = vpop.f32.mrb[106].mxu0  ;;  %v4262_v27 = vld [vmem:[#allocation3 + $0x4f] sm:$0xff]  ;;  %v4244_v4 = vld [vmem:[#allocation3 + $0x46] sm:$0xff] }
 0x453   : > { %v3812_v36 = vadd.f32 %v8162_v63, %v3811_v8  ;;  %v3813_v54 = vpop.f32.mrb[107].mxu0 }
 0x454   : > { %v4101_v29 = vpop.f32.mrb[32].mxu1  ;;  %v4211_v54 = vld [vmem:[#allocation3 + $0x41] sm:$0xff] }
 0x455   : > { %v4002_v6 = vadd.f32 %v8151_v11, %v3812_v36  ;;  %v5347_v45 = vadd.f32 %v8162_v63, %v4101_v29  ;;  %v5221_v31 = vpop.f32.mrb[33].mxu1 }
 0x456   : > { %v4245_v31 = vld [vmem:[#allocation3 + $0x4e] sm:$0xff] }
 0x457   : > { %v4113_v50 = vmax.f32 %v4002_v6, 0.0  ;;  %v4133_v28 = vmax.f32 %v5347_v45, 0.0 }
 0x458   : > { %v4239_v15 = vld [vmem:[#allocation3 + $0xe] sm:$0xff] }
 0x459   : > { %v4256_v34 = vld [vmem:[#allocation3 + $0xf] sm:$0xff]  ;;  %4165 = vst.msk [vmem:[#allocation3 + $0x18] sm:$0xff] %vm3485_vm6, %v4113_v50  ;;  %4185 = vst.msk [vmem:[#allocation3 + $0xb8] sm:$0xff] %vm3485_vm6, %v4133_v28  ;;  %v4194_v28 = vld [vmem:[#allocation3 + $0x40] sm:$0xff] }
 0x45a   : > { %v4273_v52 = vmax.f32 %v4239_v15, %v4256_v34  ;;  %v3816_v10 = vpop.f32.mrb[108].mxu0  ;;  %v4206_v43 = vld [vmem:[#allocation3 + $0x9] sm:$0xff] }
 0x45b   : > { %v3817_v47 = vadd.f32 %v8162_v63, %v3816_v10  ;;  %v3818_v44 = vpop.f32.mrb[109].mxu0  ;;  %v4204_v48 = vld [vmem:[#allocation3 + $0xb0] sm:$0xff]  ;;  %v4261_v15 = vld [vmem:[#allocation3 + $0x47] sm:$0xff] }
 0x45c   : > { %v8211_v11 = vmax.f32 %v4222_v60, %v4273_v52  ;;  %v4106_v40 = vpop.f32.mrb[34].mxu1 }
 0x45d   : > { %v4007_v41 = vadd.f32 %v8153_v14, %v3817_v47  ;;  %v5348_v22 = vadd.f32 %v8162_v63, %v4106_v40  ;;  %v5224_v39 = vpop.f32.mrb[35].mxu1  ;;  %v4223_v14 = vmax.f32 %v4189_v19, %v4206_v43  ;;  %v4247_v43 = vld [vmem:[#allocation3 + $0x66] sm:$0xff] }
 0x45e   : > { %v4314_v24 = vrot.slane %v8211_v11, 6  ;;  %v4308_v53 = vrot.slane %v8211_v11, 2  ;;  %v4210_v39 = vld [vmem:[#allocation3 + $0x39] sm:$0xff] }
 0x45f   : > { %v4114_v0 = vmax.f32 %v4007_v41, 0.0  ;;  %v4134_v26 = vmax.f32 %v5348_v22, 0.0  ;;  %v4279_v22 = vmax.f32 %v4245_v31, %v4262_v27  ;;  %v4216_v27 = vld [vmem:[#allocation3 + $0x79] sm:$0xff] }
 0x460   : > { %4315 = vrot.lane.b32.xlu0 %v4314_v24, %s5888_s20  ;;  %4309 = vrot.lane.b32.xlu1 %v4308_v53, %s5888_s20  ;;  %v4240_v61 = vld [vmem:[#allocation3 + $0x16] sm:$0xff]  ;;  %v4228_v53 = vmax.f32 %v4194_v28, %v4211_v54  ;;  %v4250_v54 = vld [vmem:[#allocation3 + $0x86] sm:$0xff] }
 0x461   : > { %v4257_v3 = vld [vmem:[#allocation3 + $0x17] sm:$0xff]  ;;  %4166 = vst.msk [vmem:[#allocation3 + $0x20] sm:$0xff] %vm3485_vm6, %v4114_v0  ;;  %v4264_v0 = vld [vmem:[#allocation3 + $0x67] sm:$0xff] }
 0x462   : > { %4187 = vst.msk [vmem:[#allocation3 + $0xc0] sm:$0xf] %vm4186_vm9, %v4134_v26  ;;  %v4274_v13 = vmax.f32 %v4240_v61, %v4257_v3  ;;  %v3821_v42 = vpop.f32.mrb[110].mxu0  ;;  %v4221_v2 = vld [vmem:[#allocation3 + $0xb1] sm:$0xff]  ;;  %v4278_v3 = vmax.f32 %v4244_v4, %v4261_v15  ;;  %v4281_v18 = vmax.f32 %v4247_v43, %v4264_v0 }
 0x463   : > { %v3822_v58 = vadd.f32 %v8162_v63, %v3821_v42  ;;  %v3823_v55 = vpop.f32.mrb[111].mxu0  ;;  %v4238_v21 = vmax.f32 %v4204_v48, %v4221_v2  ;;  %v4190_v56 = vld [vmem:[#allocation3 + $0x18] sm:$0xff] }
 0x464   : > { %v8221_v38 = vmax.f32 %v4223_v14, %v4274_v13  ;;  %v4193_v14 = vld [vmem:[#allocation3 + $0x38] sm:$0xff] }
 0x465   : > { %v4012_v59 = vadd.f32 %v8155_v5, %v3822_v58  ;;  %v4213_v13 = vld [vmem:[#allocation3 + $0x59] sm:$0xff]  ;;  %v8253_v58 = vmax.f32 %v4228_v53, %v4279_v22  ;;  %v4227_v55 = vmax.f32 %v4193_v14, %v4210_v39  ;;  %v4218_v53 = vld [vmem:[#allocation3 + $0x91] sm:$0xff] }
 0x466   : > { %v4319_v7 = vrot.slane %v8221_v38, 2  ;;  %v4246_v2 = vld [vmem:[#allocation3 + $0x5e] sm:$0xff] }
 0x467   : > { %v4115_v62 = vmax.f32 %v4012_v59, 0.0  ;;  %v3826_v49 = vpop.f32.mrb[112].mxu0  ;;  %v4265_v59 = vld [vmem:[#allocation3 + $0x6f] sm:$0xff]  ;;  %v4268_v28 = vld [vmem:[#allocation3 + $0x97] sm:$0xff] }
 0x468   : > { %4320 = vrot.lane.b32.xlu1 %v4319_v7, %s5888_s20  ;;  %v3827_v20 = vadd.f32 %v8162_v63, %v3826_v49  ;;  %v3828_v12 = vpop.f32.mrb[113].mxu0  ;;  %v4207_v63 = vld [vmem:[#allocation3 + $0x19] sm:$0xff]  ;;  %v4230_v49 = vmax.f32 %v4196_v9, %v4213_v13  ;;  %v4282_v48 = vmax.f32 %v4248_v25, %v4265_v59  ;;  %v4220_v9 = vld [vmem:[#allocation3 + $0xa9] sm:$0xff] }
 0x469   : > { %v4255_v16 = vld [vmem:[#allocation3 + $0xbe] sm:$0xff]  ;;  %4167 = vst.msk [vmem:[#allocation3 + $0x28] sm:$0xff] %vm3485_vm6, %v4115_v62  ;;  %v4224_v36 = vmax.f32 %v4190_v56, %v4207_v63  ;;  %v8256_v62 = vmax.f32 %v4227_v55, %v4278_v3  ;;  %v4215_v56 = vld [vmem:[#allocation3 + $0x71] sm:$0xff]  ;;  %v4253_v55 = vld [vmem:[#allocation3 + $0xa6] sm:$0xff] }
 0x46a   : > { %v4272_v32 = vld [vmem:[#allocation3 + $0xbf] sm:$0xff]  ;;  %v4017_v5 = vadd.f32 %v8157_v33, %v3827_v20  ;;  %v8260_v51 = vmax.f32 %v4230_v49, %v4281_v18  ;;  %v4254_v3 = vld [vmem:[#allocation3 + $0xb6] sm:$0xff]  ;;  %v4270_v18 = vld [vmem:[#allocation3 + $0xa7] sm:$0xff] }
 0x46b   : > { %v4289_v35 = vmax.f32 %v4255_v16, %v4272_v32  ;;  %v4191_v50 = vld [vmem:[#allocation3 + $0x20] sm:$0xff]  ;;  %v4364_v16 = vrot.slane %v8253_v58, 6  ;;  %v4271_v14 = vld [vmem:[#allocation3 + $0xb7] sm:$0xff] }
 0x46c   : > { %v4116_v23 = vmax.f32 %v4017_v5, 0.0  ;;  %v4263_v20 = vld [vmem:[#allocation3 + $0x5f] sm:$0xff] }
 0x46d   : > { %v8229_v57 = vmax.f32 %v4238_v21, %v4289_v35  ;;  %v4214_v12 = vld [vmem:[#allocation3 + $0x61] sm:$0xff]  ;;  %v4349_v35 = vrot.slane %v8256_v62, 2  ;;  %v4219_v49 = vld [vmem:[#allocation3 + $0x99] sm:$0xff] }
 0x46e   : > { %4168 = vst.msk [vmem:[#allocation3 + $0x30] sm:$0xff] %vm3485_vm6, %v4116_v23  ;;  %v4197_v32 = vld [vmem:[#allocation3 + $0x60] sm:$0xff]  ;;  %v4280_v23 = vmax.f32 %v4246_v2, %v4263_v20  ;;  %v4203_v2 = vld [vmem:[#allocation3 + $0xa8] sm:$0xff]  ;;  %v4287_v20 = vmax.f32 %v4253_v55, %v4270_v18 }
 0x46f   : > { %v4479_v37 = vrot.slane %v8229_v57, 4  ;;  %v4249_v5 = vld [vmem:[#allocation3 + $0x7e] sm:$0xff]  ;;  %v4231_v63 = vmax.f32 %v4197_v32, %v4214_v12  ;;  %v4237_v12 = vmax.f32 %v4203_v2, %v4220_v9 }
 0x470   : > { %v4241_v46 = vld [vmem:[#allocation3 + $0x26] sm:$0xff] }
 0x471   : > { %v4258_v17 = vld [vmem:[#allocation3 + $0x27] sm:$0xff]  ;;  %v4648_v8 = vrot.slane %v4479_v37, %v8231_v30  ;;  %v4266_v21 = vld [vmem:[#allocation3 + $0x7f] sm:$0xff]  ;;  %v4195_v37 = vld [vmem:[#allocation3 + $0x50] sm:$0xff] }
 0x472   : > { %v4275_v33 = vmax.f32 %v4241_v46, %v4258_v17  ;;  %v4208_v45 = vld [vmem:[#allocation3 + $0x21] sm:$0xff]  ;;  %v4375_v46 = vrot.slane %v8260_v51, 4  ;;  %v4229_v17 = vmax.f32 %v4195_v37, %v4212_v1 }
 0x473   : > { %v4655_v29 = vrot.slane %v4648_v8, %v8231_v30  ;;  %v4225_v47 = vmax.f32 %v4191_v50, %v4208_v45  ;;  %v4192_v24 = vld [vmem:[#allocation3 + $0x28] sm:$0xff]  ;;  %v4299_v8 = vmax.f32 %v4231_v63, %v4282_v48  ;;  %v4251_v50 = vld [vmem:[#allocation3 + $0x96] sm:$0xff] }
 0x474   : > { %v8243_v6 = vmax.f32 %v4224_v36, %v4275_v33  ;;  %v4283_v36 = vmax.f32 %v4249_v5, %v4266_v21  ;;  %v4198_v33 = vld [vmem:[#allocation3 + $0x70] sm:$0xff]  ;;  %v8267_v45 = vmax.f32 %v4229_v17, %v4280_v23  ;;  %v4451_v23 = vrot.slane %v8229_v57, 2 }
 0x475   : > { %4667 = vst.msk [vmem:[%s8240_s14 + $0x18] sm:$0x1] %vm4665_vm10, %v4655_v29  ;;  %v4242_v60 = vld [vmem:[#allocation3 + $0x2e] sm:$0xff]  ;;  %v4243_v40 = vld [vmem:[#allocation3 + $0x36] sm:$0xff]  ;;  %v4232_v31 = vmax.f32 %v4198_v33, %v4215_v56  ;;  %v4387_v4 = vrot.slane %v4299_v8, 4  ;;  %v4323_v17 = vrot.slane %v8221_v38, 4 }
 0x476   : > { %v4326_v34 = vrot.slane %v8243_v6, 4  ;;  %v4259_v52 = vld [vmem:[#allocation3 + $0x2f] sm:$0xff]  ;;  %v4260_v41 = vld [vmem:[#allocation3 + $0x37] sm:$0xff]  ;;  %v4267_v29 = vld [vmem:[#allocation3 + $0x87] sm:$0xff]  ;;  %v4312_v8 = vrot.slane %v8211_v11, 4 }
 0x477   : > { %v4209_v10 = vld [vmem:[#allocation3 + $0x29] sm:$0xff]  ;;  %v4276_v44 = vmax.f32 %v4242_v60, %v4259_v52  ;;  %v4277_v61 = vmax.f32 %v4243_v40, %v4260_v41  ;;  %v8271_v15 = vmax.f32 %v4232_v31, %v4283_v36  ;;  %v4199_v60 = vld [vmem:[#allocation3 + $0x78] sm:$0xff] }
 0x478   : > { %4327 = vrot.lane.b32.xlu0 %v4326_v34, %s5888_s20  ;;  %v4226_v19 = vmax.f32 %v4192_v24, %v4209_v10  ;;  %v4284_v34 = vmax.f32 %v4250_v54, %v4267_v29  ;;  %v4217_v52 = vld [vmem:[#allocation3 + $0x89] sm:$0xff]  ;;  %v4233_v10 = vmax.f32 %v4199_v60, %v4216_v27  ;;  %v4252_v40 = vld [vmem:[#allocation3 + $0x9e] sm:$0xff]  ;;  %v4330_v54 = vrot.slane %v8243_v6, 6 }
 0x479   : > { %v8248_v26 = vmax.f32 %v4225_v47, %v4276_v44  ;;  %v4285_v47 = vmax.f32 %v4251_v50, %v4268_v28  ;;  %v4200_v44 = vld [vmem:[#allocation3 + $0x88] sm:$0xff]  ;;  %v4269_v41 = vld [vmem:[#allocation3 + $0x9f] sm:$0xff]  ;;  %v4398_v22 = vrot.slane %v8271_v15, 2  ;;  %v4394_v43 = vrot.slane %v8271_v15, 6 }
 0x47a   : > { %v4294_v7 = vmax.f32 %v4226_v19, %v4277_v61  ;;  %v8277_v39 = vmax.f32 %v4233_v10, %v4284_v34  ;;  %v4234_v24 = vmax.f32 %v4200_v44, %v4217_v52  ;;  %v4286_v19 = vmax.f32 %v4252_v40, %v4269_v41  ;;  %v4201_v61 = vld [vmem:[#allocation3 + $0x90] sm:$0xff] }
 0x47b   : > { %4333 = vrot.lane.b32.xlu1 %v8248_v26, %s5888_s20  ;;  %v4338_v42 = vrot.slane %v8248_v26, 4  ;;  %v4336_v29 = vrot.slane %v8248_v26, 2  ;;  %v4342_v44 = vrot.slane %v8248_v26, 6 }
 0x47c   : > { %v8281_v0 = vmax.f32 %v4234_v24, %v4285_v47  ;;  %v4410_v13 = vrot.slane %v8277_v39, 2 }
 0x47d   : > { %4339 = vrot.lane.b32.xlu0 %v4338_v42, %s5888_s20  ;;  %v4235_v42 = vmax.f32 %v4201_v61, %v4218_v53 }
 0x47e   : > { %v4417_v25 = vrot.slane %v8281_v0, 4 }
 0x47f   : > { %4345 = vrot.lane.b32.xlu1 %v4294_v7, %s5888_s20  ;;  %v8287_v59 = vmax.f32 %v4235_v42, %v4286_v19  ;;  %v4288_v7 = vmax.f32 %v4254_v3, %v4271_v14  ;;  %v4362_v14 = vrot.slane %v8253_v58, 4 }
 0x481   : > { %4365 = vrot.lane.b32.xlu0 %v4364_v16, %s5888_s20  ;;  %v4202_v16 = vld [vmem:[#allocation3 + $0x98] sm:$0xff]  ;;  %v4429_v1 = vrot.slane %v8287_v59, 4  ;;  %v8293_v32 = vmax.f32 %v4237_v12, %v4288_v7 }
 0x482   : > { %v4236_v48 = vmax.f32 %v4202_v16, %v4219_v49 }
 0x483   : > { %4350 = vrot.lane.b32.xlu1 %v4349_v35, %s5888_s20  ;;  %v4440_v21 = vrot.slane %v8293_v32, 2  ;;  %v4446_v35 = vrot.slane %v8293_v32, 6 }
 0x484   : > { %v4304_v5 = vmax.f32 %v4236_v48, %v4287_v20 }
 0x485   : > { %4376 = vrot.lane.b32.xlu0 %v4375_v46, %s5888_s20 }
 0x487   : > { %4369 = vrot.lane.b32.xlu1 %v8267_v45, %s5888_s20 }
 0x489   : > { %4388 = vrot.lane.b32.xlu0 %v4387_v4, %s5888_s20 }
 0x48b   : > { %4381 = vrot.lane.b32.xlu1 %v8260_v51, %s5888_s20 }
 0x48d   : > { %4399 = vrot.lane.b32.xlu0 %v4398_v22, %s5888_s20 }
 0x48f   : > { %4395 = vrot.lane.b32.xlu1 %v4394_v43, %s5888_s20  ;;  %v4372_v43 = vrot.slane %v8267_v45, 2  ;;  %v4384_v45 = vrot.slane %v8260_v51, 2 }
 0x491   : > { %4411 = vrot.lane.b32.xlu0 %v4410_v13, %s5888_s20 }
 0x493   : > { %4418 = vrot.lane.b32.xlu1 %v4417_v25, %s5888_s20  ;;  %v4379_v25 = vrot.slane %v8260_v51, 6 }
 0x495   : > { %4424 = vrot.lane.b32.xlu0 %v8287_v59, %s5888_s20 }
 0x497   : > { %4430 = vrot.lane.b32.xlu1 %v4429_v1, %s5888_s20 }
 0x499   : > { %4436 = vrot.lane.b32.xlu0 %v4304_v5, %s5888_s20 }
 0x49b   : > { %4441 = vrot.lane.b32.xlu1 %v4440_v21, %s5888_s20 }
 0x49d   : > { %4447 = vrot.lane.b32.xlu0 %v4446_v35, %s5888_s20 }
 0x49f   : > { %4452 = vrot.lane.b32.xlu1 %v4451_v23, %s5888_s20  ;;  %v4392_v23 = vrot.slane %v8271_v15, 4 }
 0x4d2   : > { %v4310_v63 = vpop.permute.xlu1 %4309  ;;  %v4316_v37 = vpop.permute.xlu0 %4315 }
 0x4d3   : > { %v4354_v31 = vsel %vm3485_vm6, %v4312_v8, %v4316_v37  ;;  %v4353_v50 = vsel %vm3485_vm6, %v8211_v11, %v4310_v63 }
 0x4d4   : > { %v4495_v47 = vcombine.low %v4353_v50, %v4354_v31 }
 0x4da   : > { %v4321_v56 = vpop.permute.xlu1 %4320 }
 0x4db   : > { %v4355_v28 = vsel %vm3485_vm6, %v8221_v38, %v4321_v56  ;;  %v4505_v38 = vrot.slane %v4495_v47, %v8231_v30  ;;  %v4421_v47 = vrot.slane %v8281_v0, 6 }
 0x4ea   : > { %v4328_v46 = vpop.permute.xlu0 %4327 }
 0x4eb   : > { %v4356_v33 = vsel %vm3485_vm6, %v4323_v17, %v4328_v46 }
 0x4ec   : > { %v4496_v60 = vcombine.low %v4355_v28, %v4356_v33 }
 0x4ed   : > { %v4334_v36 = vpop.permute.xlu1 %4333 }
 0x4ee   : > { %v4357_v4 = vsel %vm3485_vm6, %v4330_v54, %v4334_v36  ;;  %v4512_v40 = vrot.slane %v4496_v60, %v8231_v30 }
 0x4ef   : > { %v4340_v27 = vpop.permute.xlu0 %4339 }
 0x4f0   : > { %v4358_v34 = vsel %vm3485_vm6, %v4336_v29, %v4340_v27  ;;  %v4527_v19 = vcombine.low %v4505_v38, %v4512_v40 }
 0x4f1   : > { %v4497_v52 = vcombine.low %v4357_v4, %v4358_v34  ;;  %v4346_v10 = vpop.permute.xlu1 %4345  ;;  %v4427_v34 = vrot.slane %v8287_v59, 2 }
 0x4f2   : > { %v4359_v22 = vsel %vm3485_vm6, %v4342_v44, %v4346_v10  ;;  %v4535_v7 = vrot.slane %v4527_v19, %v8231_v30  ;;  %v4414_v10 = vrot.slane %v8277_v39, 4  ;;  %v4433_v19 = vrot.slane %v8287_v59, 6 }
 0x4f3   : > { %v4366_v6 = vpop.permute.xlu0 %4365  ;;  %v4519_v61 = vrot.slane %v4497_v52, %v8231_v30 }
 0x4f4   : > { %v4402_v9 = vsel %vm3485_vm6, %v4362_v14, %v4366_v6  ;;  %v4444_v14 = vrot.slane %v8293_v32, 4 }
 0x4f5   : > { %v4351_v41 = vpop.permute.xlu1 %4350  ;;  %v4472_v1 = vrot.slane %v4402_v9, 4 }
 0x4f6   : > { %v4360_v11 = vsel %vm3485_vm6, %v8256_v62, %v4351_v41 }
 0x4f7   : > { %v4498_v24 = vcombine.low %v4359_v22, %v4360_v11  ;;  %v4377_v53 = vpop.permute.xlu0 %4376  ;;  %v4471_v49 = vrot.slane %v4360_v11, 4 }
 0x4f8   : > { %v4404_v13 = vsel %vm3485_vm6, %v4372_v43, %v4377_v53 }
 0x4f9   : > { %v4526_v3 = vrot.slane %v4498_v24, %v8231_v30  ;;  %v4370_v26 = vpop.permute.xlu1 %4369  ;;  %v4474_v20 = vrot.slane %v4404_v13, 4  ;;  %v4544_v63 = vcombine.low %v4471_v49, %v4472_v1 }
 0x4fa   : > { %v4403_v42 = vsel %vm3485_vm6, %v8253_v58, %v4370_v26 }
 0x4fb   : > { %v4528_v62 = vcombine.low %v4519_v61, %v4526_v3  ;;  %v4473_v55 = vrot.slane %v4403_v42, 4  ;;  %v4389_v18 = vpop.permute.xlu0 %4388  ;;  %v4554_v29 = vrot.slane %v4544_v63, %v8231_v30 }
 0x4fc   : > { %v4406_v16 = vsel %vm3485_vm6, %v4384_v45, %v4389_v18 }
 0x4fd   : > { %v4542_v2 = vrot.slane %v4528_v62, %v8231_v30  ;;  %v4382_v12 = vpop.permute.xlu1 %4381  ;;  %v4545_v5 = vcombine.low %v4473_v55, %v4474_v20  ;;  %v4476_v37 = vrot.slane %v4406_v16, 4 }
 0x4fe   : > { %v4405_v58 = vsel %vm3485_vm6, %v4379_v25, %v4382_v12 }
 0x4ff   : > { %v4543_v48 = vcombine.low %v4535_v7, %v4542_v2  ;;  %v4475_v21 = vrot.slane %v4405_v58, 4  ;;  %v4400_v35 = vpop.permute.xlu0 %4399  ;;  %v4561_v17 = vrot.slane %v4545_v5, %v8231_v30 }
 0x500   : > { %v4408_v51 = vsel %vm3485_vm6, %v8271_v15, %v4400_v35 }
 0x501   : > { %4660 = vst [vmem:[%s8240_s14] sm:$0xff] %v4543_v48  ;;  %v4396_v56 = vpop.permute.xlu1 %4395  ;;  %v4546_v8 = vcombine.low %v4475_v21, %v4476_v37  ;;  %v4478_v36 = vrot.slane %v4408_v51, 4  ;;  %v4576_v50 = vcombine.low %v4554_v29, %v4561_v17 }
 0x502   : > { %v4407_v46 = vsel %vm3485_vm6, %v4392_v23, %v4396_v56 }
 0x503   : > { %v4477_v33 = vrot.slane %v4407_v46, 4  ;;  %v4412_v54 = vpop.permute.xlu0 %4411  ;;  %v4568_v28 = vrot.slane %v4546_v8, %v8231_v30  ;;  %v4584_v44 = vrot.slane %v4576_v50, %v8231_v30 }
 0x504   : > { %v4455_v43 = vsel %vm3485_vm6, %v8277_v39, %v4412_v54 }
 0x505   : > { %v4547_v31 = vcombine.low %v4477_v33, %v4478_v36  ;;  %v4419_v27 = vpop.permute.xlu1 %4418 }
 0x506   : > { %v4456_v22 = vsel %vm3485_vm6, %v4414_v10, %v4419_v27 }
 0x507   : > { %v4575_v15 = vrot.slane %v4547_v31, %v8231_v30  ;;  %v4425_v4 = vpop.permute.xlu0 %4424  ;;  %v4593_v61 = vcombine.low %v4455_v43, %v4456_v22 }
 0x508   : > { %v4457_v11 = vsel %vm3485_vm6, %v4421_v47, %v4425_v4 }
 0x509   : > { %v4577_v60 = vcombine.low %v4568_v28, %v4575_v15  ;;  %v4431_v52 = vpop.permute.xlu1 %4430  ;;  %v4603_v59 = vrot.slane %v4593_v61, %v8231_v30 }
 0x50a   : > { %v4458_v6 = vsel %vm3485_vm6, %v4427_v34, %v4431_v52 }
 0x50b   : > { %v4591_v40 = vrot.slane %v4577_v60, %v8231_v30  ;;  %v4437_v41 = vpop.permute.xlu0 %4436  ;;  %v4594_v24 = vcombine.low %v4457_v11, %v4458_v6 }
 0x50c   : > { %v4459_v26 = vsel %vm3485_vm6, %v4433_v19, %v4437_v41 }
 0x50d   : > { %v4592_v38 = vcombine.low %v4584_v44, %v4591_v40  ;;  %v4442_v53 = vpop.permute.xlu1 %4441  ;;  %v4610_v13 = vrot.slane %v4594_v24, %v8231_v30 }
 0x50e   : > { %v4460_v0 = vsel %vm3485_vm6, %v8293_v32, %v4442_v53 }
 0x50f   : > { %4661 = vst [vmem:[%s8240_s14 + $0x8] sm:$0xff] %v4592_v38  ;;  %v4448_v3 = vpop.permute.xlu0 %4447  ;;  %v4595_v42 = vcombine.low %v4459_v26, %v4460_v0  ;;  %v4625_v9 = vcombine.low %v4603_v59, %v4610_v13 }
 0x510   : > { %v4461_v55 = vsel %vm3485_vm6, %v4444_v14, %v4448_v3 }
 0x511   : > { %v4453_v62 = vpop.permute.xlu1 %4452  ;;  %v4617_v45 = vrot.slane %v4595_v42, %v8231_v30  ;;  %v4633_v32 = vrot.slane %v4625_v9, %v8231_v30 }
 0x512   : > { %v4462_v39 = vsel %vm3485_vm6, %v8229_v57, %v4453_v62 }
 0x513   : > { %v4596_v18 = vcombine.low %v4461_v55, %v4462_v39 }
 0x515   : > { %v4624_v25 = vrot.slane %v4596_v18, %v8231_v30 }
 0x517   : > { %v4626_v7 = vcombine.low %v4617_v45, %v4624_v25 }
 0x519   : > { %v4640_v49 = vrot.slane %v4626_v7, %v8231_v30 }
 0x51b   : > { %v4641_v2 = vcombine.low %v4633_v32, %v4640_v49 }
 0x51d   : > { %4662 = vst [vmem:[%s8240_s14 + $0x10] sm:$0xff] %v4641_v2 }
 0x51e PF: > { %s16_s21 = sadd.s32 1, %s5872_s21  }
 0x51f   : > { %p13_p4 = scmp.ge.s32.totalorder %s16_s21, 4  }
 0x521   :  { %15 = sbr.rel (!%p13_p4) target bundleno = 1 (0x1), region = 74 }

// kernel: simple_cnn_forward.3
= control target key start
LH: loop header
LB: loop body
LE: loop exit
PB: predicated region body
PF: predicated region fallthrough
CT: control target
= control target key end

     0   :  { %vm1635_vm0 = vcmask 523264   ;;  %vm3696_vm1 = vcmask 80896   ;;  %s10473_s1 = inlined_call_operand.vmem [shape: f32[3136,512], index: 1, kind: input, shape index: {}]   ;;  %s10474_s0 = inlined_call_operand.vmem [shape: f32[8,3136], index: 0, kind: input, shape index: {}]   ;;  %s10475_s3 = inlined_call_operand.vmem [shape: f32[512,10], index: 3, kind: input, shape index: {}]   ;;  %s10476_s2 = inlined_call_operand.vmem [shape: f32[1,512], index: 2, kind: input, shape index: {}]   ;;  %s10477_s4 = inlined_call_operand.vmem [shape: f32[1,10], index: 4, kind: input, shape index: {}]   ;;  %s10478_s5 = inlined_call_operand.vmem [shape: f32[8,10], index: 5, kind: output, shape index: {}]  }
   0x1   :  { %v46_v0 = vld [vmem:[%s10473_s1 + $0x8] sm:$0xff]  ;;  %v48_v2 = vld [vmem:[%s10473_s1 + $0x18] sm:$0xff]  ;;  %v45_v5 = vld [vmem:[%s10473_s1] sm:$0xff] }
   0x2   :  { %v50_v1 = vld [vmem:[%s10473_s1 + $0x28] sm:$0xff]  ;;  %v52_v4 = vld [vmem:[%s10473_s1 + $0x38] sm:$0xff]  ;;  %v49_v6 = vld [vmem:[%s10473_s1 + $0x20] sm:$0xff] }
   0x3   :  { %v3775_v3 = vpack.c.bf16 %v50_v1, %v46_v0  ;;  %v4559_v7 = vpack.c.bf16 %v52_v4, %v48_v2  ;;  %v3777_v8 = vpack.c.bf16 %v49_v6, %v45_v5  ;;  %v47_v9 = vld [vmem:[%s10473_s1 + $0x10] sm:$0xff]  ;;  %v54_v11 = vld [vmem:[%s10473_s1 + $0x48] sm:$0xff]  ;;  %v56_v14 = vld [vmem:[%s10473_s1 + $0x58] sm:$0xff] }
   0x4   :  { %v51_v10 = vld [vmem:[%s10473_s1 + $0x30] sm:$0xff]  ;;  %v58_v13 = vld [vmem:[%s10473_s1 + $0x68] sm:$0xff]  ;;  %v60_v15 = vld [vmem:[%s10473_s1 + $0x78] sm:$0xff] }
   0x5   :  { %3776 = vmatprep.subr.bf16.mxu0 %v3775_v3  ;;  %v4561_v12 = vpack.c.bf16 %v51_v10, %v47_v9  ;;  %4560 = vmatprep.subr.bf16.mxu1 %v4559_v7  ;;  %v3779_v16 = vpack.c.bf16 %v58_v13, %v54_v11  ;;  %v4563_v17 = vpack.c.bf16 %v60_v15, %v56_v14  ;;  %v53_v18 = vld [vmem:[%s10473_s1 + $0x40] sm:$0xff]  ;;  %v55_v20 = vld [vmem:[%s10473_s1 + $0x50] sm:$0xff]  ;;  %v62_v23 = vld [vmem:[%s10473_s1 + $0x88] sm:$0xff] }
   0x6   :  { %3778 = vmatpush1.bf16.msra.mxu0 %v3777_v8  ;;  %v57_v19 = vld [vmem:[%s10473_s1 + $0x60] sm:$0xff]  ;;  %v59_v22 = vld [vmem:[%s10473_s1 + $0x70] sm:$0xff]  ;;  %v66_v24 = vld [vmem:[%s10473_s1 + $0xa8] sm:$0xff] }
   0x7   :  { %4562 = vmatpush1.bf16.msra.mxu1 %v4561_v12  ;;  %v3781_v21 = vpack.c.bf16 %v57_v19, %v53_v18  ;;  %3780 = vmatprep.subr.bf16.mxu0 %v3779_v16  ;;  %v4565_v25 = vpack.c.bf16 %v59_v22, %v55_v20  ;;  %v3783_v26 = vpack.c.bf16 %v66_v24, %v62_v23  ;;  %v64_v27 = vld [vmem:[%s10473_s1 + $0x98] sm:$0xff]  ;;  %v61_v29 = vld [vmem:[%s10473_s1 + $0x80] sm:$0xff]  ;;  %v63_v32 = vld [vmem:[%s10473_s1 + $0x90] sm:$0xff] }
   0x8   :  { %4564 = vmatprep.subr.bf16.mxu1 %v4563_v17  ;;  %v68_v28 = vld [vmem:[%s10473_s1 + $0xb8] sm:$0xff]  ;;  %v65_v31 = vld [vmem:[%s10473_s1 + $0xa0] sm:$0xff]  ;;  %v67_v33 = vld [vmem:[%s10473_s1 + $0xb0] sm:$0xff] }
   0x9   :  { %v4567_v30 = vpack.c.bf16 %v68_v28, %v64_v27  ;;  %v3785_v34 = vpack.c.bf16 %v65_v31, %v61_v29  ;;  %v70_v35 = vld [vmem:[%s10473_s1 + $0xc8] sm:$0xff]  ;;  %v72_v37 = vld [vmem:[%s10473_s1 + $0xd8] sm:$0xff]  ;;  %v4569_v38 = vpack.c.bf16 %v67_v33, %v63_v32  ;;  %v69_v41 = vld [vmem:[%s10473_s1 + $0xc0] sm:$0xff] }
   0xa   :  { %3782 = vmatpush1.bf16.msra.mxu0 %v3781_v21  ;;  %v74_v36 = vld [vmem:[%s10473_s1 + $0xe8] sm:$0xff]  ;;  %v76_v40 = vld [vmem:[%s10473_s1 + $0xf8] sm:$0xff]  ;;  %v73_v42 = vld [vmem:[%s10473_s1 + $0xe0] sm:$0xff] }
   0xb   :  { %4566 = vmatpush1.bf16.msra.mxu1 %v4565_v25  ;;  %3784 = vmatprep.subr.bf16.mxu0 %v3783_v26  ;;  %v3787_v39 = vpack.c.bf16 %v74_v36, %v70_v35  ;;  %v4571_v43 = vpack.c.bf16 %v76_v40, %v72_v37  ;;  %v71_v44 = vld [vmem:[%s10473_s1 + $0xd0] sm:$0xff]  ;;  %v78_v46 = vld [vmem:[%s10473_s1 + $0x108] sm:$0xff]  ;;  %v80_v48 = vld [vmem:[%s10473_s1 + $0x118] sm:$0xff]  ;;  %v3789_v50 = vpack.c.bf16 %v73_v42, %v69_v41 }
   0xc   :  { %4568 = vmatprep.subr.bf16.mxu1 %v4567_v30  ;;  %v75_v45 = vld [vmem:[%s10473_s1 + $0xf0] sm:$0xff]  ;;  %v82_v47 = vld [vmem:[%s10473_s1 + $0x128] sm:$0xff]  ;;  %v84_v49 = vld [vmem:[%s10473_s1 + $0x138] sm:$0xff] }
   0xd   :  { %v4573_v51 = vpack.c.bf16 %v75_v45, %v71_v44  ;;  %v3791_v52 = vpack.c.bf16 %v82_v47, %v78_v46  ;;  %v77_v53 = vld [vmem:[%s10473_s1 + $0x100] sm:$0xff]  ;;  %v79_v55 = vld [vmem:[%s10473_s1 + $0x110] sm:$0xff]  ;;  %v4575_v56 = vpack.c.bf16 %v84_v49, %v80_v48  ;;  %v86_v58 = vld [vmem:[%s10473_s1 + $0x148] sm:$0xff] }
   0xe   :  { %3786 = vmatpush1.bf16.msra.mxu0 %v3785_v34  ;;  %v81_v54 = vld [vmem:[%s10473_s1 + $0x120] sm:$0xff]  ;;  %v83_v57 = vld [vmem:[%s10473_s1 + $0x130] sm:$0xff]  ;;  %v90_v59 = vld [vmem:[%s10473_s1 + $0x168] sm:$0xff] }
   0xf   :  { %4570 = vmatpush1.bf16.msra.mxu1 %v4569_v38  ;;  %3788 = vmatprep.subr.bf16.mxu0 %v3787_v39  ;;  %v88_v60 = vld [vmem:[%s10473_s1 + $0x158] sm:$0xff]  ;;  %v3793_v62 = vpack.c.bf16 %v81_v54, %v77_v53  ;;  %v4577_v63 = vpack.c.bf16 %v83_v57, %v79_v55  ;;  %v3795_v0 = vpack.c.bf16 %v90_v59, %v86_v58  ;;  %v85_v1 = vld [vmem:[%s10473_s1 + $0x140] sm:$0xff]  ;;  %v87_v3 = vld [vmem:[%s10473_s1 + $0x150] sm:$0xff] }
  0x10   :  { %4572 = vmatprep.subr.bf16.mxu1 %v4571_v43  ;;  %v92_v61 = vld [vmem:[%s10473_s1 + $0x178] sm:$0xff]  ;;  %v89_v2 = vld [vmem:[%s10473_s1 + $0x160] sm:$0xff]  ;;  %v91_v5 = vld [vmem:[%s10473_s1 + $0x170] sm:$0xff] }
  0x11   :  { %v4579_v4 = vpack.c.bf16 %v92_v61, %v88_v60  ;;  %v94_v6 = vld [vmem:[%s10473_s1 + $0x188] sm:$0xff]  ;;  %v96_v8 = vld [vmem:[%s10473_s1 + $0x198] sm:$0xff]  ;;  %v3797_v10 = vpack.c.bf16 %v89_v2, %v85_v1  ;;  %v4581_v11 = vpack.c.bf16 %v91_v5, %v87_v3  ;;  %v93_v13 = vld [vmem:[%s10473_s1 + $0x180] sm:$0xff] }
  0x12   :  { %3790 = vmatpush1.bf16.msra.mxu0 %v3789_v50  ;;  %v98_v7 = vld [vmem:[%s10473_s1 + $0x1a8] sm:$0xff]  ;;  %v100_v9 = vld [vmem:[%s10473_s1 + $0x1b8] sm:$0xff]  ;;  %v97_v14 = vld [vmem:[%s10473_s1 + $0x1a0] sm:$0xff] }
  0x13   :  { %4574 = vmatpush1.bf16.msra.mxu1 %v4573_v51  ;;  %3792 = vmatprep.subr.bf16.mxu0 %v3791_v52  ;;  %v3799_v12 = vpack.c.bf16 %v98_v7, %v94_v6  ;;  %v95_v15 = vld [vmem:[%s10473_s1 + $0x190] sm:$0xff]  ;;  %v4583_v16 = vpack.c.bf16 %v100_v9, %v96_v8  ;;  %v102_v18 = vld [vmem:[%s10473_s1 + $0x1c8] sm:$0xff]  ;;  %v104_v20 = vld [vmem:[%s10473_s1 + $0x1d8] sm:$0xff]  ;;  %v3801_v22 = vpack.c.bf16 %v97_v14, %v93_v13 }
  0x14   :  { %4576 = vmatprep.subr.bf16.mxu1 %v4575_v56  ;;  %v99_v17 = vld [vmem:[%s10473_s1 + $0x1b0] sm:$0xff]  ;;  %v106_v19 = vld [vmem:[%s10473_s1 + $0x1e8] sm:$0xff]  ;;  %v108_v21 = vld [vmem:[%s10473_s1 + $0x1f8] sm:$0xff] }
  0x15   :  { %v4585_v23 = vpack.c.bf16 %v99_v17, %v95_v15  ;;  %v3803_v24 = vpack.c.bf16 %v106_v19, %v102_v18  ;;  %v101_v25 = vld [vmem:[%s10473_s1 + $0x1c0] sm:$0xff]  ;;  %v103_v27 = vld [vmem:[%s10473_s1 + $0x1d0] sm:$0xff]  ;;  %v4587_v28 = vpack.c.bf16 %v108_v21, %v104_v20  ;;  %v110_v30 = vld [vmem:[%s10473_s1 + $0x208] sm:$0xff] }
  0x16   :  { %3794 = vmatpush1.bf16.msra.mxu0 %v3793_v62  ;;  %v105_v26 = vld [vmem:[%s10473_s1 + $0x1e0] sm:$0xff]  ;;  %v107_v29 = vld [vmem:[%s10473_s1 + $0x1f0] sm:$0xff]  ;;  %v114_v31 = vld [vmem:[%s10473_s1 + $0x228] sm:$0xff] }
  0x17   :  { %4578 = vmatpush1.bf16.msra.mxu1 %v4577_v63  ;;  %3796 = vmatprep.subr.bf16.mxu0 %v3795_v0  ;;  %v112_v32 = vld [vmem:[%s10473_s1 + $0x218] sm:$0xff]  ;;  %v3805_v34 = vpack.c.bf16 %v105_v26, %v101_v25  ;;  %v4589_v35 = vpack.c.bf16 %v107_v29, %v103_v27  ;;  %v3807_v36 = vpack.c.bf16 %v114_v31, %v110_v30  ;;  %v109_v37 = vld [vmem:[%s10473_s1 + $0x200] sm:$0xff]  ;;  %v111_v39 = vld [vmem:[%s10473_s1 + $0x210] sm:$0xff] }
  0x18   :  { %4580 = vmatprep.subr.bf16.mxu1 %v4579_v4  ;;  %v116_v33 = vld [vmem:[%s10473_s1 + $0x238] sm:$0xff]  ;;  %v113_v38 = vld [vmem:[%s10473_s1 + $0x220] sm:$0xff]  ;;  %v115_v41 = vld [vmem:[%s10473_s1 + $0x230] sm:$0xff] }
  0x19   :  { %v4591_v40 = vpack.c.bf16 %v116_v33, %v112_v32  ;;  %v118_v42 = vld [vmem:[%s10473_s1 + $0x248] sm:$0xff]  ;;  %v120_v44 = vld [vmem:[%s10473_s1 + $0x258] sm:$0xff]  ;;  %v3809_v46 = vpack.c.bf16 %v113_v38, %v109_v37  ;;  %v4593_v47 = vpack.c.bf16 %v115_v41, %v111_v39  ;;  %v117_v49 = vld [vmem:[%s10473_s1 + $0x240] sm:$0xff] }
  0x1a   :  { %3798 = vmatpush1.bf16.msra.mxu0 %v3797_v10  ;;  %v122_v43 = vld [vmem:[%s10473_s1 + $0x268] sm:$0xff]  ;;  %v124_v45 = vld [vmem:[%s10473_s1 + $0x278] sm:$0xff]  ;;  %v121_v50 = vld [vmem:[%s10473_s1 + $0x260] sm:$0xff] }
  0x1b   :  { %4582 = vmatpush1.bf16.msra.mxu1 %v4581_v11  ;;  %3800 = vmatprep.subr.bf16.mxu0 %v3799_v12  ;;  %v3811_v48 = vpack.c.bf16 %v122_v43, %v118_v42  ;;  %v119_v51 = vld [vmem:[%s10473_s1 + $0x250] sm:$0xff]  ;;  %v4595_v52 = vpack.c.bf16 %v124_v45, %v120_v44  ;;  %v126_v54 = vld [vmem:[%s10473_s1 + $0x288] sm:$0xff]  ;;  %v128_v56 = vld [vmem:[%s10473_s1 + $0x298] sm:$0xff]  ;;  %v3813_v58 = vpack.c.bf16 %v121_v50, %v117_v49 }
  0x1c   :  { %4584 = vmatprep.subr.bf16.mxu1 %v4583_v16  ;;  %v123_v53 = vld [vmem:[%s10473_s1 + $0x270] sm:$0xff]  ;;  %v130_v55 = vld [vmem:[%s10473_s1 + $0x2a8] sm:$0xff]  ;;  %v132_v57 = vld [vmem:[%s10473_s1 + $0x2b8] sm:$0xff] }
  0x1d   :  { %v4597_v59 = vpack.c.bf16 %v123_v53, %v119_v51  ;;  %v3815_v60 = vpack.c.bf16 %v130_v55, %v126_v54  ;;  %v125_v61 = vld [vmem:[%s10473_s1 + $0x280] sm:$0xff]  ;;  %v127_v63 = vld [vmem:[%s10473_s1 + $0x290] sm:$0xff]  ;;  %v4599_v0 = vpack.c.bf16 %v132_v57, %v128_v56  ;;  %v134_v2 = vld [vmem:[%s10473_s1 + $0x2c8] sm:$0xff] }
  0x1e   :  { %3802 = vmatpush1.bf16.msra.mxu0 %v3801_v22  ;;  %v129_v62 = vld [vmem:[%s10473_s1 + $0x2a0] sm:$0xff]  ;;  %v131_v1 = vld [vmem:[%s10473_s1 + $0x2b0] sm:$0xff]  ;;  %v138_v3 = vld [vmem:[%s10473_s1 + $0x2e8] sm:$0xff] }
  0x1f   :  { %4586 = vmatpush1.bf16.msra.mxu1 %v4585_v23  ;;  %3804 = vmatprep.subr.bf16.mxu0 %v3803_v24  ;;  %v136_v4 = vld [vmem:[%s10473_s1 + $0x2d8] sm:$0xff]  ;;  %v3817_v6 = vpack.c.bf16 %v129_v62, %v125_v61  ;;  %v133_v7 = vld [vmem:[%s10473_s1 + $0x2c0] sm:$0xff]  ;;  %v4601_v8 = vpack.c.bf16 %v131_v1, %v127_v63  ;;  %v3819_v9 = vpack.c.bf16 %v138_v3, %v134_v2  ;;  %v135_v11 = vld [vmem:[%s10473_s1 + $0x2d0] sm:$0xff] }
  0x20   :  { %4588 = vmatprep.subr.bf16.mxu1 %v4587_v28  ;;  %v140_v5 = vld [vmem:[%s10473_s1 + $0x2f8] sm:$0xff]  ;;  %v137_v10 = vld [vmem:[%s10473_s1 + $0x2e0] sm:$0xff]  ;;  %v139_v12 = vld [vmem:[%s10473_s1 + $0x2f0] sm:$0xff] }
  0x21   :  { %v4603_v13 = vpack.c.bf16 %v140_v5, %v136_v4  ;;  %v142_v14 = vld [vmem:[%s10473_s1 + $0x308] sm:$0xff]  ;;  %v144_v17 = vld [vmem:[%s10473_s1 + $0x318] sm:$0xff]  ;;  %v3821_v19 = vpack.c.bf16 %v137_v10, %v133_v7  ;;  %v4605_v20 = vpack.c.bf16 %v139_v12, %v135_v11  ;;  %v141_v22 = vld [vmem:[%s10473_s1 + $0x300] sm:$0xff] }
  0x22   :  { %3806 = vmatpush1.bf16.msra.mxu0 %v3805_v34  ;;  %v146_v15 = vld [vmem:[%s10473_s1 + $0x328] sm:$0xff]  ;;  %v148_v18 = vld [vmem:[%s10473_s1 + $0x338] sm:$0xff]  ;;  %v145_v23 = vld [vmem:[%s10473_s1 + $0x320] sm:$0xff] }
  0x23   :  { %4590 = vmatpush1.bf16.msra.mxu1 %v4589_v35  ;;  %3808 = vmatprep.subr.bf16.mxu0 %v3807_v36  ;;  %v21_v16 = vld [vmem:[%s10474_s0 + $0x8] sm:$0xff]  ;;  %v3823_v21 = vpack.c.bf16 %v146_v15, %v142_v14  ;;  %v143_v24 = vld [vmem:[%s10473_s1 + $0x310] sm:$0xff]  ;;  %v4607_v25 = vpack.c.bf16 %v148_v18, %v144_v17  ;;  %v152_v29 = vld [vmem:[%s10473_s1 + $0x358] sm:$0xff]  ;;  %v3825_v31 = vpack.c.bf16 %v145_v23, %v141_v22 }
  0x24   :  { %4592 = vmatprep.subr.bf16.mxu1 %v4591_v40  ;;  %1703 = vmatprep.mubr.f32.mxu0 %v21_v16  ;;  %v147_v26 = vld [vmem:[%s10473_s1 + $0x330] sm:$0xff]  ;;  %v150_v27 = vld [vmem:[%s10473_s1 + $0x348] sm:$0xff]  ;;  %v156_v30 = vld [vmem:[%s10473_s1 + $0x378] sm:$0xff] }
  0x25   :  { %2626 = vmatprep.mubr.f32.mxu1 %v21_v16  ;;  %v154_v28 = vld [vmem:[%s10473_s1 + $0x368] sm:$0xff]  ;;  %v4609_v32 = vpack.c.bf16 %v147_v26, %v143_v24  ;;  %v149_v34 = vld [vmem:[%s10473_s1 + $0x340] sm:$0xff]  ;;  %v151_v36 = vld [vmem:[%s10473_s1 + $0x350] sm:$0xff]  ;;  %v4611_v37 = vpack.c.bf16 %v156_v30, %v152_v29 }
  0x26   :  { %3810 = vmatpush1.bf16.msra.mxu0 %v3809_v46  ;;  %v3827_v33 = vpack.c.bf16 %v154_v28, %v150_v27  ;;  %v153_v35 = vld [vmem:[%s10473_s1 + $0x360] sm:$0xff]  ;;  %v155_v38 = vld [vmem:[%s10473_s1 + $0x370] sm:$0xff]  ;;  %v158_v39 = vld [vmem:[%s10473_s1 + $0x388] sm:$0xff] }
  0x27   :  { %4594 = vmatpush1.bf16.msra.mxu1 %v4593_v47  ;;  %3812 = vmatprep.subr.bf16.mxu0 %v3811_v48  ;;  %v162_v40 = vld [vmem:[%s10473_s1 + $0x3a8] sm:$0xff]  ;;  %v160_v41 = vld [vmem:[%s10473_s1 + $0x398] sm:$0xff]  ;;  %v3829_v43 = vpack.c.bf16 %v153_v35, %v149_v34  ;;  %v4613_v44 = vpack.c.bf16 %v155_v38, %v151_v36  ;;  %v157_v46 = vld [vmem:[%s10473_s1 + $0x380] sm:$0xff] }
  0x28   :  { %4596 = vmatprep.subr.bf16.mxu1 %v4595_v52  ;;  %v164_v42 = vld [vmem:[%s10473_s1 + $0x3b8] sm:$0xff]  ;;  %v3831_v45 = vpack.c.bf16 %v162_v40, %v158_v39  ;;  %v161_v47 = vld [vmem:[%s10473_s1 + $0x3a0] sm:$0xff]  ;;  %v159_v48 = vld [vmem:[%s10473_s1 + $0x390] sm:$0xff] }
  0x29   :  { %v4615_v49 = vpack.c.bf16 %v164_v42, %v160_v41  ;;  %v163_v50 = vld [vmem:[%s10473_s1 + $0x3b0] sm:$0xff]  ;;  %v166_v51 = vld [vmem:[%s10473_s1 + $0x3c8] sm:$0xff]  ;;  %v168_v53 = vld [vmem:[%s10473_s1 + $0x3d8] sm:$0xff]  ;;  %v3833_v55 = vpack.c.bf16 %v161_v47, %v157_v46 }
  0x2a   :  { %3814 = vmatpush1.bf16.msra.mxu0 %v3813_v58  ;;  %v170_v52 = vld [vmem:[%s10473_s1 + $0x3e8] sm:$0xff]  ;;  %v172_v54 = vld [vmem:[%s10473_s1 + $0x3f8] sm:$0xff]  ;;  %v4617_v56 = vpack.c.bf16 %v163_v50, %v159_v48  ;;  %v165_v58 = vld [vmem:[%s10473_s1 + $0x3c0] sm:$0xff] }
  0x2b   :  { %4598 = vmatpush1.bf16.msra.mxu1 %v4597_v59  ;;  %3816 = vmatprep.subr.bf16.mxu0 %v3815_v60  ;;  %v3835_v57 = vpack.c.bf16 %v170_v52, %v166_v51  ;;  %v169_v59 = vld [vmem:[%s10473_s1 + $0x3e0] sm:$0xff]  ;;  %v167_v60 = vld [vmem:[%s10473_s1 + $0x3d0] sm:$0xff]  ;;  %v4619_v61 = vpack.c.bf16 %v172_v54, %v168_v53  ;;  %v174_v63 = vld [vmem:[%s10473_s1 + $0x408] sm:$0xff] }
  0x2c   :  { %4600 = vmatprep.subr.bf16.mxu1 %v4599_v0  ;;  %v171_v62 = vld [vmem:[%s10473_s1 + $0x3f0] sm:$0xff]  ;;  %v178_v0 = vld [vmem:[%s10473_s1 + $0x428] sm:$0xff]  ;;  %v176_v1 = vld [vmem:[%s10473_s1 + $0x418] sm:$0xff]  ;;  %v3837_v3 = vpack.c.bf16 %v169_v59, %v165_v58 }
  0x2d   :  { %v180_v2 = vld [vmem:[%s10473_s1 + $0x438] sm:$0xff]  ;;  %v4621_v4 = vpack.c.bf16 %v171_v62, %v167_v60  ;;  %v3839_v5 = vpack.c.bf16 %v178_v0, %v174_v63  ;;  %v177_v7 = vld [vmem:[%s10473_s1 + $0x420] sm:$0xff]  ;;  %v179_v10 = vld [vmem:[%s10473_s1 + $0x430] sm:$0xff] }
  0x2e   :  { %3818 = vmatpush1.bf16.msra.mxu0 %v3817_v6  ;;  %v173_v6 = vld [vmem:[%s10473_s1 + $0x400] sm:$0xff]  ;;  %v182_v11 = vld [vmem:[%s10473_s1 + $0x448] sm:$0xff]  ;;  %v188_v14 = vld [vmem:[%s10473_s1 + $0x478] sm:$0xff] }
  0x2f   :  { %4602 = vmatpush1.bf16.msra.mxu1 %v4601_v8  ;;  %3820 = vmatprep.subr.bf16.mxu0 %v3819_v9  ;;  %v175_v8 = vld [vmem:[%s10473_s1 + $0x410] sm:$0xff]  ;;  %v4623_v9 = vpack.c.bf16 %v180_v2, %v176_v1  ;;  %v186_v12 = vld [vmem:[%s10473_s1 + $0x468] sm:$0xff]  ;;  %v20_v15 = vld [vmem:[%s10474_s0] sm:$0xff]  ;;  %v3841_v16 = vpack.c.bf16 %v177_v7, %v173_v6 }
  0x30   :  { %4604 = vmatprep.subr.bf16.mxu1 %v4603_v13  ;;  %v184_v13 = vld [vmem:[%s10473_s1 + $0x458] sm:$0xff]  ;;  %v4625_v17 = vpack.c.bf16 %v179_v10, %v175_v8  ;;  %v3843_v18 = vpack.c.bf16 %v186_v12, %v182_v11  ;;  %v187_v23 = vld [vmem:[%s10473_s1 + $0x470] sm:$0xff]  ;;  %v190_v24 = vld [vmem:[%s10473_s1 + $0x488] sm:$0xff] }
  0x31   :  { %v4627_v22 = vpack.c.bf16 %v188_v14, %v184_v13  ;;  %v192_v26 = vld [vmem:[%s10473_s1 + $0x498] sm:$0xff]  ;;  %v195_v35 = vld [vmem:[%s10473_s1 + $0x4b0] sm:$0xff]  ;;  %v198_v36 = vld [vmem:[%s10473_s1 + $0x4c8] sm:$0xff] }
  0x32   :  { %3822 = vmatpush1.bf16.msra.mxu0 %v3821_v19  ;;  %v181_v19 = vld [vmem:[%s10473_s1 + $0x440] sm:$0xff]  ;;  %v196_v27 = vld [vmem:[%s10473_s1 + $0x4b8] sm:$0xff]  ;;  %v203_v47 = vld [vmem:[%s10473_s1 + $0x4f0] sm:$0xff] }
  0x33   :  { %4606 = vmatpush1.bf16.msra.mxu1 %v4605_v20  ;;  %3824 = vmatprep.subr.bf16.mxu0 %v3823_v21  ;;  %v185_v20 = vld [vmem:[%s10473_s1 + $0x460] sm:$0xff]  ;;  %v183_v21 = vld [vmem:[%s10473_s1 + $0x450] sm:$0xff]  ;;  %v4631_v34 = vpack.c.bf16 %v196_v27, %v192_v26  ;;  %v200_v38 = vld [vmem:[%s10473_s1 + $0x4d8] sm:$0xff] }
  0x34   :  { %4608 = vmatprep.subr.bf16.mxu1 %v4607_v25  ;;  %v194_v25 = vld [vmem:[%s10473_s1 + $0x4a8] sm:$0xff]  ;;  %v3845_v28 = vpack.c.bf16 %v185_v20, %v181_v19  ;;  %v4629_v29 = vpack.c.bf16 %v187_v23, %v183_v21  ;;  %v204_v39 = vld [vmem:[%s10473_s1 + $0x4f8] sm:$0xff]  ;;  %v211_v59 = vld [vmem:[%s10473_s1 + $0x530] sm:$0xff] }
  0x35   :  { %v3847_v30 = vpack.c.bf16 %v194_v25, %v190_v24  ;;  %v4635_v46 = vpack.c.bf16 %v204_v39, %v200_v38  ;;  %v206_v48 = vld [vmem:[%s10473_s1 + $0x508] sm:$0xff]  ;;  %v208_v50 = vld [vmem:[%s10473_s1 + $0x518] sm:$0xff]  ;;  %v219_v7 = vld [vmem:[%s10473_s1 + $0x570] sm:$0xff] }
  0x36   :  { %3826 = vmatpush1.bf16.msra.mxu0 %v3825_v31  ;;  %v189_v31 = vld [vmem:[%s10473_s1 + $0x480] sm:$0xff]  ;;  %v212_v51 = vld [vmem:[%s10473_s1 + $0x538] sm:$0xff]  ;;  %v214_v60 = vld [vmem:[%s10473_s1 + $0x548] sm:$0xff] }
  0x37   :  { %4610 = vmatpush1.bf16.msra.mxu1 %v4609_v32  ;;  %3828 = vmatprep.subr.bf16.mxu0 %v3827_v33  ;;  %v193_v32 = vld [vmem:[%s10473_s1 + $0x4a0] sm:$0xff]  ;;  %v191_v33 = vld [vmem:[%s10473_s1 + $0x490] sm:$0xff]  ;;  %v4639_v58 = vpack.c.bf16 %v212_v51, %v208_v50  ;;  %v216_v62 = vld [vmem:[%s10473_s1 + $0x558] sm:$0xff] }
  0x38   :  { %4612 = vmatprep.subr.bf16.mxu1 %v4611_v37  ;;  %v202_v37 = vld [vmem:[%s10473_s1 + $0x4e8] sm:$0xff]  ;;  %v3849_v40 = vpack.c.bf16 %v193_v32, %v189_v31  ;;  %v4633_v41 = vpack.c.bf16 %v195_v35, %v191_v33  ;;  %v220_v63 = vld [vmem:[%s10473_s1 + $0x578] sm:$0xff]  ;;  %v221_v13 = vld [vmem:[%s10473_s1 + $0x580] sm:$0xff] }
  0x39   :  { %v3851_v42 = vpack.c.bf16 %v202_v37, %v198_v36  ;;  %v4643_v6 = vpack.c.bf16 %v220_v63, %v216_v62  ;;  %v222_v8 = vld [vmem:[%s10473_s1 + $0x588] sm:$0xff]  ;;  %v224_v10 = vld [vmem:[%s10473_s1 + $0x598] sm:$0xff]  ;;  %v235_v32 = vld [vmem:[%s10473_s1 + $0x5f0] sm:$0xff] }
  0x3a   :  { %3830 = vmatpush1.bf16.msra.mxu0 %v3829_v43  ;;  %v197_v43 = vld [vmem:[%s10473_s1 + $0x4c0] sm:$0xff]  ;;  %v228_v11 = vld [vmem:[%s10473_s1 + $0x5b8] sm:$0xff]  ;;  %v230_v20 = vld [vmem:[%s10473_s1 + $0x5c8] sm:$0xff] }
  0x3b   :  { %4614 = vmatpush1.bf16.msra.mxu1 %v4613_v44  ;;  %3832 = vmatprep.subr.bf16.mxu0 %v3831_v45  ;;  %v201_v44 = vld [vmem:[%s10473_s1 + $0x4e0] sm:$0xff]  ;;  %v199_v45 = vld [vmem:[%s10473_s1 + $0x4d0] sm:$0xff]  ;;  %v4647_v19 = vpack.c.bf16 %v228_v11, %v224_v10  ;;  %v234_v21 = vld [vmem:[%s10473_s1 + $0x5e8] sm:$0xff] }
  0x3c   :  { %4616 = vmatprep.subr.bf16.mxu1 %v4615_v49  ;;  %v210_v49 = vld [vmem:[%s10473_s1 + $0x528] sm:$0xff]  ;;  %v3853_v52 = vpack.c.bf16 %v201_v44, %v197_v43  ;;  %v4637_v53 = vpack.c.bf16 %v203_v47, %v199_v45  ;;  %v232_v23 = vld [vmem:[%s10473_s1 + $0x5d8] sm:$0xff]  ;;  %v3867_v27 = vpack.c.bf16 %v234_v21, %v230_v20  ;;  %v243_v44 = vld [vmem:[%s10473_s1 + $0x630] sm:$0xff] }
  0x3d   :  { %v3855_v54 = vpack.c.bf16 %v210_v49, %v206_v48  ;;  %v236_v24 = vld [vmem:[%s10473_s1 + $0x5f8] sm:$0xff]  ;;  %v238_v33 = vld [vmem:[%s10473_s1 + $0x608] sm:$0xff] }
  0x3e   :  { %3834 = vmatpush1.bf16.msra.mxu0 %v3833_v55  ;;  %v205_v55 = vld [vmem:[%s10473_s1 + $0x500] sm:$0xff]  ;;  %v4651_v31 = vpack.c.bf16 %v236_v24, %v232_v23  ;;  %v240_v35 = vld [vmem:[%s10473_s1 + $0x618] sm:$0xff]  ;;  %v246_v45 = vld [vmem:[%s10473_s1 + $0x648] sm:$0xff] }
  0x3f   :  { %4618 = vmatpush1.bf16.msra.mxu1 %v4617_v56  ;;  %3836 = vmatprep.subr.bf16.mxu0 %v3835_v57  ;;  %v209_v56 = vld [vmem:[%s10473_s1 + $0x520] sm:$0xff]  ;;  %v207_v57 = vld [vmem:[%s10473_s1 + $0x510] sm:$0xff]  ;;  %v244_v36 = vld [vmem:[%s10473_s1 + $0x638] sm:$0xff] }
  0x40   :  { %4620 = vmatprep.subr.bf16.mxu1 %v4619_v61  ;;  %v218_v61 = vld [vmem:[%s10473_s1 + $0x568] sm:$0xff]  ;;  %v3857_v0 = vpack.c.bf16 %v209_v56, %v205_v55  ;;  %v4641_v1 = vpack.c.bf16 %v211_v59, %v207_v57  ;;  %v4655_v43 = vpack.c.bf16 %v244_v36, %v240_v35  ;;  %v248_v47 = vld [vmem:[%s10473_s1 + $0x658] sm:$0xff]  ;;  %v251_v56 = vld [vmem:[%s10473_s1 + $0x670] sm:$0xff] }
  0x41   :  { %v3859_v2 = vpack.c.bf16 %v218_v61, %v214_v60  ;;  %v252_v48 = vld [vmem:[%s10473_s1 + $0x678] sm:$0xff]  ;;  %v254_v57 = vld [vmem:[%s10473_s1 + $0x688] sm:$0xff]  ;;  %v269_v24 = vld [vmem:[%s10473_s1 + $0x700] sm:$0xff] }
  0x42   :  { %3838 = vmatpush1.bf16.msra.mxu0 %v3837_v3  ;;  %v213_v3 = vld [vmem:[%s10473_s1 + $0x540] sm:$0xff]  ;;  %v4659_v55 = vpack.c.bf16 %v252_v48, %v248_v47  ;;  %v256_v59 = vld [vmem:[%s10473_s1 + $0x698] sm:$0xff] }
  0x43   :  { %4622 = vmatpush1.bf16.msra.mxu1 %v4621_v4  ;;  %3840 = vmatprep.subr.bf16.mxu0 %v3839_v5  ;;  %v217_v4 = vld [vmem:[%s10473_s1 + $0x560] sm:$0xff]  ;;  %v215_v5 = vld [vmem:[%s10473_s1 + $0x550] sm:$0xff]  ;;  %v260_v60 = vld [vmem:[%s10473_s1 + $0x6b8] sm:$0xff] }
  0x44   :  { %4624 = vmatprep.subr.bf16.mxu1 %v4623_v9  ;;  %v226_v9 = vld [vmem:[%s10473_s1 + $0x5a8] sm:$0xff]  ;;  %v3861_v12 = vpack.c.bf16 %v217_v4, %v213_v3  ;;  %v4645_v14 = vpack.c.bf16 %v219_v7, %v215_v5  ;;  %v4663_v3 = vpack.c.bf16 %v260_v60, %v256_v59  ;;  %v259_v4 = vld [vmem:[%s10473_s1 + $0x6b0] sm:$0xff]  ;;  %v264_v7 = vld [vmem:[%s10473_s1 + $0x6d8] sm:$0xff] }
  0x45   :  { %1704 = vmatmul.mubr.f32.vlgmr.msra.gmra.mrb[0].mxu0 %v20_v15  ;;  %v262_v5 = vld [vmem:[%s10473_s1 + $0x6c8] sm:$0xff]  ;;  %v276_v20 = vld [vmem:[%s10473_s1 + $0x738] sm:$0xff]  ;;  %v277_v36 = vld [vmem:[%s10473_s1 + $0x740] sm:$0xff] }
  0x46   :  { %3842 = vmatpush1.bf16.msra.mxu0 %v3841_v16  ;;  %2627 = vmatmul.mubr.f32.vlgmr.msra.gmra.mrb[0].mxu1 %v20_v15  ;;  %v3863_v15 = vpack.c.bf16 %v226_v9, %v222_v8  ;;  %v225_v16 = vld [vmem:[%s10473_s1 + $0x5a0] sm:$0xff]  ;;  %v268_v8 = vld [vmem:[%s10473_s1 + $0x6f8] sm:$0xff] }
  0x47   :  { %4626 = vmatpush1.bf16.msra.mxu1 %v4625_v17  ;;  %3844 = vmatprep.subr.bf16.mxu0 %v3843_v18  ;;  %v223_v17 = vld [vmem:[%s10473_s1 + $0x590] sm:$0xff]  ;;  %v3865_v25 = vpack.c.bf16 %v225_v16, %v221_v13  ;;  %v265_v13 = vld [vmem:[%s10473_s1 + $0x6e0] sm:$0xff] }
  0x48   :  { %4628 = vmatprep.subr.bf16.mxu1 %v4627_v22  ;;  %v227_v18 = vld [vmem:[%s10473_s1 + $0x5b0] sm:$0xff]  ;;  %v23_v22 = vld [vmem:[%s10474_s0 + $0x18] sm:$0xff]  ;;  %v285_v48 = vld [vmem:[%s10473_s1 + $0x780] sm:$0xff] }
  0x49   :  { %1774 = vmatprep.mubr.f32.mxu0 %v23_v22  ;;  %2697 = vmatprep.mubr.f32.mxu1 %v23_v22  ;;  %v4649_v26 = vpack.c.bf16 %v227_v18, %v223_v17  ;;  %v267_v16 = vld [vmem:[%s10473_s1 + $0x6f0] sm:$0xff]  ;;  %v270_v17 = vld [vmem:[%s10473_s1 + $0x708] sm:$0xff]  ;;  %v293_v60 = vld [vmem:[%s10473_s1 + $0x7c0] sm:$0xff] }
  0x4a   :  { %3846 = vmatpush1.bf16.msra.mxu0 %v3845_v28  ;;  %v229_v28 = vld [vmem:[%s10473_s1 + $0x5c0] sm:$0xff]  ;;  %v274_v18 = vld [vmem:[%s10473_s1 + $0x728] sm:$0xff] }
  0x4b   :  { %4630 = vmatpush1.bf16.msra.mxu1 %v4629_v29  ;;  %3848 = vmatprep.subr.bf16.mxu0 %v3847_v30  ;;  %v233_v29 = vld [vmem:[%s10473_s1 + $0x5e0] sm:$0xff]  ;;  %v231_v30 = vld [vmem:[%s10473_s1 + $0x5d0] sm:$0xff]  ;;  %v3887_v23 = vpack.c.bf16 %v274_v18, %v270_v17 }
  0x4c   :  { %4632 = vmatprep.subr.bf16.mxu1 %v4631_v34  ;;  %v242_v34 = vld [vmem:[%s10473_s1 + $0x628] sm:$0xff]  ;;  %v3869_v37 = vpack.c.bf16 %v233_v29, %v229_v28  ;;  %v4653_v38 = vpack.c.bf16 %v235_v32, %v231_v30  ;;  %v275_v28 = vld [vmem:[%s10473_s1 + $0x730] sm:$0xff]  ;;  %v284_v32 = vld [vmem:[%s10473_s1 + $0x778] sm:$0xff] }
  0x4d   :  { %v3871_v39 = vpack.c.bf16 %v242_v34, %v238_v33  ;;  %v278_v29 = vld [vmem:[%s10473_s1 + $0x748] sm:$0xff]  ;;  %v22_v17 = vld [vmem:[%s10474_s0 + $0x10] sm:$0xff] }
  0x4e   :  { %3850 = vmatpush1.bf16.msra.mxu0 %v3849_v40  ;;  %v237_v40 = vld [vmem:[%s10473_s1 + $0x600] sm:$0xff]  ;;  %v282_v30 = vld [vmem:[%s10473_s1 + $0x768] sm:$0xff] }
  0x4f   :  { %4634 = vmatpush1.bf16.msra.mxu1 %v4633_v41  ;;  %3852 = vmatprep.subr.bf16.mxu0 %v3851_v42  ;;  %v241_v41 = vld [vmem:[%s10473_s1 + $0x620] sm:$0xff]  ;;  %v239_v42 = vld [vmem:[%s10473_s1 + $0x610] sm:$0xff]  ;;  %v3891_v35 = vpack.c.bf16 %v282_v30, %v278_v29  ;;  %v324_v29 = vld [vmem:[%s10473_s1 + $0x8b8] sm:$0xff] }
  0x50   :  { %4636 = vmatprep.subr.bf16.mxu1 %v4635_v46  ;;  %v250_v46 = vld [vmem:[%s10473_s1 + $0x668] sm:$0xff]  ;;  %v3873_v49 = vpack.c.bf16 %v241_v41, %v237_v40  ;;  %v4657_v50 = vpack.c.bf16 %v243_v44, %v239_v42  ;;  %v283_v40 = vld [vmem:[%s10473_s1 + $0x770] sm:$0xff]  ;;  %v292_v44 = vld [vmem:[%s10473_s1 + $0x7b8] sm:$0xff] }
  0x51   :  { %v3875_v51 = vpack.c.bf16 %v250_v46, %v246_v45  ;;  %v286_v41 = vld [vmem:[%s10473_s1 + $0x788] sm:$0xff] }
  0x52   :  { %3854 = vmatpush1.bf16.msra.mxu0 %v3853_v52  ;;  %v245_v52 = vld [vmem:[%s10473_s1 + $0x640] sm:$0xff]  ;;  %v290_v42 = vld [vmem:[%s10473_s1 + $0x7a8] sm:$0xff] }
  0x53   :  { %4638 = vmatpush1.bf16.msra.mxu1 %v4637_v53  ;;  %3856 = vmatprep.subr.bf16.mxu0 %v3855_v54  ;;  %v249_v53 = vld [vmem:[%s10473_s1 + $0x660] sm:$0xff]  ;;  %v247_v54 = vld [vmem:[%s10473_s1 + $0x650] sm:$0xff]  ;;  %v3895_v47 = vpack.c.bf16 %v290_v42, %v286_v41  ;;  %v25_v30 = vld [vmem:[%s10474_s0 + $0x28] sm:$0xff] }
  0x54   :  { %4640 = vmatprep.subr.bf16.mxu1 %v4639_v58  ;;  %v258_v58 = vld [vmem:[%s10473_s1 + $0x6a8] sm:$0xff]  ;;  %v3877_v61 = vpack.c.bf16 %v249_v53, %v245_v52  ;;  %v4661_v62 = vpack.c.bf16 %v251_v56, %v247_v54  ;;  %v291_v52 = vld [vmem:[%s10473_s1 + $0x7b0] sm:$0xff]  ;;  %v300_v56 = vld [vmem:[%s10473_s1 + $0x7f8] sm:$0xff] }
  0x55   :  { %v3879_v63 = vpack.c.bf16 %v258_v58, %v254_v57  ;;  %v294_v53 = vld [vmem:[%s10473_s1 + $0x7c8] sm:$0xff]  ;;  %v328_v41 = vld [vmem:[%s10473_s1 + $0x8d8] sm:$0xff] }
  0x56   :  { %3858 = vmatpush1.bf16.msra.mxu0 %v3857_v0  ;;  %v253_v0 = vld [vmem:[%s10473_s1 + $0x680] sm:$0xff]  ;;  %v298_v54 = vld [vmem:[%s10473_s1 + $0x7e8] sm:$0xff]  ;;  %v332_v42 = vld [vmem:[%s10473_s1 + $0x8f8] sm:$0xff] }
  0x57   :  { %4642 = vmatpush1.bf16.msra.mxu1 %v4641_v1  ;;  %3860 = vmatprep.subr.bf16.mxu0 %v3859_v2  ;;  %v257_v1 = vld [vmem:[%s10473_s1 + $0x6a0] sm:$0xff]  ;;  %v255_v2 = vld [vmem:[%s10473_s1 + $0x690] sm:$0xff]  ;;  %v3899_v59 = vpack.c.bf16 %v298_v54, %v294_v53  ;;  %v336_v53 = vld [vmem:[%s10473_s1 + $0x918] sm:$0xff] }
  0x58   :  { %4644 = vmatprep.subr.bf16.mxu1 %v4643_v6  ;;  %v266_v6 = vld [vmem:[%s10473_s1 + $0x6e8] sm:$0xff]  ;;  %v3881_v9 = vpack.c.bf16 %v257_v1, %v253_v0  ;;  %v4665_v10 = vpack.c.bf16 %v259_v4, %v255_v2  ;;  %v299_v0 = vld [vmem:[%s10473_s1 + $0x7f0] sm:$0xff]  ;;  %v308_v4 = vld [vmem:[%s10473_s1 + $0x838] sm:$0xff] }
  0x59   :  { %v3883_v11 = vpack.c.bf16 %v266_v6, %v262_v5  ;;  %v302_v1 = vld [vmem:[%s10473_s1 + $0x808] sm:$0xff]  ;;  %v340_v54 = vld [vmem:[%s10473_s1 + $0x938] sm:$0xff] }
  0x5a   :  { %3862 = vmatpush1.bf16.msra.mxu0 %v3861_v12  ;;  %v261_v12 = vld [vmem:[%s10473_s1 + $0x6c0] sm:$0xff]  ;;  %v306_v2 = vld [vmem:[%s10473_s1 + $0x828] sm:$0xff] }
  0x5b   :  { %4646 = vmatpush1.bf16.msra.mxu1 %v4645_v14  ;;  %3864 = vmatprep.subr.bf16.mxu0 %v3863_v15  ;;  %v263_v14 = vld [vmem:[%s10473_s1 + $0x6d0] sm:$0xff]  ;;  %v4667_v15 = vpack.c.bf16 %v268_v8, %v264_v7  ;;  %v3885_v21 = vpack.c.bf16 %v265_v13, %v261_v12  ;;  %v3903_v7 = vpack.c.bf16 %v306_v2, %v302_v1  ;;  %v301_v8 = vld [vmem:[%s10473_s1 + $0x800] sm:$0xff]  ;;  %v310_v13 = vld [vmem:[%s10473_s1 + $0x848] sm:$0xff] }
  0x5c   :  { %4648 = vmatprep.subr.bf16.mxu1 %v4647_v19  ;;  %v272_v19 = vld [vmem:[%s10473_s1 + $0x718] sm:$0xff]  ;;  %v4669_v22 = vpack.c.bf16 %v267_v16, %v263_v14  ;;  %v307_v12 = vld [vmem:[%s10473_s1 + $0x830] sm:$0xff]  ;;  %v314_v14 = vld [vmem:[%s10473_s1 + $0x868] sm:$0xff] }
  0x5d   :  { %v316_v16 = vld [vmem:[%s10473_s1 + $0x878] sm:$0xff] }
  0x5e   :  { %3866 = vmatpush1.bf16.msra.mxu0 %v3865_v25  ;;  %v273_v25 = vld [vmem:[%s10473_s1 + $0x720] sm:$0xff]  ;;  %v344_v1 = vld [vmem:[%s10473_s1 + $0x958] sm:$0xff] }
  0x5f   :  { %4650 = vmatpush1.bf16.msra.mxu1 %v4649_v26  ;;  %3868 = vmatprep.subr.bf16.mxu0 %v3867_v27  ;;  %v271_v26 = vld [vmem:[%s10473_s1 + $0x710] sm:$0xff]  ;;  %v4671_v27 = vpack.c.bf16 %v276_v20, %v272_v19  ;;  %v3889_v33 = vpack.c.bf16 %v273_v25, %v269_v24  ;;  %v3907_v20 = vpack.c.bf16 %v314_v14, %v310_v13  ;;  %v348_v2 = vld [vmem:[%s10473_s1 + $0x978] sm:$0xff] }
  0x60   :  { %4652 = vmatprep.subr.bf16.mxu1 %v4651_v31  ;;  %v280_v31 = vld [vmem:[%s10473_s1 + $0x758] sm:$0xff]  ;;  %v4673_v34 = vpack.c.bf16 %v275_v28, %v271_v26  ;;  %v315_v25 = vld [vmem:[%s10473_s1 + $0x870] sm:$0xff]  ;;  %v318_v26 = vld [vmem:[%s10473_s1 + $0x888] sm:$0xff] }
  0x61   :  { %v320_v28 = vld [vmem:[%s10473_s1 + $0x898] sm:$0xff] }
  0x62   :  { %3870 = vmatpush1.bf16.msra.mxu0 %v3869_v37  ;;  %v281_v37 = vld [vmem:[%s10473_s1 + $0x760] sm:$0xff]  ;;  %v352_v13 = vld [vmem:[%s10473_s1 + $0x998] sm:$0xff] }
  0x63   :  { %4654 = vmatpush1.bf16.msra.mxu1 %v4653_v38  ;;  %3872 = vmatprep.subr.bf16.mxu0 %v3871_v39  ;;  %v279_v38 = vld [vmem:[%s10473_s1 + $0x750] sm:$0xff]  ;;  %v4675_v39 = vpack.c.bf16 %v284_v32, %v280_v31  ;;  %v3893_v45 = vpack.c.bf16 %v281_v37, %v277_v36  ;;  %v4695_v37 = vpack.c.bf16 %v324_v29, %v320_v28  ;;  %v356_v14 = vld [vmem:[%s10473_s1 + $0x9b8] sm:$0xff] }
  0x64   :  { %4656 = vmatprep.subr.bf16.mxu1 %v4655_v43  ;;  %v288_v43 = vld [vmem:[%s10473_s1 + $0x798] sm:$0xff]  ;;  %v4677_v46 = vpack.c.bf16 %v283_v40, %v279_v38  ;;  %v319_v36 = vld [vmem:[%s10473_s1 + $0x890] sm:$0xff]  ;;  %v330_v40 = vld [vmem:[%s10473_s1 + $0x8e8] sm:$0xff] }
  0x65   :  { %v323_v38 = vld [vmem:[%s10473_s1 + $0x8b0] sm:$0xff] }
  0x66   :  { %3874 = vmatpush1.bf16.msra.mxu0 %v3873_v49  ;;  %v289_v49 = vld [vmem:[%s10473_s1 + $0x7a0] sm:$0xff] }
  0x67   :  { %4658 = vmatpush1.bf16.msra.mxu1 %v4657_v50  ;;  %3876 = vmatprep.subr.bf16.mxu0 %v3875_v51  ;;  %v287_v50 = vld [vmem:[%s10473_s1 + $0x790] sm:$0xff]  ;;  %v4679_v51 = vpack.c.bf16 %v292_v44, %v288_v43  ;;  %v3897_v57 = vpack.c.bf16 %v289_v49, %v285_v48  ;;  %v4697_v44 = vpack.c.bf16 %v323_v38, %v319_v36  ;;  %v370_v36 = vld [vmem:[%s10473_s1 + $0xa28] sm:$0xff]  ;;  %v372_v38 = vld [vmem:[%s10473_s1 + $0xa38] sm:$0xff] }
  0x68   :  { %4660 = vmatprep.subr.bf16.mxu1 %v4659_v55  ;;  %v296_v55 = vld [vmem:[%s10473_s1 + $0x7d8] sm:$0xff]  ;;  %v4681_v58 = vpack.c.bf16 %v291_v52, %v287_v50  ;;  %v327_v48 = vld [vmem:[%s10473_s1 + $0x8d0] sm:$0xff]  ;;  %v4699_v49 = vpack.c.bf16 %v332_v42, %v328_v41  ;;  %v338_v52 = vld [vmem:[%s10473_s1 + $0x928] sm:$0xff] }
  0x69   :  { %v331_v50 = vld [vmem:[%s10473_s1 + $0x8f0] sm:$0xff]  ;;  %v365_v42 = vld [vmem:[%s10473_s1 + $0xa00] sm:$0xff] }
  0x6a   :  { %3878 = vmatpush1.bf16.msra.mxu0 %v3877_v61  ;;  %v297_v61 = vld [vmem:[%s10473_s1 + $0x7e0] sm:$0xff] }
  0x6b   :  { %4662 = vmatpush1.bf16.msra.mxu1 %v4661_v62  ;;  %3880 = vmatprep.subr.bf16.mxu0 %v3879_v63  ;;  %v295_v62 = vld [vmem:[%s10473_s1 + $0x7d0] sm:$0xff]  ;;  %v4683_v63 = vpack.c.bf16 %v300_v56, %v296_v55  ;;  %v3901_v5 = vpack.c.bf16 %v297_v61, %v293_v60  ;;  %v4701_v56 = vpack.c.bf16 %v331_v50, %v327_v48  ;;  %v378_v48 = vld [vmem:[%s10473_s1 + $0xa68] sm:$0xff]  ;;  %v380_v50 = vld [vmem:[%s10473_s1 + $0xa78] sm:$0xff] }
  0x6c   :  { %4664 = vmatprep.subr.bf16.mxu1 %v4663_v3  ;;  %v304_v3 = vld [vmem:[%s10473_s1 + $0x818] sm:$0xff]  ;;  %v4685_v6 = vpack.c.bf16 %v299_v0, %v295_v62  ;;  %v335_v60 = vld [vmem:[%s10473_s1 + $0x910] sm:$0xff]  ;;  %v4703_v61 = vpack.c.bf16 %v340_v54, %v336_v53  ;;  %v346_v0 = vld [vmem:[%s10473_s1 + $0x968] sm:$0xff] }
  0x6d   :  { %v339_v62 = vld [vmem:[%s10473_s1 + $0x930] sm:$0xff]  ;;  %v373_v54 = vld [vmem:[%s10473_s1 + $0xa40] sm:$0xff] }
  0x6e   :  { %3882 = vmatpush1.bf16.msra.mxu0 %v3881_v9  ;;  %v305_v9 = vld [vmem:[%s10473_s1 + $0x820] sm:$0xff] }
  0x6f   :  { %4666 = vmatpush1.bf16.msra.mxu1 %v4665_v10  ;;  %3884 = vmatprep.subr.bf16.mxu0 %v3883_v11  ;;  %v303_v10 = vld [vmem:[%s10473_s1 + $0x810] sm:$0xff]  ;;  %v4687_v11 = vpack.c.bf16 %v308_v4, %v304_v3  ;;  %v3905_v18 = vpack.c.bf16 %v305_v9, %v301_v8  ;;  %v4705_v4 = vpack.c.bf16 %v339_v62, %v335_v60  ;;  %v386_v60 = vld [vmem:[%s10473_s1 + $0xaa8] sm:$0xff]  ;;  %v388_v62 = vld [vmem:[%s10473_s1 + $0xab8] sm:$0xff] }
  0x70   :  { %4668 = vmatprep.subr.bf16.mxu1 %v4667_v15  ;;  %v312_v15 = vld [vmem:[%s10473_s1 + $0x858] sm:$0xff]  ;;  %v4689_v19 = vpack.c.bf16 %v307_v12, %v303_v10  ;;  %v343_v8 = vld [vmem:[%s10473_s1 + $0x950] sm:$0xff]  ;;  %v4707_v9 = vpack.c.bf16 %v348_v2, %v344_v1  ;;  %v354_v12 = vld [vmem:[%s10473_s1 + $0x9a8] sm:$0xff] }
  0x71   :  { %v4691_v24 = vpack.c.bf16 %v316_v16, %v312_v15  ;;  %v347_v10 = vld [vmem:[%s10473_s1 + $0x970] sm:$0xff]  ;;  %v381_v2 = vld [vmem:[%s10473_s1 + $0xa80] sm:$0xff] }
  0x72   :  { %3886 = vmatpush1.bf16.msra.mxu0 %v3885_v21  ;;  %v309_v21 = vld [vmem:[%s10473_s1 + $0x840] sm:$0xff]  ;;  %v4709_v16 = vpack.c.bf16 %v347_v10, %v343_v8  ;;  %v394_v8 = vld [vmem:[%s10473_s1 + $0xae8] sm:$0xff]  ;;  %v396_v10 = vld [vmem:[%s10473_s1 + $0xaf8] sm:$0xff] }
  0x73   :  { %4670 = vmatpush1.bf16.msra.mxu1 %v4669_v22  ;;  %3888 = vmatprep.subr.bf16.mxu0 %v3887_v23  ;;  %v313_v22 = vld [vmem:[%s10473_s1 + $0x860] sm:$0xff]  ;;  %v311_v23 = vld [vmem:[%s10473_s1 + $0x850] sm:$0xff] }
  0x74   :  { %4672 = vmatprep.subr.bf16.mxu1 %v4671_v27  ;;  %v322_v27 = vld [vmem:[%s10473_s1 + $0x8a8] sm:$0xff]  ;;  %v3909_v31 = vpack.c.bf16 %v313_v22, %v309_v21  ;;  %v4693_v32 = vpack.c.bf16 %v315_v25, %v311_v23  ;;  %v4711_v21 = vpack.c.bf16 %v356_v14, %v352_v13  ;;  %v355_v22 = vld [vmem:[%s10473_s1 + $0x9b0] sm:$0xff]  ;;  %v360_v25 = vld [vmem:[%s10473_s1 + $0x9d8] sm:$0xff] }
  0x75   :  { %v358_v23 = vld [vmem:[%s10473_s1 + $0x9c8] sm:$0xff]  ;;  %v389_v14 = vld [vmem:[%s10473_s1 + $0xac0] sm:$0xff] }
  0x76   :  { %3890 = vmatpush1.bf16.msra.mxu0 %v3889_v33  ;;  %v3911_v33 = vpack.c.bf16 %v322_v27, %v318_v26  ;;  %v364_v26 = vld [vmem:[%s10473_s1 + $0x9f8] sm:$0xff] }
  0x77   :  { %4674 = vmatpush1.bf16.msra.mxu1 %v4673_v34  ;;  %3892 = vmatprep.subr.bf16.mxu0 %v3891_v35  ;;  %v317_v34 = vld [vmem:[%s10473_s1 + $0x880] sm:$0xff] }
  0x78   :  { %4676 = vmatprep.subr.bf16.mxu1 %v4675_v39  ;;  %v321_v35 = vld [vmem:[%s10473_s1 + $0x8a0] sm:$0xff]  ;;  %v326_v39 = vld [vmem:[%s10473_s1 + $0x8c8] sm:$0xff] }
  0x79   :  { %v3913_v43 = vpack.c.bf16 %v321_v35, %v317_v34  ;;  %v363_v34 = vld [vmem:[%s10473_s1 + $0x9f0] sm:$0xff]  ;;  %v366_v35 = vld [vmem:[%s10473_s1 + $0xa08] sm:$0xff] }
  0x7a   :  { %3894 = vmatpush1.bf16.msra.mxu0 %v3893_v45  ;;  %v3915_v45 = vpack.c.bf16 %v330_v40, %v326_v39  ;;  %v3935_v41 = vpack.c.bf16 %v370_v36, %v366_v35 }
  0x7b   :  { %4678 = vmatpush1.bf16.msra.mxu1 %v4677_v46  ;;  %3896 = vmatprep.subr.bf16.mxu0 %v3895_v47  ;;  %v325_v46 = vld [vmem:[%s10473_s1 + $0x8c0] sm:$0xff] }
  0x7c   :  { %4680 = vmatprep.subr.bf16.mxu1 %v4679_v51  ;;  %v329_v47 = vld [vmem:[%s10473_s1 + $0x8e0] sm:$0xff]  ;;  %v334_v51 = vld [vmem:[%s10473_s1 + $0x908] sm:$0xff] }
  0x7d   :  { %v3917_v55 = vpack.c.bf16 %v329_v47, %v325_v46  ;;  %v371_v46 = vld [vmem:[%s10473_s1 + $0xa30] sm:$0xff]  ;;  %v374_v47 = vld [vmem:[%s10473_s1 + $0xa48] sm:$0xff] }
  0x7e   :  { %3898 = vmatpush1.bf16.msra.mxu0 %v3897_v57  ;;  %v3919_v57 = vpack.c.bf16 %v338_v52, %v334_v51  ;;  %v3939_v53 = vpack.c.bf16 %v378_v48, %v374_v47 }
  0x7f   :  { %4682 = vmatpush1.bf16.msra.mxu1 %v4681_v58  ;;  %3900 = vmatprep.subr.bf16.mxu0 %v3899_v59  ;;  %v333_v58 = vld [vmem:[%s10473_s1 + $0x900] sm:$0xff] }
  0x80   :  { %4684 = vmatprep.subr.bf16.mxu1 %v4683_v63  ;;  %v337_v59 = vld [vmem:[%s10473_s1 + $0x920] sm:$0xff]  ;;  %v342_v63 = vld [vmem:[%s10473_s1 + $0x948] sm:$0xff] }
  0x81   :  { %v3921_v3 = vpack.c.bf16 %v337_v59, %v333_v58  ;;  %v379_v58 = vld [vmem:[%s10473_s1 + $0xa70] sm:$0xff]  ;;  %v382_v59 = vld [vmem:[%s10473_s1 + $0xa88] sm:$0xff] }
  0x82   :  { %3902 = vmatpush1.bf16.msra.mxu0 %v3901_v5  ;;  %v3923_v5 = vpack.c.bf16 %v346_v0, %v342_v63  ;;  %v3943_v1 = vpack.c.bf16 %v386_v60, %v382_v59 }
  0x83   :  { %4686 = vmatpush1.bf16.msra.mxu1 %v4685_v6  ;;  %3904 = vmatprep.subr.bf16.mxu0 %v3903_v7  ;;  %v341_v6 = vld [vmem:[%s10473_s1 + $0x940] sm:$0xff] }
  0x84   :  { %4688 = vmatprep.subr.bf16.mxu1 %v4687_v11  ;;  %v345_v7 = vld [vmem:[%s10473_s1 + $0x960] sm:$0xff]  ;;  %v350_v11 = vld [vmem:[%s10473_s1 + $0x988] sm:$0xff] }
  0x85   :  { %1775 = vmatmul.mubr.f32.vlgmr.msra.gmra.mrb[0].mxu0 %v22_v17  ;;  %v3925_v15 = vpack.c.bf16 %v345_v7, %v341_v6  ;;  %v387_v6 = vld [vmem:[%s10473_s1 + $0xab0] sm:$0xff]  ;;  %v390_v7 = vld [vmem:[%s10473_s1 + $0xac8] sm:$0xff] }
  0x86   :  { %3906 = vmatpush1.bf16.msra.mxu0 %v3905_v18  ;;  %2698 = vmatmul.mubr.f32.vlgmr.msra.gmra.mrb[0].mxu1 %v22_v17  ;;  %v3927_v17 = vpack.c.bf16 %v354_v12, %v350_v11  ;;  %v349_v18 = vld [vmem:[%s10473_s1 + $0x980] sm:$0xff]  ;;  %v3947_v13 = vpack.c.bf16 %v394_v8, %v390_v7 }
  0x87   :  { %4690 = vmatpush1.bf16.msra.mxu1 %v4689_v19  ;;  %3908 = vmatprep.subr.bf16.mxu0 %v3907_v20  ;;  %v353_v19 = vld [vmem:[%s10473_s1 + $0x9a0] sm:$0xff]  ;;  %v351_v20 = vld [vmem:[%s10473_s1 + $0x990] sm:$0xff] }
  0x88   :  { %4692 = vmatprep.subr.bf16.mxu1 %v4691_v24  ;;  %1845 = vmatprep.mubr.f32.mxu0 %v25_v30  ;;  %v362_v24 = vld [vmem:[%s10473_s1 + $0x9e8] sm:$0xff]  ;;  %v3929_v27 = vpack.c.bf16 %v353_v19, %v349_v18  ;;  %v4713_v28 = vpack.c.bf16 %v355_v22, %v351_v20  ;;  %v395_v18 = vld [vmem:[%s10473_s1 + $0xaf0] sm:$0xff]  ;;  %v404_v22 = vld [vmem:[%s10473_s1 + $0xb38] sm:$0xff] }
  0x89   :  { %2768 = vmatprep.mubr.f32.mxu1 %v25_v30  ;;  %v3931_v29 = vpack.c.bf16 %v362_v24, %v358_v23  ;;  %v357_v30 = vld [vmem:[%s10473_s1 + $0x9c0] sm:$0xff]  ;;  %v398_v19 = vld [vmem:[%s10473_s1 + $0xb08] sm:$0xff] }
  0x8a   :  { %3910 = vmatpush1.bf16.msra.mxu0 %v3909_v31  ;;  %v361_v31 = vld [vmem:[%s10473_s1 + $0x9e0] sm:$0xff]  ;;  %v402_v20 = vld [vmem:[%s10473_s1 + $0xb28] sm:$0xff] }
  0x8b   :  { %4694 = vmatpush1.bf16.msra.mxu1 %v4693_v32  ;;  %3912 = vmatprep.subr.bf16.mxu0 %v3911_v33  ;;  %v359_v32 = vld [vmem:[%s10473_s1 + $0x9d0] sm:$0xff]  ;;  %v4715_v33 = vpack.c.bf16 %v364_v26, %v360_v25  ;;  %v3933_v39 = vpack.c.bf16 %v361_v31, %v357_v30  ;;  %v3951_v25 = vpack.c.bf16 %v402_v20, %v398_v19  ;;  %v397_v26 = vld [vmem:[%s10473_s1 + $0xb00] sm:$0xff]  ;;  %v406_v31 = vld [vmem:[%s10473_s1 + $0xb48] sm:$0xff] }
  0x8c   :  { %4696 = vmatprep.subr.bf16.mxu1 %v4695_v37  ;;  %v368_v37 = vld [vmem:[%s10473_s1 + $0xa18] sm:$0xff]  ;;  %v4717_v40 = vpack.c.bf16 %v363_v34, %v359_v32  ;;  %v403_v30 = vld [vmem:[%s10473_s1 + $0xb30] sm:$0xff]  ;;  %v410_v32 = vld [vmem:[%s10473_s1 + $0xb68] sm:$0xff] }
  0x8d   :  { %v412_v34 = vld [vmem:[%s10473_s1 + $0xb78] sm:$0xff]  ;;  %v24_v19 = vld [vmem:[%s10474_s0 + $0x20] sm:$0xff] }
  0x8e   :  { %3914 = vmatpush1.bf16.msra.mxu0 %v3913_v43  ;;  %v369_v43 = vld [vmem:[%s10473_s1 + $0xa20] sm:$0xff] }
  0x8f   :  { %4698 = vmatpush1.bf16.msra.mxu1 %v4697_v44  ;;  %3916 = vmatprep.subr.bf16.mxu0 %v3915_v45  ;;  %v367_v44 = vld [vmem:[%s10473_s1 + $0xa10] sm:$0xff]  ;;  %v4719_v45 = vpack.c.bf16 %v372_v38, %v368_v37  ;;  %v3937_v51 = vpack.c.bf16 %v369_v43, %v365_v42  ;;  %v3955_v37 = vpack.c.bf16 %v410_v32, %v406_v31  ;;  %v405_v38 = vld [vmem:[%s10473_s1 + $0xb40] sm:$0xff]  ;;  %v414_v43 = vld [vmem:[%s10473_s1 + $0xb88] sm:$0xff] }
  0x90   :  { %4700 = vmatprep.subr.bf16.mxu1 %v4699_v49  ;;  %v376_v49 = vld [vmem:[%s10473_s1 + $0xa58] sm:$0xff]  ;;  %v4721_v52 = vpack.c.bf16 %v371_v46, %v367_v44  ;;  %v411_v42 = vld [vmem:[%s10473_s1 + $0xb70] sm:$0xff]  ;;  %v418_v44 = vld [vmem:[%s10473_s1 + $0xba8] sm:$0xff] }
  0x91   :  { %v420_v46 = vld [vmem:[%s10473_s1 + $0xbb8] sm:$0xff] }
  0x92   :  { %3918 = vmatpush1.bf16.msra.mxu0 %v3917_v55  ;;  %v377_v55 = vld [vmem:[%s10473_s1 + $0xa60] sm:$0xff]  ;;  %v452_v31 = vld [vmem:[%s10473_s1 + $0xcb8] sm:$0xff] }
  0x93   :  { %4702 = vmatpush1.bf16.msra.mxu1 %v4701_v56  ;;  %3920 = vmatprep.subr.bf16.mxu0 %v3919_v57  ;;  %v375_v56 = vld [vmem:[%s10473_s1 + $0xa50] sm:$0xff]  ;;  %v4723_v57 = vpack.c.bf16 %v380_v50, %v376_v49  ;;  %v3941_v63 = vpack.c.bf16 %v377_v55, %v373_v54  ;;  %v3959_v49 = vpack.c.bf16 %v418_v44, %v414_v43  ;;  %v413_v50 = vld [vmem:[%s10473_s1 + $0xb80] sm:$0xff]  ;;  %v422_v55 = vld [vmem:[%s10473_s1 + $0xbc8] sm:$0xff] }
  0x94   :  { %4704 = vmatprep.subr.bf16.mxu1 %v4703_v61  ;;  %v384_v61 = vld [vmem:[%s10473_s1 + $0xa98] sm:$0xff]  ;;  %v4725_v0 = vpack.c.bf16 %v379_v58, %v375_v56  ;;  %v419_v54 = vld [vmem:[%s10473_s1 + $0xbb0] sm:$0xff]  ;;  %v426_v56 = vld [vmem:[%s10473_s1 + $0xbe8] sm:$0xff] }
  0x95   :  { %v428_v58 = vld [vmem:[%s10473_s1 + $0xbf8] sm:$0xff] }
  0x96   :  { %3922 = vmatpush1.bf16.msra.mxu0 %v3921_v3  ;;  %v385_v3 = vld [vmem:[%s10473_s1 + $0xaa0] sm:$0xff]  ;;  %v27_v32 = vld [vmem:[%s10474_s0 + $0x38] sm:$0xff] }
  0x97   :  { %4706 = vmatpush1.bf16.msra.mxu1 %v4705_v4  ;;  %3924 = vmatprep.subr.bf16.mxu0 %v3923_v5  ;;  %v383_v4 = vld [vmem:[%s10473_s1 + $0xa90] sm:$0xff]  ;;  %v4727_v5 = vpack.c.bf16 %v388_v62, %v384_v61  ;;  %v3945_v11 = vpack.c.bf16 %v385_v3, %v381_v2  ;;  %v3963_v61 = vpack.c.bf16 %v426_v56, %v422_v55  ;;  %v421_v62 = vld [vmem:[%s10473_s1 + $0xbc0] sm:$0xff]  ;;  %v430_v3 = vld [vmem:[%s10473_s1 + $0xc08] sm:$0xff] }
  0x98   :  { %4708 = vmatprep.subr.bf16.mxu1 %v4707_v9  ;;  %v392_v9 = vld [vmem:[%s10473_s1 + $0xad8] sm:$0xff]  ;;  %v4729_v12 = vpack.c.bf16 %v387_v6, %v383_v4  ;;  %v427_v2 = vld [vmem:[%s10473_s1 + $0xbf0] sm:$0xff]  ;;  %v434_v4 = vld [vmem:[%s10473_s1 + $0xc28] sm:$0xff] }
  0x99   :  { %v436_v6 = vld [vmem:[%s10473_s1 + $0xc38] sm:$0xff] }
  0x9a   :  { %3926 = vmatpush1.bf16.msra.mxu0 %v3925_v15  ;;  %v393_v15 = vld [vmem:[%s10473_s1 + $0xae0] sm:$0xff]  ;;  %v456_v43 = vld [vmem:[%s10473_s1 + $0xcd8] sm:$0xff] }
  0x9b   :  { %4710 = vmatpush1.bf16.msra.mxu1 %v4709_v16  ;;  %3928 = vmatprep.subr.bf16.mxu0 %v3927_v17  ;;  %v391_v16 = vld [vmem:[%s10473_s1 + $0xad0] sm:$0xff]  ;;  %v4731_v17 = vpack.c.bf16 %v396_v10, %v392_v9  ;;  %v3949_v23 = vpack.c.bf16 %v393_v15, %v389_v14  ;;  %v3967_v9 = vpack.c.bf16 %v434_v4, %v430_v3  ;;  %v429_v10 = vld [vmem:[%s10473_s1 + $0xc00] sm:$0xff]  ;;  %v438_v15 = vld [vmem:[%s10473_s1 + $0xc48] sm:$0xff] }
  0x9c   :  { %4712 = vmatprep.subr.bf16.mxu1 %v4711_v21  ;;  %v400_v21 = vld [vmem:[%s10473_s1 + $0xb18] sm:$0xff]  ;;  %v4733_v24 = vpack.c.bf16 %v395_v18, %v391_v16  ;;  %v435_v14 = vld [vmem:[%s10473_s1 + $0xc30] sm:$0xff]  ;;  %v442_v16 = vld [vmem:[%s10473_s1 + $0xc68] sm:$0xff] }
  0x9d   :  { %v444_v18 = vld [vmem:[%s10473_s1 + $0xc78] sm:$0xff] }
  0x9e   :  { %3930 = vmatpush1.bf16.msra.mxu0 %v3929_v27  ;;  %v401_v27 = vld [vmem:[%s10473_s1 + $0xb20] sm:$0xff]  ;;  %v460_v44 = vld [vmem:[%s10473_s1 + $0xcf8] sm:$0xff] }
  0x9f   :  { %4714 = vmatpush1.bf16.msra.mxu1 %v4713_v28  ;;  %3932 = vmatprep.subr.bf16.mxu0 %v3931_v29  ;;  %v399_v28 = vld [vmem:[%s10473_s1 + $0xb10] sm:$0xff]  ;;  %v4735_v29 = vpack.c.bf16 %v404_v22, %v400_v21  ;;  %v3953_v35 = vpack.c.bf16 %v401_v27, %v397_v26  ;;  %v3971_v22 = vpack.c.bf16 %v442_v16, %v438_v15  ;;  %v464_v55 = vld [vmem:[%s10473_s1 + $0xd18] sm:$0xff] }
  0xa0   :  { %4716 = vmatprep.subr.bf16.mxu1 %v4715_v33  ;;  %v408_v33 = vld [vmem:[%s10473_s1 + $0xb58] sm:$0xff]  ;;  %v4737_v36 = vpack.c.bf16 %v403_v30, %v399_v28  ;;  %v443_v27 = vld [vmem:[%s10473_s1 + $0xc70] sm:$0xff]  ;;  %v446_v28 = vld [vmem:[%s10473_s1 + $0xc88] sm:$0xff] }
  0xa1   :  { %v448_v30 = vld [vmem:[%s10473_s1 + $0xc98] sm:$0xff] }
  0xa2   :  { %3934 = vmatpush1.bf16.msra.mxu0 %v3933_v39  ;;  %v409_v39 = vld [vmem:[%s10473_s1 + $0xb60] sm:$0xff]  ;;  %v468_v56 = vld [vmem:[%s10473_s1 + $0xd38] sm:$0xff] }
  0xa3   :  { %4718 = vmatpush1.bf16.msra.mxu1 %v4717_v40  ;;  %3936 = vmatprep.subr.bf16.mxu0 %v3935_v41  ;;  %v407_v40 = vld [vmem:[%s10473_s1 + $0xb50] sm:$0xff]  ;;  %v4739_v41 = vpack.c.bf16 %v412_v34, %v408_v33  ;;  %v3957_v47 = vpack.c.bf16 %v409_v39, %v405_v38  ;;  %v4759_v39 = vpack.c.bf16 %v452_v31, %v448_v30  ;;  %v472_v3 = vld [vmem:[%s10473_s1 + $0xd58] sm:$0xff] }
  0xa4   :  { %4720 = vmatprep.subr.bf16.mxu1 %v4719_v45  ;;  %v416_v45 = vld [vmem:[%s10473_s1 + $0xb98] sm:$0xff]  ;;  %v4741_v48 = vpack.c.bf16 %v411_v42, %v407_v40  ;;  %v447_v38 = vld [vmem:[%s10473_s1 + $0xc90] sm:$0xff]  ;;  %v458_v42 = vld [vmem:[%s10473_s1 + $0xce8] sm:$0xff] }
  0xa5   :  { %v451_v40 = vld [vmem:[%s10473_s1 + $0xcb0] sm:$0xff]  ;;  %v476_v4 = vld [vmem:[%s10473_s1 + $0xd78] sm:$0xff] }
  0xa6   :  { %3938 = vmatpush1.bf16.msra.mxu0 %v3937_v51  ;;  %v417_v51 = vld [vmem:[%s10473_s1 + $0xba0] sm:$0xff]  ;;  %v480_v15 = vld [vmem:[%s10473_s1 + $0xd98] sm:$0xff] }
  0xa7   :  { %4722 = vmatpush1.bf16.msra.mxu1 %v4721_v52  ;;  %3940 = vmatprep.subr.bf16.mxu0 %v3939_v53  ;;  %v415_v52 = vld [vmem:[%s10473_s1 + $0xb90] sm:$0xff]  ;;  %v4743_v53 = vpack.c.bf16 %v420_v46, %v416_v45  ;;  %v3961_v59 = vpack.c.bf16 %v417_v51, %v413_v50  ;;  %v4761_v46 = vpack.c.bf16 %v451_v40, %v447_v38  ;;  %v484_v16 = vld [vmem:[%s10473_s1 + $0xdb8] sm:$0xff]  ;;  %v498_v38 = vld [vmem:[%s10473_s1 + $0xe28] sm:$0xff] }
  0xa8   :  { %4724 = vmatprep.subr.bf16.mxu1 %v4723_v57  ;;  %v424_v57 = vld [vmem:[%s10473_s1 + $0xbd8] sm:$0xff]  ;;  %v4745_v60 = vpack.c.bf16 %v419_v54, %v415_v52  ;;  %v455_v50 = vld [vmem:[%s10473_s1 + $0xcd0] sm:$0xff]  ;;  %v4763_v51 = vpack.c.bf16 %v460_v44, %v456_v43  ;;  %v466_v54 = vld [vmem:[%s10473_s1 + $0xd28] sm:$0xff] }
  0xa9   :  { %v459_v52 = vld [vmem:[%s10473_s1 + $0xcf0] sm:$0xff]  ;;  %v500_v40 = vld [vmem:[%s10473_s1 + $0xe38] sm:$0xff]  ;;  %v493_v44 = vld [vmem:[%s10473_s1 + $0xe00] sm:$0xff] }
  0xaa   :  { %3942 = vmatpush1.bf16.msra.mxu0 %v3941_v63  ;;  %v425_v63 = vld [vmem:[%s10473_s1 + $0xbe0] sm:$0xff] }
  0xab   :  { %4726 = vmatpush1.bf16.msra.mxu1 %v4725_v0  ;;  %3944 = vmatprep.subr.bf16.mxu0 %v3943_v1  ;;  %v423_v0 = vld [vmem:[%s10473_s1 + $0xbd0] sm:$0xff]  ;;  %v4747_v1 = vpack.c.bf16 %v428_v58, %v424_v57  ;;  %v3965_v7 = vpack.c.bf16 %v425_v63, %v421_v62  ;;  %v4765_v58 = vpack.c.bf16 %v459_v52, %v455_v50  ;;  %v506_v50 = vld [vmem:[%s10473_s1 + $0xe68] sm:$0xff]  ;;  %v508_v52 = vld [vmem:[%s10473_s1 + $0xe78] sm:$0xff] }
  0xac   :  { %4728 = vmatprep.subr.bf16.mxu1 %v4727_v5  ;;  %v432_v5 = vld [vmem:[%s10473_s1 + $0xc18] sm:$0xff]  ;;  %v4749_v8 = vpack.c.bf16 %v427_v2, %v423_v0  ;;  %v463_v62 = vld [vmem:[%s10473_s1 + $0xd10] sm:$0xff]  ;;  %v4767_v63 = vpack.c.bf16 %v468_v56, %v464_v55  ;;  %v474_v2 = vld [vmem:[%s10473_s1 + $0xd68] sm:$0xff] }
  0xad   :  { %v467_v0 = vld [vmem:[%s10473_s1 + $0xd30] sm:$0xff]  ;;  %v501_v56 = vld [vmem:[%s10473_s1 + $0xe40] sm:$0xff] }
  0xae   :  { %3946 = vmatpush1.bf16.msra.mxu0 %v3945_v11  ;;  %v433_v11 = vld [vmem:[%s10473_s1 + $0xc20] sm:$0xff] }
  0xaf   :  { %4730 = vmatpush1.bf16.msra.mxu1 %v4729_v12  ;;  %3948 = vmatprep.subr.bf16.mxu0 %v3947_v13  ;;  %v431_v12 = vld [vmem:[%s10473_s1 + $0xc10] sm:$0xff]  ;;  %v4751_v13 = vpack.c.bf16 %v436_v6, %v432_v5  ;;  %v3969_v20 = vpack.c.bf16 %v433_v11, %v429_v10  ;;  %v4769_v6 = vpack.c.bf16 %v467_v0, %v463_v62  ;;  %v514_v62 = vld [vmem:[%s10473_s1 + $0xea8] sm:$0xff]  ;;  %v516_v0 = vld [vmem:[%s10473_s1 + $0xeb8] sm:$0xff] }
  0xb0   :  { %4732 = vmatprep.subr.bf16.mxu1 %v4731_v17  ;;  %v440_v17 = vld [vmem:[%s10473_s1 + $0xc58] sm:$0xff]  ;;  %v4753_v21 = vpack.c.bf16 %v435_v14, %v431_v12  ;;  %v471_v10 = vld [vmem:[%s10473_s1 + $0xd50] sm:$0xff]  ;;  %v4771_v11 = vpack.c.bf16 %v476_v4, %v472_v3  ;;  %v482_v14 = vld [vmem:[%s10473_s1 + $0xda8] sm:$0xff] }
  0xb1   :  { %v4755_v26 = vpack.c.bf16 %v444_v18, %v440_v17  ;;  %v475_v12 = vld [vmem:[%s10473_s1 + $0xd70] sm:$0xff]  ;;  %v509_v4 = vld [vmem:[%s10473_s1 + $0xe80] sm:$0xff] }
  0xb2   :  { %3950 = vmatpush1.bf16.msra.mxu0 %v3949_v23  ;;  %v437_v23 = vld [vmem:[%s10473_s1 + $0xc40] sm:$0xff]  ;;  %v4773_v18 = vpack.c.bf16 %v475_v12, %v471_v10  ;;  %v522_v10 = vld [vmem:[%s10473_s1 + $0xee8] sm:$0xff]  ;;  %v524_v12 = vld [vmem:[%s10473_s1 + $0xef8] sm:$0xff] }
  0xb3   :  { %4734 = vmatpush1.bf16.msra.mxu1 %v4733_v24  ;;  %3952 = vmatprep.subr.bf16.mxu0 %v3951_v25  ;;  %v441_v24 = vld [vmem:[%s10473_s1 + $0xc60] sm:$0xff]  ;;  %v439_v25 = vld [vmem:[%s10473_s1 + $0xc50] sm:$0xff] }
  0xb4   :  { %4736 = vmatprep.subr.bf16.mxu1 %v4735_v29  ;;  %v450_v29 = vld [vmem:[%s10473_s1 + $0xca8] sm:$0xff]  ;;  %v3973_v33 = vpack.c.bf16 %v441_v24, %v437_v23  ;;  %v4757_v34 = vpack.c.bf16 %v443_v27, %v439_v25  ;;  %v4775_v23 = vpack.c.bf16 %v484_v16, %v480_v15  ;;  %v483_v24 = vld [vmem:[%s10473_s1 + $0xdb0] sm:$0xff]  ;;  %v488_v27 = vld [vmem:[%s10473_s1 + $0xdd8] sm:$0xff] }
  0xb5   :  { %v486_v25 = vld [vmem:[%s10473_s1 + $0xdc8] sm:$0xff]  ;;  %v517_v16 = vld [vmem:[%s10473_s1 + $0xec0] sm:$0xff] }
  0xb6   :  { %3954 = vmatpush1.bf16.msra.mxu0 %v3953_v35  ;;  %v3975_v35 = vpack.c.bf16 %v450_v29, %v446_v28  ;;  %v492_v28 = vld [vmem:[%s10473_s1 + $0xdf8] sm:$0xff] }
  0xb7   :  { %4738 = vmatpush1.bf16.msra.mxu1 %v4737_v36  ;;  %3956 = vmatprep.subr.bf16.mxu0 %v3955_v37  ;;  %v445_v36 = vld [vmem:[%s10473_s1 + $0xc80] sm:$0xff] }
  0xb8   :  { %4740 = vmatprep.subr.bf16.mxu1 %v4739_v41  ;;  %v449_v37 = vld [vmem:[%s10473_s1 + $0xca0] sm:$0xff]  ;;  %v454_v41 = vld [vmem:[%s10473_s1 + $0xcc8] sm:$0xff] }
  0xb9   :  { %v3977_v45 = vpack.c.bf16 %v449_v37, %v445_v36  ;;  %v491_v36 = vld [vmem:[%s10473_s1 + $0xdf0] sm:$0xff]  ;;  %v494_v37 = vld [vmem:[%s10473_s1 + $0xe08] sm:$0xff] }
  0xba   :  { %3958 = vmatpush1.bf16.msra.mxu0 %v3957_v47  ;;  %v3979_v47 = vpack.c.bf16 %v458_v42, %v454_v41  ;;  %v3999_v43 = vpack.c.bf16 %v498_v38, %v494_v37 }
  0xbb   :  { %4742 = vmatpush1.bf16.msra.mxu1 %v4741_v48  ;;  %3960 = vmatprep.subr.bf16.mxu0 %v3959_v49  ;;  %v453_v48 = vld [vmem:[%s10473_s1 + $0xcc0] sm:$0xff] }
  0xbc   :  { %4744 = vmatprep.subr.bf16.mxu1 %v4743_v53  ;;  %v457_v49 = vld [vmem:[%s10473_s1 + $0xce0] sm:$0xff]  ;;  %v462_v53 = vld [vmem:[%s10473_s1 + $0xd08] sm:$0xff] }
  0xbd   :  { %v3981_v57 = vpack.c.bf16 %v457_v49, %v453_v48  ;;  %v499_v48 = vld [vmem:[%s10473_s1 + $0xe30] sm:$0xff]  ;;  %v502_v49 = vld [vmem:[%s10473_s1 + $0xe48] sm:$0xff] }
  0xbe   :  { %3962 = vmatpush1.bf16.msra.mxu0 %v3961_v59  ;;  %v3983_v59 = vpack.c.bf16 %v466_v54, %v462_v53  ;;  %v4003_v55 = vpack.c.bf16 %v506_v50, %v502_v49 }
  0xbf   :  { %4746 = vmatpush1.bf16.msra.mxu1 %v4745_v60  ;;  %3964 = vmatprep.subr.bf16.mxu0 %v3963_v61  ;;  %v461_v60 = vld [vmem:[%s10473_s1 + $0xd00] sm:$0xff] }
  0xc0   :  { %4748 = vmatprep.subr.bf16.mxu1 %v4747_v1  ;;  %v465_v61 = vld [vmem:[%s10473_s1 + $0xd20] sm:$0xff]  ;;  %v470_v1 = vld [vmem:[%s10473_s1 + $0xd48] sm:$0xff] }
  0xc1   :  { %v3985_v5 = vpack.c.bf16 %v465_v61, %v461_v60  ;;  %v507_v60 = vld [vmem:[%s10473_s1 + $0xe70] sm:$0xff]  ;;  %v510_v61 = vld [vmem:[%s10473_s1 + $0xe88] sm:$0xff] }
  0xc2   :  { %3966 = vmatpush1.bf16.msra.mxu0 %v3965_v7  ;;  %v3987_v7 = vpack.c.bf16 %v474_v2, %v470_v1  ;;  %v4007_v3 = vpack.c.bf16 %v514_v62, %v510_v61 }
  0xc3   :  { %4750 = vmatpush1.bf16.msra.mxu1 %v4749_v8  ;;  %3968 = vmatprep.subr.bf16.mxu0 %v3967_v9  ;;  %v469_v8 = vld [vmem:[%s10473_s1 + $0xd40] sm:$0xff] }
  0xc4   :  { %4752 = vmatprep.subr.bf16.mxu1 %v4751_v13  ;;  %v473_v9 = vld [vmem:[%s10473_s1 + $0xd60] sm:$0xff]  ;;  %v478_v13 = vld [vmem:[%s10473_s1 + $0xd88] sm:$0xff] }
  0xc5   :  { %1846 = vmatmul.mubr.f32.vlgmr.msra.gmra.mrb[0].mxu0 %v24_v19  ;;  %v3989_v17 = vpack.c.bf16 %v473_v9, %v469_v8  ;;  %v515_v8 = vld [vmem:[%s10473_s1 + $0xeb0] sm:$0xff]  ;;  %v518_v9 = vld [vmem:[%s10473_s1 + $0xec8] sm:$0xff] }
  0xc6   :  { %3970 = vmatpush1.bf16.msra.mxu0 %v3969_v20  ;;  %2769 = vmatmul.mubr.f32.vlgmr.msra.gmra.mrb[0].mxu1 %v24_v19  ;;  %v3991_v19 = vpack.c.bf16 %v482_v14, %v478_v13  ;;  %v477_v20 = vld [vmem:[%s10473_s1 + $0xd80] sm:$0xff]  ;;  %v4011_v15 = vpack.c.bf16 %v522_v10, %v518_v9 }
  0xc7   :  { %4754 = vmatpush1.bf16.msra.mxu1 %v4753_v21  ;;  %3972 = vmatprep.subr.bf16.mxu0 %v3971_v22  ;;  %v481_v21 = vld [vmem:[%s10473_s1 + $0xda0] sm:$0xff]  ;;  %v479_v22 = vld [vmem:[%s10473_s1 + $0xd90] sm:$0xff] }
  0xc8   :  { %4756 = vmatprep.subr.bf16.mxu1 %v4755_v26  ;;  %1916 = vmatprep.mubr.f32.mxu0 %v27_v32  ;;  %v490_v26 = vld [vmem:[%s10473_s1 + $0xde8] sm:$0xff]  ;;  %v3993_v29 = vpack.c.bf16 %v481_v21, %v477_v20  ;;  %v4777_v30 = vpack.c.bf16 %v483_v24, %v479_v22  ;;  %v523_v20 = vld [vmem:[%s10473_s1 + $0xef0] sm:$0xff]  ;;  %v532_v24 = vld [vmem:[%s10473_s1 + $0xf38] sm:$0xff] }
  0xc9   :  { %2839 = vmatprep.mubr.f32.mxu1 %v27_v32  ;;  %v3995_v31 = vpack.c.bf16 %v490_v26, %v486_v25  ;;  %v485_v32 = vld [vmem:[%s10473_s1 + $0xdc0] sm:$0xff]  ;;  %v526_v21 = vld [vmem:[%s10473_s1 + $0xf08] sm:$0xff] }
  0xca   :  { %3974 = vmatpush1.bf16.msra.mxu0 %v3973_v33  ;;  %v489_v33 = vld [vmem:[%s10473_s1 + $0xde0] sm:$0xff]  ;;  %v530_v22 = vld [vmem:[%s10473_s1 + $0xf28] sm:$0xff] }
  0xcb   :  { %4758 = vmatpush1.bf16.msra.mxu1 %v4757_v34  ;;  %3976 = vmatprep.subr.bf16.mxu0 %v3975_v35  ;;  %v487_v34 = vld [vmem:[%s10473_s1 + $0xdd0] sm:$0xff]  ;;  %v4779_v35 = vpack.c.bf16 %v492_v28, %v488_v27  ;;  %v3997_v41 = vpack.c.bf16 %v489_v33, %v485_v32  ;;  %v4015_v27 = vpack.c.bf16 %v530_v22, %v526_v21  ;;  %v525_v28 = vld [vmem:[%s10473_s1 + $0xf00] sm:$0xff]  ;;  %v534_v33 = vld [vmem:[%s10473_s1 + $0xf48] sm:$0xff] }
  0xcc   :  { %4760 = vmatprep.subr.bf16.mxu1 %v4759_v39  ;;  %v496_v39 = vld [vmem:[%s10473_s1 + $0xe18] sm:$0xff]  ;;  %v4781_v42 = vpack.c.bf16 %v491_v36, %v487_v34  ;;  %v531_v32 = vld [vmem:[%s10473_s1 + $0xf30] sm:$0xff]  ;;  %v538_v34 = vld [vmem:[%s10473_s1 + $0xf68] sm:$0xff] }
  0xcd   :  { %v540_v36 = vld [vmem:[%s10473_s1 + $0xf78] sm:$0xff]  ;;  %v26_v21 = vld [vmem:[%s10474_s0 + $0x30] sm:$0xff] }
  0xce   :  { %3978 = vmatpush1.bf16.msra.mxu0 %v3977_v45  ;;  %v497_v45 = vld [vmem:[%s10473_s1 + $0xe20] sm:$0xff] }
  0xcf   :  { %4762 = vmatpush1.bf16.msra.mxu1 %v4761_v46  ;;  %3980 = vmatprep.subr.bf16.mxu0 %v3979_v47  ;;  %v495_v46 = vld [vmem:[%s10473_s1 + $0xe10] sm:$0xff]  ;;  %v4783_v47 = vpack.c.bf16 %v500_v40, %v496_v39  ;;  %v4001_v53 = vpack.c.bf16 %v497_v45, %v493_v44  ;;  %v4019_v39 = vpack.c.bf16 %v538_v34, %v534_v33  ;;  %v533_v40 = vld [vmem:[%s10473_s1 + $0xf40] sm:$0xff]  ;;  %v542_v45 = vld [vmem:[%s10473_s1 + $0xf88] sm:$0xff] }
  0xd0   :  { %4764 = vmatprep.subr.bf16.mxu1 %v4763_v51  ;;  %v504_v51 = vld [vmem:[%s10473_s1 + $0xe58] sm:$0xff]  ;;  %v4785_v54 = vpack.c.bf16 %v499_v48, %v495_v46  ;;  %v539_v44 = vld [vmem:[%s10473_s1 + $0xf70] sm:$0xff]  ;;  %v546_v46 = vld [vmem:[%s10473_s1 + $0xfa8] sm:$0xff] }
  0xd1   :  { %v548_v48 = vld [vmem:[%s10473_s1 + $0xfb8] sm:$0xff]  ;;  %v29_v34 = vld [vmem:[%s10474_s0 + $0x48] sm:$0xff] }
  0xd2   :  { %3982 = vmatpush1.bf16.msra.mxu0 %v3981_v57  ;;  %v505_v57 = vld [vmem:[%s10473_s1 + $0xe60] sm:$0xff]  ;;  %v580_v33 = vld [vmem:[%s10473_s1 + $0x10b8] sm:$0xff] }
  0xd3   :  { %4766 = vmatpush1.bf16.msra.mxu1 %v4765_v58  ;;  %3984 = vmatprep.subr.bf16.mxu0 %v3983_v59  ;;  %v503_v58 = vld [vmem:[%s10473_s1 + $0xe50] sm:$0xff]  ;;  %v4787_v59 = vpack.c.bf16 %v508_v52, %v504_v51  ;;  %v4005_v1 = vpack.c.bf16 %v505_v57, %v501_v56  ;;  %v4023_v51 = vpack.c.bf16 %v546_v46, %v542_v45  ;;  %v541_v52 = vld [vmem:[%s10473_s1 + $0xf80] sm:$0xff]  ;;  %v550_v57 = vld [vmem:[%s10473_s1 + $0xfc8] sm:$0xff] }
  0xd4   :  { %4768 = vmatprep.subr.bf16.mxu1 %v4767_v63  ;;  %v512_v63 = vld [vmem:[%s10473_s1 + $0xe98] sm:$0xff]  ;;  %v4789_v2 = vpack.c.bf16 %v507_v60, %v503_v58  ;;  %v547_v56 = vld [vmem:[%s10473_s1 + $0xfb0] sm:$0xff]  ;;  %v554_v58 = vld [vmem:[%s10473_s1 + $0xfe8] sm:$0xff] }
  0xd5   :  { %v556_v60 = vld [vmem:[%s10473_s1 + $0xff8] sm:$0xff] }
  0xd6   :  { %3986 = vmatpush1.bf16.msra.mxu0 %v3985_v5  ;;  %v513_v5 = vld [vmem:[%s10473_s1 + $0xea0] sm:$0xff]  ;;  %v584_v45 = vld [vmem:[%s10473_s1 + $0x10d8] sm:$0xff] }
  0xd7   :  { %4770 = vmatpush1.bf16.msra.mxu1 %v4769_v6  ;;  %3988 = vmatprep.subr.bf16.mxu0 %v3987_v7  ;;  %v511_v6 = vld [vmem:[%s10473_s1 + $0xe90] sm:$0xff]  ;;  %v4791_v7 = vpack.c.bf16 %v516_v0, %v512_v63  ;;  %v4009_v13 = vpack.c.bf16 %v513_v5, %v509_v4  ;;  %v4027_v63 = vpack.c.bf16 %v554_v58, %v550_v57  ;;  %v549_v0 = vld [vmem:[%s10473_s1 + $0xfc0] sm:$0xff]  ;;  %v558_v5 = vld [vmem:[%s10473_s1 + $0x1008] sm:$0xff] }
  0xd8   :  { %4772 = vmatprep.subr.bf16.mxu1 %v4771_v11  ;;  %v520_v11 = vld [vmem:[%s10473_s1 + $0xed8] sm:$0xff]  ;;  %v4793_v14 = vpack.c.bf16 %v515_v8, %v511_v6  ;;  %v555_v4 = vld [vmem:[%s10473_s1 + $0xff0] sm:$0xff]  ;;  %v562_v6 = vld [vmem:[%s10473_s1 + $0x1028] sm:$0xff] }
  0xd9   :  { %v564_v8 = vld [vmem:[%s10473_s1 + $0x1038] sm:$0xff] }
  0xda   :  { %3990 = vmatpush1.bf16.msra.mxu0 %v3989_v17  ;;  %v521_v17 = vld [vmem:[%s10473_s1 + $0xee0] sm:$0xff]  ;;  %v588_v46 = vld [vmem:[%s10473_s1 + $0x10f8] sm:$0xff] }
  0xdb   :  { %4774 = vmatpush1.bf16.msra.mxu1 %v4773_v18  ;;  %3992 = vmatprep.subr.bf16.mxu0 %v3991_v19  ;;  %v519_v18 = vld [vmem:[%s10473_s1 + $0xed0] sm:$0xff]  ;;  %v4795_v19 = vpack.c.bf16 %v524_v12, %v520_v11  ;;  %v4013_v25 = vpack.c.bf16 %v521_v17, %v517_v16  ;;  %v4031_v11 = vpack.c.bf16 %v562_v6, %v558_v5  ;;  %v557_v12 = vld [vmem:[%s10473_s1 + $0x1000] sm:$0xff]  ;;  %v566_v17 = vld [vmem:[%s10473_s1 + $0x1048] sm:$0xff] }
  0xdc   :  { %4776 = vmatprep.subr.bf16.mxu1 %v4775_v23  ;;  %v528_v23 = vld [vmem:[%s10473_s1 + $0xf18] sm:$0xff]  ;;  %v4797_v26 = vpack.c.bf16 %v523_v20, %v519_v18  ;;  %v563_v16 = vld [vmem:[%s10473_s1 + $0x1030] sm:$0xff]  ;;  %v570_v18 = vld [vmem:[%s10473_s1 + $0x1068] sm:$0xff] }
  0xdd   :  { %v572_v20 = vld [vmem:[%s10473_s1 + $0x1078] sm:$0xff] }
  0xde   :  { %3994 = vmatpush1.bf16.msra.mxu0 %v3993_v29  ;;  %v529_v29 = vld [vmem:[%s10473_s1 + $0xf20] sm:$0xff]  ;;  %v592_v57 = vld [vmem:[%s10473_s1 + $0x1118] sm:$0xff] }
  0xdf   :  { %4778 = vmatpush1.bf16.msra.mxu1 %v4777_v30  ;;  %3996 = vmatprep.subr.bf16.mxu0 %v3995_v31  ;;  %v527_v30 = vld [vmem:[%s10473_s1 + $0xf10] sm:$0xff]  ;;  %v4799_v31 = vpack.c.bf16 %v532_v24, %v528_v23  ;;  %v4017_v37 = vpack.c.bf16 %v529_v29, %v525_v28  ;;  %v4035_v24 = vpack.c.bf16 %v570_v18, %v566_v17  ;;  %v596_v58 = vld [vmem:[%s10473_s1 + $0x1138] sm:$0xff] }
  0xe0   :  { %4780 = vmatprep.subr.bf16.mxu1 %v4779_v35  ;;  %v536_v35 = vld [vmem:[%s10473_s1 + $0xf58] sm:$0xff]  ;;  %v4801_v38 = vpack.c.bf16 %v531_v32, %v527_v30  ;;  %v571_v29 = vld [vmem:[%s10473_s1 + $0x1070] sm:$0xff]  ;;  %v574_v30 = vld [vmem:[%s10473_s1 + $0x1088] sm:$0xff] }
  0xe1   :  { %v576_v32 = vld [vmem:[%s10473_s1 + $0x1098] sm:$0xff] }
  0xe2   :  { %3998 = vmatpush1.bf16.msra.mxu0 %v3997_v41  ;;  %v537_v41 = vld [vmem:[%s10473_s1 + $0xf60] sm:$0xff]  ;;  %v600_v5 = vld [vmem:[%s10473_s1 + $0x1158] sm:$0xff] }
  0xe3   :  { %4782 = vmatpush1.bf16.msra.mxu1 %v4781_v42  ;;  %4000 = vmatprep.subr.bf16.mxu0 %v3999_v43  ;;  %v535_v42 = vld [vmem:[%s10473_s1 + $0xf50] sm:$0xff]  ;;  %v4803_v43 = vpack.c.bf16 %v540_v36, %v536_v35  ;;  %v4021_v49 = vpack.c.bf16 %v537_v41, %v533_v40  ;;  %v4823_v41 = vpack.c.bf16 %v580_v33, %v576_v32  ;;  %v604_v6 = vld [vmem:[%s10473_s1 + $0x1178] sm:$0xff] }
  0xe4   :  { %4784 = vmatprep.subr.bf16.mxu1 %v4783_v47  ;;  %v544_v47 = vld [vmem:[%s10473_s1 + $0xf98] sm:$0xff]  ;;  %v4805_v50 = vpack.c.bf16 %v539_v44, %v535_v42  ;;  %v575_v40 = vld [vmem:[%s10473_s1 + $0x1090] sm:$0xff]  ;;  %v586_v44 = vld [vmem:[%s10473_s1 + $0x10e8] sm:$0xff] }
  0xe5   :  { %v579_v42 = vld [vmem:[%s10473_s1 + $0x10b0] sm:$0xff]  ;;  %v608_v17 = vld [vmem:[%s10473_s1 + $0x1198] sm:$0xff] }
  0xe6   :  { %4002 = vmatpush1.bf16.msra.mxu0 %v4001_v53  ;;  %v545_v53 = vld [vmem:[%s10473_s1 + $0xfa0] sm:$0xff]  ;;  %v612_v18 = vld [vmem:[%s10473_s1 + $0x11b8] sm:$0xff] }
  0xe7   :  { %4786 = vmatpush1.bf16.msra.mxu1 %v4785_v54  ;;  %4004 = vmatprep.subr.bf16.mxu0 %v4003_v55  ;;  %v543_v54 = vld [vmem:[%s10473_s1 + $0xf90] sm:$0xff]  ;;  %v4807_v55 = vpack.c.bf16 %v548_v48, %v544_v47  ;;  %v4025_v61 = vpack.c.bf16 %v545_v53, %v541_v52  ;;  %v4825_v48 = vpack.c.bf16 %v579_v42, %v575_v40  ;;  %v626_v40 = vld [vmem:[%s10473_s1 + $0x1228] sm:$0xff]  ;;  %v628_v42 = vld [vmem:[%s10473_s1 + $0x1238] sm:$0xff] }
  0xe8   :  { %4788 = vmatprep.subr.bf16.mxu1 %v4787_v59  ;;  %v552_v59 = vld [vmem:[%s10473_s1 + $0xfd8] sm:$0xff]  ;;  %v4809_v62 = vpack.c.bf16 %v547_v56, %v543_v54  ;;  %v583_v52 = vld [vmem:[%s10473_s1 + $0x10d0] sm:$0xff]  ;;  %v4827_v53 = vpack.c.bf16 %v588_v46, %v584_v45  ;;  %v594_v56 = vld [vmem:[%s10473_s1 + $0x1128] sm:$0xff] }
  0xe9   :  { %v587_v54 = vld [vmem:[%s10473_s1 + $0x10f0] sm:$0xff]  ;;  %v621_v46 = vld [vmem:[%s10473_s1 + $0x1200] sm:$0xff] }
  0xea   :  { %4006 = vmatpush1.bf16.msra.mxu0 %v4005_v1  ;;  %v553_v1 = vld [vmem:[%s10473_s1 + $0xfe0] sm:$0xff] }
  0xeb   :  { %4790 = vmatpush1.bf16.msra.mxu1 %v4789_v2  ;;  %4008 = vmatprep.subr.bf16.mxu0 %v4007_v3  ;;  %v551_v2 = vld [vmem:[%s10473_s1 + $0xfd0] sm:$0xff]  ;;  %v4811_v3 = vpack.c.bf16 %v556_v60, %v552_v59  ;;  %v4029_v9 = vpack.c.bf16 %v553_v1, %v549_v0  ;;  %v4829_v60 = vpack.c.bf16 %v587_v54, %v583_v52  ;;  %v634_v52 = vld [vmem:[%s10473_s1 + $0x1268] sm:$0xff]  ;;  %v636_v54 = vld [vmem:[%s10473_s1 + $0x1278] sm:$0xff] }
  0xec   :  { %4792 = vmatprep.subr.bf16.mxu1 %v4791_v7  ;;  %v560_v7 = vld [vmem:[%s10473_s1 + $0x1018] sm:$0xff]  ;;  %v4813_v10 = vpack.c.bf16 %v555_v4, %v551_v2  ;;  %v591_v0 = vld [vmem:[%s10473_s1 + $0x1110] sm:$0xff]  ;;  %v4831_v1 = vpack.c.bf16 %v596_v58, %v592_v57  ;;  %v602_v4 = vld [vmem:[%s10473_s1 + $0x1168] sm:$0xff] }
  0xed   :  { %v595_v2 = vld [vmem:[%s10473_s1 + $0x1130] sm:$0xff]  ;;  %v629_v58 = vld [vmem:[%s10473_s1 + $0x1240] sm:$0xff] }
  0xee   :  { %4010 = vmatpush1.bf16.msra.mxu0 %v4009_v13  ;;  %v561_v13 = vld [vmem:[%s10473_s1 + $0x1020] sm:$0xff] }
  0xef   :  { %4794 = vmatpush1.bf16.msra.mxu1 %v4793_v14  ;;  %4012 = vmatprep.subr.bf16.mxu0 %v4011_v15  ;;  %v559_v14 = vld [vmem:[%s10473_s1 + $0x1010] sm:$0xff]  ;;  %v4815_v15 = vpack.c.bf16 %v564_v8, %v560_v7  ;;  %v4033_v22 = vpack.c.bf16 %v561_v13, %v557_v12  ;;  %v4833_v8 = vpack.c.bf16 %v595_v2, %v591_v0  ;;  %v642_v0 = vld [vmem:[%s10473_s1 + $0x12a8] sm:$0xff]  ;;  %v644_v2 = vld [vmem:[%s10473_s1 + $0x12b8] sm:$0xff] }
  0xf0   :  { %4796 = vmatprep.subr.bf16.mxu1 %v4795_v19  ;;  %v568_v19 = vld [vmem:[%s10473_s1 + $0x1058] sm:$0xff]  ;;  %v4817_v23 = vpack.c.bf16 %v563_v16, %v559_v14  ;;  %v599_v12 = vld [vmem:[%s10473_s1 + $0x1150] sm:$0xff]  ;;  %v4835_v13 = vpack.c.bf16 %v604_v6, %v600_v5  ;;  %v610_v16 = vld [vmem:[%s10473_s1 + $0x11a8] sm:$0xff] }
  0xf1   :  { %v4819_v28 = vpack.c.bf16 %v572_v20, %v568_v19  ;;  %v603_v14 = vld [vmem:[%s10473_s1 + $0x1170] sm:$0xff]  ;;  %v637_v6 = vld [vmem:[%s10473_s1 + $0x1280] sm:$0xff] }
  0xf2   :  { %4014 = vmatpush1.bf16.msra.mxu0 %v4013_v25  ;;  %v565_v25 = vld [vmem:[%s10473_s1 + $0x1040] sm:$0xff]  ;;  %v4837_v20 = vpack.c.bf16 %v603_v14, %v599_v12  ;;  %v650_v12 = vld [vmem:[%s10473_s1 + $0x12e8] sm:$0xff]  ;;  %v652_v14 = vld [vmem:[%s10473_s1 + $0x12f8] sm:$0xff] }
  0xf3   :  { %4798 = vmatpush1.bf16.msra.mxu1 %v4797_v26  ;;  %4016 = vmatprep.subr.bf16.mxu0 %v4015_v27  ;;  %v569_v26 = vld [vmem:[%s10473_s1 + $0x1060] sm:$0xff]  ;;  %v567_v27 = vld [vmem:[%s10473_s1 + $0x1050] sm:$0xff] }
  0xf4   :  { %4800 = vmatprep.subr.bf16.mxu1 %v4799_v31  ;;  %v578_v31 = vld [vmem:[%s10473_s1 + $0x10a8] sm:$0xff]  ;;  %v4037_v35 = vpack.c.bf16 %v569_v26, %v565_v25  ;;  %v4821_v36 = vpack.c.bf16 %v571_v29, %v567_v27  ;;  %v4839_v25 = vpack.c.bf16 %v612_v18, %v608_v17  ;;  %v611_v26 = vld [vmem:[%s10473_s1 + $0x11b0] sm:$0xff]  ;;  %v616_v29 = vld [vmem:[%s10473_s1 + $0x11d8] sm:$0xff] }
  0xf5   :  { %v614_v27 = vld [vmem:[%s10473_s1 + $0x11c8] sm:$0xff]  ;;  %v645_v18 = vld [vmem:[%s10473_s1 + $0x12c0] sm:$0xff] }
  0xf6   :  { %4018 = vmatpush1.bf16.msra.mxu0 %v4017_v37  ;;  %v4039_v37 = vpack.c.bf16 %v578_v31, %v574_v30  ;;  %v620_v30 = vld [vmem:[%s10473_s1 + $0x11f8] sm:$0xff] }
  0xf7   :  { %4802 = vmatpush1.bf16.msra.mxu1 %v4801_v38  ;;  %4020 = vmatprep.subr.bf16.mxu0 %v4019_v39  ;;  %v573_v38 = vld [vmem:[%s10473_s1 + $0x1080] sm:$0xff] }
  0xf8   :  { %4804 = vmatprep.subr.bf16.mxu1 %v4803_v43  ;;  %v577_v39 = vld [vmem:[%s10473_s1 + $0x10a0] sm:$0xff]  ;;  %v582_v43 = vld [vmem:[%s10473_s1 + $0x10c8] sm:$0xff] }
  0xf9   :  { %v4041_v47 = vpack.c.bf16 %v577_v39, %v573_v38  ;;  %v619_v38 = vld [vmem:[%s10473_s1 + $0x11f0] sm:$0xff]  ;;  %v622_v39 = vld [vmem:[%s10473_s1 + $0x1208] sm:$0xff] }
  0xfa   :  { %4022 = vmatpush1.bf16.msra.mxu0 %v4021_v49  ;;  %v4043_v49 = vpack.c.bf16 %v586_v44, %v582_v43  ;;  %v4063_v45 = vpack.c.bf16 %v626_v40, %v622_v39 }
  0xfb   :  { %4806 = vmatpush1.bf16.msra.mxu1 %v4805_v50  ;;  %4024 = vmatprep.subr.bf16.mxu0 %v4023_v51  ;;  %v581_v50 = vld [vmem:[%s10473_s1 + $0x10c0] sm:$0xff] }
  0xfc   :  { %4808 = vmatprep.subr.bf16.mxu1 %v4807_v55  ;;  %v585_v51 = vld [vmem:[%s10473_s1 + $0x10e0] sm:$0xff]  ;;  %v590_v55 = vld [vmem:[%s10473_s1 + $0x1108] sm:$0xff] }
  0xfd   :  { %v4045_v59 = vpack.c.bf16 %v585_v51, %v581_v50  ;;  %v627_v50 = vld [vmem:[%s10473_s1 + $0x1230] sm:$0xff]  ;;  %v630_v51 = vld [vmem:[%s10473_s1 + $0x1248] sm:$0xff] }
  0xfe   :  { %4026 = vmatpush1.bf16.msra.mxu0 %v4025_v61  ;;  %v4047_v61 = vpack.c.bf16 %v594_v56, %v590_v55  ;;  %v4067_v57 = vpack.c.bf16 %v634_v52, %v630_v51 }
  0xff   :  { %4810 = vmatpush1.bf16.msra.mxu1 %v4809_v62  ;;  %4028 = vmatprep.subr.bf16.mxu0 %v4027_v63  ;;  %v589_v62 = vld [vmem:[%s10473_s1 + $0x1100] sm:$0xff] }
 0x100   :  { %4812 = vmatprep.subr.bf16.mxu1 %v4811_v3  ;;  %v593_v63 = vld [vmem:[%s10473_s1 + $0x1120] sm:$0xff]  ;;  %v598_v3 = vld [vmem:[%s10473_s1 + $0x1148] sm:$0xff] }
 0x101   :  { %v4049_v7 = vpack.c.bf16 %v593_v63, %v589_v62  ;;  %v635_v62 = vld [vmem:[%s10473_s1 + $0x1270] sm:$0xff]  ;;  %v638_v63 = vld [vmem:[%s10473_s1 + $0x1288] sm:$0xff] }
 0x102   :  { %4030 = vmatpush1.bf16.msra.mxu0 %v4029_v9  ;;  %v4051_v9 = vpack.c.bf16 %v602_v4, %v598_v3  ;;  %v4071_v5 = vpack.c.bf16 %v642_v0, %v638_v63 }
 0x103   :  { %4814 = vmatpush1.bf16.msra.mxu1 %v4813_v10  ;;  %4032 = vmatprep.subr.bf16.mxu0 %v4031_v11  ;;  %v597_v10 = vld [vmem:[%s10473_s1 + $0x1140] sm:$0xff] }
 0x104   :  { %4816 = vmatprep.subr.bf16.mxu1 %v4815_v15  ;;  %v601_v11 = vld [vmem:[%s10473_s1 + $0x1160] sm:$0xff]  ;;  %v606_v15 = vld [vmem:[%s10473_s1 + $0x1188] sm:$0xff] }
 0x105   :  { %1917 = vmatmul.mubr.f32.vlgmr.msra.gmra.mrb[0].mxu0 %v26_v21  ;;  %v4053_v19 = vpack.c.bf16 %v601_v11, %v597_v10  ;;  %v643_v10 = vld [vmem:[%s10473_s1 + $0x12b0] sm:$0xff]  ;;  %v646_v11 = vld [vmem:[%s10473_s1 + $0x12c8] sm:$0xff] }
 0x106   :  { %4034 = vmatpush1.bf16.msra.mxu0 %v4033_v22  ;;  %2840 = vmatmul.mubr.f32.vlgmr.msra.gmra.mrb[0].mxu1 %v26_v21  ;;  %v4055_v21 = vpack.c.bf16 %v610_v16, %v606_v15  ;;  %v605_v22 = vld [vmem:[%s10473_s1 + $0x1180] sm:$0xff]  ;;  %v4075_v17 = vpack.c.bf16 %v650_v12, %v646_v11 }
 0x107   :  { %4818 = vmatpush1.bf16.msra.mxu1 %v4817_v23  ;;  %4036 = vmatprep.subr.bf16.mxu0 %v4035_v24  ;;  %v609_v23 = vld [vmem:[%s10473_s1 + $0x11a0] sm:$0xff]  ;;  %v607_v24 = vld [vmem:[%s10473_s1 + $0x1190] sm:$0xff] }
 0x108   :  { %4820 = vmatprep.subr.bf16.mxu1 %v4819_v28  ;;  %1987 = vmatprep.mubr.f32.mxu0 %v29_v34  ;;  %v618_v28 = vld [vmem:[%s10473_s1 + $0x11e8] sm:$0xff]  ;;  %v4057_v31 = vpack.c.bf16 %v609_v23, %v605_v22  ;;  %v4841_v32 = vpack.c.bf16 %v611_v26, %v607_v24  ;;  %v651_v22 = vld [vmem:[%s10473_s1 + $0x12f0] sm:$0xff]  ;;  %v660_v26 = vld [vmem:[%s10473_s1 + $0x1338] sm:$0xff] }
 0x109   :  { %2910 = vmatprep.mubr.f32.mxu1 %v29_v34  ;;  %v4059_v33 = vpack.c.bf16 %v618_v28, %v614_v27  ;;  %v613_v34 = vld [vmem:[%s10473_s1 + $0x11c0] sm:$0xff]  ;;  %v654_v23 = vld [vmem:[%s10473_s1 + $0x1308] sm:$0xff] }
 0x10a   :  { %4038 = vmatpush1.bf16.msra.mxu0 %v4037_v35  ;;  %v617_v35 = vld [vmem:[%s10473_s1 + $0x11e0] sm:$0xff]  ;;  %v658_v24 = vld [vmem:[%s10473_s1 + $0x1328] sm:$0xff] }
 0x10b   :  { %4822 = vmatpush1.bf16.msra.mxu1 %v4821_v36  ;;  %4040 = vmatprep.subr.bf16.mxu0 %v4039_v37  ;;  %v615_v36 = vld [vmem:[%s10473_s1 + $0x11d0] sm:$0xff]  ;;  %v4843_v37 = vpack.c.bf16 %v620_v30, %v616_v29  ;;  %v4061_v43 = vpack.c.bf16 %v617_v35, %v613_v34  ;;  %v4079_v29 = vpack.c.bf16 %v658_v24, %v654_v23  ;;  %v653_v30 = vld [vmem:[%s10473_s1 + $0x1300] sm:$0xff]  ;;  %v662_v35 = vld [vmem:[%s10473_s1 + $0x1348] sm:$0xff] }
 0x10c   :  { %4824 = vmatprep.subr.bf16.mxu1 %v4823_v41  ;;  %v624_v41 = vld [vmem:[%s10473_s1 + $0x1218] sm:$0xff]  ;;  %v4845_v44 = vpack.c.bf16 %v619_v38, %v615_v36  ;;  %v659_v34 = vld [vmem:[%s10473_s1 + $0x1330] sm:$0xff]  ;;  %v666_v36 = vld [vmem:[%s10473_s1 + $0x1368] sm:$0xff] }
 0x10d   :  { %v668_v38 = vld [vmem:[%s10473_s1 + $0x1378] sm:$0xff]  ;;  %v28_v23 = vld [vmem:[%s10474_s0 + $0x40] sm:$0xff] }
 0x10e   :  { %4042 = vmatpush1.bf16.msra.mxu0 %v4041_v47  ;;  %v625_v47 = vld [vmem:[%s10473_s1 + $0x1220] sm:$0xff] }
 0x10f   :  { %4826 = vmatpush1.bf16.msra.mxu1 %v4825_v48  ;;  %4044 = vmatprep.subr.bf16.mxu0 %v4043_v49  ;;  %v623_v48 = vld [vmem:[%s10473_s1 + $0x1210] sm:$0xff]  ;;  %v4847_v49 = vpack.c.bf16 %v628_v42, %v624_v41  ;;  %v4065_v55 = vpack.c.bf16 %v625_v47, %v621_v46  ;;  %v4083_v41 = vpack.c.bf16 %v666_v36, %v662_v35  ;;  %v661_v42 = vld [vmem:[%s10473_s1 + $0x1340] sm:$0xff]  ;;  %v670_v47 = vld [vmem:[%s10473_s1 + $0x1388] sm:$0xff] }
 0x110   :  { %4828 = vmatprep.subr.bf16.mxu1 %v4827_v53  ;;  %v632_v53 = vld [vmem:[%s10473_s1 + $0x1258] sm:$0xff]  ;;  %v4849_v56 = vpack.c.bf16 %v627_v50, %v623_v48  ;;  %v667_v46 = vld [vmem:[%s10473_s1 + $0x1370] sm:$0xff]  ;;  %v674_v48 = vld [vmem:[%s10473_s1 + $0x13a8] sm:$0xff] }
 0x111   :  { %v676_v50 = vld [vmem:[%s10473_s1 + $0x13b8] sm:$0xff] }
 0x112   :  { %4046 = vmatpush1.bf16.msra.mxu0 %v4045_v59  ;;  %v633_v59 = vld [vmem:[%s10473_s1 + $0x1260] sm:$0xff]  ;;  %v708_v35 = vld [vmem:[%s10473_s1 + $0x14b8] sm:$0xff] }
 0x113   :  { %4830 = vmatpush1.bf16.msra.mxu1 %v4829_v60  ;;  %4048 = vmatprep.subr.bf16.mxu0 %v4047_v61  ;;  %v631_v60 = vld [vmem:[%s10473_s1 + $0x1250] sm:$0xff]  ;;  %v4851_v61 = vpack.c.bf16 %v636_v54, %v632_v53  ;;  %v4069_v3 = vpack.c.bf16 %v633_v59, %v629_v58  ;;  %v4087_v53 = vpack.c.bf16 %v674_v48, %v670_v47  ;;  %v669_v54 = vld [vmem:[%s10473_s1 + $0x1380] sm:$0xff]  ;;  %v678_v59 = vld [vmem:[%s10473_s1 + $0x13c8] sm:$0xff] }
 0x114   :  { %4832 = vmatprep.subr.bf16.mxu1 %v4831_v1  ;;  %v640_v1 = vld [vmem:[%s10473_s1 + $0x1298] sm:$0xff]  ;;  %v4853_v4 = vpack.c.bf16 %v635_v62, %v631_v60  ;;  %v675_v58 = vld [vmem:[%s10473_s1 + $0x13b0] sm:$0xff]  ;;  %v682_v60 = vld [vmem:[%s10473_s1 + $0x13e8] sm:$0xff] }
 0x115   :  { %v684_v62 = vld [vmem:[%s10473_s1 + $0x13f8] sm:$0xff] }
 0x116   :  { %4050 = vmatpush1.bf16.msra.mxu0 %v4049_v7  ;;  %v641_v7 = vld [vmem:[%s10473_s1 + $0x12a0] sm:$0xff]  ;;  %v31_v36 = vld [vmem:[%s10474_s0 + $0x58] sm:$0xff] }
 0x117   :  { %4834 = vmatpush1.bf16.msra.mxu1 %v4833_v8  ;;  %4052 = vmatprep.subr.bf16.mxu0 %v4051_v9  ;;  %v639_v8 = vld [vmem:[%s10473_s1 + $0x1290] sm:$0xff]  ;;  %v4855_v9 = vpack.c.bf16 %v644_v2, %v640_v1  ;;  %v4073_v15 = vpack.c.bf16 %v641_v7, %v637_v6  ;;  %v4091_v1 = vpack.c.bf16 %v682_v60, %v678_v59  ;;  %v677_v2 = vld [vmem:[%s10473_s1 + $0x13c0] sm:$0xff]  ;;  %v686_v7 = vld [vmem:[%s10473_s1 + $0x1408] sm:$0xff] }
 0x118   :  { %4836 = vmatprep.subr.bf16.mxu1 %v4835_v13  ;;  %v648_v13 = vld [vmem:[%s10473_s1 + $0x12d8] sm:$0xff]  ;;  %v4857_v16 = vpack.c.bf16 %v643_v10, %v639_v8  ;;  %v683_v6 = vld [vmem:[%s10473_s1 + $0x13f0] sm:$0xff]  ;;  %v690_v8 = vld [vmem:[%s10473_s1 + $0x1428] sm:$0xff] }
 0x119   :  { %v692_v10 = vld [vmem:[%s10473_s1 + $0x1438] sm:$0xff] }
 0x11a   :  { %4054 = vmatpush1.bf16.msra.mxu0 %v4053_v19  ;;  %v649_v19 = vld [vmem:[%s10473_s1 + $0x12e0] sm:$0xff]  ;;  %v712_v47 = vld [vmem:[%s10473_s1 + $0x14d8] sm:$0xff] }
 0x11b   :  { %4838 = vmatpush1.bf16.msra.mxu1 %v4837_v20  ;;  %4056 = vmatprep.subr.bf16.mxu0 %v4055_v21  ;;  %v647_v20 = vld [vmem:[%s10473_s1 + $0x12d0] sm:$0xff]  ;;  %v4859_v21 = vpack.c.bf16 %v652_v14, %v648_v13  ;;  %v4077_v27 = vpack.c.bf16 %v649_v19, %v645_v18  ;;  %v4095_v13 = vpack.c.bf16 %v690_v8, %v686_v7  ;;  %v685_v14 = vld [vmem:[%s10473_s1 + $0x1400] sm:$0xff]  ;;  %v694_v19 = vld [vmem:[%s10473_s1 + $0x1448] sm:$0xff] }
 0x11c   :  { %4840 = vmatprep.subr.bf16.mxu1 %v4839_v25  ;;  %v656_v25 = vld [vmem:[%s10473_s1 + $0x1318] sm:$0xff]  ;;  %v4861_v28 = vpack.c.bf16 %v651_v22, %v647_v20  ;;  %v691_v18 = vld [vmem:[%s10473_s1 + $0x1430] sm:$0xff]  ;;  %v698_v20 = vld [vmem:[%s10473_s1 + $0x1468] sm:$0xff] }
 0x11d   :  { %v700_v22 = vld [vmem:[%s10473_s1 + $0x1478] sm:$0xff] }
 0x11e   :  { %4058 = vmatpush1.bf16.msra.mxu0 %v4057_v31  ;;  %v657_v31 = vld [vmem:[%s10473_s1 + $0x1320] sm:$0xff]  ;;  %v716_v48 = vld [vmem:[%s10473_s1 + $0x14f8] sm:$0xff] }
 0x11f   :  { %4842 = vmatpush1.bf16.msra.mxu1 %v4841_v32  ;;  %4060 = vmatprep.subr.bf16.mxu0 %v4059_v33  ;;  %v655_v32 = vld [vmem:[%s10473_s1 + $0x1310] sm:$0xff]  ;;  %v4863_v33 = vpack.c.bf16 %v660_v26, %v656_v25  ;;  %v4081_v39 = vpack.c.bf16 %v657_v31, %v653_v30  ;;  %v4099_v26 = vpack.c.bf16 %v698_v20, %v694_v19  ;;  %v720_v59 = vld [vmem:[%s10473_s1 + $0x1518] sm:$0xff] }
 0x120   :  { %4844 = vmatprep.subr.bf16.mxu1 %v4843_v37  ;;  %v664_v37 = vld [vmem:[%s10473_s1 + $0x1358] sm:$0xff]  ;;  %v4865_v40 = vpack.c.bf16 %v659_v34, %v655_v32  ;;  %v699_v31 = vld [vmem:[%s10473_s1 + $0x1470] sm:$0xff]  ;;  %v702_v32 = vld [vmem:[%s10473_s1 + $0x1488] sm:$0xff] }
 0x121   :  { %v704_v34 = vld [vmem:[%s10473_s1 + $0x1498] sm:$0xff] }
 0x122   :  { %4062 = vmatpush1.bf16.msra.mxu0 %v4061_v43  ;;  %v665_v43 = vld [vmem:[%s10473_s1 + $0x1360] sm:$0xff]  ;;  %v724_v60 = vld [vmem:[%s10473_s1 + $0x1538] sm:$0xff] }
 0x123   :  { %4846 = vmatpush1.bf16.msra.mxu1 %v4845_v44  ;;  %4064 = vmatprep.subr.bf16.mxu0 %v4063_v45  ;;  %v663_v44 = vld [vmem:[%s10473_s1 + $0x1350] sm:$0xff]  ;;  %v4867_v45 = vpack.c.bf16 %v668_v38, %v664_v37  ;;  %v4085_v51 = vpack.c.bf16 %v665_v43, %v661_v42  ;;  %v4887_v43 = vpack.c.bf16 %v708_v35, %v704_v34  ;;  %v728_v7 = vld [vmem:[%s10473_s1 + $0x1558] sm:$0xff] }
 0x124   :  { %4848 = vmatprep.subr.bf16.mxu1 %v4847_v49  ;;  %v672_v49 = vld [vmem:[%s10473_s1 + $0x1398] sm:$0xff]  ;;  %v4869_v52 = vpack.c.bf16 %v667_v46, %v663_v44  ;;  %v703_v42 = vld [vmem:[%s10473_s1 + $0x1490] sm:$0xff]  ;;  %v714_v46 = vld [vmem:[%s10473_s1 + $0x14e8] sm:$0xff] }
 0x125   :  { %v707_v44 = vld [vmem:[%s10473_s1 + $0x14b0] sm:$0xff]  ;;  %v732_v8 = vld [vmem:[%s10473_s1 + $0x1578] sm:$0xff] }
 0x126   :  { %4066 = vmatpush1.bf16.msra.mxu0 %v4065_v55  ;;  %v673_v55 = vld [vmem:[%s10473_s1 + $0x13a0] sm:$0xff]  ;;  %v736_v19 = vld [vmem:[%s10473_s1 + $0x1598] sm:$0xff] }
 0x127   :  { %4850 = vmatpush1.bf16.msra.mxu1 %v4849_v56  ;;  %4068 = vmatprep.subr.bf16.mxu0 %v4067_v57  ;;  %v671_v56 = vld [vmem:[%s10473_s1 + $0x1390] sm:$0xff]  ;;  %v4871_v57 = vpack.c.bf16 %v676_v50, %v672_v49  ;;  %v4089_v63 = vpack.c.bf16 %v673_v55, %v669_v54  ;;  %v4889_v50 = vpack.c.bf16 %v707_v44, %v703_v42  ;;  %v740_v20 = vld [vmem:[%s10473_s1 + $0x15b8] sm:$0xff]  ;;  %v754_v42 = vld [vmem:[%s10473_s1 + $0x1628] sm:$0xff] }
 0x128   :  { %4852 = vmatprep.subr.bf16.mxu1 %v4851_v61  ;;  %v680_v61 = vld [vmem:[%s10473_s1 + $0x13d8] sm:$0xff]  ;;  %v4873_v0 = vpack.c.bf16 %v675_v58, %v671_v56  ;;  %v711_v54 = vld [vmem:[%s10473_s1 + $0x14d0] sm:$0xff]  ;;  %v4891_v55 = vpack.c.bf16 %v716_v48, %v712_v47  ;;  %v722_v58 = vld [vmem:[%s10473_s1 + $0x1528] sm:$0xff] }
 0x129   :  { %v715_v56 = vld [vmem:[%s10473_s1 + $0x14f0] sm:$0xff]  ;;  %v756_v44 = vld [vmem:[%s10473_s1 + $0x1638] sm:$0xff]  ;;  %v749_v48 = vld [vmem:[%s10473_s1 + $0x1600] sm:$0xff] }
 0x12a   :  { %4070 = vmatpush1.bf16.msra.mxu0 %v4069_v3  ;;  %v681_v3 = vld [vmem:[%s10473_s1 + $0x13e0] sm:$0xff] }
 0x12b   :  { %4854 = vmatpush1.bf16.msra.mxu1 %v4853_v4  ;;  %4072 = vmatprep.subr.bf16.mxu0 %v4071_v5  ;;  %v679_v4 = vld [vmem:[%s10473_s1 + $0x13d0] sm:$0xff]  ;;  %v4875_v5 = vpack.c.bf16 %v684_v62, %v680_v61  ;;  %v4093_v11 = vpack.c.bf16 %v681_v3, %v677_v2  ;;  %v4893_v62 = vpack.c.bf16 %v715_v56, %v711_v54  ;;  %v762_v54 = vld [vmem:[%s10473_s1 + $0x1668] sm:$0xff]  ;;  %v764_v56 = vld [vmem:[%s10473_s1 + $0x1678] sm:$0xff] }
 0x12c   :  { %4856 = vmatprep.subr.bf16.mxu1 %v4855_v9  ;;  %v688_v9 = vld [vmem:[%s10473_s1 + $0x1418] sm:$0xff]  ;;  %v4877_v12 = vpack.c.bf16 %v683_v6, %v679_v4  ;;  %v719_v2 = vld [vmem:[%s10473_s1 + $0x1510] sm:$0xff]  ;;  %v4895_v3 = vpack.c.bf16 %v724_v60, %v720_v59  ;;  %v730_v6 = vld [vmem:[%s10473_s1 + $0x1568] sm:$0xff] }
 0x12d   :  { %v723_v4 = vld [vmem:[%s10473_s1 + $0x1530] sm:$0xff]  ;;  %v757_v60 = vld [vmem:[%s10473_s1 + $0x1640] sm:$0xff] }
 0x12e   :  { %4074 = vmatpush1.bf16.msra.mxu0 %v4073_v15  ;;  %v689_v15 = vld [vmem:[%s10473_s1 + $0x1420] sm:$0xff] }
 0x12f   :  { %4858 = vmatpush1.bf16.msra.mxu1 %v4857_v16  ;;  %4076 = vmatprep.subr.bf16.mxu0 %v4075_v17  ;;  %v687_v16 = vld [vmem:[%s10473_s1 + $0x1410] sm:$0xff]  ;;  %v4879_v17 = vpack.c.bf16 %v692_v10, %v688_v9  ;;  %v4097_v24 = vpack.c.bf16 %v689_v15, %v685_v14  ;;  %v4897_v10 = vpack.c.bf16 %v723_v4, %v719_v2  ;;  %v770_v2 = vld [vmem:[%s10473_s1 + $0x16a8] sm:$0xff]  ;;  %v772_v4 = vld [vmem:[%s10473_s1 + $0x16b8] sm:$0xff] }
 0x130   :  { %4860 = vmatprep.subr.bf16.mxu1 %v4859_v21  ;;  %v696_v21 = vld [vmem:[%s10473_s1 + $0x1458] sm:$0xff]  ;;  %v4881_v25 = vpack.c.bf16 %v691_v18, %v687_v16  ;;  %v727_v14 = vld [vmem:[%s10473_s1 + $0x1550] sm:$0xff]  ;;  %v4899_v15 = vpack.c.bf16 %v732_v8, %v728_v7  ;;  %v738_v18 = vld [vmem:[%s10473_s1 + $0x15a8] sm:$0xff] }
 0x131   :  { %v4883_v30 = vpack.c.bf16 %v700_v22, %v696_v21  ;;  %v731_v16 = vld [vmem:[%s10473_s1 + $0x1570] sm:$0xff]  ;;  %v765_v8 = vld [vmem:[%s10473_s1 + $0x1680] sm:$0xff] }
 0x132   :  { %4078 = vmatpush1.bf16.msra.mxu0 %v4077_v27  ;;  %v693_v27 = vld [vmem:[%s10473_s1 + $0x1440] sm:$0xff]  ;;  %v4901_v22 = vpack.c.bf16 %v731_v16, %v727_v14  ;;  %v778_v14 = vld [vmem:[%s10473_s1 + $0x16e8] sm:$0xff]  ;;  %v780_v16 = vld [vmem:[%s10473_s1 + $0x16f8] sm:$0xff] }
 0x133   :  { %4862 = vmatpush1.bf16.msra.mxu1 %v4861_v28  ;;  %4080 = vmatprep.subr.bf16.mxu0 %v4079_v29  ;;  %v697_v28 = vld [vmem:[%s10473_s1 + $0x1460] sm:$0xff]  ;;  %v695_v29 = vld [vmem:[%s10473_s1 + $0x1450] sm:$0xff] }
 0x134   :  { %4864 = vmatprep.subr.bf16.mxu1 %v4863_v33  ;;  %v706_v33 = vld [vmem:[%s10473_s1 + $0x14a8] sm:$0xff]  ;;  %v4101_v37 = vpack.c.bf16 %v697_v28, %v693_v27  ;;  %v4885_v38 = vpack.c.bf16 %v699_v31, %v695_v29  ;;  %v4903_v27 = vpack.c.bf16 %v740_v20, %v736_v19  ;;  %v739_v28 = vld [vmem:[%s10473_s1 + $0x15b0] sm:$0xff]  ;;  %v744_v31 = vld [vmem:[%s10473_s1 + $0x15d8] sm:$0xff] }
 0x135   :  { %v742_v29 = vld [vmem:[%s10473_s1 + $0x15c8] sm:$0xff]  ;;  %v773_v20 = vld [vmem:[%s10473_s1 + $0x16c0] sm:$0xff] }
 0x136   :  { %4082 = vmatpush1.bf16.msra.mxu0 %v4081_v39  ;;  %v4103_v39 = vpack.c.bf16 %v706_v33, %v702_v32  ;;  %v748_v32 = vld [vmem:[%s10473_s1 + $0x15f8] sm:$0xff] }
 0x137   :  { %4866 = vmatpush1.bf16.msra.mxu1 %v4865_v40  ;;  %4084 = vmatprep.subr.bf16.mxu0 %v4083_v41  ;;  %v701_v40 = vld [vmem:[%s10473_s1 + $0x1480] sm:$0xff] }
 0x138   :  { %4868 = vmatprep.subr.bf16.mxu1 %v4867_v45  ;;  %v705_v41 = vld [vmem:[%s10473_s1 + $0x14a0] sm:$0xff]  ;;  %v710_v45 = vld [vmem:[%s10473_s1 + $0x14c8] sm:$0xff] }
 0x139   :  { %v4105_v49 = vpack.c.bf16 %v705_v41, %v701_v40  ;;  %v747_v40 = vld [vmem:[%s10473_s1 + $0x15f0] sm:$0xff]  ;;  %v750_v41 = vld [vmem:[%s10473_s1 + $0x1608] sm:$0xff] }
 0x13a   :  { %4086 = vmatpush1.bf16.msra.mxu0 %v4085_v51  ;;  %v4107_v51 = vpack.c.bf16 %v714_v46, %v710_v45  ;;  %v4127_v47 = vpack.c.bf16 %v754_v42, %v750_v41 }
 0x13b   :  { %4870 = vmatpush1.bf16.msra.mxu1 %v4869_v52  ;;  %4088 = vmatprep.subr.bf16.mxu0 %v4087_v53  ;;  %v709_v52 = vld [vmem:[%s10473_s1 + $0x14c0] sm:$0xff] }
 0x13c   :  { %4872 = vmatprep.subr.bf16.mxu1 %v4871_v57  ;;  %v713_v53 = vld [vmem:[%s10473_s1 + $0x14e0] sm:$0xff]  ;;  %v718_v57 = vld [vmem:[%s10473_s1 + $0x1508] sm:$0xff] }
 0x13d   :  { %v4109_v61 = vpack.c.bf16 %v713_v53, %v709_v52  ;;  %v755_v52 = vld [vmem:[%s10473_s1 + $0x1630] sm:$0xff]  ;;  %v758_v53 = vld [vmem:[%s10473_s1 + $0x1648] sm:$0xff] }
 0x13e   :  { %4090 = vmatpush1.bf16.msra.mxu0 %v4089_v63  ;;  %v4111_v63 = vpack.c.bf16 %v722_v58, %v718_v57  ;;  %v4131_v59 = vpack.c.bf16 %v762_v54, %v758_v53 }
 0x13f   :  { %4874 = vmatpush1.bf16.msra.mxu1 %v4873_v0  ;;  %4092 = vmatprep.subr.bf16.mxu0 %v4091_v1  ;;  %v717_v0 = vld [vmem:[%s10473_s1 + $0x1500] sm:$0xff] }
 0x140   :  { %4876 = vmatprep.subr.bf16.mxu1 %v4875_v5  ;;  %v721_v1 = vld [vmem:[%s10473_s1 + $0x1520] sm:$0xff]  ;;  %v726_v5 = vld [vmem:[%s10473_s1 + $0x1548] sm:$0xff] }
 0x141   :  { %v4113_v9 = vpack.c.bf16 %v721_v1, %v717_v0  ;;  %v763_v0 = vld [vmem:[%s10473_s1 + $0x1670] sm:$0xff]  ;;  %v766_v1 = vld [vmem:[%s10473_s1 + $0x1688] sm:$0xff] }
 0x142   :  { %4094 = vmatpush1.bf16.msra.mxu0 %v4093_v11  ;;  %v4115_v11 = vpack.c.bf16 %v730_v6, %v726_v5  ;;  %v4135_v7 = vpack.c.bf16 %v770_v2, %v766_v1 }
 0x143   :  { %4878 = vmatpush1.bf16.msra.mxu1 %v4877_v12  ;;  %4096 = vmatprep.subr.bf16.mxu0 %v4095_v13  ;;  %v725_v12 = vld [vmem:[%s10473_s1 + $0x1540] sm:$0xff] }
 0x144   :  { %4880 = vmatprep.subr.bf16.mxu1 %v4879_v17  ;;  %v729_v13 = vld [vmem:[%s10473_s1 + $0x1560] sm:$0xff]  ;;  %v734_v17 = vld [vmem:[%s10473_s1 + $0x1588] sm:$0xff] }
 0x145   :  { %1988 = vmatmul.mubr.f32.vlgmr.msra.gmra.mrb[0].mxu0 %v28_v23  ;;  %v4117_v21 = vpack.c.bf16 %v729_v13, %v725_v12  ;;  %v771_v12 = vld [vmem:[%s10473_s1 + $0x16b0] sm:$0xff]  ;;  %v774_v13 = vld [vmem:[%s10473_s1 + $0x16c8] sm:$0xff] }
 0x146   :  { %4098 = vmatpush1.bf16.msra.mxu0 %v4097_v24  ;;  %2911 = vmatmul.mubr.f32.vlgmr.msra.gmra.mrb[0].mxu1 %v28_v23  ;;  %v4119_v23 = vpack.c.bf16 %v738_v18, %v734_v17  ;;  %v733_v24 = vld [vmem:[%s10473_s1 + $0x1580] sm:$0xff]  ;;  %v4139_v19 = vpack.c.bf16 %v778_v14, %v774_v13 }
 0x147   :  { %4882 = vmatpush1.bf16.msra.mxu1 %v4881_v25  ;;  %4100 = vmatprep.subr.bf16.mxu0 %v4099_v26  ;;  %v737_v25 = vld [vmem:[%s10473_s1 + $0x15a0] sm:$0xff]  ;;  %v735_v26 = vld [vmem:[%s10473_s1 + $0x1590] sm:$0xff] }
 0x148   :  { %4884 = vmatprep.subr.bf16.mxu1 %v4883_v30  ;;  %2058 = vmatprep.mubr.f32.mxu0 %v31_v36  ;;  %v746_v30 = vld [vmem:[%s10473_s1 + $0x15e8] sm:$0xff]  ;;  %v4121_v33 = vpack.c.bf16 %v737_v25, %v733_v24  ;;  %v4905_v34 = vpack.c.bf16 %v739_v28, %v735_v26  ;;  %v779_v24 = vld [vmem:[%s10473_s1 + $0x16f0] sm:$0xff]  ;;  %v788_v28 = vld [vmem:[%s10473_s1 + $0x1738] sm:$0xff] }
 0x149   :  { %2981 = vmatprep.mubr.f32.mxu1 %v31_v36  ;;  %v4123_v35 = vpack.c.bf16 %v746_v30, %v742_v29  ;;  %v741_v36 = vld [vmem:[%s10473_s1 + $0x15c0] sm:$0xff]  ;;  %v782_v25 = vld [vmem:[%s10473_s1 + $0x1708] sm:$0xff] }
 0x14a   :  { %4102 = vmatpush1.bf16.msra.mxu0 %v4101_v37  ;;  %v745_v37 = vld [vmem:[%s10473_s1 + $0x15e0] sm:$0xff]  ;;  %v786_v26 = vld [vmem:[%s10473_s1 + $0x1728] sm:$0xff] }
 0x14b   :  { %4886 = vmatpush1.bf16.msra.mxu1 %v4885_v38  ;;  %4104 = vmatprep.subr.bf16.mxu0 %v4103_v39  ;;  %v743_v38 = vld [vmem:[%s10473_s1 + $0x15d0] sm:$0xff]  ;;  %v4907_v39 = vpack.c.bf16 %v748_v32, %v744_v31  ;;  %v4125_v45 = vpack.c.bf16 %v745_v37, %v741_v36  ;;  %v4143_v31 = vpack.c.bf16 %v786_v26, %v782_v25  ;;  %v781_v32 = vld [vmem:[%s10473_s1 + $0x1700] sm:$0xff]  ;;  %v790_v37 = vld [vmem:[%s10473_s1 + $0x1748] sm:$0xff] }
 0x14c   :  { %4888 = vmatprep.subr.bf16.mxu1 %v4887_v43  ;;  %v752_v43 = vld [vmem:[%s10473_s1 + $0x1618] sm:$0xff]  ;;  %v4909_v46 = vpack.c.bf16 %v747_v40, %v743_v38  ;;  %v787_v36 = vld [vmem:[%s10473_s1 + $0x1730] sm:$0xff]  ;;  %v794_v38 = vld [vmem:[%s10473_s1 + $0x1768] sm:$0xff] }
 0x14d   :  { %v796_v40 = vld [vmem:[%s10473_s1 + $0x1778] sm:$0xff]  ;;  %v30_v25 = vld [vmem:[%s10474_s0 + $0x50] sm:$0xff] }
 0x14e   :  { %4106 = vmatpush1.bf16.msra.mxu0 %v4105_v49  ;;  %v753_v49 = vld [vmem:[%s10473_s1 + $0x1620] sm:$0xff] }
 0x14f   :  { %4890 = vmatpush1.bf16.msra.mxu1 %v4889_v50  ;;  %4108 = vmatprep.subr.bf16.mxu0 %v4107_v51  ;;  %v751_v50 = vld [vmem:[%s10473_s1 + $0x1610] sm:$0xff]  ;;  %v4911_v51 = vpack.c.bf16 %v756_v44, %v752_v43  ;;  %v4129_v57 = vpack.c.bf16 %v753_v49, %v749_v48  ;;  %v4147_v43 = vpack.c.bf16 %v794_v38, %v790_v37  ;;  %v789_v44 = vld [vmem:[%s10473_s1 + $0x1740] sm:$0xff]  ;;  %v798_v49 = vld [vmem:[%s10473_s1 + $0x1788] sm:$0xff] }
 0x150   :  { %4892 = vmatprep.subr.bf16.mxu1 %v4891_v55  ;;  %v760_v55 = vld [vmem:[%s10473_s1 + $0x1658] sm:$0xff]  ;;  %v4913_v58 = vpack.c.bf16 %v755_v52, %v751_v50  ;;  %v795_v48 = vld [vmem:[%s10473_s1 + $0x1770] sm:$0xff]  ;;  %v802_v50 = vld [vmem:[%s10473_s1 + $0x17a8] sm:$0xff] }
 0x151   :  { %v804_v52 = vld [vmem:[%s10473_s1 + $0x17b8] sm:$0xff]  ;;  %v33_v38 = vld [vmem:[%s10474_s0 + $0x68] sm:$0xff] }
 0x152   :  { %4110 = vmatpush1.bf16.msra.mxu0 %v4109_v61  ;;  %v761_v61 = vld [vmem:[%s10473_s1 + $0x1660] sm:$0xff]  ;;  %v836_v37 = vld [vmem:[%s10473_s1 + $0x18b8] sm:$0xff] }
 0x153   :  { %4894 = vmatpush1.bf16.msra.mxu1 %v4893_v62  ;;  %4112 = vmatprep.subr.bf16.mxu0 %v4111_v63  ;;  %v759_v62 = vld [vmem:[%s10473_s1 + $0x1650] sm:$0xff]  ;;  %v4915_v63 = vpack.c.bf16 %v764_v56, %v760_v55  ;;  %v4133_v5 = vpack.c.bf16 %v761_v61, %v757_v60  ;;  %v4151_v55 = vpack.c.bf16 %v802_v50, %v798_v49  ;;  %v797_v56 = vld [vmem:[%s10473_s1 + $0x1780] sm:$0xff]  ;;  %v806_v61 = vld [vmem:[%s10473_s1 + $0x17c8] sm:$0xff] }
 0x154   :  { %4896 = vmatprep.subr.bf16.mxu1 %v4895_v3  ;;  %v768_v3 = vld [vmem:[%s10473_s1 + $0x1698] sm:$0xff]  ;;  %v4917_v6 = vpack.c.bf16 %v763_v0, %v759_v62  ;;  %v803_v60 = vld [vmem:[%s10473_s1 + $0x17b0] sm:$0xff]  ;;  %v810_v62 = vld [vmem:[%s10473_s1 + $0x17e8] sm:$0xff] }
 0x155   :  { %v812_v0 = vld [vmem:[%s10473_s1 + $0x17f8] sm:$0xff] }
 0x156   :  { %4114 = vmatpush1.bf16.msra.mxu0 %v4113_v9  ;;  %v769_v9 = vld [vmem:[%s10473_s1 + $0x16a0] sm:$0xff]  ;;  %v840_v49 = vld [vmem:[%s10473_s1 + $0x18d8] sm:$0xff] }
 0x157   :  { %4898 = vmatpush1.bf16.msra.mxu1 %v4897_v10  ;;  %4116 = vmatprep.subr.bf16.mxu0 %v4115_v11  ;;  %v767_v10 = vld [vmem:[%s10473_s1 + $0x1690] sm:$0xff]  ;;  %v4919_v11 = vpack.c.bf16 %v772_v4, %v768_v3  ;;  %v4137_v17 = vpack.c.bf16 %v769_v9, %v765_v8  ;;  %v4155_v3 = vpack.c.bf16 %v810_v62, %v806_v61  ;;  %v805_v4 = vld [vmem:[%s10473_s1 + $0x17c0] sm:$0xff]  ;;  %v814_v9 = vld [vmem:[%s10473_s1 + $0x1808] sm:$0xff] }
 0x158   :  { %4900 = vmatprep.subr.bf16.mxu1 %v4899_v15  ;;  %v776_v15 = vld [vmem:[%s10473_s1 + $0x16d8] sm:$0xff]  ;;  %v4921_v18 = vpack.c.bf16 %v771_v12, %v767_v10  ;;  %v811_v8 = vld [vmem:[%s10473_s1 + $0x17f0] sm:$0xff]  ;;  %v818_v10 = vld [vmem:[%s10473_s1 + $0x1828] sm:$0xff] }
 0x159   :  { %v820_v12 = vld [vmem:[%s10473_s1 + $0x1838] sm:$0xff] }
 0x15a   :  { %4118 = vmatpush1.bf16.msra.mxu0 %v4117_v21  ;;  %v777_v21 = vld [vmem:[%s10473_s1 + $0x16e0] sm:$0xff]  ;;  %v844_v50 = vld [vmem:[%s10473_s1 + $0x18f8] sm:$0xff] }
 0x15b   :  { %4902 = vmatpush1.bf16.msra.mxu1 %v4901_v22  ;;  %4120 = vmatprep.subr.bf16.mxu0 %v4119_v23  ;;  %v775_v22 = vld [vmem:[%s10473_s1 + $0x16d0] sm:$0xff]  ;;  %v4923_v23 = vpack.c.bf16 %v780_v16, %v776_v15  ;;  %v4141_v29 = vpack.c.bf16 %v777_v21, %v773_v20  ;;  %v4159_v15 = vpack.c.bf16 %v818_v10, %v814_v9  ;;  %v813_v16 = vld [vmem:[%s10473_s1 + $0x1800] sm:$0xff]  ;;  %v822_v21 = vld [vmem:[%s10473_s1 + $0x1848] sm:$0xff] }
 0x15c   :  { %4904 = vmatprep.subr.bf16.mxu1 %v4903_v27  ;;  %v784_v27 = vld [vmem:[%s10473_s1 + $0x1718] sm:$0xff]  ;;  %v4925_v30 = vpack.c.bf16 %v779_v24, %v775_v22  ;;  %v819_v20 = vld [vmem:[%s10473_s1 + $0x1830] sm:$0xff]  ;;  %v826_v22 = vld [vmem:[%s10473_s1 + $0x1868] sm:$0xff] }
 0x15d   :  { %v828_v24 = vld [vmem:[%s10473_s1 + $0x1878] sm:$0xff] }
 0x15e   :  { %4122 = vmatpush1.bf16.msra.mxu0 %v4121_v33  ;;  %v785_v33 = vld [vmem:[%s10473_s1 + $0x1720] sm:$0xff]  ;;  %v848_v61 = vld [vmem:[%s10473_s1 + $0x1918] sm:$0xff] }
 0x15f   :  { %4906 = vmatpush1.bf16.msra.mxu1 %v4905_v34  ;;  %4124 = vmatprep.subr.bf16.mxu0 %v4123_v35  ;;  %v783_v34 = vld [vmem:[%s10473_s1 + $0x1710] sm:$0xff]  ;;  %v4927_v35 = vpack.c.bf16 %v788_v28, %v784_v27  ;;  %v4145_v41 = vpack.c.bf16 %v785_v33, %v781_v32  ;;  %v4163_v28 = vpack.c.bf16 %v826_v22, %v822_v21  ;;  %v852_v62 = vld [vmem:[%s10473_s1 + $0x1938] sm:$0xff] }
 0x160   :  { %4908 = vmatprep.subr.bf16.mxu1 %v4907_v39  ;;  %v792_v39 = vld [vmem:[%s10473_s1 + $0x1758] sm:$0xff]  ;;  %v4929_v42 = vpack.c.bf16 %v787_v36, %v783_v34  ;;  %v827_v33 = vld [vmem:[%s10473_s1 + $0x1870] sm:$0xff]  ;;  %v830_v34 = vld [vmem:[%s10473_s1 + $0x1888] sm:$0xff] }
 0x161   :  { %v832_v36 = vld [vmem:[%s10473_s1 + $0x1898] sm:$0xff] }
 0x162   :  { %4126 = vmatpush1.bf16.msra.mxu0 %v4125_v45  ;;  %v793_v45 = vld [vmem:[%s10473_s1 + $0x1760] sm:$0xff]  ;;  %v856_v9 = vld [vmem:[%s10473_s1 + $0x1958] sm:$0xff] }
 0x163   :  { %4910 = vmatpush1.bf16.msra.mxu1 %v4909_v46  ;;  %4128 = vmatprep.subr.bf16.mxu0 %v4127_v47  ;;  %v791_v46 = vld [vmem:[%s10473_s1 + $0x1750] sm:$0xff]  ;;  %v4931_v47 = vpack.c.bf16 %v796_v40, %v792_v39  ;;  %v4149_v53 = vpack.c.bf16 %v793_v45, %v789_v44  ;;  %v4951_v45 = vpack.c.bf16 %v836_v37, %v832_v36  ;;  %v860_v10 = vld [vmem:[%s10473_s1 + $0x1978] sm:$0xff] }
 0x164   :  { %4912 = vmatprep.subr.bf16.mxu1 %v4911_v51  ;;  %v800_v51 = vld [vmem:[%s10473_s1 + $0x1798] sm:$0xff]  ;;  %v4933_v54 = vpack.c.bf16 %v795_v48, %v791_v46  ;;  %v831_v44 = vld [vmem:[%s10473_s1 + $0x1890] sm:$0xff]  ;;  %v842_v48 = vld [vmem:[%s10473_s1 + $0x18e8] sm:$0xff] }
 0x165   :  { %v835_v46 = vld [vmem:[%s10473_s1 + $0x18b0] sm:$0xff]  ;;  %v864_v21 = vld [vmem:[%s10473_s1 + $0x1998] sm:$0xff] }
 0x166   :  { %4130 = vmatpush1.bf16.msra.mxu0 %v4129_v57  ;;  %v801_v57 = vld [vmem:[%s10473_s1 + $0x17a0] sm:$0xff]  ;;  %v868_v22 = vld [vmem:[%s10473_s1 + $0x19b8] sm:$0xff] }
 0x167   :  { %4914 = vmatpush1.bf16.msra.mxu1 %v4913_v58  ;;  %4132 = vmatprep.subr.bf16.mxu0 %v4131_v59  ;;  %v799_v58 = vld [vmem:[%s10473_s1 + $0x1790] sm:$0xff]  ;;  %v4935_v59 = vpack.c.bf16 %v804_v52, %v800_v51  ;;  %v4153_v1 = vpack.c.bf16 %v801_v57, %v797_v56  ;;  %v4953_v52 = vpack.c.bf16 %v835_v46, %v831_v44  ;;  %v882_v44 = vld [vmem:[%s10473_s1 + $0x1a28] sm:$0xff]  ;;  %v884_v46 = vld [vmem:[%s10473_s1 + $0x1a38] sm:$0xff] }
 0x168   :  { %4916 = vmatprep.subr.bf16.mxu1 %v4915_v63  ;;  %v808_v63 = vld [vmem:[%s10473_s1 + $0x17d8] sm:$0xff]  ;;  %v4937_v2 = vpack.c.bf16 %v803_v60, %v799_v58  ;;  %v839_v56 = vld [vmem:[%s10473_s1 + $0x18d0] sm:$0xff]  ;;  %v4955_v57 = vpack.c.bf16 %v844_v50, %v840_v49  ;;  %v850_v60 = vld [vmem:[%s10473_s1 + $0x1928] sm:$0xff] }
 0x169   :  { %v843_v58 = vld [vmem:[%s10473_s1 + $0x18f0] sm:$0xff]  ;;  %v877_v50 = vld [vmem:[%s10473_s1 + $0x1a00] sm:$0xff] }
 0x16a   :  { %4134 = vmatpush1.bf16.msra.mxu0 %v4133_v5  ;;  %v809_v5 = vld [vmem:[%s10473_s1 + $0x17e0] sm:$0xff] }
 0x16b   :  { %4918 = vmatpush1.bf16.msra.mxu1 %v4917_v6  ;;  %4136 = vmatprep.subr.bf16.mxu0 %v4135_v7  ;;  %v807_v6 = vld [vmem:[%s10473_s1 + $0x17d0] sm:$0xff]  ;;  %v4939_v7 = vpack.c.bf16 %v812_v0, %v808_v63  ;;  %v4157_v13 = vpack.c.bf16 %v809_v5, %v805_v4  ;;  %v4957_v0 = vpack.c.bf16 %v843_v58, %v839_v56  ;;  %v890_v56 = vld [vmem:[%s10473_s1 + $0x1a68] sm:$0xff]  ;;  %v892_v58 = vld [vmem:[%s10473_s1 + $0x1a78] sm:$0xff] }
 0x16c   :  { %4920 = vmatprep.subr.bf16.mxu1 %v4919_v11  ;;  %v816_v11 = vld [vmem:[%s10473_s1 + $0x1818] sm:$0xff]  ;;  %v4941_v14 = vpack.c.bf16 %v811_v8, %v807_v6  ;;  %v847_v4 = vld [vmem:[%s10473_s1 + $0x1910] sm:$0xff]  ;;  %v4959_v5 = vpack.c.bf16 %v852_v62, %v848_v61  ;;  %v858_v8 = vld [vmem:[%s10473_s1 + $0x1968] sm:$0xff] }
 0x16d   :  { %v851_v6 = vld [vmem:[%s10473_s1 + $0x1930] sm:$0xff]  ;;  %v885_v62 = vld [vmem:[%s10473_s1 + $0x1a40] sm:$0xff] }
 0x16e   :  { %4138 = vmatpush1.bf16.msra.mxu0 %v4137_v17  ;;  %v817_v17 = vld [vmem:[%s10473_s1 + $0x1820] sm:$0xff] }
 0x16f   :  { %4922 = vmatpush1.bf16.msra.mxu1 %v4921_v18  ;;  %4140 = vmatprep.subr.bf16.mxu0 %v4139_v19  ;;  %v815_v18 = vld [vmem:[%s10473_s1 + $0x1810] sm:$0xff]  ;;  %v4943_v19 = vpack.c.bf16 %v820_v12, %v816_v11  ;;  %v4161_v26 = vpack.c.bf16 %v817_v17, %v813_v16  ;;  %v4961_v12 = vpack.c.bf16 %v851_v6, %v847_v4  ;;  %v898_v4 = vld [vmem:[%s10473_s1 + $0x1aa8] sm:$0xff]  ;;  %v900_v6 = vld [vmem:[%s10473_s1 + $0x1ab8] sm:$0xff] }
 0x170   :  { %4924 = vmatprep.subr.bf16.mxu1 %v4923_v23  ;;  %v824_v23 = vld [vmem:[%s10473_s1 + $0x1858] sm:$0xff]  ;;  %v4945_v27 = vpack.c.bf16 %v819_v20, %v815_v18  ;;  %v855_v16 = vld [vmem:[%s10473_s1 + $0x1950] sm:$0xff]  ;;  %v4963_v17 = vpack.c.bf16 %v860_v10, %v856_v9  ;;  %v866_v20 = vld [vmem:[%s10473_s1 + $0x19a8] sm:$0xff] }
 0x171   :  { %v4947_v32 = vpack.c.bf16 %v828_v24, %v824_v23  ;;  %v859_v18 = vld [vmem:[%s10473_s1 + $0x1970] sm:$0xff]  ;;  %v893_v10 = vld [vmem:[%s10473_s1 + $0x1a80] sm:$0xff] }
 0x172   :  { %4142 = vmatpush1.bf16.msra.mxu0 %v4141_v29  ;;  %v821_v29 = vld [vmem:[%s10473_s1 + $0x1840] sm:$0xff]  ;;  %v4965_v24 = vpack.c.bf16 %v859_v18, %v855_v16  ;;  %v906_v16 = vld [vmem:[%s10473_s1 + $0x1ae8] sm:$0xff]  ;;  %v908_v18 = vld [vmem:[%s10473_s1 + $0x1af8] sm:$0xff] }
 0x173   :  { %4926 = vmatpush1.bf16.msra.mxu1 %v4925_v30  ;;  %4144 = vmatprep.subr.bf16.mxu0 %v4143_v31  ;;  %v825_v30 = vld [vmem:[%s10473_s1 + $0x1860] sm:$0xff]  ;;  %v823_v31 = vld [vmem:[%s10473_s1 + $0x1850] sm:$0xff] }
 0x174   :  { %4928 = vmatprep.subr.bf16.mxu1 %v4927_v35  ;;  %v834_v35 = vld [vmem:[%s10473_s1 + $0x18a8] sm:$0xff]  ;;  %v4165_v39 = vpack.c.bf16 %v825_v30, %v821_v29  ;;  %v4949_v40 = vpack.c.bf16 %v827_v33, %v823_v31  ;;  %v4967_v29 = vpack.c.bf16 %v868_v22, %v864_v21  ;;  %v867_v30 = vld [vmem:[%s10473_s1 + $0x19b0] sm:$0xff]  ;;  %v872_v33 = vld [vmem:[%s10473_s1 + $0x19d8] sm:$0xff] }
 0x175   :  { %v870_v31 = vld [vmem:[%s10473_s1 + $0x19c8] sm:$0xff]  ;;  %v901_v22 = vld [vmem:[%s10473_s1 + $0x1ac0] sm:$0xff] }
 0x176   :  { %4146 = vmatpush1.bf16.msra.mxu0 %v4145_v41  ;;  %v4167_v41 = vpack.c.bf16 %v834_v35, %v830_v34  ;;  %v876_v34 = vld [vmem:[%s10473_s1 + $0x19f8] sm:$0xff] }
 0x177   :  { %4930 = vmatpush1.bf16.msra.mxu1 %v4929_v42  ;;  %4148 = vmatprep.subr.bf16.mxu0 %v4147_v43  ;;  %v829_v42 = vld [vmem:[%s10473_s1 + $0x1880] sm:$0xff] }
 0x178   :  { %4932 = vmatprep.subr.bf16.mxu1 %v4931_v47  ;;  %v833_v43 = vld [vmem:[%s10473_s1 + $0x18a0] sm:$0xff]  ;;  %v838_v47 = vld [vmem:[%s10473_s1 + $0x18c8] sm:$0xff] }
 0x179   :  { %v4169_v51 = vpack.c.bf16 %v833_v43, %v829_v42  ;;  %v875_v42 = vld [vmem:[%s10473_s1 + $0x19f0] sm:$0xff]  ;;  %v878_v43 = vld [vmem:[%s10473_s1 + $0x1a08] sm:$0xff] }
 0x17a   :  { %4150 = vmatpush1.bf16.msra.mxu0 %v4149_v53  ;;  %v4171_v53 = vpack.c.bf16 %v842_v48, %v838_v47  ;;  %v4191_v49 = vpack.c.bf16 %v882_v44, %v878_v43 }
 0x17b   :  { %4934 = vmatpush1.bf16.msra.mxu1 %v4933_v54  ;;  %4152 = vmatprep.subr.bf16.mxu0 %v4151_v55  ;;  %v837_v54 = vld [vmem:[%s10473_s1 + $0x18c0] sm:$0xff] }
 0x17c   :  { %4936 = vmatprep.subr.bf16.mxu1 %v4935_v59  ;;  %v841_v55 = vld [vmem:[%s10473_s1 + $0x18e0] sm:$0xff]  ;;  %v846_v59 = vld [vmem:[%s10473_s1 + $0x1908] sm:$0xff] }
 0x17d   :  { %v4173_v63 = vpack.c.bf16 %v841_v55, %v837_v54  ;;  %v883_v54 = vld [vmem:[%s10473_s1 + $0x1a30] sm:$0xff]  ;;  %v886_v55 = vld [vmem:[%s10473_s1 + $0x1a48] sm:$0xff] }
 0x17e   :  { %4154 = vmatpush1.bf16.msra.mxu0 %v4153_v1  ;;  %v4175_v1 = vpack.c.bf16 %v850_v60, %v846_v59  ;;  %v4195_v61 = vpack.c.bf16 %v890_v56, %v886_v55 }
 0x17f   :  { %4938 = vmatpush1.bf16.msra.mxu1 %v4937_v2  ;;  %4156 = vmatprep.subr.bf16.mxu0 %v4155_v3  ;;  %v845_v2 = vld [vmem:[%s10473_s1 + $0x1900] sm:$0xff] }
 0x180   :  { %4940 = vmatprep.subr.bf16.mxu1 %v4939_v7  ;;  %v849_v3 = vld [vmem:[%s10473_s1 + $0x1920] sm:$0xff]  ;;  %v854_v7 = vld [vmem:[%s10473_s1 + $0x1948] sm:$0xff] }
 0x181   :  { %v4177_v11 = vpack.c.bf16 %v849_v3, %v845_v2  ;;  %v891_v2 = vld [vmem:[%s10473_s1 + $0x1a70] sm:$0xff]  ;;  %v894_v3 = vld [vmem:[%s10473_s1 + $0x1a88] sm:$0xff] }
 0x182   :  { %4158 = vmatpush1.bf16.msra.mxu0 %v4157_v13  ;;  %v4179_v13 = vpack.c.bf16 %v858_v8, %v854_v7  ;;  %v4199_v9 = vpack.c.bf16 %v898_v4, %v894_v3 }
 0x183   :  { %4942 = vmatpush1.bf16.msra.mxu1 %v4941_v14  ;;  %4160 = vmatprep.subr.bf16.mxu0 %v4159_v15  ;;  %v853_v14 = vld [vmem:[%s10473_s1 + $0x1940] sm:$0xff] }
 0x184   :  { %4944 = vmatprep.subr.bf16.mxu1 %v4943_v19  ;;  %v857_v15 = vld [vmem:[%s10473_s1 + $0x1960] sm:$0xff]  ;;  %v862_v19 = vld [vmem:[%s10473_s1 + $0x1988] sm:$0xff] }
 0x185   :  { %2059 = vmatmul.mubr.f32.vlgmr.msra.gmra.mrb[0].mxu0 %v30_v25  ;;  %v4181_v23 = vpack.c.bf16 %v857_v15, %v853_v14  ;;  %v899_v14 = vld [vmem:[%s10473_s1 + $0x1ab0] sm:$0xff]  ;;  %v902_v15 = vld [vmem:[%s10473_s1 + $0x1ac8] sm:$0xff] }
 0x186   :  { %4162 = vmatpush1.bf16.msra.mxu0 %v4161_v26  ;;  %2982 = vmatmul.mubr.f32.vlgmr.msra.gmra.mrb[0].mxu1 %v30_v25  ;;  %v4183_v25 = vpack.c.bf16 %v866_v20, %v862_v19  ;;  %v861_v26 = vld [vmem:[%s10473_s1 + $0x1980] sm:$0xff]  ;;  %v4203_v21 = vpack.c.bf16 %v906_v16, %v902_v15 }
 0x187   :  { %4946 = vmatpush1.bf16.msra.mxu1 %v4945_v27  ;;  %4164 = vmatprep.subr.bf16.mxu0 %v4163_v28  ;;  %v865_v27 = vld [vmem:[%s10473_s1 + $0x19a0] sm:$0xff]  ;;  %v863_v28 = vld [vmem:[%s10473_s1 + $0x1990] sm:$0xff] }
 0x188   :  { %4948 = vmatprep.subr.bf16.mxu1 %v4947_v32  ;;  %2129 = vmatprep.mubr.f32.mxu0 %v33_v38  ;;  %v874_v32 = vld [vmem:[%s10473_s1 + $0x19e8] sm:$0xff]  ;;  %v4185_v35 = vpack.c.bf16 %v865_v27, %v861_v26  ;;  %v4969_v36 = vpack.c.bf16 %v867_v30, %v863_v28  ;;  %v907_v26 = vld [vmem:[%s10473_s1 + $0x1af0] sm:$0xff]  ;;  %v916_v30 = vld [vmem:[%s10473_s1 + $0x1b38] sm:$0xff] }
 0x189   :  { %3052 = vmatprep.mubr.f32.mxu1 %v33_v38  ;;  %v4187_v37 = vpack.c.bf16 %v874_v32, %v870_v31  ;;  %v869_v38 = vld [vmem:[%s10473_s1 + $0x19c0] sm:$0xff]  ;;  %v910_v27 = vld [vmem:[%s10473_s1 + $0x1b08] sm:$0xff] }
 0x18a   :  { %4166 = vmatpush1.bf16.msra.mxu0 %v4165_v39  ;;  %v873_v39 = vld [vmem:[%s10473_s1 + $0x19e0] sm:$0xff]  ;;  %v914_v28 = vld [vmem:[%s10473_s1 + $0x1b28] sm:$0xff] }
 0x18b   :  { %4950 = vmatpush1.bf16.msra.mxu1 %v4949_v40  ;;  %4168 = vmatprep.subr.bf16.mxu0 %v4167_v41  ;;  %v871_v40 = vld [vmem:[%s10473_s1 + $0x19d0] sm:$0xff]  ;;  %v4971_v41 = vpack.c.bf16 %v876_v34, %v872_v33  ;;  %v4189_v47 = vpack.c.bf16 %v873_v39, %v869_v38  ;;  %v4207_v33 = vpack.c.bf16 %v914_v28, %v910_v27  ;;  %v909_v34 = vld [vmem:[%s10473_s1 + $0x1b00] sm:$0xff]  ;;  %v918_v39 = vld [vmem:[%s10473_s1 + $0x1b48] sm:$0xff] }
 0x18c   :  { %4952 = vmatprep.subr.bf16.mxu1 %v4951_v45  ;;  %v880_v45 = vld [vmem:[%s10473_s1 + $0x1a18] sm:$0xff]  ;;  %v4973_v48 = vpack.c.bf16 %v875_v42, %v871_v40  ;;  %v915_v38 = vld [vmem:[%s10473_s1 + $0x1b30] sm:$0xff]  ;;  %v922_v40 = vld [vmem:[%s10473_s1 + $0x1b68] sm:$0xff] }
 0x18d   :  { %v924_v42 = vld [vmem:[%s10473_s1 + $0x1b78] sm:$0xff]  ;;  %v32_v27 = vld [vmem:[%s10474_s0 + $0x60] sm:$0xff] }
 0x18e   :  { %4170 = vmatpush1.bf16.msra.mxu0 %v4169_v51  ;;  %v881_v51 = vld [vmem:[%s10473_s1 + $0x1a20] sm:$0xff] }
 0x18f   :  { %4954 = vmatpush1.bf16.msra.mxu1 %v4953_v52  ;;  %4172 = vmatprep.subr.bf16.mxu0 %v4171_v53  ;;  %v879_v52 = vld [vmem:[%s10473_s1 + $0x1a10] sm:$0xff]  ;;  %v4975_v53 = vpack.c.bf16 %v884_v46, %v880_v45  ;;  %v4193_v59 = vpack.c.bf16 %v881_v51, %v877_v50  ;;  %v4211_v45 = vpack.c.bf16 %v922_v40, %v918_v39  ;;  %v917_v46 = vld [vmem:[%s10473_s1 + $0x1b40] sm:$0xff]  ;;  %v926_v51 = vld [vmem:[%s10473_s1 + $0x1b88] sm:$0xff] }
 0x190   :  { %4956 = vmatprep.subr.bf16.mxu1 %v4955_v57  ;;  %v888_v57 = vld [vmem:[%s10473_s1 + $0x1a58] sm:$0xff]  ;;  %v4977_v60 = vpack.c.bf16 %v883_v54, %v879_v52  ;;  %v923_v50 = vld [vmem:[%s10473_s1 + $0x1b70] sm:$0xff]  ;;  %v930_v52 = vld [vmem:[%s10473_s1 + $0x1ba8] sm:$0xff] }
 0x191   :  { %v932_v54 = vld [vmem:[%s10473_s1 + $0x1bb8] sm:$0xff] }
 0x192   :  { %4174 = vmatpush1.bf16.msra.mxu0 %v4173_v63  ;;  %v889_v63 = vld [vmem:[%s10473_s1 + $0x1a60] sm:$0xff]  ;;  %v964_v39 = vld [vmem:[%s10473_s1 + $0x1cb8] sm:$0xff] }
 0x193   :  { %4958 = vmatpush1.bf16.msra.mxu1 %v4957_v0  ;;  %4176 = vmatprep.subr.bf16.mxu0 %v4175_v1  ;;  %v887_v0 = vld [vmem:[%s10473_s1 + $0x1a50] sm:$0xff]  ;;  %v4979_v1 = vpack.c.bf16 %v892_v58, %v888_v57  ;;  %v4197_v7 = vpack.c.bf16 %v889_v63, %v885_v62  ;;  %v4215_v57 = vpack.c.bf16 %v930_v52, %v926_v51  ;;  %v925_v58 = vld [vmem:[%s10473_s1 + $0x1b80] sm:$0xff]  ;;  %v934_v63 = vld [vmem:[%s10473_s1 + $0x1bc8] sm:$0xff] }
 0x194   :  { %4960 = vmatprep.subr.bf16.mxu1 %v4959_v5  ;;  %v896_v5 = vld [vmem:[%s10473_s1 + $0x1a98] sm:$0xff]  ;;  %v4981_v8 = vpack.c.bf16 %v891_v2, %v887_v0  ;;  %v931_v62 = vld [vmem:[%s10473_s1 + $0x1bb0] sm:$0xff]  ;;  %v938_v0 = vld [vmem:[%s10473_s1 + $0x1be8] sm:$0xff] }
 0x195   :  { %v940_v2 = vld [vmem:[%s10473_s1 + $0x1bf8] sm:$0xff] }
 0x196   :  { %4178 = vmatpush1.bf16.msra.mxu0 %v4177_v11  ;;  %v897_v11 = vld [vmem:[%s10473_s1 + $0x1aa0] sm:$0xff]  ;;  %v35_v40 = vld [vmem:[%s10474_s0 + $0x78] sm:$0xff] }
 0x197   :  { %4962 = vmatpush1.bf16.msra.mxu1 %v4961_v12  ;;  %4180 = vmatprep.subr.bf16.mxu0 %v4179_v13  ;;  %v895_v12 = vld [vmem:[%s10473_s1 + $0x1a90] sm:$0xff]  ;;  %v4983_v13 = vpack.c.bf16 %v900_v6, %v896_v5  ;;  %v4201_v19 = vpack.c.bf16 %v897_v11, %v893_v10  ;;  %v4219_v5 = vpack.c.bf16 %v938_v0, %v934_v63  ;;  %v933_v6 = vld [vmem:[%s10473_s1 + $0x1bc0] sm:$0xff]  ;;  %v942_v11 = vld [vmem:[%s10473_s1 + $0x1c08] sm:$0xff] }
 0x198   :  { %4964 = vmatprep.subr.bf16.mxu1 %v4963_v17  ;;  %v904_v17 = vld [vmem:[%s10473_s1 + $0x1ad8] sm:$0xff]  ;;  %v4985_v20 = vpack.c.bf16 %v899_v14, %v895_v12  ;;  %v939_v10 = vld [vmem:[%s10473_s1 + $0x1bf0] sm:$0xff]  ;;  %v946_v12 = vld [vmem:[%s10473_s1 + $0x1c28] sm:$0xff] }
 0x199   :  { %v948_v14 = vld [vmem:[%s10473_s1 + $0x1c38] sm:$0xff] }
 0x19a   :  { %4182 = vmatpush1.bf16.msra.mxu0 %v4181_v23  ;;  %v905_v23 = vld [vmem:[%s10473_s1 + $0x1ae0] sm:$0xff]  ;;  %v968_v51 = vld [vmem:[%s10473_s1 + $0x1cd8] sm:$0xff] }
 0x19b   :  { %4966 = vmatpush1.bf16.msra.mxu1 %v4965_v24  ;;  %4184 = vmatprep.subr.bf16.mxu0 %v4183_v25  ;;  %v903_v24 = vld [vmem:[%s10473_s1 + $0x1ad0] sm:$0xff]  ;;  %v4987_v25 = vpack.c.bf16 %v908_v18, %v904_v17  ;;  %v4205_v31 = vpack.c.bf16 %v905_v23, %v901_v22  ;;  %v4223_v17 = vpack.c.bf16 %v946_v12, %v942_v11  ;;  %v941_v18 = vld [vmem:[%s10473_s1 + $0x1c00] sm:$0xff]  ;;  %v950_v23 = vld [vmem:[%s10473_s1 + $0x1c48] sm:$0xff] }
 0x19c   :  { %4968 = vmatprep.subr.bf16.mxu1 %v4967_v29  ;;  %v912_v29 = vld [vmem:[%s10473_s1 + $0x1b18] sm:$0xff]  ;;  %v4989_v32 = vpack.c.bf16 %v907_v26, %v903_v24  ;;  %v947_v22 = vld [vmem:[%s10473_s1 + $0x1c30] sm:$0xff]  ;;  %v954_v24 = vld [vmem:[%s10473_s1 + $0x1c68] sm:$0xff] }
 0x19d   :  { %v956_v26 = vld [vmem:[%s10473_s1 + $0x1c78] sm:$0xff] }
 0x19e   :  { %4186 = vmatpush1.bf16.msra.mxu0 %v4185_v35  ;;  %v913_v35 = vld [vmem:[%s10473_s1 + $0x1b20] sm:$0xff]  ;;  %v972_v52 = vld [vmem:[%s10473_s1 + $0x1cf8] sm:$0xff] }
 0x19f   :  { %4970 = vmatpush1.bf16.msra.mxu1 %v4969_v36  ;;  %4188 = vmatprep.subr.bf16.mxu0 %v4187_v37  ;;  %v911_v36 = vld [vmem:[%s10473_s1 + $0x1b10] sm:$0xff]  ;;  %v4991_v37 = vpack.c.bf16 %v916_v30, %v912_v29  ;;  %v4209_v43 = vpack.c.bf16 %v913_v35, %v909_v34  ;;  %v4227_v30 = vpack.c.bf16 %v954_v24, %v950_v23  ;;  %v976_v63 = vld [vmem:[%s10473_s1 + $0x1d18] sm:$0xff] }
 0x1a0   :  { %4972 = vmatprep.subr.bf16.mxu1 %v4971_v41  ;;  %v920_v41 = vld [vmem:[%s10473_s1 + $0x1b58] sm:$0xff]  ;;  %v4993_v44 = vpack.c.bf16 %v915_v38, %v911_v36  ;;  %v955_v35 = vld [vmem:[%s10473_s1 + $0x1c70] sm:$0xff]  ;;  %v958_v36 = vld [vmem:[%s10473_s1 + $0x1c88] sm:$0xff] }
 0x1a1   :  { %v960_v38 = vld [vmem:[%s10473_s1 + $0x1c98] sm:$0xff] }
 0x1a2   :  { %4190 = vmatpush1.bf16.msra.mxu0 %v4189_v47  ;;  %v921_v47 = vld [vmem:[%s10473_s1 + $0x1b60] sm:$0xff]  ;;  %v980_v0 = vld [vmem:[%s10473_s1 + $0x1d38] sm:$0xff] }
 0x1a3   :  { %4974 = vmatpush1.bf16.msra.mxu1 %v4973_v48  ;;  %4192 = vmatprep.subr.bf16.mxu0 %v4191_v49  ;;  %v919_v48 = vld [vmem:[%s10473_s1 + $0x1b50] sm:$0xff]  ;;  %v4995_v49 = vpack.c.bf16 %v924_v42, %v920_v41  ;;  %v4213_v55 = vpack.c.bf16 %v921_v47, %v917_v46  ;;  %v5015_v47 = vpack.c.bf16 %v964_v39, %v960_v38  ;;  %v984_v11 = vld [vmem:[%s10473_s1 + $0x1d58] sm:$0xff] }
 0x1a4   :  { %4976 = vmatprep.subr.bf16.mxu1 %v4975_v53  ;;  %v928_v53 = vld [vmem:[%s10473_s1 + $0x1b98] sm:$0xff]  ;;  %v4997_v56 = vpack.c.bf16 %v923_v50, %v919_v48  ;;  %v959_v46 = vld [vmem:[%s10473_s1 + $0x1c90] sm:$0xff]  ;;  %v970_v50 = vld [vmem:[%s10473_s1 + $0x1ce8] sm:$0xff] }
 0x1a5   :  { %v963_v48 = vld [vmem:[%s10473_s1 + $0x1cb0] sm:$0xff]  ;;  %v988_v12 = vld [vmem:[%s10473_s1 + $0x1d78] sm:$0xff] }
 0x1a6   :  { %4194 = vmatpush1.bf16.msra.mxu0 %v4193_v59  ;;  %v929_v59 = vld [vmem:[%s10473_s1 + $0x1ba0] sm:$0xff]  ;;  %v992_v23 = vld [vmem:[%s10473_s1 + $0x1d98] sm:$0xff] }
 0x1a7   :  { %4978 = vmatpush1.bf16.msra.mxu1 %v4977_v60  ;;  %4196 = vmatprep.subr.bf16.mxu0 %v4195_v61  ;;  %v927_v60 = vld [vmem:[%s10473_s1 + $0x1b90] sm:$0xff]  ;;  %v4999_v61 = vpack.c.bf16 %v932_v54, %v928_v53  ;;  %v4217_v3 = vpack.c.bf16 %v929_v59, %v925_v58  ;;  %v5017_v54 = vpack.c.bf16 %v963_v48, %v959_v46  ;;  %v996_v24 = vld [vmem:[%s10473_s1 + $0x1db8] sm:$0xff]  ;;  %v1010_v46 = vld [vmem:[%s10473_s1 + $0x1e28] sm:$0xff] }
 0x1a8   :  { %4980 = vmatprep.subr.bf16.mxu1 %v4979_v1  ;;  %v936_v1 = vld [vmem:[%s10473_s1 + $0x1bd8] sm:$0xff]  ;;  %v5001_v4 = vpack.c.bf16 %v931_v62, %v927_v60  ;;  %v967_v58 = vld [vmem:[%s10473_s1 + $0x1cd0] sm:$0xff]  ;;  %v5019_v59 = vpack.c.bf16 %v972_v52, %v968_v51  ;;  %v978_v62 = vld [vmem:[%s10473_s1 + $0x1d28] sm:$0xff] }
 0x1a9   :  { %v971_v60 = vld [vmem:[%s10473_s1 + $0x1cf0] sm:$0xff]  ;;  %v1012_v48 = vld [vmem:[%s10473_s1 + $0x1e38] sm:$0xff]  ;;  %v1005_v52 = vld [vmem:[%s10473_s1 + $0x1e00] sm:$0xff] }
 0x1aa   :  { %4198 = vmatpush1.bf16.msra.mxu0 %v4197_v7  ;;  %v937_v7 = vld [vmem:[%s10473_s1 + $0x1be0] sm:$0xff] }
 0x1ab   :  { %4982 = vmatpush1.bf16.msra.mxu1 %v4981_v8  ;;  %4200 = vmatprep.subr.bf16.mxu0 %v4199_v9  ;;  %v935_v8 = vld [vmem:[%s10473_s1 + $0x1bd0] sm:$0xff]  ;;  %v5003_v9 = vpack.c.bf16 %v940_v2, %v936_v1  ;;  %v4221_v15 = vpack.c.bf16 %v937_v7, %v933_v6  ;;  %v5021_v2 = vpack.c.bf16 %v971_v60, %v967_v58  ;;  %v1018_v58 = vld [vmem:[%s10473_s1 + $0x1e68] sm:$0xff]  ;;  %v1020_v60 = vld [vmem:[%s10473_s1 + $0x1e78] sm:$0xff] }
 0x1ac   :  { %4984 = vmatprep.subr.bf16.mxu1 %v4983_v13  ;;  %v944_v13 = vld [vmem:[%s10473_s1 + $0x1c18] sm:$0xff]  ;;  %v5005_v16 = vpack.c.bf16 %v939_v10, %v935_v8  ;;  %v975_v6 = vld [vmem:[%s10473_s1 + $0x1d10] sm:$0xff]  ;;  %v5023_v7 = vpack.c.bf16 %v980_v0, %v976_v63  ;;  %v986_v10 = vld [vmem:[%s10473_s1 + $0x1d68] sm:$0xff] }
 0x1ad   :  { %v979_v8 = vld [vmem:[%s10473_s1 + $0x1d30] sm:$0xff]  ;;  %v1013_v0 = vld [vmem:[%s10473_s1 + $0x1e40] sm:$0xff] }
 0x1ae   :  { %4202 = vmatpush1.bf16.msra.mxu0 %v4201_v19  ;;  %v945_v19 = vld [vmem:[%s10473_s1 + $0x1c20] sm:$0xff] }
 0x1af   :  { %4986 = vmatpush1.bf16.msra.mxu1 %v4985_v20  ;;  %4204 = vmatprep.subr.bf16.mxu0 %v4203_v21  ;;  %v943_v20 = vld [vmem:[%s10473_s1 + $0x1c10] sm:$0xff]  ;;  %v5007_v21 = vpack.c.bf16 %v948_v14, %v944_v13  ;;  %v4225_v28 = vpack.c.bf16 %v945_v19, %v941_v18  ;;  %v5025_v14 = vpack.c.bf16 %v979_v8, %v975_v6  ;;  %v1026_v6 = vld [vmem:[%s10473_s1 + $0x1ea8] sm:$0xff]  ;;  %v1028_v8 = vld [vmem:[%s10473_s1 + $0x1eb8] sm:$0xff] }
 0x1b0   :  { %4988 = vmatprep.subr.bf16.mxu1 %v4987_v25  ;;  %v952_v25 = vld [vmem:[%s10473_s1 + $0x1c58] sm:$0xff]  ;;  %v5009_v29 = vpack.c.bf16 %v947_v22, %v943_v20  ;;  %v983_v18 = vld [vmem:[%s10473_s1 + $0x1d50] sm:$0xff]  ;;  %v5027_v19 = vpack.c.bf16 %v988_v12, %v984_v11  ;;  %v994_v22 = vld [vmem:[%s10473_s1 + $0x1da8] sm:$0xff] }
 0x1b1   :  { %v5011_v34 = vpack.c.bf16 %v956_v26, %v952_v25  ;;  %v987_v20 = vld [vmem:[%s10473_s1 + $0x1d70] sm:$0xff]  ;;  %v1021_v12 = vld [vmem:[%s10473_s1 + $0x1e80] sm:$0xff] }
 0x1b2   :  { %4206 = vmatpush1.bf16.msra.mxu0 %v4205_v31  ;;  %v949_v31 = vld [vmem:[%s10473_s1 + $0x1c40] sm:$0xff]  ;;  %v5029_v26 = vpack.c.bf16 %v987_v20, %v983_v18  ;;  %v1034_v18 = vld [vmem:[%s10473_s1 + $0x1ee8] sm:$0xff]  ;;  %v1036_v20 = vld [vmem:[%s10473_s1 + $0x1ef8] sm:$0xff] }
 0x1b3   :  { %4990 = vmatpush1.bf16.msra.mxu1 %v4989_v32  ;;  %4208 = vmatprep.subr.bf16.mxu0 %v4207_v33  ;;  %v953_v32 = vld [vmem:[%s10473_s1 + $0x1c60] sm:$0xff]  ;;  %v951_v33 = vld [vmem:[%s10473_s1 + $0x1c50] sm:$0xff] }
 0x1b4   :  { %4992 = vmatprep.subr.bf16.mxu1 %v4991_v37  ;;  %v962_v37 = vld [vmem:[%s10473_s1 + $0x1ca8] sm:$0xff]  ;;  %v4229_v41 = vpack.c.bf16 %v953_v32, %v949_v31  ;;  %v5013_v42 = vpack.c.bf16 %v955_v35, %v951_v33  ;;  %v5031_v31 = vpack.c.bf16 %v996_v24, %v992_v23  ;;  %v995_v32 = vld [vmem:[%s10473_s1 + $0x1db0] sm:$0xff]  ;;  %v1000_v35 = vld [vmem:[%s10473_s1 + $0x1dd8] sm:$0xff] }
 0x1b5   :  { %v998_v33 = vld [vmem:[%s10473_s1 + $0x1dc8] sm:$0xff]  ;;  %v1029_v24 = vld [vmem:[%s10473_s1 + $0x1ec0] sm:$0xff] }
 0x1b6   :  { %4210 = vmatpush1.bf16.msra.mxu0 %v4209_v43  ;;  %v4231_v43 = vpack.c.bf16 %v962_v37, %v958_v36  ;;  %v1004_v36 = vld [vmem:[%s10473_s1 + $0x1df8] sm:$0xff] }
 0x1b7   :  { %4994 = vmatpush1.bf16.msra.mxu1 %v4993_v44  ;;  %4212 = vmatprep.subr.bf16.mxu0 %v4211_v45  ;;  %v957_v44 = vld [vmem:[%s10473_s1 + $0x1c80] sm:$0xff] }
 0x1b8   :  { %4996 = vmatprep.subr.bf16.mxu1 %v4995_v49  ;;  %v961_v45 = vld [vmem:[%s10473_s1 + $0x1ca0] sm:$0xff]  ;;  %v966_v49 = vld [vmem:[%s10473_s1 + $0x1cc8] sm:$0xff] }
 0x1b9   :  { %v4233_v53 = vpack.c.bf16 %v961_v45, %v957_v44  ;;  %v1003_v44 = vld [vmem:[%s10473_s1 + $0x1df0] sm:$0xff]  ;;  %v1006_v45 = vld [vmem:[%s10473_s1 + $0x1e08] sm:$0xff] }
 0x1ba   :  { %4214 = vmatpush1.bf16.msra.mxu0 %v4213_v55  ;;  %v4235_v55 = vpack.c.bf16 %v970_v50, %v966_v49  ;;  %v4255_v51 = vpack.c.bf16 %v1010_v46, %v1006_v45 }
 0x1bb   :  { %4998 = vmatpush1.bf16.msra.mxu1 %v4997_v56  ;;  %4216 = vmatprep.subr.bf16.mxu0 %v4215_v57  ;;  %v965_v56 = vld [vmem:[%s10473_s1 + $0x1cc0] sm:$0xff] }
 0x1bc   :  { %5000 = vmatprep.subr.bf16.mxu1 %v4999_v61  ;;  %v969_v57 = vld [vmem:[%s10473_s1 + $0x1ce0] sm:$0xff]  ;;  %v974_v61 = vld [vmem:[%s10473_s1 + $0x1d08] sm:$0xff] }
 0x1bd   :  { %v4237_v1 = vpack.c.bf16 %v969_v57, %v965_v56  ;;  %v1011_v56 = vld [vmem:[%s10473_s1 + $0x1e30] sm:$0xff]  ;;  %v1014_v57 = vld [vmem:[%s10473_s1 + $0x1e48] sm:$0xff] }
 0x1be   :  { %4218 = vmatpush1.bf16.msra.mxu0 %v4217_v3  ;;  %v4239_v3 = vpack.c.bf16 %v978_v62, %v974_v61  ;;  %v4259_v63 = vpack.c.bf16 %v1018_v58, %v1014_v57 }
 0x1bf   :  { %5002 = vmatpush1.bf16.msra.mxu1 %v5001_v4  ;;  %4220 = vmatprep.subr.bf16.mxu0 %v4219_v5  ;;  %v973_v4 = vld [vmem:[%s10473_s1 + $0x1d00] sm:$0xff] }
 0x1c0   :  { %5004 = vmatprep.subr.bf16.mxu1 %v5003_v9  ;;  %v977_v5 = vld [vmem:[%s10473_s1 + $0x1d20] sm:$0xff]  ;;  %v982_v9 = vld [vmem:[%s10473_s1 + $0x1d48] sm:$0xff] }
 0x1c1   :  { %v4241_v13 = vpack.c.bf16 %v977_v5, %v973_v4  ;;  %v1019_v4 = vld [vmem:[%s10473_s1 + $0x1e70] sm:$0xff]  ;;  %v1022_v5 = vld [vmem:[%s10473_s1 + $0x1e88] sm:$0xff] }
 0x1c2   :  { %4222 = vmatpush1.bf16.msra.mxu0 %v4221_v15  ;;  %v4243_v15 = vpack.c.bf16 %v986_v10, %v982_v9  ;;  %v4263_v11 = vpack.c.bf16 %v1026_v6, %v1022_v5 }
 0x1c3   :  { %5006 = vmatpush1.bf16.msra.mxu1 %v5005_v16  ;;  %4224 = vmatprep.subr.bf16.mxu0 %v4223_v17  ;;  %v981_v16 = vld [vmem:[%s10473_s1 + $0x1d40] sm:$0xff] }
 0x1c4   :  { %5008 = vmatprep.subr.bf16.mxu1 %v5007_v21  ;;  %v985_v17 = vld [vmem:[%s10473_s1 + $0x1d60] sm:$0xff]  ;;  %v990_v21 = vld [vmem:[%s10473_s1 + $0x1d88] sm:$0xff] }
 0x1c5   :  { %2130 = vmatmul.mubr.f32.vlgmr.msra.gmra.mrb[0].mxu0 %v32_v27  ;;  %v4245_v25 = vpack.c.bf16 %v985_v17, %v981_v16  ;;  %v1027_v16 = vld [vmem:[%s10473_s1 + $0x1eb0] sm:$0xff]  ;;  %v1030_v17 = vld [vmem:[%s10473_s1 + $0x1ec8] sm:$0xff] }
 0x1c6   :  { %4226 = vmatpush1.bf16.msra.mxu0 %v4225_v28  ;;  %3053 = vmatmul.mubr.f32.vlgmr.msra.gmra.mrb[0].mxu1 %v32_v27  ;;  %v4247_v27 = vpack.c.bf16 %v994_v22, %v990_v21  ;;  %v989_v28 = vld [vmem:[%s10473_s1 + $0x1d80] sm:$0xff]  ;;  %v4267_v23 = vpack.c.bf16 %v1034_v18, %v1030_v17 }
 0x1c7   :  { %5010 = vmatpush1.bf16.msra.mxu1 %v5009_v29  ;;  %4228 = vmatprep.subr.bf16.mxu0 %v4227_v30  ;;  %v993_v29 = vld [vmem:[%s10473_s1 + $0x1da0] sm:$0xff]  ;;  %v991_v30 = vld [vmem:[%s10473_s1 + $0x1d90] sm:$0xff] }
 0x1c8   :  { %5012 = vmatprep.subr.bf16.mxu1 %v5011_v34  ;;  %2200 = vmatprep.mubr.f32.mxu0 %v35_v40  ;;  %v1002_v34 = vld [vmem:[%s10473_s1 + $0x1de8] sm:$0xff]  ;;  %v4249_v37 = vpack.c.bf16 %v993_v29, %v989_v28  ;;  %v5033_v38 = vpack.c.bf16 %v995_v32, %v991_v30  ;;  %v1035_v28 = vld [vmem:[%s10473_s1 + $0x1ef0] sm:$0xff]  ;;  %v1044_v32 = vld [vmem:[%s10473_s1 + $0x1f38] sm:$0xff] }
 0x1c9   :  { %3123 = vmatprep.mubr.f32.mxu1 %v35_v40  ;;  %v4251_v39 = vpack.c.bf16 %v1002_v34, %v998_v33  ;;  %v997_v40 = vld [vmem:[%s10473_s1 + $0x1dc0] sm:$0xff]  ;;  %v1038_v29 = vld [vmem:[%s10473_s1 + $0x1f08] sm:$0xff] }
 0x1ca   :  { %4230 = vmatpush1.bf16.msra.mxu0 %v4229_v41  ;;  %v1001_v41 = vld [vmem:[%s10473_s1 + $0x1de0] sm:$0xff]  ;;  %v1042_v30 = vld [vmem:[%s10473_s1 + $0x1f28] sm:$0xff] }
 0x1cb   :  { %5014 = vmatpush1.bf16.msra.mxu1 %v5013_v42  ;;  %4232 = vmatprep.subr.bf16.mxu0 %v4231_v43  ;;  %v999_v42 = vld [vmem:[%s10473_s1 + $0x1dd0] sm:$0xff]  ;;  %v5035_v43 = vpack.c.bf16 %v1004_v36, %v1000_v35  ;;  %v4253_v49 = vpack.c.bf16 %v1001_v41, %v997_v40  ;;  %v4271_v35 = vpack.c.bf16 %v1042_v30, %v1038_v29  ;;  %v1037_v36 = vld [vmem:[%s10473_s1 + $0x1f00] sm:$0xff]  ;;  %v1046_v41 = vld [vmem:[%s10473_s1 + $0x1f48] sm:$0xff] }
 0x1cc   :  { %5016 = vmatprep.subr.bf16.mxu1 %v5015_v47  ;;  %v1008_v47 = vld [vmem:[%s10473_s1 + $0x1e18] sm:$0xff]  ;;  %v5037_v50 = vpack.c.bf16 %v1003_v44, %v999_v42  ;;  %v1043_v40 = vld [vmem:[%s10473_s1 + $0x1f30] sm:$0xff]  ;;  %v1050_v42 = vld [vmem:[%s10473_s1 + $0x1f68] sm:$0xff] }
 0x1cd   :  { %v1052_v44 = vld [vmem:[%s10473_s1 + $0x1f78] sm:$0xff]  ;;  %v34_v29 = vld [vmem:[%s10474_s0 + $0x70] sm:$0xff] }
 0x1ce   :  { %4234 = vmatpush1.bf16.msra.mxu0 %v4233_v53  ;;  %v1009_v53 = vld [vmem:[%s10473_s1 + $0x1e20] sm:$0xff] }
 0x1cf   :  { %5018 = vmatpush1.bf16.msra.mxu1 %v5017_v54  ;;  %4236 = vmatprep.subr.bf16.mxu0 %v4235_v55  ;;  %v1007_v54 = vld [vmem:[%s10473_s1 + $0x1e10] sm:$0xff]  ;;  %v5039_v55 = vpack.c.bf16 %v1012_v48, %v1008_v47  ;;  %v4257_v61 = vpack.c.bf16 %v1009_v53, %v1005_v52  ;;  %v4275_v47 = vpack.c.bf16 %v1050_v42, %v1046_v41  ;;  %v1045_v48 = vld [vmem:[%s10473_s1 + $0x1f40] sm:$0xff]  ;;  %v1054_v53 = vld [vmem:[%s10473_s1 + $0x1f88] sm:$0xff] }
 0x1d0   :  { %5020 = vmatprep.subr.bf16.mxu1 %v5019_v59  ;;  %v1016_v59 = vld [vmem:[%s10473_s1 + $0x1e58] sm:$0xff]  ;;  %v5041_v62 = vpack.c.bf16 %v1011_v56, %v1007_v54  ;;  %v1051_v52 = vld [vmem:[%s10473_s1 + $0x1f70] sm:$0xff]  ;;  %v1058_v54 = vld [vmem:[%s10473_s1 + $0x1fa8] sm:$0xff] }
 0x1d1   :  { %v1060_v56 = vld [vmem:[%s10473_s1 + $0x1fb8] sm:$0xff]  ;;  %v37_v42 = vld [vmem:[%s10474_s0 + $0x88] sm:$0xff] }
 0x1d2   :  { %4238 = vmatpush1.bf16.msra.mxu0 %v4237_v1  ;;  %v1017_v1 = vld [vmem:[%s10473_s1 + $0x1e60] sm:$0xff]  ;;  %v1092_v41 = vld [vmem:[%s10473_s1 + $0x20b8] sm:$0xff] }
 0x1d3   :  { %5022 = vmatpush1.bf16.msra.mxu1 %v5021_v2  ;;  %4240 = vmatprep.subr.bf16.mxu0 %v4239_v3  ;;  %v1015_v2 = vld [vmem:[%s10473_s1 + $0x1e50] sm:$0xff]  ;;  %v5043_v3 = vpack.c.bf16 %v1020_v60, %v1016_v59  ;;  %v4261_v9 = vpack.c.bf16 %v1017_v1, %v1013_v0  ;;  %v4279_v59 = vpack.c.bf16 %v1058_v54, %v1054_v53  ;;  %v1053_v60 = vld [vmem:[%s10473_s1 + $0x1f80] sm:$0xff]  ;;  %v1062_v1 = vld [vmem:[%s10473_s1 + $0x1fc8] sm:$0xff] }
 0x1d4   :  { %5024 = vmatprep.subr.bf16.mxu1 %v5023_v7  ;;  %v1024_v7 = vld [vmem:[%s10473_s1 + $0x1e98] sm:$0xff]  ;;  %v5045_v10 = vpack.c.bf16 %v1019_v4, %v1015_v2  ;;  %v1059_v0 = vld [vmem:[%s10473_s1 + $0x1fb0] sm:$0xff]  ;;  %v1066_v2 = vld [vmem:[%s10473_s1 + $0x1fe8] sm:$0xff] }
 0x1d5   :  { %v1068_v4 = vld [vmem:[%s10473_s1 + $0x1ff8] sm:$0xff] }
 0x1d6   :  { %4242 = vmatpush1.bf16.msra.mxu0 %v4241_v13  ;;  %v1025_v13 = vld [vmem:[%s10473_s1 + $0x1ea0] sm:$0xff]  ;;  %v1096_v53 = vld [vmem:[%s10473_s1 + $0x20d8] sm:$0xff] }
 0x1d7   :  { %5026 = vmatpush1.bf16.msra.mxu1 %v5025_v14  ;;  %4244 = vmatprep.subr.bf16.mxu0 %v4243_v15  ;;  %v1023_v14 = vld [vmem:[%s10473_s1 + $0x1e90] sm:$0xff]  ;;  %v5047_v15 = vpack.c.bf16 %v1028_v8, %v1024_v7  ;;  %v4265_v21 = vpack.c.bf16 %v1025_v13, %v1021_v12  ;;  %v4283_v7 = vpack.c.bf16 %v1066_v2, %v1062_v1  ;;  %v1061_v8 = vld [vmem:[%s10473_s1 + $0x1fc0] sm:$0xff]  ;;  %v1070_v13 = vld [vmem:[%s10473_s1 + $0x2008] sm:$0xff] }
 0x1d8   :  { %5028 = vmatprep.subr.bf16.mxu1 %v5027_v19  ;;  %v1032_v19 = vld [vmem:[%s10473_s1 + $0x1ed8] sm:$0xff]  ;;  %v5049_v22 = vpack.c.bf16 %v1027_v16, %v1023_v14  ;;  %v1067_v12 = vld [vmem:[%s10473_s1 + $0x1ff0] sm:$0xff]  ;;  %v1074_v14 = vld [vmem:[%s10473_s1 + $0x2028] sm:$0xff] }
 0x1d9   :  { %v1076_v16 = vld [vmem:[%s10473_s1 + $0x2038] sm:$0xff] }
 0x1da   :  { %4246 = vmatpush1.bf16.msra.mxu0 %v4245_v25  ;;  %v1033_v25 = vld [vmem:[%s10473_s1 + $0x1ee0] sm:$0xff]  ;;  %v1100_v54 = vld [vmem:[%s10473_s1 + $0x20f8] sm:$0xff] }
 0x1db   :  { %5030 = vmatpush1.bf16.msra.mxu1 %v5029_v26  ;;  %4248 = vmatprep.subr.bf16.mxu0 %v4247_v27  ;;  %v1031_v26 = vld [vmem:[%s10473_s1 + $0x1ed0] sm:$0xff]  ;;  %v5051_v27 = vpack.c.bf16 %v1036_v20, %v1032_v19  ;;  %v4269_v33 = vpack.c.bf16 %v1033_v25, %v1029_v24  ;;  %v4287_v19 = vpack.c.bf16 %v1074_v14, %v1070_v13  ;;  %v1069_v20 = vld [vmem:[%s10473_s1 + $0x2000] sm:$0xff]  ;;  %v1078_v25 = vld [vmem:[%s10473_s1 + $0x2048] sm:$0xff] }
 0x1dc   :  { %5032 = vmatprep.subr.bf16.mxu1 %v5031_v31  ;;  %v1040_v31 = vld [vmem:[%s10473_s1 + $0x1f18] sm:$0xff]  ;;  %v5053_v34 = vpack.c.bf16 %v1035_v28, %v1031_v26  ;;  %v1075_v24 = vld [vmem:[%s10473_s1 + $0x2030] sm:$0xff]  ;;  %v1082_v26 = vld [vmem:[%s10473_s1 + $0x2068] sm:$0xff] }
 0x1dd   :  { %v1084_v28 = vld [vmem:[%s10473_s1 + $0x2078] sm:$0xff] }
 0x1de   :  { %4250 = vmatpush1.bf16.msra.mxu0 %v4249_v37  ;;  %v1041_v37 = vld [vmem:[%s10473_s1 + $0x1f20] sm:$0xff]  ;;  %v1104_v1 = vld [vmem:[%s10473_s1 + $0x2118] sm:$0xff] }
 0x1df   :  { %5034 = vmatpush1.bf16.msra.mxu1 %v5033_v38  ;;  %4252 = vmatprep.subr.bf16.mxu0 %v4251_v39  ;;  %v1039_v38 = vld [vmem:[%s10473_s1 + $0x1f10] sm:$0xff]  ;;  %v5055_v39 = vpack.c.bf16 %v1044_v32, %v1040_v31  ;;  %v4273_v45 = vpack.c.bf16 %v1041_v37, %v1037_v36  ;;  %v4291_v32 = vpack.c.bf16 %v1082_v26, %v1078_v25  ;;  %v1108_v2 = vld [vmem:[%s10473_s1 + $0x2138] sm:$0xff] }
 0x1e0   :  { %5036 = vmatprep.subr.bf16.mxu1 %v5035_v43  ;;  %v1048_v43 = vld [vmem:[%s10473_s1 + $0x1f58] sm:$0xff]  ;;  %v5057_v46 = vpack.c.bf16 %v1043_v40, %v1039_v38  ;;  %v1083_v37 = vld [vmem:[%s10473_s1 + $0x2070] sm:$0xff]  ;;  %v1086_v38 = vld [vmem:[%s10473_s1 + $0x2088] sm:$0xff] }
 0x1e1   :  { %v1088_v40 = vld [vmem:[%s10473_s1 + $0x2098] sm:$0xff] }
 0x1e2   :  { %4254 = vmatpush1.bf16.msra.mxu0 %v4253_v49  ;;  %v1049_v49 = vld [vmem:[%s10473_s1 + $0x1f60] sm:$0xff]  ;;  %v1112_v13 = vld [vmem:[%s10473_s1 + $0x2158] sm:$0xff] }
 0x1e3   :  { %5038 = vmatpush1.bf16.msra.mxu1 %v5037_v50  ;;  %4256 = vmatprep.subr.bf16.mxu0 %v4255_v51  ;;  %v1047_v50 = vld [vmem:[%s10473_s1 + $0x1f50] sm:$0xff]  ;;  %v5059_v51 = vpack.c.bf16 %v1052_v44, %v1048_v43  ;;  %v4277_v57 = vpack.c.bf16 %v1049_v49, %v1045_v48  ;;  %v5079_v49 = vpack.c.bf16 %v1092_v41, %v1088_v40  ;;  %v1116_v14 = vld [vmem:[%s10473_s1 + $0x2178] sm:$0xff] }
 0x1e4   :  { %5040 = vmatprep.subr.bf16.mxu1 %v5039_v55  ;;  %v1056_v55 = vld [vmem:[%s10473_s1 + $0x1f98] sm:$0xff]  ;;  %v5061_v58 = vpack.c.bf16 %v1051_v52, %v1047_v50  ;;  %v1087_v48 = vld [vmem:[%s10473_s1 + $0x2090] sm:$0xff]  ;;  %v1098_v52 = vld [vmem:[%s10473_s1 + $0x20e8] sm:$0xff] }
 0x1e5   :  { %v1091_v50 = vld [vmem:[%s10473_s1 + $0x20b0] sm:$0xff]  ;;  %v1120_v25 = vld [vmem:[%s10473_s1 + $0x2198] sm:$0xff] }
 0x1e6   :  { %4258 = vmatpush1.bf16.msra.mxu0 %v4257_v61  ;;  %v1057_v61 = vld [vmem:[%s10473_s1 + $0x1fa0] sm:$0xff]  ;;  %v1124_v26 = vld [vmem:[%s10473_s1 + $0x21b8] sm:$0xff] }
 0x1e7   :  { %5042 = vmatpush1.bf16.msra.mxu1 %v5041_v62  ;;  %4260 = vmatprep.subr.bf16.mxu0 %v4259_v63  ;;  %v1055_v62 = vld [vmem:[%s10473_s1 + $0x1f90] sm:$0xff]  ;;  %v5063_v63 = vpack.c.bf16 %v1060_v56, %v1056_v55  ;;  %v4281_v5 = vpack.c.bf16 %v1057_v61, %v1053_v60  ;;  %v5081_v56 = vpack.c.bf16 %v1091_v50, %v1087_v48  ;;  %v1138_v48 = vld [vmem:[%s10473_s1 + $0x2228] sm:$0xff]  ;;  %v1140_v50 = vld [vmem:[%s10473_s1 + $0x2238] sm:$0xff] }
 0x1e8   :  { %5044 = vmatprep.subr.bf16.mxu1 %v5043_v3  ;;  %v1064_v3 = vld [vmem:[%s10473_s1 + $0x1fd8] sm:$0xff]  ;;  %v5065_v6 = vpack.c.bf16 %v1059_v0, %v1055_v62  ;;  %v1095_v60 = vld [vmem:[%s10473_s1 + $0x20d0] sm:$0xff]  ;;  %v5083_v61 = vpack.c.bf16 %v1100_v54, %v1096_v53  ;;  %v1106_v0 = vld [vmem:[%s10473_s1 + $0x2128] sm:$0xff] }
 0x1e9   :  { %v1099_v62 = vld [vmem:[%s10473_s1 + $0x20f0] sm:$0xff]  ;;  %v1133_v54 = vld [vmem:[%s10473_s1 + $0x2200] sm:$0xff] }
 0x1ea   :  { %4262 = vmatpush1.bf16.msra.mxu0 %v4261_v9  ;;  %v1065_v9 = vld [vmem:[%s10473_s1 + $0x1fe0] sm:$0xff] }
 0x1eb   :  { %5046 = vmatpush1.bf16.msra.mxu1 %v5045_v10  ;;  %4264 = vmatprep.subr.bf16.mxu0 %v4263_v11  ;;  %v1063_v10 = vld [vmem:[%s10473_s1 + $0x1fd0] sm:$0xff]  ;;  %v5067_v11 = vpack.c.bf16 %v1068_v4, %v1064_v3  ;;  %v4285_v17 = vpack.c.bf16 %v1065_v9, %v1061_v8  ;;  %v5085_v4 = vpack.c.bf16 %v1099_v62, %v1095_v60  ;;  %v1146_v60 = vld [vmem:[%s10473_s1 + $0x2268] sm:$0xff]  ;;  %v1148_v62 = vld [vmem:[%s10473_s1 + $0x2278] sm:$0xff] }
 0x1ec   :  { %5048 = vmatprep.subr.bf16.mxu1 %v5047_v15  ;;  %v1072_v15 = vld [vmem:[%s10473_s1 + $0x2018] sm:$0xff]  ;;  %v5069_v18 = vpack.c.bf16 %v1067_v12, %v1063_v10  ;;  %v1103_v8 = vld [vmem:[%s10473_s1 + $0x2110] sm:$0xff]  ;;  %v5087_v9 = vpack.c.bf16 %v1108_v2, %v1104_v1  ;;  %v1114_v12 = vld [vmem:[%s10473_s1 + $0x2168] sm:$0xff] }
 0x1ed   :  { %v1107_v10 = vld [vmem:[%s10473_s1 + $0x2130] sm:$0xff]  ;;  %v1141_v2 = vld [vmem:[%s10473_s1 + $0x2240] sm:$0xff] }
 0x1ee   :  { %4266 = vmatpush1.bf16.msra.mxu0 %v4265_v21  ;;  %v1073_v21 = vld [vmem:[%s10473_s1 + $0x2020] sm:$0xff] }
 0x1ef   :  { %5050 = vmatpush1.bf16.msra.mxu1 %v5049_v22  ;;  %4268 = vmatprep.subr.bf16.mxu0 %v4267_v23  ;;  %v1071_v22 = vld [vmem:[%s10473_s1 + $0x2010] sm:$0xff]  ;;  %v5071_v23 = vpack.c.bf16 %v1076_v16, %v1072_v15  ;;  %v4289_v30 = vpack.c.bf16 %v1073_v21, %v1069_v20  ;;  %v5089_v16 = vpack.c.bf16 %v1107_v10, %v1103_v8  ;;  %v1154_v8 = vld [vmem:[%s10473_s1 + $0x22a8] sm:$0xff]  ;;  %v1156_v10 = vld [vmem:[%s10473_s1 + $0x22b8] sm:$0xff] }
 0x1f0   :  { %5052 = vmatprep.subr.bf16.mxu1 %v5051_v27  ;;  %v1080_v27 = vld [vmem:[%s10473_s1 + $0x2058] sm:$0xff]  ;;  %v5073_v31 = vpack.c.bf16 %v1075_v24, %v1071_v22  ;;  %v1111_v20 = vld [vmem:[%s10473_s1 + $0x2150] sm:$0xff]  ;;  %v5091_v21 = vpack.c.bf16 %v1116_v14, %v1112_v13  ;;  %v1122_v24 = vld [vmem:[%s10473_s1 + $0x21a8] sm:$0xff] }
 0x1f1   :  { %v5075_v36 = vpack.c.bf16 %v1084_v28, %v1080_v27  ;;  %v1115_v22 = vld [vmem:[%s10473_s1 + $0x2170] sm:$0xff]  ;;  %v1149_v14 = vld [vmem:[%s10473_s1 + $0x2280] sm:$0xff] }
 0x1f2   :  { %4270 = vmatpush1.bf16.msra.mxu0 %v4269_v33  ;;  %v1077_v33 = vld [vmem:[%s10473_s1 + $0x2040] sm:$0xff]  ;;  %v5093_v28 = vpack.c.bf16 %v1115_v22, %v1111_v20  ;;  %v1162_v20 = vld [vmem:[%s10473_s1 + $0x22e8] sm:$0xff]  ;;  %v1164_v22 = vld [vmem:[%s10473_s1 + $0x22f8] sm:$0xff] }
 0x1f3   :  { %5054 = vmatpush1.bf16.msra.mxu1 %v5053_v34  ;;  %4272 = vmatprep.subr.bf16.mxu0 %v4271_v35  ;;  %v1081_v34 = vld [vmem:[%s10473_s1 + $0x2060] sm:$0xff]  ;;  %v1079_v35 = vld [vmem:[%s10473_s1 + $0x2050] sm:$0xff] }
 0x1f4   :  { %5056 = vmatprep.subr.bf16.mxu1 %v5055_v39  ;;  %v1090_v39 = vld [vmem:[%s10473_s1 + $0x20a8] sm:$0xff]  ;;  %v4293_v43 = vpack.c.bf16 %v1081_v34, %v1077_v33  ;;  %v5077_v44 = vpack.c.bf16 %v1083_v37, %v1079_v35  ;;  %v5095_v33 = vpack.c.bf16 %v1124_v26, %v1120_v25  ;;  %v1123_v34 = vld [vmem:[%s10473_s1 + $0x21b0] sm:$0xff]  ;;  %v1128_v37 = vld [vmem:[%s10473_s1 + $0x21d8] sm:$0xff] }
 0x1f5   :  { %v1126_v35 = vld [vmem:[%s10473_s1 + $0x21c8] sm:$0xff]  ;;  %v1157_v26 = vld [vmem:[%s10473_s1 + $0x22c0] sm:$0xff] }
 0x1f6   :  { %4274 = vmatpush1.bf16.msra.mxu0 %v4273_v45  ;;  %v4295_v45 = vpack.c.bf16 %v1090_v39, %v1086_v38  ;;  %v1132_v38 = vld [vmem:[%s10473_s1 + $0x21f8] sm:$0xff] }
 0x1f7   :  { %5058 = vmatpush1.bf16.msra.mxu1 %v5057_v46  ;;  %4276 = vmatprep.subr.bf16.mxu0 %v4275_v47  ;;  %v1085_v46 = vld [vmem:[%s10473_s1 + $0x2080] sm:$0xff] }
 0x1f8   :  { %5060 = vmatprep.subr.bf16.mxu1 %v5059_v51  ;;  %v1089_v47 = vld [vmem:[%s10473_s1 + $0x20a0] sm:$0xff]  ;;  %v1094_v51 = vld [vmem:[%s10473_s1 + $0x20c8] sm:$0xff] }
 0x1f9   :  { %v4297_v55 = vpack.c.bf16 %v1089_v47, %v1085_v46  ;;  %v1131_v46 = vld [vmem:[%s10473_s1 + $0x21f0] sm:$0xff]  ;;  %v1134_v47 = vld [vmem:[%s10473_s1 + $0x2208] sm:$0xff] }
 0x1fa   :  { %4278 = vmatpush1.bf16.msra.mxu0 %v4277_v57  ;;  %v4299_v57 = vpack.c.bf16 %v1098_v52, %v1094_v51  ;;  %v4319_v53 = vpack.c.bf16 %v1138_v48, %v1134_v47 }
 0x1fb   :  { %5062 = vmatpush1.bf16.msra.mxu1 %v5061_v58  ;;  %4280 = vmatprep.subr.bf16.mxu0 %v4279_v59  ;;  %v1093_v58 = vld [vmem:[%s10473_s1 + $0x20c0] sm:$0xff] }
 0x1fc   :  { %5064 = vmatprep.subr.bf16.mxu1 %v5063_v63  ;;  %v1097_v59 = vld [vmem:[%s10473_s1 + $0x20e0] sm:$0xff]  ;;  %v1102_v63 = vld [vmem:[%s10473_s1 + $0x2108] sm:$0xff] }
 0x1fd   :  { %v4301_v3 = vpack.c.bf16 %v1097_v59, %v1093_v58  ;;  %v1139_v58 = vld [vmem:[%s10473_s1 + $0x2230] sm:$0xff]  ;;  %v1142_v59 = vld [vmem:[%s10473_s1 + $0x2248] sm:$0xff] }
 0x1fe   :  { %4282 = vmatpush1.bf16.msra.mxu0 %v4281_v5  ;;  %v4303_v5 = vpack.c.bf16 %v1106_v0, %v1102_v63  ;;  %v4323_v1 = vpack.c.bf16 %v1146_v60, %v1142_v59 }
 0x1ff   :  { %5066 = vmatpush1.bf16.msra.mxu1 %v5065_v6  ;;  %4284 = vmatprep.subr.bf16.mxu0 %v4283_v7  ;;  %v1101_v6 = vld [vmem:[%s10473_s1 + $0x2100] sm:$0xff] }
 0x200   :  { %5068 = vmatprep.subr.bf16.mxu1 %v5067_v11  ;;  %v1105_v7 = vld [vmem:[%s10473_s1 + $0x2120] sm:$0xff]  ;;  %v1110_v11 = vld [vmem:[%s10473_s1 + $0x2148] sm:$0xff] }
 0x201   :  { %v4305_v15 = vpack.c.bf16 %v1105_v7, %v1101_v6  ;;  %v1147_v6 = vld [vmem:[%s10473_s1 + $0x2270] sm:$0xff]  ;;  %v1150_v7 = vld [vmem:[%s10473_s1 + $0x2288] sm:$0xff] }
 0x202   :  { %4286 = vmatpush1.bf16.msra.mxu0 %v4285_v17  ;;  %v4307_v17 = vpack.c.bf16 %v1114_v12, %v1110_v11  ;;  %v4327_v13 = vpack.c.bf16 %v1154_v8, %v1150_v7 }
 0x203   :  { %5070 = vmatpush1.bf16.msra.mxu1 %v5069_v18  ;;  %4288 = vmatprep.subr.bf16.mxu0 %v4287_v19  ;;  %v1109_v18 = vld [vmem:[%s10473_s1 + $0x2140] sm:$0xff] }
 0x204   :  { %5072 = vmatprep.subr.bf16.mxu1 %v5071_v23  ;;  %v1113_v19 = vld [vmem:[%s10473_s1 + $0x2160] sm:$0xff]  ;;  %v1118_v23 = vld [vmem:[%s10473_s1 + $0x2188] sm:$0xff] }
 0x205   :  { %2201 = vmatmul.mubr.f32.vlgmr.msra.gmra.mrb[0].mxu0 %v34_v29  ;;  %v4309_v27 = vpack.c.bf16 %v1113_v19, %v1109_v18  ;;  %v1155_v18 = vld [vmem:[%s10473_s1 + $0x22b0] sm:$0xff]  ;;  %v1158_v19 = vld [vmem:[%s10473_s1 + $0x22c8] sm:$0xff] }
 0x206   :  { %4290 = vmatpush1.bf16.msra.mxu0 %v4289_v30  ;;  %3124 = vmatmul.mubr.f32.vlgmr.msra.gmra.mrb[0].mxu1 %v34_v29  ;;  %v4311_v29 = vpack.c.bf16 %v1122_v24, %v1118_v23  ;;  %v1117_v30 = vld [vmem:[%s10473_s1 + $0x2180] sm:$0xff]  ;;  %v4331_v25 = vpack.c.bf16 %v1162_v20, %v1158_v19 }
 0x207   :  { %5074 = vmatpush1.bf16.msra.mxu1 %v5073_v31  ;;  %4292 = vmatprep.subr.bf16.mxu0 %v4291_v32  ;;  %v1121_v31 = vld [vmem:[%s10473_s1 + $0x21a0] sm:$0xff]  ;;  %v1119_v32 = vld [vmem:[%s10473_s1 + $0x2190] sm:$0xff] }
 0x208   :  { %5076 = vmatprep.subr.bf16.mxu1 %v5075_v36  ;;  %2271 = vmatprep.mubr.f32.mxu0 %v37_v42  ;;  %v1130_v36 = vld [vmem:[%s10473_s1 + $0x21e8] sm:$0xff]  ;;  %v4313_v39 = vpack.c.bf16 %v1121_v31, %v1117_v30  ;;  %v5097_v40 = vpack.c.bf16 %v1123_v34, %v1119_v32  ;;  %v1163_v30 = vld [vmem:[%s10473_s1 + $0x22f0] sm:$0xff]  ;;  %v1172_v34 = vld [vmem:[%s10473_s1 + $0x2338] sm:$0xff] }
 0x209   :  { %3194 = vmatprep.mubr.f32.mxu1 %v37_v42  ;;  %v4315_v41 = vpack.c.bf16 %v1130_v36, %v1126_v35  ;;  %v1125_v42 = vld [vmem:[%s10473_s1 + $0x21c0] sm:$0xff]  ;;  %v1166_v31 = vld [vmem:[%s10473_s1 + $0x2308] sm:$0xff] }
 0x20a   :  { %4294 = vmatpush1.bf16.msra.mxu0 %v4293_v43  ;;  %v1129_v43 = vld [vmem:[%s10473_s1 + $0x21e0] sm:$0xff]  ;;  %v1170_v32 = vld [vmem:[%s10473_s1 + $0x2328] sm:$0xff] }
 0x20b   :  { %5078 = vmatpush1.bf16.msra.mxu1 %v5077_v44  ;;  %4296 = vmatprep.subr.bf16.mxu0 %v4295_v45  ;;  %v1127_v44 = vld [vmem:[%s10473_s1 + $0x21d0] sm:$0xff]  ;;  %v5099_v45 = vpack.c.bf16 %v1132_v38, %v1128_v37  ;;  %v4317_v51 = vpack.c.bf16 %v1129_v43, %v1125_v42  ;;  %v4335_v37 = vpack.c.bf16 %v1170_v32, %v1166_v31  ;;  %v1165_v38 = vld [vmem:[%s10473_s1 + $0x2300] sm:$0xff]  ;;  %v1174_v43 = vld [vmem:[%s10473_s1 + $0x2348] sm:$0xff] }
 0x20c   :  { %5080 = vmatprep.subr.bf16.mxu1 %v5079_v49  ;;  %v1136_v49 = vld [vmem:[%s10473_s1 + $0x2218] sm:$0xff]  ;;  %v5101_v52 = vpack.c.bf16 %v1131_v46, %v1127_v44  ;;  %v1171_v42 = vld [vmem:[%s10473_s1 + $0x2330] sm:$0xff]  ;;  %v1178_v44 = vld [vmem:[%s10473_s1 + $0x2368] sm:$0xff] }
 0x20d   :  { %v1180_v46 = vld [vmem:[%s10473_s1 + $0x2378] sm:$0xff]  ;;  %v36_v31 = vld [vmem:[%s10474_s0 + $0x80] sm:$0xff] }
 0x20e   :  { %4298 = vmatpush1.bf16.msra.mxu0 %v4297_v55  ;;  %v1137_v55 = vld [vmem:[%s10473_s1 + $0x2220] sm:$0xff] }
 0x20f   :  { %5082 = vmatpush1.bf16.msra.mxu1 %v5081_v56  ;;  %4300 = vmatprep.subr.bf16.mxu0 %v4299_v57  ;;  %v1135_v56 = vld [vmem:[%s10473_s1 + $0x2210] sm:$0xff]  ;;  %v5103_v57 = vpack.c.bf16 %v1140_v50, %v1136_v49  ;;  %v4321_v63 = vpack.c.bf16 %v1137_v55, %v1133_v54  ;;  %v4339_v49 = vpack.c.bf16 %v1178_v44, %v1174_v43  ;;  %v1173_v50 = vld [vmem:[%s10473_s1 + $0x2340] sm:$0xff]  ;;  %v1182_v55 = vld [vmem:[%s10473_s1 + $0x2388] sm:$0xff] }
 0x210   :  { %5084 = vmatprep.subr.bf16.mxu1 %v5083_v61  ;;  %v1144_v61 = vld [vmem:[%s10473_s1 + $0x2258] sm:$0xff]  ;;  %v5105_v0 = vpack.c.bf16 %v1139_v58, %v1135_v56  ;;  %v1179_v54 = vld [vmem:[%s10473_s1 + $0x2370] sm:$0xff]  ;;  %v1186_v56 = vld [vmem:[%s10473_s1 + $0x23a8] sm:$0xff] }
 0x211   :  { %v1188_v58 = vld [vmem:[%s10473_s1 + $0x23b8] sm:$0xff] }
 0x212   :  { %4302 = vmatpush1.bf16.msra.mxu0 %v4301_v3  ;;  %v1145_v3 = vld [vmem:[%s10473_s1 + $0x2260] sm:$0xff]  ;;  %v1220_v43 = vld [vmem:[%s10473_s1 + $0x24b8] sm:$0xff] }
 0x213   :  { %5086 = vmatpush1.bf16.msra.mxu1 %v5085_v4  ;;  %4304 = vmatprep.subr.bf16.mxu0 %v4303_v5  ;;  %v1143_v4 = vld [vmem:[%s10473_s1 + $0x2250] sm:$0xff]  ;;  %v5107_v5 = vpack.c.bf16 %v1148_v62, %v1144_v61  ;;  %v4325_v11 = vpack.c.bf16 %v1145_v3, %v1141_v2  ;;  %v4343_v61 = vpack.c.bf16 %v1186_v56, %v1182_v55  ;;  %v1181_v62 = vld [vmem:[%s10473_s1 + $0x2380] sm:$0xff]  ;;  %v1190_v3 = vld [vmem:[%s10473_s1 + $0x23c8] sm:$0xff] }
 0x214   :  { %5088 = vmatprep.subr.bf16.mxu1 %v5087_v9  ;;  %v1152_v9 = vld [vmem:[%s10473_s1 + $0x2298] sm:$0xff]  ;;  %v5109_v12 = vpack.c.bf16 %v1147_v6, %v1143_v4  ;;  %v1187_v2 = vld [vmem:[%s10473_s1 + $0x23b0] sm:$0xff]  ;;  %v1194_v4 = vld [vmem:[%s10473_s1 + $0x23e8] sm:$0xff] }
 0x215   :  { %v1196_v6 = vld [vmem:[%s10473_s1 + $0x23f8] sm:$0xff] }
 0x216   :  { %4306 = vmatpush1.bf16.msra.mxu0 %v4305_v15  ;;  %v1153_v15 = vld [vmem:[%s10473_s1 + $0x22a0] sm:$0xff]  ;;  %v39_v44 = vld [vmem:[%s10474_s0 + $0x98] sm:$0xff] }
 0x217   :  { %5090 = vmatpush1.bf16.msra.mxu1 %v5089_v16  ;;  %4308 = vmatprep.subr.bf16.mxu0 %v4307_v17  ;;  %v1151_v16 = vld [vmem:[%s10473_s1 + $0x2290] sm:$0xff]  ;;  %v5111_v17 = vpack.c.bf16 %v1156_v10, %v1152_v9  ;;  %v4329_v23 = vpack.c.bf16 %v1153_v15, %v1149_v14  ;;  %v4347_v9 = vpack.c.bf16 %v1194_v4, %v1190_v3  ;;  %v1189_v10 = vld [vmem:[%s10473_s1 + $0x23c0] sm:$0xff]  ;;  %v1198_v15 = vld [vmem:[%s10473_s1 + $0x2408] sm:$0xff] }
 0x218   :  { %5092 = vmatprep.subr.bf16.mxu1 %v5091_v21  ;;  %v1160_v21 = vld [vmem:[%s10473_s1 + $0x22d8] sm:$0xff]  ;;  %v5113_v24 = vpack.c.bf16 %v1155_v18, %v1151_v16  ;;  %v1195_v14 = vld [vmem:[%s10473_s1 + $0x23f0] sm:$0xff]  ;;  %v1202_v16 = vld [vmem:[%s10473_s1 + $0x2428] sm:$0xff] }
 0x219   :  { %v1204_v18 = vld [vmem:[%s10473_s1 + $0x2438] sm:$0xff] }
 0x21a   :  { %4310 = vmatpush1.bf16.msra.mxu0 %v4309_v27  ;;  %v1161_v27 = vld [vmem:[%s10473_s1 + $0x22e0] sm:$0xff]  ;;  %v1224_v55 = vld [vmem:[%s10473_s1 + $0x24d8] sm:$0xff] }
 0x21b   :  { %5094 = vmatpush1.bf16.msra.mxu1 %v5093_v28  ;;  %4312 = vmatprep.subr.bf16.mxu0 %v4311_v29  ;;  %v1159_v28 = vld [vmem:[%s10473_s1 + $0x22d0] sm:$0xff]  ;;  %v5115_v29 = vpack.c.bf16 %v1164_v22, %v1160_v21  ;;  %v4333_v35 = vpack.c.bf16 %v1161_v27, %v1157_v26  ;;  %v4351_v21 = vpack.c.bf16 %v1202_v16, %v1198_v15  ;;  %v1197_v22 = vld [vmem:[%s10473_s1 + $0x2400] sm:$0xff]  ;;  %v1206_v27 = vld [vmem:[%s10473_s1 + $0x2448] sm:$0xff] }
 0x21c   :  { %5096 = vmatprep.subr.bf16.mxu1 %v5095_v33  ;;  %v1168_v33 = vld [vmem:[%s10473_s1 + $0x2318] sm:$0xff]  ;;  %v5117_v36 = vpack.c.bf16 %v1163_v30, %v1159_v28  ;;  %v1203_v26 = vld [vmem:[%s10473_s1 + $0x2430] sm:$0xff]  ;;  %v1210_v28 = vld [vmem:[%s10473_s1 + $0x2468] sm:$0xff] }
 0x21d   :  { %v1212_v30 = vld [vmem:[%s10473_s1 + $0x2478] sm:$0xff] }
 0x21e   :  { %4314 = vmatpush1.bf16.msra.mxu0 %v4313_v39  ;;  %v1169_v39 = vld [vmem:[%s10473_s1 + $0x2320] sm:$0xff]  ;;  %v1228_v56 = vld [vmem:[%s10473_s1 + $0x24f8] sm:$0xff] }
 0x21f   :  { %5098 = vmatpush1.bf16.msra.mxu1 %v5097_v40  ;;  %4316 = vmatprep.subr.bf16.mxu0 %v4315_v41  ;;  %v1167_v40 = vld [vmem:[%s10473_s1 + $0x2310] sm:$0xff]  ;;  %v5119_v41 = vpack.c.bf16 %v1172_v34, %v1168_v33  ;;  %v4337_v47 = vpack.c.bf16 %v1169_v39, %v1165_v38  ;;  %v4355_v34 = vpack.c.bf16 %v1210_v28, %v1206_v27  ;;  %v1232_v3 = vld [vmem:[%s10473_s1 + $0x2518] sm:$0xff] }
 0x220   :  { %5100 = vmatprep.subr.bf16.mxu1 %v5099_v45  ;;  %v1176_v45 = vld [vmem:[%s10473_s1 + $0x2358] sm:$0xff]  ;;  %v5121_v48 = vpack.c.bf16 %v1171_v42, %v1167_v40  ;;  %v1211_v39 = vld [vmem:[%s10473_s1 + $0x2470] sm:$0xff]  ;;  %v1214_v40 = vld [vmem:[%s10473_s1 + $0x2488] sm:$0xff] }
 0x221   :  { %v1216_v42 = vld [vmem:[%s10473_s1 + $0x2498] sm:$0xff] }
 0x222   :  { %4318 = vmatpush1.bf16.msra.mxu0 %v4317_v51  ;;  %v1177_v51 = vld [vmem:[%s10473_s1 + $0x2360] sm:$0xff]  ;;  %v1236_v4 = vld [vmem:[%s10473_s1 + $0x2538] sm:$0xff] }
 0x223   :  { %5102 = vmatpush1.bf16.msra.mxu1 %v5101_v52  ;;  %4320 = vmatprep.subr.bf16.mxu0 %v4319_v53  ;;  %v1175_v52 = vld [vmem:[%s10473_s1 + $0x2350] sm:$0xff]  ;;  %v5123_v53 = vpack.c.bf16 %v1180_v46, %v1176_v45  ;;  %v4341_v59 = vpack.c.bf16 %v1177_v51, %v1173_v50  ;;  %v5143_v51 = vpack.c.bf16 %v1220_v43, %v1216_v42  ;;  %v1240_v15 = vld [vmem:[%s10473_s1 + $0x2558] sm:$0xff] }
 0x224   :  { %5104 = vmatprep.subr.bf16.mxu1 %v5103_v57  ;;  %v1184_v57 = vld [vmem:[%s10473_s1 + $0x2398] sm:$0xff]  ;;  %v5125_v60 = vpack.c.bf16 %v1179_v54, %v1175_v52  ;;  %v1215_v50 = vld [vmem:[%s10473_s1 + $0x2490] sm:$0xff]  ;;  %v1226_v54 = vld [vmem:[%s10473_s1 + $0x24e8] sm:$0xff] }
 0x225   :  { %v1219_v52 = vld [vmem:[%s10473_s1 + $0x24b0] sm:$0xff]  ;;  %v1244_v16 = vld [vmem:[%s10473_s1 + $0x2578] sm:$0xff] }
 0x226   :  { %4322 = vmatpush1.bf16.msra.mxu0 %v4321_v63  ;;  %v1185_v63 = vld [vmem:[%s10473_s1 + $0x23a0] sm:$0xff]  ;;  %v1248_v27 = vld [vmem:[%s10473_s1 + $0x2598] sm:$0xff] }
 0x227   :  { %5106 = vmatpush1.bf16.msra.mxu1 %v5105_v0  ;;  %4324 = vmatprep.subr.bf16.mxu0 %v4323_v1  ;;  %v1183_v0 = vld [vmem:[%s10473_s1 + $0x2390] sm:$0xff]  ;;  %v5127_v1 = vpack.c.bf16 %v1188_v58, %v1184_v57  ;;  %v4345_v7 = vpack.c.bf16 %v1185_v63, %v1181_v62  ;;  %v5145_v58 = vpack.c.bf16 %v1219_v52, %v1215_v50  ;;  %v1252_v28 = vld [vmem:[%s10473_s1 + $0x25b8] sm:$0xff]  ;;  %v1266_v50 = vld [vmem:[%s10473_s1 + $0x2628] sm:$0xff] }
 0x228   :  { %5108 = vmatprep.subr.bf16.mxu1 %v5107_v5  ;;  %v1192_v5 = vld [vmem:[%s10473_s1 + $0x23d8] sm:$0xff]  ;;  %v5129_v8 = vpack.c.bf16 %v1187_v2, %v1183_v0  ;;  %v1223_v62 = vld [vmem:[%s10473_s1 + $0x24d0] sm:$0xff]  ;;  %v5147_v63 = vpack.c.bf16 %v1228_v56, %v1224_v55  ;;  %v1234_v2 = vld [vmem:[%s10473_s1 + $0x2528] sm:$0xff] }
 0x229   :  { %v1227_v0 = vld [vmem:[%s10473_s1 + $0x24f0] sm:$0xff]  ;;  %v1268_v52 = vld [vmem:[%s10473_s1 + $0x2638] sm:$0xff]  ;;  %v1261_v56 = vld [vmem:[%s10473_s1 + $0x2600] sm:$0xff] }
 0x22a   :  { %4326 = vmatpush1.bf16.msra.mxu0 %v4325_v11  ;;  %v1193_v11 = vld [vmem:[%s10473_s1 + $0x23e0] sm:$0xff] }
 0x22b   :  { %5110 = vmatpush1.bf16.msra.mxu1 %v5109_v12  ;;  %4328 = vmatprep.subr.bf16.mxu0 %v4327_v13  ;;  %v1191_v12 = vld [vmem:[%s10473_s1 + $0x23d0] sm:$0xff]  ;;  %v5131_v13 = vpack.c.bf16 %v1196_v6, %v1192_v5  ;;  %v4349_v19 = vpack.c.bf16 %v1193_v11, %v1189_v10  ;;  %v5149_v6 = vpack.c.bf16 %v1227_v0, %v1223_v62  ;;  %v1274_v62 = vld [vmem:[%s10473_s1 + $0x2668] sm:$0xff]  ;;  %v1276_v0 = vld [vmem:[%s10473_s1 + $0x2678] sm:$0xff] }
 0x22c   :  { %5112 = vmatprep.subr.bf16.mxu1 %v5111_v17  ;;  %v1200_v17 = vld [vmem:[%s10473_s1 + $0x2418] sm:$0xff]  ;;  %v5133_v20 = vpack.c.bf16 %v1195_v14, %v1191_v12  ;;  %v1231_v10 = vld [vmem:[%s10473_s1 + $0x2510] sm:$0xff]  ;;  %v5151_v11 = vpack.c.bf16 %v1236_v4, %v1232_v3  ;;  %v1242_v14 = vld [vmem:[%s10473_s1 + $0x2568] sm:$0xff] }
 0x22d   :  { %v1235_v12 = vld [vmem:[%s10473_s1 + $0x2530] sm:$0xff]  ;;  %v1269_v4 = vld [vmem:[%s10473_s1 + $0x2640] sm:$0xff] }
 0x22e   :  { %4330 = vmatpush1.bf16.msra.mxu0 %v4329_v23  ;;  %v1201_v23 = vld [vmem:[%s10473_s1 + $0x2420] sm:$0xff] }
 0x22f   :  { %5114 = vmatpush1.bf16.msra.mxu1 %v5113_v24  ;;  %4332 = vmatprep.subr.bf16.mxu0 %v4331_v25  ;;  %v1199_v24 = vld [vmem:[%s10473_s1 + $0x2410] sm:$0xff]  ;;  %v5135_v25 = vpack.c.bf16 %v1204_v18, %v1200_v17  ;;  %v4353_v32 = vpack.c.bf16 %v1201_v23, %v1197_v22  ;;  %v5153_v18 = vpack.c.bf16 %v1235_v12, %v1231_v10  ;;  %v1282_v10 = vld [vmem:[%s10473_s1 + $0x26a8] sm:$0xff]  ;;  %v1284_v12 = vld [vmem:[%s10473_s1 + $0x26b8] sm:$0xff] }
 0x230   :  { %5116 = vmatprep.subr.bf16.mxu1 %v5115_v29  ;;  %v1208_v29 = vld [vmem:[%s10473_s1 + $0x2458] sm:$0xff]  ;;  %v5137_v33 = vpack.c.bf16 %v1203_v26, %v1199_v24  ;;  %v1239_v22 = vld [vmem:[%s10473_s1 + $0x2550] sm:$0xff]  ;;  %v5155_v23 = vpack.c.bf16 %v1244_v16, %v1240_v15  ;;  %v1250_v26 = vld [vmem:[%s10473_s1 + $0x25a8] sm:$0xff] }
 0x231   :  { %v5139_v38 = vpack.c.bf16 %v1212_v30, %v1208_v29  ;;  %v1243_v24 = vld [vmem:[%s10473_s1 + $0x2570] sm:$0xff]  ;;  %v1277_v16 = vld [vmem:[%s10473_s1 + $0x2680] sm:$0xff] }
 0x232   :  { %4334 = vmatpush1.bf16.msra.mxu0 %v4333_v35  ;;  %v1205_v35 = vld [vmem:[%s10473_s1 + $0x2440] sm:$0xff]  ;;  %v5157_v30 = vpack.c.bf16 %v1243_v24, %v1239_v22  ;;  %v1290_v22 = vld [vmem:[%s10473_s1 + $0x26e8] sm:$0xff]  ;;  %v1292_v24 = vld [vmem:[%s10473_s1 + $0x26f8] sm:$0xff] }
 0x233   :  { %5118 = vmatpush1.bf16.msra.mxu1 %v5117_v36  ;;  %4336 = vmatprep.subr.bf16.mxu0 %v4335_v37  ;;  %v1209_v36 = vld [vmem:[%s10473_s1 + $0x2460] sm:$0xff]  ;;  %v1207_v37 = vld [vmem:[%s10473_s1 + $0x2450] sm:$0xff] }
 0x234   :  { %5120 = vmatprep.subr.bf16.mxu1 %v5119_v41  ;;  %v1218_v41 = vld [vmem:[%s10473_s1 + $0x24a8] sm:$0xff]  ;;  %v4357_v45 = vpack.c.bf16 %v1209_v36, %v1205_v35  ;;  %v5141_v46 = vpack.c.bf16 %v1211_v39, %v1207_v37  ;;  %v5159_v35 = vpack.c.bf16 %v1252_v28, %v1248_v27  ;;  %v1251_v36 = vld [vmem:[%s10473_s1 + $0x25b0] sm:$0xff]  ;;  %v1256_v39 = vld [vmem:[%s10473_s1 + $0x25d8] sm:$0xff] }
 0x235   :  { %v1254_v37 = vld [vmem:[%s10473_s1 + $0x25c8] sm:$0xff]  ;;  %v1285_v28 = vld [vmem:[%s10473_s1 + $0x26c0] sm:$0xff] }
 0x236   :  { %4338 = vmatpush1.bf16.msra.mxu0 %v4337_v47  ;;  %v4359_v47 = vpack.c.bf16 %v1218_v41, %v1214_v40  ;;  %v1260_v40 = vld [vmem:[%s10473_s1 + $0x25f8] sm:$0xff] }
 0x237   :  { %5122 = vmatpush1.bf16.msra.mxu1 %v5121_v48  ;;  %4340 = vmatprep.subr.bf16.mxu0 %v4339_v49  ;;  %v1213_v48 = vld [vmem:[%s10473_s1 + $0x2480] sm:$0xff] }
 0x238   :  { %5124 = vmatprep.subr.bf16.mxu1 %v5123_v53  ;;  %v1217_v49 = vld [vmem:[%s10473_s1 + $0x24a0] sm:$0xff]  ;;  %v1222_v53 = vld [vmem:[%s10473_s1 + $0x24c8] sm:$0xff] }
 0x239   :  { %v4361_v57 = vpack.c.bf16 %v1217_v49, %v1213_v48  ;;  %v1259_v48 = vld [vmem:[%s10473_s1 + $0x25f0] sm:$0xff]  ;;  %v1262_v49 = vld [vmem:[%s10473_s1 + $0x2608] sm:$0xff] }
 0x23a   :  { %4342 = vmatpush1.bf16.msra.mxu0 %v4341_v59  ;;  %v4363_v59 = vpack.c.bf16 %v1226_v54, %v1222_v53  ;;  %v4383_v55 = vpack.c.bf16 %v1266_v50, %v1262_v49 }
 0x23b   :  { %5126 = vmatpush1.bf16.msra.mxu1 %v5125_v60  ;;  %4344 = vmatprep.subr.bf16.mxu0 %v4343_v61  ;;  %v1221_v60 = vld [vmem:[%s10473_s1 + $0x24c0] sm:$0xff] }
 0x23c   :  { %5128 = vmatprep.subr.bf16.mxu1 %v5127_v1  ;;  %v1225_v61 = vld [vmem:[%s10473_s1 + $0x24e0] sm:$0xff]  ;;  %v1230_v1 = vld [vmem:[%s10473_s1 + $0x2508] sm:$0xff] }
 0x23d   :  { %v4365_v5 = vpack.c.bf16 %v1225_v61, %v1221_v60  ;;  %v1267_v60 = vld [vmem:[%s10473_s1 + $0x2630] sm:$0xff]  ;;  %v1270_v61 = vld [vmem:[%s10473_s1 + $0x2648] sm:$0xff] }
 0x23e   :  { %4346 = vmatpush1.bf16.msra.mxu0 %v4345_v7  ;;  %v4367_v7 = vpack.c.bf16 %v1234_v2, %v1230_v1  ;;  %v4387_v3 = vpack.c.bf16 %v1274_v62, %v1270_v61 }
 0x23f   :  { %5130 = vmatpush1.bf16.msra.mxu1 %v5129_v8  ;;  %4348 = vmatprep.subr.bf16.mxu0 %v4347_v9  ;;  %v1229_v8 = vld [vmem:[%s10473_s1 + $0x2500] sm:$0xff] }
 0x240   :  { %5132 = vmatprep.subr.bf16.mxu1 %v5131_v13  ;;  %v1233_v9 = vld [vmem:[%s10473_s1 + $0x2520] sm:$0xff]  ;;  %v1238_v13 = vld [vmem:[%s10473_s1 + $0x2548] sm:$0xff] }
 0x241   :  { %v4369_v17 = vpack.c.bf16 %v1233_v9, %v1229_v8  ;;  %v1275_v8 = vld [vmem:[%s10473_s1 + $0x2670] sm:$0xff]  ;;  %v1278_v9 = vld [vmem:[%s10473_s1 + $0x2688] sm:$0xff] }
 0x242   :  { %4350 = vmatpush1.bf16.msra.mxu0 %v4349_v19  ;;  %v4371_v19 = vpack.c.bf16 %v1242_v14, %v1238_v13  ;;  %v4391_v15 = vpack.c.bf16 %v1282_v10, %v1278_v9 }
 0x243   :  { %5134 = vmatpush1.bf16.msra.mxu1 %v5133_v20  ;;  %4352 = vmatprep.subr.bf16.mxu0 %v4351_v21  ;;  %v1237_v20 = vld [vmem:[%s10473_s1 + $0x2540] sm:$0xff] }
 0x244   :  { %5136 = vmatprep.subr.bf16.mxu1 %v5135_v25  ;;  %v1241_v21 = vld [vmem:[%s10473_s1 + $0x2560] sm:$0xff]  ;;  %v1246_v25 = vld [vmem:[%s10473_s1 + $0x2588] sm:$0xff] }
 0x245   :  { %2272 = vmatmul.mubr.f32.vlgmr.msra.gmra.mrb[0].mxu0 %v36_v31  ;;  %v4373_v29 = vpack.c.bf16 %v1241_v21, %v1237_v20  ;;  %v1283_v20 = vld [vmem:[%s10473_s1 + $0x26b0] sm:$0xff]  ;;  %v1286_v21 = vld [vmem:[%s10473_s1 + $0x26c8] sm:$0xff] }
 0x246   :  { %4354 = vmatpush1.bf16.msra.mxu0 %v4353_v32  ;;  %3195 = vmatmul.mubr.f32.vlgmr.msra.gmra.mrb[0].mxu1 %v36_v31  ;;  %v4375_v31 = vpack.c.bf16 %v1250_v26, %v1246_v25  ;;  %v1245_v32 = vld [vmem:[%s10473_s1 + $0x2580] sm:$0xff]  ;;  %v4395_v27 = vpack.c.bf16 %v1290_v22, %v1286_v21 }
 0x247   :  { %5138 = vmatpush1.bf16.msra.mxu1 %v5137_v33  ;;  %4356 = vmatprep.subr.bf16.mxu0 %v4355_v34  ;;  %v1249_v33 = vld [vmem:[%s10473_s1 + $0x25a0] sm:$0xff]  ;;  %v1247_v34 = vld [vmem:[%s10473_s1 + $0x2590] sm:$0xff] }
 0x248   :  { %5140 = vmatprep.subr.bf16.mxu1 %v5139_v38  ;;  %2342 = vmatprep.mubr.f32.mxu0 %v39_v44  ;;  %v1258_v38 = vld [vmem:[%s10473_s1 + $0x25e8] sm:$0xff]  ;;  %v4377_v41 = vpack.c.bf16 %v1249_v33, %v1245_v32  ;;  %v5161_v42 = vpack.c.bf16 %v1251_v36, %v1247_v34  ;;  %v1291_v32 = vld [vmem:[%s10473_s1 + $0x26f0] sm:$0xff]  ;;  %v1300_v36 = vld [vmem:[%s10473_s1 + $0x2738] sm:$0xff] }
 0x249   :  { %3265 = vmatprep.mubr.f32.mxu1 %v39_v44  ;;  %v4379_v43 = vpack.c.bf16 %v1258_v38, %v1254_v37  ;;  %v1253_v44 = vld [vmem:[%s10473_s1 + $0x25c0] sm:$0xff]  ;;  %v1294_v33 = vld [vmem:[%s10473_s1 + $0x2708] sm:$0xff] }
 0x24a   :  { %4358 = vmatpush1.bf16.msra.mxu0 %v4357_v45  ;;  %v1257_v45 = vld [vmem:[%s10473_s1 + $0x25e0] sm:$0xff]  ;;  %v1298_v34 = vld [vmem:[%s10473_s1 + $0x2728] sm:$0xff] }
 0x24b   :  { %5142 = vmatpush1.bf16.msra.mxu1 %v5141_v46  ;;  %4360 = vmatprep.subr.bf16.mxu0 %v4359_v47  ;;  %v1255_v46 = vld [vmem:[%s10473_s1 + $0x25d0] sm:$0xff]  ;;  %v5163_v47 = vpack.c.bf16 %v1260_v40, %v1256_v39  ;;  %v4381_v53 = vpack.c.bf16 %v1257_v45, %v1253_v44  ;;  %v4399_v39 = vpack.c.bf16 %v1298_v34, %v1294_v33  ;;  %v1293_v40 = vld [vmem:[%s10473_s1 + $0x2700] sm:$0xff]  ;;  %v1302_v45 = vld [vmem:[%s10473_s1 + $0x2748] sm:$0xff] }
 0x24c   :  { %5144 = vmatprep.subr.bf16.mxu1 %v5143_v51  ;;  %v1264_v51 = vld [vmem:[%s10473_s1 + $0x2618] sm:$0xff]  ;;  %v5165_v54 = vpack.c.bf16 %v1259_v48, %v1255_v46  ;;  %v1299_v44 = vld [vmem:[%s10473_s1 + $0x2730] sm:$0xff]  ;;  %v1306_v46 = vld [vmem:[%s10473_s1 + $0x2768] sm:$0xff] }
 0x24d   :  { %v1308_v48 = vld [vmem:[%s10473_s1 + $0x2778] sm:$0xff]  ;;  %v38_v33 = vld [vmem:[%s10474_s0 + $0x90] sm:$0xff] }
 0x24e   :  { %4362 = vmatpush1.bf16.msra.mxu0 %v4361_v57  ;;  %v1265_v57 = vld [vmem:[%s10473_s1 + $0x2620] sm:$0xff] }
 0x24f   :  { %5146 = vmatpush1.bf16.msra.mxu1 %v5145_v58  ;;  %4364 = vmatprep.subr.bf16.mxu0 %v4363_v59  ;;  %v1263_v58 = vld [vmem:[%s10473_s1 + $0x2610] sm:$0xff]  ;;  %v5167_v59 = vpack.c.bf16 %v1268_v52, %v1264_v51  ;;  %v4385_v1 = vpack.c.bf16 %v1265_v57, %v1261_v56  ;;  %v4403_v51 = vpack.c.bf16 %v1306_v46, %v1302_v45  ;;  %v1301_v52 = vld [vmem:[%s10473_s1 + $0x2740] sm:$0xff]  ;;  %v1310_v57 = vld [vmem:[%s10473_s1 + $0x2788] sm:$0xff] }
 0x250   :  { %5148 = vmatprep.subr.bf16.mxu1 %v5147_v63  ;;  %v1272_v63 = vld [vmem:[%s10473_s1 + $0x2658] sm:$0xff]  ;;  %v5169_v2 = vpack.c.bf16 %v1267_v60, %v1263_v58  ;;  %v1307_v56 = vld [vmem:[%s10473_s1 + $0x2770] sm:$0xff]  ;;  %v1314_v58 = vld [vmem:[%s10473_s1 + $0x27a8] sm:$0xff] }
 0x251   :  { %v1316_v60 = vld [vmem:[%s10473_s1 + $0x27b8] sm:$0xff]  ;;  %v41_v46 = vld [vmem:[%s10474_s0 + $0xa8] sm:$0xff] }
 0x252   :  { %4366 = vmatpush1.bf16.msra.mxu0 %v4365_v5  ;;  %v1273_v5 = vld [vmem:[%s10473_s1 + $0x2660] sm:$0xff]  ;;  %v1348_v45 = vld [vmem:[%s10473_s1 + $0x28b8] sm:$0xff] }
 0x253   :  { %5150 = vmatpush1.bf16.msra.mxu1 %v5149_v6  ;;  %4368 = vmatprep.subr.bf16.mxu0 %v4367_v7  ;;  %v1271_v6 = vld [vmem:[%s10473_s1 + $0x2650] sm:$0xff]  ;;  %v5171_v7 = vpack.c.bf16 %v1276_v0, %v1272_v63  ;;  %v4389_v13 = vpack.c.bf16 %v1273_v5, %v1269_v4  ;;  %v4407_v63 = vpack.c.bf16 %v1314_v58, %v1310_v57  ;;  %v1309_v0 = vld [vmem:[%s10473_s1 + $0x2780] sm:$0xff]  ;;  %v1318_v5 = vld [vmem:[%s10473_s1 + $0x27c8] sm:$0xff] }
 0x254   :  { %5152 = vmatprep.subr.bf16.mxu1 %v5151_v11  ;;  %v1280_v11 = vld [vmem:[%s10473_s1 + $0x2698] sm:$0xff]  ;;  %v5173_v14 = vpack.c.bf16 %v1275_v8, %v1271_v6  ;;  %v1315_v4 = vld [vmem:[%s10473_s1 + $0x27b0] sm:$0xff]  ;;  %v1322_v6 = vld [vmem:[%s10473_s1 + $0x27e8] sm:$0xff] }
 0x255   :  { %v1324_v8 = vld [vmem:[%s10473_s1 + $0x27f8] sm:$0xff] }
 0x256   :  { %4370 = vmatpush1.bf16.msra.mxu0 %v4369_v17  ;;  %v1281_v17 = vld [vmem:[%s10473_s1 + $0x26a0] sm:$0xff]  ;;  %v1352_v57 = vld [vmem:[%s10473_s1 + $0x28d8] sm:$0xff] }
 0x257   :  { %5154 = vmatpush1.bf16.msra.mxu1 %v5153_v18  ;;  %4372 = vmatprep.subr.bf16.mxu0 %v4371_v19  ;;  %v1279_v18 = vld [vmem:[%s10473_s1 + $0x2690] sm:$0xff]  ;;  %v5175_v19 = vpack.c.bf16 %v1284_v12, %v1280_v11  ;;  %v4393_v25 = vpack.c.bf16 %v1281_v17, %v1277_v16  ;;  %v4411_v11 = vpack.c.bf16 %v1322_v6, %v1318_v5  ;;  %v1317_v12 = vld [vmem:[%s10473_s1 + $0x27c0] sm:$0xff]  ;;  %v1326_v17 = vld [vmem:[%s10473_s1 + $0x2808] sm:$0xff] }
 0x258   :  { %5156 = vmatprep.subr.bf16.mxu1 %v5155_v23  ;;  %v1288_v23 = vld [vmem:[%s10473_s1 + $0x26d8] sm:$0xff]  ;;  %v5177_v26 = vpack.c.bf16 %v1283_v20, %v1279_v18  ;;  %v1323_v16 = vld [vmem:[%s10473_s1 + $0x27f0] sm:$0xff]  ;;  %v1330_v18 = vld [vmem:[%s10473_s1 + $0x2828] sm:$0xff] }
 0x259   :  { %v1332_v20 = vld [vmem:[%s10473_s1 + $0x2838] sm:$0xff] }
 0x25a   :  { %4374 = vmatpush1.bf16.msra.mxu0 %v4373_v29  ;;  %v1289_v29 = vld [vmem:[%s10473_s1 + $0x26e0] sm:$0xff]  ;;  %v1356_v58 = vld [vmem:[%s10473_s1 + $0x28f8] sm:$0xff] }
 0x25b   :  { %5158 = vmatpush1.bf16.msra.mxu1 %v5157_v30  ;;  %4376 = vmatprep.subr.bf16.mxu0 %v4375_v31  ;;  %v1287_v30 = vld [vmem:[%s10473_s1 + $0x26d0] sm:$0xff]  ;;  %v5179_v31 = vpack.c.bf16 %v1292_v24, %v1288_v23  ;;  %v4397_v37 = vpack.c.bf16 %v1289_v29, %v1285_v28  ;;  %v4415_v23 = vpack.c.bf16 %v1330_v18, %v1326_v17  ;;  %v1325_v24 = vld [vmem:[%s10473_s1 + $0x2800] sm:$0xff]  ;;  %v1334_v29 = vld [vmem:[%s10473_s1 + $0x2848] sm:$0xff] }
 0x25c   :  { %5160 = vmatprep.subr.bf16.mxu1 %v5159_v35  ;;  %v1296_v35 = vld [vmem:[%s10473_s1 + $0x2718] sm:$0xff]  ;;  %v5181_v38 = vpack.c.bf16 %v1291_v32, %v1287_v30  ;;  %v1331_v28 = vld [vmem:[%s10473_s1 + $0x2830] sm:$0xff]  ;;  %v1338_v30 = vld [vmem:[%s10473_s1 + $0x2868] sm:$0xff] }
 0x25d   :  { %v1340_v32 = vld [vmem:[%s10473_s1 + $0x2878] sm:$0xff] }
 0x25e   :  { %4378 = vmatpush1.bf16.msra.mxu0 %v4377_v41  ;;  %v1297_v41 = vld [vmem:[%s10473_s1 + $0x2720] sm:$0xff]  ;;  %v1360_v5 = vld [vmem:[%s10473_s1 + $0x2918] sm:$0xff] }
 0x25f   :  { %5162 = vmatpush1.bf16.msra.mxu1 %v5161_v42  ;;  %4380 = vmatprep.subr.bf16.mxu0 %v4379_v43  ;;  %v1295_v42 = vld [vmem:[%s10473_s1 + $0x2710] sm:$0xff]  ;;  %v5183_v43 = vpack.c.bf16 %v1300_v36, %v1296_v35  ;;  %v4401_v49 = vpack.c.bf16 %v1297_v41, %v1293_v40  ;;  %v4419_v36 = vpack.c.bf16 %v1338_v30, %v1334_v29  ;;  %v1364_v6 = vld [vmem:[%s10473_s1 + $0x2938] sm:$0xff] }
 0x260   :  { %5164 = vmatprep.subr.bf16.mxu1 %v5163_v47  ;;  %v1304_v47 = vld [vmem:[%s10473_s1 + $0x2758] sm:$0xff]  ;;  %v5185_v50 = vpack.c.bf16 %v1299_v44, %v1295_v42  ;;  %v1339_v41 = vld [vmem:[%s10473_s1 + $0x2870] sm:$0xff]  ;;  %v1342_v42 = vld [vmem:[%s10473_s1 + $0x2888] sm:$0xff] }
 0x261   :  { %v1344_v44 = vld [vmem:[%s10473_s1 + $0x2898] sm:$0xff] }
 0x262   :  { %4382 = vmatpush1.bf16.msra.mxu0 %v4381_v53  ;;  %v1305_v53 = vld [vmem:[%s10473_s1 + $0x2760] sm:$0xff]  ;;  %v1368_v17 = vld [vmem:[%s10473_s1 + $0x2958] sm:$0xff] }
 0x263   :  { %5166 = vmatpush1.bf16.msra.mxu1 %v5165_v54  ;;  %4384 = vmatprep.subr.bf16.mxu0 %v4383_v55  ;;  %v1303_v54 = vld [vmem:[%s10473_s1 + $0x2750] sm:$0xff]  ;;  %v5187_v55 = vpack.c.bf16 %v1308_v48, %v1304_v47  ;;  %v4405_v61 = vpack.c.bf16 %v1305_v53, %v1301_v52  ;;  %v5207_v53 = vpack.c.bf16 %v1348_v45, %v1344_v44  ;;  %v1372_v18 = vld [vmem:[%s10473_s1 + $0x2978] sm:$0xff] }
 0x264   :  { %5168 = vmatprep.subr.bf16.mxu1 %v5167_v59  ;;  %v1312_v59 = vld [vmem:[%s10473_s1 + $0x2798] sm:$0xff]  ;;  %v5189_v62 = vpack.c.bf16 %v1307_v56, %v1303_v54  ;;  %v1343_v52 = vld [vmem:[%s10473_s1 + $0x2890] sm:$0xff]  ;;  %v1354_v56 = vld [vmem:[%s10473_s1 + $0x28e8] sm:$0xff] }
 0x265   :  { %v1347_v54 = vld [vmem:[%s10473_s1 + $0x28b0] sm:$0xff]  ;;  %v1376_v29 = vld [vmem:[%s10473_s1 + $0x2998] sm:$0xff] }
 0x266   :  { %4386 = vmatpush1.bf16.msra.mxu0 %v4385_v1  ;;  %v1313_v1 = vld [vmem:[%s10473_s1 + $0x27a0] sm:$0xff]  ;;  %v1380_v30 = vld [vmem:[%s10473_s1 + $0x29b8] sm:$0xff] }
 0x267   :  { %5170 = vmatpush1.bf16.msra.mxu1 %v5169_v2  ;;  %4388 = vmatprep.subr.bf16.mxu0 %v4387_v3  ;;  %v1311_v2 = vld [vmem:[%s10473_s1 + $0x2790] sm:$0xff]  ;;  %v5191_v3 = vpack.c.bf16 %v1316_v60, %v1312_v59  ;;  %v4409_v9 = vpack.c.bf16 %v1313_v1, %v1309_v0  ;;  %v5209_v60 = vpack.c.bf16 %v1347_v54, %v1343_v52  ;;  %v1394_v52 = vld [vmem:[%s10473_s1 + $0x2a28] sm:$0xff]  ;;  %v1396_v54 = vld [vmem:[%s10473_s1 + $0x2a38] sm:$0xff] }
 0x268   :  { %5172 = vmatprep.subr.bf16.mxu1 %v5171_v7  ;;  %v1320_v7 = vld [vmem:[%s10473_s1 + $0x27d8] sm:$0xff]  ;;  %v5193_v10 = vpack.c.bf16 %v1315_v4, %v1311_v2  ;;  %v1351_v0 = vld [vmem:[%s10473_s1 + $0x28d0] sm:$0xff]  ;;  %v5211_v1 = vpack.c.bf16 %v1356_v58, %v1352_v57  ;;  %v1362_v4 = vld [vmem:[%s10473_s1 + $0x2928] sm:$0xff] }
 0x269   :  { %v1355_v2 = vld [vmem:[%s10473_s1 + $0x28f0] sm:$0xff]  ;;  %v1389_v58 = vld [vmem:[%s10473_s1 + $0x2a00] sm:$0xff] }
 0x26a   :  { %4390 = vmatpush1.bf16.msra.mxu0 %v4389_v13  ;;  %v1321_v13 = vld [vmem:[%s10473_s1 + $0x27e0] sm:$0xff] }
 0x26b   :  { %5174 = vmatpush1.bf16.msra.mxu1 %v5173_v14  ;;  %4392 = vmatprep.subr.bf16.mxu0 %v4391_v15  ;;  %v1319_v14 = vld [vmem:[%s10473_s1 + $0x27d0] sm:$0xff]  ;;  %v5195_v15 = vpack.c.bf16 %v1324_v8, %v1320_v7  ;;  %v4413_v21 = vpack.c.bf16 %v1321_v13, %v1317_v12  ;;  %v5213_v8 = vpack.c.bf16 %v1355_v2, %v1351_v0  ;;  %v1402_v0 = vld [vmem:[%s10473_s1 + $0x2a68] sm:$0xff]  ;;  %v1404_v2 = vld [vmem:[%s10473_s1 + $0x2a78] sm:$0xff] }
 0x26c   :  { %5176 = vmatprep.subr.bf16.mxu1 %v5175_v19  ;;  %v1328_v19 = vld [vmem:[%s10473_s1 + $0x2818] sm:$0xff]  ;;  %v5197_v22 = vpack.c.bf16 %v1323_v16, %v1319_v14  ;;  %v1359_v12 = vld [vmem:[%s10473_s1 + $0x2910] sm:$0xff]  ;;  %v5215_v13 = vpack.c.bf16 %v1364_v6, %v1360_v5  ;;  %v1370_v16 = vld [vmem:[%s10473_s1 + $0x2968] sm:$0xff] }
 0x26d   :  { %v1363_v14 = vld [vmem:[%s10473_s1 + $0x2930] sm:$0xff]  ;;  %v1397_v6 = vld [vmem:[%s10473_s1 + $0x2a40] sm:$0xff] }
 0x26e   :  { %4394 = vmatpush1.bf16.msra.mxu0 %v4393_v25  ;;  %v1329_v25 = vld [vmem:[%s10473_s1 + $0x2820] sm:$0xff] }
 0x26f   :  { %5178 = vmatpush1.bf16.msra.mxu1 %v5177_v26  ;;  %4396 = vmatprep.subr.bf16.mxu0 %v4395_v27  ;;  %v1327_v26 = vld [vmem:[%s10473_s1 + $0x2810] sm:$0xff]  ;;  %v5199_v27 = vpack.c.bf16 %v1332_v20, %v1328_v19  ;;  %v4417_v34 = vpack.c.bf16 %v1329_v25, %v1325_v24  ;;  %v5217_v20 = vpack.c.bf16 %v1363_v14, %v1359_v12  ;;  %v1410_v12 = vld [vmem:[%s10473_s1 + $0x2aa8] sm:$0xff]  ;;  %v1412_v14 = vld [vmem:[%s10473_s1 + $0x2ab8] sm:$0xff] }
 0x270   :  { %5180 = vmatprep.subr.bf16.mxu1 %v5179_v31  ;;  %v1336_v31 = vld [vmem:[%s10473_s1 + $0x2858] sm:$0xff]  ;;  %v5201_v35 = vpack.c.bf16 %v1331_v28, %v1327_v26  ;;  %v1367_v24 = vld [vmem:[%s10473_s1 + $0x2950] sm:$0xff]  ;;  %v5219_v25 = vpack.c.bf16 %v1372_v18, %v1368_v17  ;;  %v1378_v28 = vld [vmem:[%s10473_s1 + $0x29a8] sm:$0xff] }
 0x271   :  { %v5203_v40 = vpack.c.bf16 %v1340_v32, %v1336_v31  ;;  %v1371_v26 = vld [vmem:[%s10473_s1 + $0x2970] sm:$0xff]  ;;  %v1405_v18 = vld [vmem:[%s10473_s1 + $0x2a80] sm:$0xff] }
 0x272   :  { %4398 = vmatpush1.bf16.msra.mxu0 %v4397_v37  ;;  %v1333_v37 = vld [vmem:[%s10473_s1 + $0x2840] sm:$0xff]  ;;  %v5221_v32 = vpack.c.bf16 %v1371_v26, %v1367_v24  ;;  %v1418_v24 = vld [vmem:[%s10473_s1 + $0x2ae8] sm:$0xff]  ;;  %v1420_v26 = vld [vmem:[%s10473_s1 + $0x2af8] sm:$0xff] }
 0x273   :  { %5182 = vmatpush1.bf16.msra.mxu1 %v5181_v38  ;;  %4400 = vmatprep.subr.bf16.mxu0 %v4399_v39  ;;  %v1337_v38 = vld [vmem:[%s10473_s1 + $0x2860] sm:$0xff]  ;;  %v1335_v39 = vld [vmem:[%s10473_s1 + $0x2850] sm:$0xff] }
 0x274   :  { %5184 = vmatprep.subr.bf16.mxu1 %v5183_v43  ;;  %v1346_v43 = vld [vmem:[%s10473_s1 + $0x28a8] sm:$0xff]  ;;  %v4421_v47 = vpack.c.bf16 %v1337_v38, %v1333_v37  ;;  %v5205_v48 = vpack.c.bf16 %v1339_v41, %v1335_v39  ;;  %v5223_v37 = vpack.c.bf16 %v1380_v30, %v1376_v29  ;;  %v1379_v38 = vld [vmem:[%s10473_s1 + $0x29b0] sm:$0xff]  ;;  %v1384_v41 = vld [vmem:[%s10473_s1 + $0x29d8] sm:$0xff] }
 0x275   :  { %v1382_v39 = vld [vmem:[%s10473_s1 + $0x29c8] sm:$0xff]  ;;  %v1413_v30 = vld [vmem:[%s10473_s1 + $0x2ac0] sm:$0xff] }
 0x276   :  { %4402 = vmatpush1.bf16.msra.mxu0 %v4401_v49  ;;  %v4423_v49 = vpack.c.bf16 %v1346_v43, %v1342_v42  ;;  %v1388_v42 = vld [vmem:[%s10473_s1 + $0x29f8] sm:$0xff] }
 0x277   :  { %5186 = vmatpush1.bf16.msra.mxu1 %v5185_v50  ;;  %4404 = vmatprep.subr.bf16.mxu0 %v4403_v51  ;;  %v1341_v50 = vld [vmem:[%s10473_s1 + $0x2880] sm:$0xff] }
 0x278   :  { %5188 = vmatprep.subr.bf16.mxu1 %v5187_v55  ;;  %v1345_v51 = vld [vmem:[%s10473_s1 + $0x28a0] sm:$0xff]  ;;  %v1350_v55 = vld [vmem:[%s10473_s1 + $0x28c8] sm:$0xff] }
 0x279   :  { %v4425_v59 = vpack.c.bf16 %v1345_v51, %v1341_v50  ;;  %v1387_v50 = vld [vmem:[%s10473_s1 + $0x29f0] sm:$0xff]  ;;  %v1390_v51 = vld [vmem:[%s10473_s1 + $0x2a08] sm:$0xff] }
 0x27a   :  { %4406 = vmatpush1.bf16.msra.mxu0 %v4405_v61  ;;  %v4427_v61 = vpack.c.bf16 %v1354_v56, %v1350_v55  ;;  %v4447_v57 = vpack.c.bf16 %v1394_v52, %v1390_v51 }
 0x27b   :  { %5190 = vmatpush1.bf16.msra.mxu1 %v5189_v62  ;;  %4408 = vmatprep.subr.bf16.mxu0 %v4407_v63  ;;  %v1349_v62 = vld [vmem:[%s10473_s1 + $0x28c0] sm:$0xff] }
 0x27c   :  { %5192 = vmatprep.subr.bf16.mxu1 %v5191_v3  ;;  %v1353_v63 = vld [vmem:[%s10473_s1 + $0x28e0] sm:$0xff]  ;;  %v1358_v3 = vld [vmem:[%s10473_s1 + $0x2908] sm:$0xff] }
 0x27d   :  { %v4429_v7 = vpack.c.bf16 %v1353_v63, %v1349_v62  ;;  %v1395_v62 = vld [vmem:[%s10473_s1 + $0x2a30] sm:$0xff]  ;;  %v1398_v63 = vld [vmem:[%s10473_s1 + $0x2a48] sm:$0xff] }
 0x27e   :  { %4410 = vmatpush1.bf16.msra.mxu0 %v4409_v9  ;;  %v4431_v9 = vpack.c.bf16 %v1362_v4, %v1358_v3  ;;  %v4451_v5 = vpack.c.bf16 %v1402_v0, %v1398_v63 }
 0x27f   :  { %5194 = vmatpush1.bf16.msra.mxu1 %v5193_v10  ;;  %4412 = vmatprep.subr.bf16.mxu0 %v4411_v11  ;;  %v1357_v10 = vld [vmem:[%s10473_s1 + $0x2900] sm:$0xff] }
 0x280   :  { %5196 = vmatprep.subr.bf16.mxu1 %v5195_v15  ;;  %v1361_v11 = vld [vmem:[%s10473_s1 + $0x2920] sm:$0xff]  ;;  %v1366_v15 = vld [vmem:[%s10473_s1 + $0x2948] sm:$0xff] }
 0x281   :  { %v4433_v19 = vpack.c.bf16 %v1361_v11, %v1357_v10  ;;  %v1403_v10 = vld [vmem:[%s10473_s1 + $0x2a70] sm:$0xff]  ;;  %v1406_v11 = vld [vmem:[%s10473_s1 + $0x2a88] sm:$0xff] }
 0x282   :  { %4414 = vmatpush1.bf16.msra.mxu0 %v4413_v21  ;;  %v4435_v21 = vpack.c.bf16 %v1370_v16, %v1366_v15  ;;  %v4455_v17 = vpack.c.bf16 %v1410_v12, %v1406_v11 }
 0x283   :  { %5198 = vmatpush1.bf16.msra.mxu1 %v5197_v22  ;;  %4416 = vmatprep.subr.bf16.mxu0 %v4415_v23  ;;  %v1365_v22 = vld [vmem:[%s10473_s1 + $0x2940] sm:$0xff] }
 0x284   :  { %5200 = vmatprep.subr.bf16.mxu1 %v5199_v27  ;;  %v1369_v23 = vld [vmem:[%s10473_s1 + $0x2960] sm:$0xff]  ;;  %v1374_v27 = vld [vmem:[%s10473_s1 + $0x2988] sm:$0xff] }
 0x285   :  { %2343 = vmatmul.mubr.f32.vlgmr.msra.gmra.mrb[0].mxu0 %v38_v33  ;;  %v4437_v31 = vpack.c.bf16 %v1369_v23, %v1365_v22  ;;  %v1411_v22 = vld [vmem:[%s10473_s1 + $0x2ab0] sm:$0xff]  ;;  %v1414_v23 = vld [vmem:[%s10473_s1 + $0x2ac8] sm:$0xff] }
 0x286   :  { %4418 = vmatpush1.bf16.msra.mxu0 %v4417_v34  ;;  %3266 = vmatmul.mubr.f32.vlgmr.msra.gmra.mrb[0].mxu1 %v38_v33  ;;  %v4439_v33 = vpack.c.bf16 %v1378_v28, %v1374_v27  ;;  %v1373_v34 = vld [vmem:[%s10473_s1 + $0x2980] sm:$0xff]  ;;  %v4459_v29 = vpack.c.bf16 %v1418_v24, %v1414_v23 }
 0x287   :  { %5202 = vmatpush1.bf16.msra.mxu1 %v5201_v35  ;;  %4420 = vmatprep.subr.bf16.mxu0 %v4419_v36  ;;  %v1377_v35 = vld [vmem:[%s10473_s1 + $0x29a0] sm:$0xff]  ;;  %v1375_v36 = vld [vmem:[%s10473_s1 + $0x2990] sm:$0xff] }
 0x288   :  { %5204 = vmatprep.subr.bf16.mxu1 %v5203_v40  ;;  %2413 = vmatprep.mubr.f32.mxu0 %v41_v46  ;;  %v1386_v40 = vld [vmem:[%s10473_s1 + $0x29e8] sm:$0xff]  ;;  %v4441_v43 = vpack.c.bf16 %v1377_v35, %v1373_v34  ;;  %v5225_v44 = vpack.c.bf16 %v1379_v38, %v1375_v36  ;;  %v1419_v34 = vld [vmem:[%s10473_s1 + $0x2af0] sm:$0xff]  ;;  %v1428_v38 = vld [vmem:[%s10473_s1 + $0x2b38] sm:$0xff] }
 0x289   :  { %3336 = vmatprep.mubr.f32.mxu1 %v41_v46  ;;  %v4443_v45 = vpack.c.bf16 %v1386_v40, %v1382_v39  ;;  %v1381_v46 = vld [vmem:[%s10473_s1 + $0x29c0] sm:$0xff]  ;;  %v1422_v35 = vld [vmem:[%s10473_s1 + $0x2b08] sm:$0xff] }
 0x28a   :  { %4422 = vmatpush1.bf16.msra.mxu0 %v4421_v47  ;;  %v1385_v47 = vld [vmem:[%s10473_s1 + $0x29e0] sm:$0xff]  ;;  %v1426_v36 = vld [vmem:[%s10473_s1 + $0x2b28] sm:$0xff] }
 0x28b   :  { %5206 = vmatpush1.bf16.msra.mxu1 %v5205_v48  ;;  %4424 = vmatprep.subr.bf16.mxu0 %v4423_v49  ;;  %v1383_v48 = vld [vmem:[%s10473_s1 + $0x29d0] sm:$0xff]  ;;  %v5227_v49 = vpack.c.bf16 %v1388_v42, %v1384_v41  ;;  %v4445_v55 = vpack.c.bf16 %v1385_v47, %v1381_v46  ;;  %v4463_v41 = vpack.c.bf16 %v1426_v36, %v1422_v35  ;;  %v1421_v42 = vld [vmem:[%s10473_s1 + $0x2b00] sm:$0xff]  ;;  %v1430_v47 = vld [vmem:[%s10473_s1 + $0x2b48] sm:$0xff] }
 0x28c   :  { %5208 = vmatprep.subr.bf16.mxu1 %v5207_v53  ;;  %v1392_v53 = vld [vmem:[%s10473_s1 + $0x2a18] sm:$0xff]  ;;  %v5229_v56 = vpack.c.bf16 %v1387_v50, %v1383_v48  ;;  %v1427_v46 = vld [vmem:[%s10473_s1 + $0x2b30] sm:$0xff]  ;;  %v1434_v48 = vld [vmem:[%s10473_s1 + $0x2b68] sm:$0xff] }
 0x28d   :  { %v1436_v50 = vld [vmem:[%s10473_s1 + $0x2b78] sm:$0xff]  ;;  %v40_v35 = vld [vmem:[%s10474_s0 + $0xa0] sm:$0xff] }
 0x28e   :  { %4426 = vmatpush1.bf16.msra.mxu0 %v4425_v59  ;;  %v1393_v59 = vld [vmem:[%s10473_s1 + $0x2a20] sm:$0xff] }
 0x28f   :  { %5210 = vmatpush1.bf16.msra.mxu1 %v5209_v60  ;;  %4428 = vmatprep.subr.bf16.mxu0 %v4427_v61  ;;  %v1391_v60 = vld [vmem:[%s10473_s1 + $0x2a10] sm:$0xff]  ;;  %v5231_v61 = vpack.c.bf16 %v1396_v54, %v1392_v53  ;;  %v4449_v3 = vpack.c.bf16 %v1393_v59, %v1389_v58  ;;  %v4467_v53 = vpack.c.bf16 %v1434_v48, %v1430_v47  ;;  %v1429_v54 = vld [vmem:[%s10473_s1 + $0x2b40] sm:$0xff]  ;;  %v1438_v59 = vld [vmem:[%s10473_s1 + $0x2b88] sm:$0xff] }
 0x290   :  { %5212 = vmatprep.subr.bf16.mxu1 %v5211_v1  ;;  %v1400_v1 = vld [vmem:[%s10473_s1 + $0x2a58] sm:$0xff]  ;;  %v5233_v4 = vpack.c.bf16 %v1395_v62, %v1391_v60  ;;  %v1435_v58 = vld [vmem:[%s10473_s1 + $0x2b70] sm:$0xff]  ;;  %v1442_v60 = vld [vmem:[%s10473_s1 + $0x2ba8] sm:$0xff] }
 0x291   :  { %v1444_v62 = vld [vmem:[%s10473_s1 + $0x2bb8] sm:$0xff] }
 0x292   :  { %4430 = vmatpush1.bf16.msra.mxu0 %v4429_v7  ;;  %v1401_v7 = vld [vmem:[%s10473_s1 + $0x2a60] sm:$0xff]  ;;  %v1476_v47 = vld [vmem:[%s10473_s1 + $0x2cb8] sm:$0xff] }
 0x293   :  { %5214 = vmatpush1.bf16.msra.mxu1 %v5213_v8  ;;  %4432 = vmatprep.subr.bf16.mxu0 %v4431_v9  ;;  %v1399_v8 = vld [vmem:[%s10473_s1 + $0x2a50] sm:$0xff]  ;;  %v5235_v9 = vpack.c.bf16 %v1404_v2, %v1400_v1  ;;  %v4453_v15 = vpack.c.bf16 %v1401_v7, %v1397_v6  ;;  %v4471_v1 = vpack.c.bf16 %v1442_v60, %v1438_v59  ;;  %v1437_v2 = vld [vmem:[%s10473_s1 + $0x2b80] sm:$0xff]  ;;  %v1446_v7 = vld [vmem:[%s10473_s1 + $0x2bc8] sm:$0xff] }
 0x294   :  { %5216 = vmatprep.subr.bf16.mxu1 %v5215_v13  ;;  %v1408_v13 = vld [vmem:[%s10473_s1 + $0x2a98] sm:$0xff]  ;;  %v5237_v16 = vpack.c.bf16 %v1403_v10, %v1399_v8  ;;  %v1443_v6 = vld [vmem:[%s10473_s1 + $0x2bb0] sm:$0xff]  ;;  %v1450_v8 = vld [vmem:[%s10473_s1 + $0x2be8] sm:$0xff] }
 0x295   :  { %v1452_v10 = vld [vmem:[%s10473_s1 + $0x2bf8] sm:$0xff] }
 0x296   :  { %4434 = vmatpush1.bf16.msra.mxu0 %v4433_v19  ;;  %v1409_v19 = vld [vmem:[%s10473_s1 + $0x2aa0] sm:$0xff]  ;;  %v43_v48 = vld [vmem:[%s10474_s0 + $0xb8] sm:$0xff] }
 0x297   :  { %5218 = vmatpush1.bf16.msra.mxu1 %v5217_v20  ;;  %4436 = vmatprep.subr.bf16.mxu0 %v4435_v21  ;;  %v1407_v20 = vld [vmem:[%s10473_s1 + $0x2a90] sm:$0xff]  ;;  %v5239_v21 = vpack.c.bf16 %v1412_v14, %v1408_v13  ;;  %v4457_v27 = vpack.c.bf16 %v1409_v19, %v1405_v18  ;;  %v4475_v13 = vpack.c.bf16 %v1450_v8, %v1446_v7  ;;  %v1445_v14 = vld [vmem:[%s10473_s1 + $0x2bc0] sm:$0xff]  ;;  %v1454_v19 = vld [vmem:[%s10473_s1 + $0x2c08] sm:$0xff] }
 0x298   :  { %5220 = vmatprep.subr.bf16.mxu1 %v5219_v25  ;;  %v1416_v25 = vld [vmem:[%s10473_s1 + $0x2ad8] sm:$0xff]  ;;  %v5241_v28 = vpack.c.bf16 %v1411_v22, %v1407_v20  ;;  %v1451_v18 = vld [vmem:[%s10473_s1 + $0x2bf0] sm:$0xff]  ;;  %v1458_v20 = vld [vmem:[%s10473_s1 + $0x2c28] sm:$0xff] }
 0x299   :  { %v1460_v22 = vld [vmem:[%s10473_s1 + $0x2c38] sm:$0xff] }
 0x29a   :  { %4438 = vmatpush1.bf16.msra.mxu0 %v4437_v31  ;;  %v1417_v31 = vld [vmem:[%s10473_s1 + $0x2ae0] sm:$0xff]  ;;  %v1480_v59 = vld [vmem:[%s10473_s1 + $0x2cd8] sm:$0xff] }
 0x29b   :  { %5222 = vmatpush1.bf16.msra.mxu1 %v5221_v32  ;;  %4440 = vmatprep.subr.bf16.mxu0 %v4439_v33  ;;  %v1415_v32 = vld [vmem:[%s10473_s1 + $0x2ad0] sm:$0xff]  ;;  %v5243_v33 = vpack.c.bf16 %v1420_v26, %v1416_v25  ;;  %v4461_v39 = vpack.c.bf16 %v1417_v31, %v1413_v30  ;;  %v4479_v25 = vpack.c.bf16 %v1458_v20, %v1454_v19  ;;  %v1453_v26 = vld [vmem:[%s10473_s1 + $0x2c00] sm:$0xff]  ;;  %v1462_v31 = vld [vmem:[%s10473_s1 + $0x2c48] sm:$0xff] }
 0x29c   :  { %5224 = vmatprep.subr.bf16.mxu1 %v5223_v37  ;;  %v1424_v37 = vld [vmem:[%s10473_s1 + $0x2b18] sm:$0xff]  ;;  %v5245_v40 = vpack.c.bf16 %v1419_v34, %v1415_v32  ;;  %v1459_v30 = vld [vmem:[%s10473_s1 + $0x2c30] sm:$0xff]  ;;  %v1466_v32 = vld [vmem:[%s10473_s1 + $0x2c68] sm:$0xff] }
 0x29d   :  { %v1468_v34 = vld [vmem:[%s10473_s1 + $0x2c78] sm:$0xff] }
 0x29e   :  { %4442 = vmatpush1.bf16.msra.mxu0 %v4441_v43  ;;  %v1425_v43 = vld [vmem:[%s10473_s1 + $0x2b20] sm:$0xff]  ;;  %v1484_v60 = vld [vmem:[%s10473_s1 + $0x2cf8] sm:$0xff] }
 0x29f   :  { %5226 = vmatpush1.bf16.msra.mxu1 %v5225_v44  ;;  %4444 = vmatprep.subr.bf16.mxu0 %v4443_v45  ;;  %v1423_v44 = vld [vmem:[%s10473_s1 + $0x2b10] sm:$0xff]  ;;  %v5247_v45 = vpack.c.bf16 %v1428_v38, %v1424_v37  ;;  %v4465_v51 = vpack.c.bf16 %v1425_v43, %v1421_v42  ;;  %v4483_v38 = vpack.c.bf16 %v1466_v32, %v1462_v31  ;;  %v1488_v7 = vld [vmem:[%s10473_s1 + $0x2d18] sm:$0xff] }
 0x2a0   :  { %5228 = vmatprep.subr.bf16.mxu1 %v5227_v49  ;;  %v1432_v49 = vld [vmem:[%s10473_s1 + $0x2b58] sm:$0xff]  ;;  %v5249_v52 = vpack.c.bf16 %v1427_v46, %v1423_v44  ;;  %v1467_v43 = vld [vmem:[%s10473_s1 + $0x2c70] sm:$0xff]  ;;  %v1470_v44 = vld [vmem:[%s10473_s1 + $0x2c88] sm:$0xff] }
 0x2a1   :  { %v1472_v46 = vld [vmem:[%s10473_s1 + $0x2c98] sm:$0xff] }
 0x2a2   :  { %4446 = vmatpush1.bf16.msra.mxu0 %v4445_v55  ;;  %v1433_v55 = vld [vmem:[%s10473_s1 + $0x2b60] sm:$0xff]  ;;  %v1492_v8 = vld [vmem:[%s10473_s1 + $0x2d38] sm:$0xff] }
 0x2a3   :  { %5230 = vmatpush1.bf16.msra.mxu1 %v5229_v56  ;;  %4448 = vmatprep.subr.bf16.mxu0 %v4447_v57  ;;  %v1431_v56 = vld [vmem:[%s10473_s1 + $0x2b50] sm:$0xff]  ;;  %v5251_v57 = vpack.c.bf16 %v1436_v50, %v1432_v49  ;;  %v4469_v63 = vpack.c.bf16 %v1433_v55, %v1429_v54  ;;  %v5271_v55 = vpack.c.bf16 %v1476_v47, %v1472_v46  ;;  %v1496_v19 = vld [vmem:[%s10473_s1 + $0x2d58] sm:$0xff] }
 0x2a4   :  { %5232 = vmatprep.subr.bf16.mxu1 %v5231_v61  ;;  %v1440_v61 = vld [vmem:[%s10473_s1 + $0x2b98] sm:$0xff]  ;;  %v5253_v0 = vpack.c.bf16 %v1435_v58, %v1431_v56  ;;  %v1471_v54 = vld [vmem:[%s10473_s1 + $0x2c90] sm:$0xff]  ;;  %v1482_v58 = vld [vmem:[%s10473_s1 + $0x2ce8] sm:$0xff] }
 0x2a5   :  { %v1475_v56 = vld [vmem:[%s10473_s1 + $0x2cb0] sm:$0xff]  ;;  %v1500_v20 = vld [vmem:[%s10473_s1 + $0x2d78] sm:$0xff] }
 0x2a6   :  { %4450 = vmatpush1.bf16.msra.mxu0 %v4449_v3  ;;  %v1441_v3 = vld [vmem:[%s10473_s1 + $0x2ba0] sm:$0xff]  ;;  %v1504_v31 = vld [vmem:[%s10473_s1 + $0x2d98] sm:$0xff] }
 0x2a7   :  { %5234 = vmatpush1.bf16.msra.mxu1 %v5233_v4  ;;  %4452 = vmatprep.subr.bf16.mxu0 %v4451_v5  ;;  %v1439_v4 = vld [vmem:[%s10473_s1 + $0x2b90] sm:$0xff]  ;;  %v5255_v5 = vpack.c.bf16 %v1444_v62, %v1440_v61  ;;  %v4473_v11 = vpack.c.bf16 %v1441_v3, %v1437_v2  ;;  %v5273_v62 = vpack.c.bf16 %v1475_v56, %v1471_v54  ;;  %v1508_v32 = vld [vmem:[%s10473_s1 + $0x2db8] sm:$0xff]  ;;  %v1522_v54 = vld [vmem:[%s10473_s1 + $0x2e28] sm:$0xff] }
 0x2a8   :  { %5236 = vmatprep.subr.bf16.mxu1 %v5235_v9  ;;  %v1448_v9 = vld [vmem:[%s10473_s1 + $0x2bd8] sm:$0xff]  ;;  %v5257_v12 = vpack.c.bf16 %v1443_v6, %v1439_v4  ;;  %v1479_v2 = vld [vmem:[%s10473_s1 + $0x2cd0] sm:$0xff]  ;;  %v5275_v3 = vpack.c.bf16 %v1484_v60, %v1480_v59  ;;  %v1490_v6 = vld [vmem:[%s10473_s1 + $0x2d28] sm:$0xff] }
 0x2a9   :  { %v1483_v4 = vld [vmem:[%s10473_s1 + $0x2cf0] sm:$0xff]  ;;  %v1524_v56 = vld [vmem:[%s10473_s1 + $0x2e38] sm:$0xff]  ;;  %v1517_v60 = vld [vmem:[%s10473_s1 + $0x2e00] sm:$0xff] }
 0x2aa   :  { %4454 = vmatpush1.bf16.msra.mxu0 %v4453_v15  ;;  %v1449_v15 = vld [vmem:[%s10473_s1 + $0x2be0] sm:$0xff] }
 0x2ab   :  { %5238 = vmatpush1.bf16.msra.mxu1 %v5237_v16  ;;  %4456 = vmatprep.subr.bf16.mxu0 %v4455_v17  ;;  %v1447_v16 = vld [vmem:[%s10473_s1 + $0x2bd0] sm:$0xff]  ;;  %v5259_v17 = vpack.c.bf16 %v1452_v10, %v1448_v9  ;;  %v4477_v23 = vpack.c.bf16 %v1449_v15, %v1445_v14  ;;  %v5277_v10 = vpack.c.bf16 %v1483_v4, %v1479_v2  ;;  %v1530_v2 = vld [vmem:[%s10473_s1 + $0x2e68] sm:$0xff]  ;;  %v1532_v4 = vld [vmem:[%s10473_s1 + $0x2e78] sm:$0xff] }
 0x2ac   :  { %5240 = vmatprep.subr.bf16.mxu1 %v5239_v21  ;;  %v1456_v21 = vld [vmem:[%s10473_s1 + $0x2c18] sm:$0xff]  ;;  %v5261_v24 = vpack.c.bf16 %v1451_v18, %v1447_v16  ;;  %v1487_v14 = vld [vmem:[%s10473_s1 + $0x2d10] sm:$0xff]  ;;  %v5279_v15 = vpack.c.bf16 %v1492_v8, %v1488_v7  ;;  %v1498_v18 = vld [vmem:[%s10473_s1 + $0x2d68] sm:$0xff] }
 0x2ad   :  { %v1491_v16 = vld [vmem:[%s10473_s1 + $0x2d30] sm:$0xff]  ;;  %v1525_v8 = vld [vmem:[%s10473_s1 + $0x2e40] sm:$0xff] }
 0x2ae   :  { %4458 = vmatpush1.bf16.msra.mxu0 %v4457_v27  ;;  %v1457_v27 = vld [vmem:[%s10473_s1 + $0x2c20] sm:$0xff] }
 0x2af   :  { %5242 = vmatpush1.bf16.msra.mxu1 %v5241_v28  ;;  %4460 = vmatprep.subr.bf16.mxu0 %v4459_v29  ;;  %v1455_v28 = vld [vmem:[%s10473_s1 + $0x2c10] sm:$0xff]  ;;  %v5263_v29 = vpack.c.bf16 %v1460_v22, %v1456_v21  ;;  %v4481_v36 = vpack.c.bf16 %v1457_v27, %v1453_v26  ;;  %v5281_v22 = vpack.c.bf16 %v1491_v16, %v1487_v14  ;;  %v1538_v14 = vld [vmem:[%s10473_s1 + $0x2ea8] sm:$0xff]  ;;  %v1540_v16 = vld [vmem:[%s10473_s1 + $0x2eb8] sm:$0xff] }
 0x2b0   :  { %5244 = vmatprep.subr.bf16.mxu1 %v5243_v33  ;;  %v1464_v33 = vld [vmem:[%s10473_s1 + $0x2c58] sm:$0xff]  ;;  %v5265_v37 = vpack.c.bf16 %v1459_v30, %v1455_v28  ;;  %v1495_v26 = vld [vmem:[%s10473_s1 + $0x2d50] sm:$0xff]  ;;  %v5283_v27 = vpack.c.bf16 %v1500_v20, %v1496_v19  ;;  %v1506_v30 = vld [vmem:[%s10473_s1 + $0x2da8] sm:$0xff] }
 0x2b1   :  { %v5267_v42 = vpack.c.bf16 %v1468_v34, %v1464_v33  ;;  %v1499_v28 = vld [vmem:[%s10473_s1 + $0x2d70] sm:$0xff]  ;;  %v1533_v20 = vld [vmem:[%s10473_s1 + $0x2e80] sm:$0xff] }
 0x2b2   :  { %4462 = vmatpush1.bf16.msra.mxu0 %v4461_v39  ;;  %v1461_v39 = vld [vmem:[%s10473_s1 + $0x2c40] sm:$0xff]  ;;  %v5285_v34 = vpack.c.bf16 %v1499_v28, %v1495_v26  ;;  %v1546_v26 = vld [vmem:[%s10473_s1 + $0x2ee8] sm:$0xff]  ;;  %v1548_v28 = vld [vmem:[%s10473_s1 + $0x2ef8] sm:$0xff] }
 0x2b3   :  { %5246 = vmatpush1.bf16.msra.mxu1 %v5245_v40  ;;  %4464 = vmatprep.subr.bf16.mxu0 %v4463_v41  ;;  %v1465_v40 = vld [vmem:[%s10473_s1 + $0x2c60] sm:$0xff]  ;;  %v1463_v41 = vld [vmem:[%s10473_s1 + $0x2c50] sm:$0xff] }
 0x2b4   :  { %5248 = vmatprep.subr.bf16.mxu1 %v5247_v45  ;;  %v1474_v45 = vld [vmem:[%s10473_s1 + $0x2ca8] sm:$0xff]  ;;  %v4485_v49 = vpack.c.bf16 %v1465_v40, %v1461_v39  ;;  %v5269_v50 = vpack.c.bf16 %v1467_v43, %v1463_v41  ;;  %v5287_v39 = vpack.c.bf16 %v1508_v32, %v1504_v31  ;;  %v1507_v40 = vld [vmem:[%s10473_s1 + $0x2db0] sm:$0xff]  ;;  %v1512_v43 = vld [vmem:[%s10473_s1 + $0x2dd8] sm:$0xff] }
 0x2b5   :  { %v1510_v41 = vld [vmem:[%s10473_s1 + $0x2dc8] sm:$0xff]  ;;  %v1541_v32 = vld [vmem:[%s10473_s1 + $0x2ec0] sm:$0xff] }
 0x2b6   :  { %4466 = vmatpush1.bf16.msra.mxu0 %v4465_v51  ;;  %v4487_v51 = vpack.c.bf16 %v1474_v45, %v1470_v44  ;;  %v1516_v44 = vld [vmem:[%s10473_s1 + $0x2df8] sm:$0xff] }
 0x2b7   :  { %5250 = vmatpush1.bf16.msra.mxu1 %v5249_v52  ;;  %4468 = vmatprep.subr.bf16.mxu0 %v4467_v53  ;;  %v1469_v52 = vld [vmem:[%s10473_s1 + $0x2c80] sm:$0xff] }
 0x2b8   :  { %5252 = vmatprep.subr.bf16.mxu1 %v5251_v57  ;;  %v1473_v53 = vld [vmem:[%s10473_s1 + $0x2ca0] sm:$0xff]  ;;  %v1478_v57 = vld [vmem:[%s10473_s1 + $0x2cc8] sm:$0xff] }
 0x2b9   :  { %v4489_v61 = vpack.c.bf16 %v1473_v53, %v1469_v52  ;;  %v1515_v52 = vld [vmem:[%s10473_s1 + $0x2df0] sm:$0xff]  ;;  %v1518_v53 = vld [vmem:[%s10473_s1 + $0x2e08] sm:$0xff] }
 0x2ba   :  { %4470 = vmatpush1.bf16.msra.mxu0 %v4469_v63  ;;  %v4491_v63 = vpack.c.bf16 %v1482_v58, %v1478_v57  ;;  %v4511_v59 = vpack.c.bf16 %v1522_v54, %v1518_v53 }
 0x2bb   :  { %5254 = vmatpush1.bf16.msra.mxu1 %v5253_v0  ;;  %4472 = vmatprep.subr.bf16.mxu0 %v4471_v1  ;;  %v1477_v0 = vld [vmem:[%s10473_s1 + $0x2cc0] sm:$0xff] }
 0x2bc   :  { %5256 = vmatprep.subr.bf16.mxu1 %v5255_v5  ;;  %v1481_v1 = vld [vmem:[%s10473_s1 + $0x2ce0] sm:$0xff]  ;;  %v1486_v5 = vld [vmem:[%s10473_s1 + $0x2d08] sm:$0xff] }
 0x2bd   :  { %v4493_v9 = vpack.c.bf16 %v1481_v1, %v1477_v0  ;;  %v1523_v0 = vld [vmem:[%s10473_s1 + $0x2e30] sm:$0xff]  ;;  %v1526_v1 = vld [vmem:[%s10473_s1 + $0x2e48] sm:$0xff] }
 0x2be   :  { %4474 = vmatpush1.bf16.msra.mxu0 %v4473_v11  ;;  %v4495_v11 = vpack.c.bf16 %v1490_v6, %v1486_v5  ;;  %v4515_v7 = vpack.c.bf16 %v1530_v2, %v1526_v1 }
 0x2bf   :  { %5258 = vmatpush1.bf16.msra.mxu1 %v5257_v12  ;;  %4476 = vmatprep.subr.bf16.mxu0 %v4475_v13  ;;  %v1485_v12 = vld [vmem:[%s10473_s1 + $0x2d00] sm:$0xff] }
 0x2c0   :  { %5260 = vmatprep.subr.bf16.mxu1 %v5259_v17  ;;  %v1489_v13 = vld [vmem:[%s10473_s1 + $0x2d20] sm:$0xff]  ;;  %v1494_v17 = vld [vmem:[%s10473_s1 + $0x2d48] sm:$0xff] }
 0x2c1   :  { %v4497_v21 = vpack.c.bf16 %v1489_v13, %v1485_v12  ;;  %v1531_v12 = vld [vmem:[%s10473_s1 + $0x2e70] sm:$0xff]  ;;  %v1534_v13 = vld [vmem:[%s10473_s1 + $0x2e88] sm:$0xff] }
 0x2c2   :  { %4478 = vmatpush1.bf16.msra.mxu0 %v4477_v23  ;;  %v4499_v23 = vpack.c.bf16 %v1498_v18, %v1494_v17  ;;  %v4519_v19 = vpack.c.bf16 %v1538_v14, %v1534_v13 }
 0x2c3   :  { %5262 = vmatpush1.bf16.msra.mxu1 %v5261_v24  ;;  %4480 = vmatprep.subr.bf16.mxu0 %v4479_v25  ;;  %v1493_v24 = vld [vmem:[%s10473_s1 + $0x2d40] sm:$0xff] }
 0x2c4   :  { %5264 = vmatprep.subr.bf16.mxu1 %v5263_v29  ;;  %v1497_v25 = vld [vmem:[%s10473_s1 + $0x2d60] sm:$0xff]  ;;  %v1502_v29 = vld [vmem:[%s10473_s1 + $0x2d88] sm:$0xff] }
 0x2c5   :  { %2414 = vmatmul.mubr.f32.vlgmr.msra.gmra.mrb[0].mxu0 %v40_v35  ;;  %v4501_v33 = vpack.c.bf16 %v1497_v25, %v1493_v24  ;;  %v1539_v24 = vld [vmem:[%s10473_s1 + $0x2eb0] sm:$0xff]  ;;  %v1542_v25 = vld [vmem:[%s10473_s1 + $0x2ec8] sm:$0xff] }
 0x2c6   :  { %4482 = vmatpush1.bf16.msra.mxu0 %v4481_v36  ;;  %3337 = vmatmul.mubr.f32.vlgmr.msra.gmra.mrb[0].mxu1 %v40_v35  ;;  %v4503_v35 = vpack.c.bf16 %v1506_v30, %v1502_v29  ;;  %v1501_v36 = vld [vmem:[%s10473_s1 + $0x2d80] sm:$0xff]  ;;  %v4523_v31 = vpack.c.bf16 %v1546_v26, %v1542_v25 }
 0x2c7   :  { %5266 = vmatpush1.bf16.msra.mxu1 %v5265_v37  ;;  %4484 = vmatprep.subr.bf16.mxu0 %v4483_v38  ;;  %v1505_v37 = vld [vmem:[%s10473_s1 + $0x2da0] sm:$0xff]  ;;  %v1503_v38 = vld [vmem:[%s10473_s1 + $0x2d90] sm:$0xff] }
 0x2c8   :  { %5268 = vmatprep.subr.bf16.mxu1 %v5267_v42  ;;  %2484 = vmatprep.mubr.f32.mxu0 %v43_v48  ;;  %v1514_v42 = vld [vmem:[%s10473_s1 + $0x2de8] sm:$0xff]  ;;  %v4505_v45 = vpack.c.bf16 %v1505_v37, %v1501_v36  ;;  %v5289_v46 = vpack.c.bf16 %v1507_v40, %v1503_v38  ;;  %v1547_v36 = vld [vmem:[%s10473_s1 + $0x2ef0] sm:$0xff]  ;;  %v1556_v40 = vld [vmem:[%s10473_s1 + $0x2f38] sm:$0xff] }
 0x2c9   :  { %3407 = vmatprep.mubr.f32.mxu1 %v43_v48  ;;  %v4507_v47 = vpack.c.bf16 %v1514_v42, %v1510_v41  ;;  %v1509_v48 = vld [vmem:[%s10473_s1 + $0x2dc0] sm:$0xff]  ;;  %v1550_v37 = vld [vmem:[%s10473_s1 + $0x2f08] sm:$0xff] }
 0x2ca   :  { %4486 = vmatpush1.bf16.msra.mxu0 %v4485_v49  ;;  %v1513_v49 = vld [vmem:[%s10473_s1 + $0x2de0] sm:$0xff]  ;;  %v1554_v38 = vld [vmem:[%s10473_s1 + $0x2f28] sm:$0xff] }
 0x2cb   :  { %5270 = vmatpush1.bf16.msra.mxu1 %v5269_v50  ;;  %4488 = vmatprep.subr.bf16.mxu0 %v4487_v51  ;;  %v1511_v50 = vld [vmem:[%s10473_s1 + $0x2dd0] sm:$0xff]  ;;  %v5291_v51 = vpack.c.bf16 %v1516_v44, %v1512_v43  ;;  %v4509_v57 = vpack.c.bf16 %v1513_v49, %v1509_v48  ;;  %v4527_v43 = vpack.c.bf16 %v1554_v38, %v1550_v37  ;;  %v1549_v44 = vld [vmem:[%s10473_s1 + $0x2f00] sm:$0xff]  ;;  %v1558_v49 = vld [vmem:[%s10473_s1 + $0x2f48] sm:$0xff] }
 0x2cc   :  { %5272 = vmatprep.subr.bf16.mxu1 %v5271_v55  ;;  %v1520_v55 = vld [vmem:[%s10473_s1 + $0x2e18] sm:$0xff]  ;;  %v5293_v58 = vpack.c.bf16 %v1515_v52, %v1511_v50  ;;  %v1555_v48 = vld [vmem:[%s10473_s1 + $0x2f30] sm:$0xff]  ;;  %v1562_v50 = vld [vmem:[%s10473_s1 + $0x2f68] sm:$0xff] }
 0x2cd   :  { %v1564_v52 = vld [vmem:[%s10473_s1 + $0x2f78] sm:$0xff]  ;;  %v42_v37 = vld [vmem:[%s10474_s0 + $0xb0] sm:$0xff] }
 0x2ce   :  { %4490 = vmatpush1.bf16.msra.mxu0 %v4489_v61  ;;  %v1521_v61 = vld [vmem:[%s10473_s1 + $0x2e20] sm:$0xff] }
 0x2cf   :  { %5274 = vmatpush1.bf16.msra.mxu1 %v5273_v62  ;;  %4492 = vmatprep.subr.bf16.mxu0 %v4491_v63  ;;  %v1519_v62 = vld [vmem:[%s10473_s1 + $0x2e10] sm:$0xff]  ;;  %v5295_v63 = vpack.c.bf16 %v1524_v56, %v1520_v55  ;;  %v4513_v5 = vpack.c.bf16 %v1521_v61, %v1517_v60  ;;  %v4531_v55 = vpack.c.bf16 %v1562_v50, %v1558_v49  ;;  %v1557_v56 = vld [vmem:[%s10473_s1 + $0x2f40] sm:$0xff]  ;;  %v1566_v61 = vld [vmem:[%s10473_s1 + $0x2f88] sm:$0xff] }
 0x2d0   :  { %5276 = vmatprep.subr.bf16.mxu1 %v5275_v3  ;;  %v1528_v3 = vld [vmem:[%s10473_s1 + $0x2e58] sm:$0xff]  ;;  %v5297_v6 = vpack.c.bf16 %v1523_v0, %v1519_v62  ;;  %v1563_v60 = vld [vmem:[%s10473_s1 + $0x2f70] sm:$0xff]  ;;  %v1570_v62 = vld [vmem:[%s10473_s1 + $0x2fa8] sm:$0xff] }
 0x2d1   :  { %v1572_v0 = vld [vmem:[%s10473_s1 + $0x2fb8] sm:$0xff] }
 0x2d2   :  { %4494 = vmatpush1.bf16.msra.mxu0 %v4493_v9  ;;  %v1529_v9 = vld [vmem:[%s10473_s1 + $0x2e60] sm:$0xff]  ;;  %v1604_v49 = vld [vmem:[%s10473_s1 + $0x30b8] sm:$0xff] }
 0x2d3   :  { %5278 = vmatpush1.bf16.msra.mxu1 %v5277_v10  ;;  %4496 = vmatprep.subr.bf16.mxu0 %v4495_v11  ;;  %v1527_v10 = vld [vmem:[%s10473_s1 + $0x2e50] sm:$0xff]  ;;  %v5299_v11 = vpack.c.bf16 %v1532_v4, %v1528_v3  ;;  %v4517_v17 = vpack.c.bf16 %v1529_v9, %v1525_v8  ;;  %v4535_v3 = vpack.c.bf16 %v1570_v62, %v1566_v61  ;;  %v1565_v4 = vld [vmem:[%s10473_s1 + $0x2f80] sm:$0xff]  ;;  %v1574_v9 = vld [vmem:[%s10473_s1 + $0x2fc8] sm:$0xff] }
 0x2d4   :  { %5280 = vmatprep.subr.bf16.mxu1 %v5279_v15  ;;  %v1536_v15 = vld [vmem:[%s10473_s1 + $0x2e98] sm:$0xff]  ;;  %v5301_v18 = vpack.c.bf16 %v1531_v12, %v1527_v10  ;;  %v1571_v8 = vld [vmem:[%s10473_s1 + $0x2fb0] sm:$0xff]  ;;  %v1578_v10 = vld [vmem:[%s10473_s1 + $0x2fe8] sm:$0xff] }
 0x2d5   :  { %v1580_v12 = vld [vmem:[%s10473_s1 + $0x2ff8] sm:$0xff] }
 0x2d6   :  { %4498 = vmatpush1.bf16.msra.mxu0 %v4497_v21  ;;  %v1537_v21 = vld [vmem:[%s10473_s1 + $0x2ea0] sm:$0xff]  ;;  %v1608_v61 = vld [vmem:[%s10473_s1 + $0x30d8] sm:$0xff] }
 0x2d7   :  { %5282 = vmatpush1.bf16.msra.mxu1 %v5281_v22  ;;  %4500 = vmatprep.subr.bf16.mxu0 %v4499_v23  ;;  %v1535_v22 = vld [vmem:[%s10473_s1 + $0x2e90] sm:$0xff]  ;;  %v5303_v23 = vpack.c.bf16 %v1540_v16, %v1536_v15  ;;  %v4521_v29 = vpack.c.bf16 %v1537_v21, %v1533_v20  ;;  %v4539_v15 = vpack.c.bf16 %v1578_v10, %v1574_v9  ;;  %v1573_v16 = vld [vmem:[%s10473_s1 + $0x2fc0] sm:$0xff]  ;;  %v1582_v21 = vld [vmem:[%s10473_s1 + $0x3008] sm:$0xff] }
 0x2d8   :  { %5284 = vmatprep.subr.bf16.mxu1 %v5283_v27  ;;  %v1544_v27 = vld [vmem:[%s10473_s1 + $0x2ed8] sm:$0xff]  ;;  %v5305_v30 = vpack.c.bf16 %v1539_v24, %v1535_v22  ;;  %v1579_v20 = vld [vmem:[%s10473_s1 + $0x2ff0] sm:$0xff]  ;;  %v1586_v22 = vld [vmem:[%s10473_s1 + $0x3028] sm:$0xff] }
 0x2d9   :  { %v1588_v24 = vld [vmem:[%s10473_s1 + $0x3038] sm:$0xff]  ;;  %v3533_v9 = vld [vmem:[%s10475_s3 + $0x180] sm:$0xff]  ;;  %v3534_v10 = vld [vmem:[%s10475_s3 + $0x188] sm:$0xff] }
 0x2da   :  { %4502 = vmatpush1.bf16.msra.mxu0 %v4501_v33  ;;  %v1545_v33 = vld [vmem:[%s10473_s1 + $0x2ee0] sm:$0xff]  ;;  %v1612_v62 = vld [vmem:[%s10473_s1 + $0x30f8] sm:$0xff] }
 0x2db   :  { %5286 = vmatpush1.bf16.msra.mxu1 %v5285_v34  ;;  %4504 = vmatprep.subr.bf16.mxu0 %v4503_v35  ;;  %v1543_v34 = vld [vmem:[%s10473_s1 + $0x2ed0] sm:$0xff]  ;;  %v5307_v35 = vpack.c.bf16 %v1548_v28, %v1544_v27  ;;  %v4525_v41 = vpack.c.bf16 %v1545_v33, %v1541_v32  ;;  %v4543_v27 = vpack.c.bf16 %v1586_v22, %v1582_v21  ;;  %v1581_v28 = vld [vmem:[%s10473_s1 + $0x3000] sm:$0xff]  ;;  %v1590_v33 = vld [vmem:[%s10473_s1 + $0x3048] sm:$0xff] }
 0x2dc   :  { %5288 = vmatprep.subr.bf16.mxu1 %v5287_v39  ;;  %v1552_v39 = vld [vmem:[%s10473_s1 + $0x2f18] sm:$0xff]  ;;  %v5309_v42 = vpack.c.bf16 %v1547_v36, %v1543_v34  ;;  %v1587_v32 = vld [vmem:[%s10473_s1 + $0x3030] sm:$0xff]  ;;  %v1594_v34 = vld [vmem:[%s10473_s1 + $0x3068] sm:$0xff] }
 0x2dd   :  { %v1596_v36 = vld [vmem:[%s10473_s1 + $0x3078] sm:$0xff]  ;;  %v3535_v21 = vld [vmem:[%s10475_s3 + $0x190] sm:$0xff] }
 0x2de   :  { %4506 = vmatpush1.bf16.msra.mxu0 %v4505_v45  ;;  %v1553_v45 = vld [vmem:[%s10473_s1 + $0x2f20] sm:$0xff]  ;;  %v3536_v22 = vld [vmem:[%s10475_s3 + $0x198] sm:$0xff] }
 0x2df   :  { %5290 = vmatpush1.bf16.msra.mxu1 %v5289_v46  ;;  %4508 = vmatprep.subr.bf16.mxu0 %v4507_v47  ;;  %v1551_v46 = vld [vmem:[%s10473_s1 + $0x2f10] sm:$0xff]  ;;  %v5311_v47 = vpack.c.bf16 %v1556_v40, %v1552_v39  ;;  %v4529_v53 = vpack.c.bf16 %v1553_v45, %v1549_v44  ;;  %v4547_v40 = vpack.c.bf16 %v1594_v34, %v1590_v33  ;;  %v3506_v33 = vld [vmem:[%s10475_s3 + $0xa8] sm:$0xff]  ;;  %v3537_v34 = vld [vmem:[%s10475_s3 + $0x1a0] sm:$0xff] }
 0x2e0   :  { %5292 = vmatprep.subr.bf16.mxu1 %v5291_v51  ;;  %v1560_v51 = vld [vmem:[%s10473_s1 + $0x2f58] sm:$0xff]  ;;  %v5313_v54 = vpack.c.bf16 %v1555_v48, %v1551_v46  ;;  %v1595_v45 = vld [vmem:[%s10473_s1 + $0x3070] sm:$0xff]  ;;  %v1598_v46 = vld [vmem:[%s10473_s1 + $0x3088] sm:$0xff] }
 0x2e1   :  { %v1600_v48 = vld [vmem:[%s10473_s1 + $0x3098] sm:$0xff] }
 0x2e2   :  { %4510 = vmatpush1.bf16.msra.mxu0 %v4509_v57  ;;  %v1561_v57 = vld [vmem:[%s10473_s1 + $0x2f60] sm:$0xff] }
 0x2e3   :  { %5294 = vmatpush1.bf16.msra.mxu1 %v5293_v58  ;;  %4512 = vmatprep.subr.bf16.mxu0 %v4511_v59  ;;  %v1559_v58 = vld [vmem:[%s10473_s1 + $0x2f50] sm:$0xff]  ;;  %v5315_v59 = vpack.c.bf16 %v1564_v52, %v1560_v51  ;;  %v4533_v1 = vpack.c.bf16 %v1561_v57, %v1557_v56  ;;  %v5335_v56 = vpack.c.bf16 %v1604_v49, %v1600_v48 }
 0x2e4   :  { %5296 = vmatprep.subr.bf16.mxu1 %v5295_v63  ;;  %v1568_v63 = vld [vmem:[%s10473_s1 + $0x2f98] sm:$0xff]  ;;  %v5317_v2 = vpack.c.bf16 %v1563_v60, %v1559_v58  ;;  %v1603_v57 = vld [vmem:[%s10473_s1 + $0x30b0] sm:$0xff]  ;;  %v1606_v58 = vld [vmem:[%s10473_s1 + $0x30c8] sm:$0xff]  ;;  %v5460_v60 = vmov 0.0  }
 0x2e6   :  { %4514 = vmatpush1.bf16.msra.mxu0 %v4513_v5  ;;  %v1569_v5 = vld [vmem:[%s10473_s1 + $0x2fa0] sm:$0xff] }
 0x2e7   :  { %5298 = vmatpush1.bf16.msra.mxu1 %v5297_v6  ;;  %4516 = vmatprep.subr.bf16.mxu0 %v4515_v7  ;;  %v1567_v6 = vld [vmem:[%s10473_s1 + $0x2f90] sm:$0xff]  ;;  %v5319_v7 = vpack.c.bf16 %v1572_v0, %v1568_v63  ;;  %v4537_v13 = vpack.c.bf16 %v1569_v5, %v1565_v4  ;;  %v5339_v5 = vpack.c.bf16 %v1612_v62, %v1608_v61 }
 0x2e8   :  { %5300 = vmatprep.subr.bf16.mxu1 %v5299_v11  ;;  %v1576_v11 = vld [vmem:[%s10473_s1 + $0x2fd8] sm:$0xff]  ;;  %v5321_v14 = vpack.c.bf16 %v1571_v8, %v1567_v6  ;;  %v1607_v4 = vld [vmem:[%s10473_s1 + $0x30d0] sm:$0xff]  ;;  %v3502_v8 = vld [vmem:[%s10475_s3 + $0x88] sm:$0xff] }
 0x2e9   :  { %v1611_v6 = vld [vmem:[%s10473_s1 + $0x30f0] sm:$0xff] }
 0x2ea   :  { %4518 = vmatpush1.bf16.msra.mxu0 %v4517_v17  ;;  %v1577_v17 = vld [vmem:[%s10473_s1 + $0x2fe0] sm:$0xff] }
 0x2eb   :  { %5302 = vmatpush1.bf16.msra.mxu1 %v5301_v18  ;;  %4520 = vmatprep.subr.bf16.mxu0 %v4519_v19  ;;  %v1575_v18 = vld [vmem:[%s10473_s1 + $0x2fd0] sm:$0xff]  ;;  %v5323_v19 = vpack.c.bf16 %v1580_v12, %v1576_v11  ;;  %v4541_v25 = vpack.c.bf16 %v1577_v17, %v1573_v16  ;;  %v5341_v12 = vpack.c.bf16 %v1611_v6, %v1607_v4  ;;  %v3517_v16 = vld [vmem:[%s10475_s3 + $0x100] sm:$0xff] }
 0x2ec   :  { %5304 = vmatprep.subr.bf16.mxu1 %v5303_v23  ;;  %v1584_v23 = vld [vmem:[%s10473_s1 + $0x3018] sm:$0xff]  ;;  %v5325_v26 = vpack.c.bf16 %v1579_v20, %v1575_v18  ;;  %v5375_v17 = vpack.c.bf16 %v3534_v10, %v3533_v9  ;;  %v3518_v18 = vld [vmem:[%s10475_s3 + $0x108] sm:$0xff]  ;;  %v3511_v4 = vld [vmem:[%s10475_s3 + $0xd0] sm:$0xff] }
 0x2ed   :  { %v3504_v20 = vld [vmem:[%s10475_s3 + $0x98] sm:$0xff]  ;;  %v3543_v6 = vld [vmem:[%s10475_s3 + $0x1d0] sm:$0xff] }
 0x2ee   :  { %4522 = vmatpush1.bf16.msra.mxu0 %v4521_v29  ;;  %v1585_v29 = vld [vmem:[%s10473_s1 + $0x3020] sm:$0xff] }
 0x2ef   :  { %5306 = vmatpush1.bf16.msra.mxu1 %v5305_v30  ;;  %4524 = vmatprep.subr.bf16.mxu0 %v4523_v31  ;;  %v1583_v30 = vld [vmem:[%s10473_s1 + $0x3010] sm:$0xff]  ;;  %v5327_v31 = vpack.c.bf16 %v1588_v24, %v1584_v23  ;;  %v4545_v38 = vpack.c.bf16 %v1585_v29, %v1581_v28  ;;  %v44_v23 = vld [vmem:[%s10474_s0 + $0xc0] sm:$0xff]  ;;  %v3488_v28 = vld [vmem:[%s10475_s3 + $0x18] sm:$0xff] }
 0x2f0   :  { %5308 = vmatprep.subr.bf16.mxu1 %v5307_v35  ;;  %v1592_v35 = vld [vmem:[%s10473_s1 + $0x3058] sm:$0xff]  ;;  %v5329_v39 = vpack.c.bf16 %v1587_v32, %v1583_v30  ;;  %v3519_v29 = vld [vmem:[%s10475_s3 + $0x110] sm:$0xff]  ;;  %v5379_v30 = vpack.c.bf16 %v3536_v22, %v3535_v21  ;;  %v3505_v32 = vld [vmem:[%s10475_s3 + $0xa0] sm:$0xff] }
 0x2f1   :  { %v5331_v44 = vpack.c.bf16 %v1596_v36, %v1592_v35  ;;  %v3538_v35 = vld [vmem:[%s10475_s3 + $0x1a8] sm:$0xff] }
 0x2f2   :  { %4526 = vmatpush1.bf16.msra.mxu0 %v4525_v41  ;;  %v1589_v41 = vld [vmem:[%s10473_s1 + $0x3040] sm:$0xff] }
 0x2f3   :  { %5310 = vmatpush1.bf16.msra.mxu1 %v5309_v42  ;;  %4528 = vmatprep.subr.bf16.mxu0 %v4527_v43  ;;  %v1593_v42 = vld [vmem:[%s10473_s1 + $0x3060] sm:$0xff]  ;;  %v1591_v43 = vld [vmem:[%s10473_s1 + $0x3050] sm:$0xff] }
 0x2f4   :  { %5312 = vmatprep.subr.bf16.mxu1 %v5311_v47  ;;  %v1602_v47 = vld [vmem:[%s10473_s1 + $0x30a8] sm:$0xff]  ;;  %v4549_v50 = vpack.c.bf16 %v1593_v42, %v1589_v41  ;;  %v5333_v51 = vpack.c.bf16 %v1595_v45, %v1591_v43  ;;  %v3521_v41 = vld [vmem:[%s10475_s3 + $0x120] sm:$0xff]  ;;  %v5383_v42 = vpack.c.bf16 %v3538_v35, %v3537_v34  ;;  %v3508_v45 = vld [vmem:[%s10475_s3 + $0xb8] sm:$0xff] }
 0x2f5   :  { %v4551_v52 = vpack.c.bf16 %v1602_v47, %v1598_v46  ;;  %v3522_v43 = vld [vmem:[%s10475_s3 + $0x128] sm:$0xff]  ;;  %v3539_v46 = vld [vmem:[%s10475_s3 + $0x1b0] sm:$0xff]  ;;  %v3540_v47 = vld [vmem:[%s10475_s3 + $0x1b8] sm:$0xff] }
 0x2f6   :  { %4530 = vmatpush1.bf16.msra.mxu0 %v4529_v53  ;;  %v1597_v53 = vld [vmem:[%s10473_s1 + $0x3080] sm:$0xff]  ;;  %v5385_v49 = vpack.c.bf16 %v3522_v43, %v3521_v41  ;;  %v3548_v34 = vld [vmem:[%s10475_s3 + $0x1f8] sm:$0xff]  ;;  %v3499_v35 = vld [vmem:[%s10475_s3 + $0x70] sm:$0xff] }
 0x2f7   :  { %5314 = vmatpush1.bf16.msra.mxu1 %v5313_v54  ;;  %4532 = vmatprep.subr.bf16.mxu0 %v4531_v55  ;;  %v1601_v54 = vld [vmem:[%s10473_s1 + $0x30a0] sm:$0xff]  ;;  %v1599_v55 = vld [vmem:[%s10473_s1 + $0x3090] sm:$0xff] }
 0x2f8   :  { %5316 = vmatprep.subr.bf16.mxu1 %v5315_v59  ;;  %v1610_v59 = vld [vmem:[%s10473_s1 + $0x30e8] sm:$0xff]  ;;  %v4553_v63 = vpack.c.bf16 %v1601_v54, %v1597_v53  ;;  %v5337_v0 = vpack.c.bf16 %v1603_v57, %v1599_v55  ;;  %v3523_v53 = vld [vmem:[%s10475_s3 + $0x130] sm:$0xff]  ;;  %v5387_v54 = vpack.c.bf16 %v3540_v47, %v3539_v46  ;;  %v3524_v55 = vld [vmem:[%s10475_s3 + $0x138] sm:$0xff] }
 0x2f9   :  { %v3510_v57 = vld [vmem:[%s10475_s3 + $0xc8] sm:$0xff]  ;;  %v5389_v61 = vpack.c.bf16 %v3524_v55, %v3523_v53 }
 0x2fa   :  { %4534 = vmatpush1.bf16.msra.mxu0 %v4533_v1  ;;  %v4555_v1 = vpack.c.bf16 %v1610_v59, %v1606_v58  ;;  %v3541_v58 = vld [vmem:[%s10475_s3 + $0x1c0] sm:$0xff]  ;;  %v3542_v59 = vld [vmem:[%s10475_s3 + $0x1c8] sm:$0xff] }
 0x2fb   :  { %5318 = vmatpush1.bf16.msra.mxu1 %v5317_v2  ;;  %4536 = vmatprep.subr.bf16.mxu0 %v4535_v3  ;;  %v1605_v2 = vld [vmem:[%s10473_s1 + $0x30c0] sm:$0xff] }
 0x2fc   :  { %5320 = vmatprep.subr.bf16.mxu1 %v5319_v7  ;;  %v1609_v3 = vld [vmem:[%s10473_s1 + $0x30e0] sm:$0xff] }
 0x2fd   :  { %v3501_v7 = vld [vmem:[%s10475_s3 + $0x80] sm:$0xff]  ;;  %v4557_v11 = vpack.c.bf16 %v1609_v3, %v1605_v2  ;;  %v5391_v2 = vpack.c.bf16 %v3542_v59, %v3541_v58  ;;  %v3526_v3 = vld [vmem:[%s10475_s3 + $0x148] sm:$0xff] }
 0x2fe   :  { %4538 = vmatpush1.bf16.msra.mxu0 %v4537_v13  ;;  %v5343_v13 = vpack.c.bf16 %v3502_v8, %v3501_v7  ;;  %v3544_v7 = vld [vmem:[%s10475_s3 + $0x1d8] sm:$0xff] }
 0x2ff   :  { %5322 = vmatpush1.bf16.msra.mxu1 %v5321_v14  ;;  %4540 = vmatprep.subr.bf16.mxu0 %v4539_v15  ;;  %v3485_v14 = vld [vmem:[%s10475_s3] sm:$0xff]  ;;  %v3486_v15 = vld [vmem:[%s10475_s3 + $0x8] sm:$0xff] }
 0x300   :  { %5324 = vmatprep.subr.bf16.mxu1 %v5323_v19  ;;  %v3503_v19 = vld [vmem:[%s10475_s3 + $0x90] sm:$0xff]  ;;  %v5345_v24 = vpack.c.bf16 %v3486_v15, %v3485_v14  ;;  %v5395_v14 = vpack.c.bf16 %v3544_v7, %v3543_v6  ;;  %v3528_v15 = vld [vmem:[%s10475_s3 + $0x158] sm:$0xff] }
 0x302   :  { %4542 = vmatpush1.bf16.msra.mxu0 %v4541_v25  ;;  %v5377_v25 = vpack.c.bf16 %v3518_v18, %v3517_v16  ;;  %v3513_v16 = vld [vmem:[%s10475_s3 + $0xe0] sm:$0xff] }
 0x303   :  { %5326 = vmatpush1.bf16.msra.mxu1 %v5325_v26  ;;  %4544 = vmatprep.subr.bf16.mxu0 %v4543_v27  ;;  %v5347_v26 = vpack.c.bf16 %v3504_v20, %v3503_v19  ;;  %v3487_v27 = vld [vmem:[%s10475_s3 + $0x10] sm:$0xff]  ;;  %v3545_v18 = vld [vmem:[%s10475_s3 + $0x1e0] sm:$0xff]  ;;  %v3546_v19 = vld [vmem:[%s10475_s3 + $0x1e8] sm:$0xff] }
 0x304   :  { %5328 = vmatprep.subr.bf16.mxu1 %v5327_v31  ;;  %v3520_v31 = vld [vmem:[%s10475_s3 + $0x118] sm:$0xff]  ;;  %v5349_v36 = vpack.c.bf16 %v3488_v28, %v3487_v27  ;;  %v3530_v27 = vld [vmem:[%s10475_s3 + $0x168] sm:$0xff] }
 0x305   :  { %2485 = vmatmul.mubr.f32.vlgmr.msra.gmra.mrb[0].mxu0 %v42_v37 }
 0x306   :  { %4546 = vmatpush1.bf16.msra.mxu0 %v4545_v38  ;;  %3408 = vmatmul.mubr.f32.vlgmr.msra.gmra.mrb[0].mxu1 %v42_v37  ;;  %v5381_v37 = vpack.c.bf16 %v3520_v31, %v3519_v29  ;;  %v5351_v38 = vpack.c.bf16 %v3506_v33, %v3505_v32  ;;  %v3516_v31 = vld [vmem:[%s10475_s3 + $0xf8] sm:$0xff]  ;;  %v3547_v32 = vld [vmem:[%s10475_s3 + $0x1f0] sm:$0xff] }
 0x307   :  { %5330 = vmatpush1.bf16.msra.mxu1 %v5329_v39  ;;  %4548 = vmatprep.subr.bf16.mxu0 %v4547_v40  ;;  %v3489_v39 = vld [vmem:[%s10475_s3 + $0x20] sm:$0xff]  ;;  %v3490_v40 = vld [vmem:[%s10475_s3 + $0x28] sm:$0xff] }
 0x308   :  { %5332 = vmatprep.subr.bf16.mxu1 %v5331_v44  ;;  %2555 = vmatprep.mubr.f32.mxu0 %v5460_v60  ;;  %v3507_v44 = vld [vmem:[%s10475_s3 + $0xb0] sm:$0xff]  ;;  %v5353_v48 = vpack.c.bf16 %v3490_v40, %v3489_v39  ;;  %v3532_v40 = vld [vmem:[%s10475_s3 + $0x178] sm:$0xff] }
 0x309   :  { %3478 = vmatprep.mubr.f32.mxu1 %v5460_v60  ;;  %v3531_v39 = vld [vmem:[%s10475_s3 + $0x170] sm:$0xff] }
 0x30a   :  { %4550 = vmatpush1.bf16.msra.mxu0 %v4549_v50  ;;  %v5355_v50 = vpack.c.bf16 %v3508_v45, %v3507_v44  ;;  %v5405_v41 = vpack.c.bf16 %v3532_v40, %v3531_v39  ;;  %v1613_v45 = vld [vmem:[%s10476_s2] sm:$0xf] }
 0x30b   :  { %5334 = vmatpush1.bf16.msra.mxu1 %v5333_v51  ;;  %4552 = vmatprep.subr.bf16.mxu0 %v4551_v52  ;;  %v3491_v51 = vld [vmem:[%s10475_s3 + $0x30] sm:$0xff]  ;;  %v3492_v52 = vld [vmem:[%s10475_s3 + $0x38] sm:$0xff] }
 0x30c   :  { %5336 = vmatprep.subr.bf16.mxu1 %v5335_v56  ;;  %v3509_v56 = vld [vmem:[%s10475_s3 + $0xc0] sm:$0xff]  ;;  %v5357_v60 = vpack.c.bf16 %v3492_v52, %v3491_v51 }
 0x30d   :  { %v5359_v62 = vpack.c.bf16 %v3510_v57, %v3509_v56 }
 0x30e   :  { %4554 = vmatpush1.bf16.msra.mxu0 %v4553_v63  ;;  %v3493_v63 = vld [vmem:[%s10475_s3 + $0x40] sm:$0xff] }
 0x30f   :  { %5338 = vmatpush1.bf16.msra.mxu1 %v5337_v0  ;;  %4556 = vmatprep.subr.bf16.mxu0 %v4555_v1  ;;  %v3494_v0 = vld [vmem:[%s10475_s3 + $0x48] sm:$0xff]  ;;  %v3525_v1 = vld [vmem:[%s10475_s3 + $0x140] sm:$0xff] }
 0x310   :  { %5340 = vmatprep.subr.bf16.mxu1 %v5339_v5  ;;  %v3512_v5 = vld [vmem:[%s10475_s3 + $0xd8] sm:$0xff]  ;;  %v5361_v8 = vpack.c.bf16 %v3494_v0, %v3493_v63  ;;  %v5393_v9 = vpack.c.bf16 %v3526_v3, %v3525_v1  ;;  %v3704_v63 = vld [vmem:[%s10477_s4] ss:$0 sm:$0xff] }
 0x311   :  { %v5363_v10 = vpack.c.bf16 %v3512_v5, %v3511_v4 }
 0x312   :  { %4558 = vmatpush1.bf16.msra.mxu0 %v4557_v11  ;;  %v3495_v11 = vld [vmem:[%s10475_s3 + $0x50] sm:$0xff] }
 0x313   :  { %5342 = vmatpush1.bf16.msra.mxu1 %v5341_v12  ;;  %5344 = vmatprep.subr.bf16.mxu0 %v5343_v13  ;;  %v3496_v12 = vld [vmem:[%s10475_s3 + $0x58] sm:$0xff]  ;;  %v3527_v13 = vld [vmem:[%s10475_s3 + $0x150] sm:$0xff] }
 0x314   :  { %5376 = vmatprep.subr.bf16.mxu1 %v5375_v17  ;;  %v3514_v17 = vld [vmem:[%s10475_s3 + $0xe8] sm:$0xff]  ;;  %v5365_v20 = vpack.c.bf16 %v3496_v12, %v3495_v11  ;;  %v5397_v21 = vpack.c.bf16 %v3528_v15, %v3527_v13 }
 0x315   :  { %3702 = vmatmul.mubr.msk.f32.vlgmr.msra.gmra.mrb[0].mxu0 %vm1635_vm0, %v44_v23  ;;  %v5367_v22 = vpack.c.bf16 %v3514_v17, %v3513_v16 }
 0x316   :  { %3703 = vmatmul.mubr.msk.f32.vlgmr.msra.gmra.mrb[0].mxu1 %vm1635_vm0, %v44_v23  ;;  %5346 = vmatpush3.bf16.msra.mxu0 %v5345_v24  ;;  %v3497_v23 = vld [vmem:[%s10475_s3 + $0x60] sm:$0xff]  ;;  %v3498_v24 = vld [vmem:[%s10475_s3 + $0x68] sm:$0xff] }
 0x317   :  { %5378 = vmatpush3.bf16.msra.mxu1 %v5377_v25  ;;  %5348 = vmatprep.subr.bf16.mxu0 %v5347_v26  ;;  %v5399_v25 = vpack.c.bf16 %v3546_v19, %v3545_v18  ;;  %v3529_v26 = vld [vmem:[%s10475_s3 + $0x160] sm:$0xff]  ;;  %v5369_v28 = vpack.c.bf16 %v3498_v24, %v3497_v23 }
 0x318   :  { %5380 = vmatprep.subr.bf16.mxu1 %v5379_v30  ;;  %v5401_v29 = vpack.c.bf16 %v3530_v27, %v3529_v26  ;;  %v3515_v30 = vld [vmem:[%s10475_s3 + $0xf0] sm:$0xff] }
 0x319   :  { %v5371_v33 = vpack.c.bf16 %v3516_v31, %v3515_v30 }
 0x31a   :  { %5350 = vmatpush3.bf16.msra.mxu0 %v5349_v36  ;;  %v3500_v36 = vld [vmem:[%s10475_s3 + $0x78] sm:$0xff] }
 0x31b   :  { %5382 = vmatpush3.bf16.msra.mxu1 %v5381_v37  ;;  %5352 = vmatprep.subr.bf16.mxu0 %v5351_v38  ;;  %v5403_v37 = vpack.c.bf16 %v3548_v34, %v3547_v32  ;;  %v5373_v38 = vpack.c.bf16 %v3500_v36, %v3499_v35 }
 0x31c   :  { %5384 = vmatprep.subr.bf16.mxu1 %v5383_v42  ;;  %v1615_v42 = vlaneseq }
 0x31e   :  { %5354 = vmatpush3.bf16.msra.mxu0 %v5353_v48  ;;  %v1616_v43 = vshrl.u32 %v1615_v42, 7 }
 0x31f   :  { %5386 = vmatpush3.bf16.msra.mxu1 %v5385_v49  ;;  %5356 = vmatprep.subr.bf16.mxu0 %v5355_v50 }
 0x320   :  { %5388 = vmatprep.subr.bf16.mxu1 %v5387_v54  ;;  %v1621_v44 = vsub.s32 1, %v1616_v43  ;;  %v1617_v46 = vsub.s32 0, %v1616_v43  ;;  %v1629_v47 = vsub.s32 3, %v1616_v43  ;;  %v1625_v48 = vsub.s32 2, %v1616_v43 }
 0x322   :  { %5358 = vmatpush3.bf16.msra.mxu0 %v5357_v60  ;;  %v1622_v49 = vrot.slane %v1613_v45, %v1621_v44  ;;  %v1618_v50 = vrot.slane %v1613_v45, %v1617_v46  ;;  %v1630_v51 = vrot.slane %v1613_v45, %v1629_v47  ;;  %v1626_v53 = vrot.slane %v1613_v45, %v1625_v48 }
 0x323   :  { %5390 = vmatpush3.bf16.msra.mxu1 %v5389_v61  ;;  %5360 = vmatprep.subr.bf16.mxu0 %v5359_v62 }
 0x324   :  { %5392 = vmatprep.subr.bf16.mxu1 %v5391_v2 }
 0x326   :  { %5362 = vmatpush3.bf16.msra.mxu0 %v5361_v8 }
 0x327   :  { %5394 = vmatpush3.bf16.msra.mxu1 %v5393_v9  ;;  %5364 = vmatprep.subr.bf16.mxu0 %v5363_v10 }
 0x328   :  { %5396 = vmatprep.subr.bf16.mxu1 %v5395_v14 }
 0x32a   :  { %5366 = vmatpush3.bf16.msra.mxu0 %v5365_v20 }
 0x32b   :  { %5398 = vmatpush3.bf16.msra.mxu1 %v5397_v21  ;;  %5368 = vmatprep.subr.bf16.mxu0 %v5367_v22 }
 0x32c   :  { %5400 = vmatprep.subr.bf16.mxu1 %v5399_v25 }
 0x32e   :  { %5370 = vmatpush3.bf16.msra.mxu0 %v5369_v28 }
 0x32f   :  { %5402 = vmatpush3.bf16.msra.mxu1 %v5401_v29  ;;  %5372 = vmatprep.subr.bf16.mxu0 %v5371_v33 }
 0x330   :  { %5404 = vmatprep.subr.bf16.mxu1 %v5403_v37 }
 0x332   :  { %5374 = vmatpush3.bf16.msra.mxu0 %v5373_v38 }
 0x333   :  { %5406 = vmatpush3.bf16.msra.mxu1 %v5405_v41 }
 0x3e8   :  { %v2557_v52 = vpop.f32.mrb[0].mxu0 }
 0x3e9   :  { %v3480_v54 = vpop.f32.mrb[0].mxu1  ;;  %v2559_v55 = vpop.f32.mrb[1].mxu0  ;;  %v5407_v58 = vadd.f32 %v2557_v52, %v1618_v50 }
 0x3ea   :  { %v5408_v56 = vadd.f32 %v2559_v55, %v1622_v49  ;;  %v3482_v57 = vpop.f32.mrb[1].mxu1  ;;  %v5409_v60 = vadd.f32 %v3480_v54, %v1626_v53 }
 0x3eb   :  { %v5410_v59 = vadd.f32 %v3482_v57, %v1630_v51 }
 0x3ec   :  { %3620 = vmatprep.mubr.f32.mxu0 %v5408_v56 }
 0x3ed   :  { %3690 = vmatprep.mubr.f32.mxu1 %v5410_v59  ;;  %3621 = vmatmul.mubr.f32.vlgmr.msra.gmra.mrb[2].mxu0 %v5407_v58 }
 0x3ee   :  { %3691 = vmatmul.mubr.f32.vlgmr.msra.gmra.mrb[2].mxu1 %v5409_v60 }
 0x4c0   :  { %v3737_v61 = vpop.f32.mrb[2].mxu0 }
 0x4c1   :  { %v3772_v62 = vpop.f32.mrb[2].mxu1  ;;  %v3738_v0 = vpop.f32.mrb[3].mxu0 }
 0x4c2   :  { %v3739_v1 = vadd.f32 %v3738_v0, %v3737_v61  ;;  %v3773_v2 = vpop.f32.mrb[3].mxu1 }
 0x4c3   :  { %v3774_v3 = vadd.f32 %v3773_v2, %v3772_v62 }
 0x4c4   :  { %v3623_v4 = vadd.f32 %v3739_v1, %v3704_v63 }
 0x4c6   :  { %v3693_v5 = vadd.f32 %v3774_v3, %v3623_v4 }
 0x4c8   :  { %3697 = vst.msk [vmem:[%s10478_s5] sm:$0xff] %vm3696_vm1, %v3693_v5 }

</bundles_post_ra>
